<compile_context>
chip_gen: v6e
topology: v6e:2x2x1
jax: 0.10.0
libtpu: 0.0.40
codegen_flags: <defaults>
</compile_context>

<pallas_src>
import functools

import jax
import jax.numpy as jnp
from jax.experimental import pallas as pl
from jax.experimental.pallas import tpu as pltpu

# Safe on every generation (v7x has 64 MiB physical VMEM per TensorCore).
# On v5e/v6e this can be raised to ~96 MB together with larger tile_rows_*.
VMEM_LIMIT = 48 * 1024 * 1024


# --------------------------------------------------------------------------
# Kernel A: conv1(1->32)+ReLU -> conv2(32->64)+ReLU -> maxpool(2,2), fused.
# --------------------------------------------------------------------------
def block1_kernel(xpad_ref, w1_ref, b1_ref, w2_ref, b2_ref, o_ref, c1pad_ref,
                  *, H, W, TP):
    R2 = 2 * TP                     # conv2 output rows in this tile
    R1 = R2 + 2                     # conv1 rows incl. +-1 halo for conv2
    W1 = W // 2                     # pooled width (floor -> odd W handled)
    r0 = pl.multiple_of(pl.program_id(0) * R2, R2)

    # One dynamic row-window load covering all 3x3 taps of this tile.
    xwin = xpad_ref[pl.ds(r0, R1 + 2), :].astype(jnp.bfloat16)     # (R1+2, W+2)

    # ---- conv1 (cin=1): MXU im2col matmul, K = 9 padded to 16 ----
    taps = [xwin[kh:kh + R1, kw:kw + W][:, :, None]
            for kh in range(3) for kw in range(3)]
    taps.append(jnp.zeros((R1, W, 7), jnp.bfloat16))
    patches = jnp.concatenate(taps, axis=-1).reshape(R1 * W, 16)
    c1 = jnp.dot(patches, w1_ref[...], preferred_element_type=jnp.float32)
    c1 = jnp.maximum(c1 + b1_ref[...], 0.0).reshape(R1, W, 32)

    # ---- column-padded conv1 scratch (conv2's zero padding) ----
    # Edge columns are re-zeroed every step (cheap, 2 columns) so each grid
    # iteration is self-contained and the axis can stay megacore-parallel.
    zcol = jnp.zeros((R1, 1, 32), c1pad_ref.dtype)
    c1pad_ref[:, 0:1, :] = zcol
    c1pad_ref[:, W + 1:W + 2, :] = zcol
    c1pad_ref[:, 1:W + 1, :] = c1.astype(c1pad_ref.dtype)

    # conv2's zero row padding: halo rows outside the valid range [0, H).
    zrow = jnp.zeros((1, W + 2, 32), c1pad_ref.dtype)

    @pl.when(r0 == 0)
    def _():
        c1pad_ref[0:1, :, :] = zrow

    @pl.when(r0 + R2 >= H)
    def _():
        c1pad_ref[R1 - 1:R1, :, :] = zrow

    # ---- conv2: 3 matmuls over kh, K = 3*32 = 96, f32 accumulation ----
    c2 = None
    for kh in range(3):
        p = jnp.concatenate(
            [c1pad_ref[kh:kh + R2, kw:kw + W, :] for kw in range(3)],
            axis=-1).reshape(R2 * W, 96)
        t = jnp.dot(p, w2_ref[kh], preferred_element_type=jnp.float32)
        c2 = t if c2 is None else c2 + t

    # ---- MaxPool2d(2,2) (floor) then ReLU (ReLU commutes with max) ----
    c2 = (c2 + b2_ref[...]).reshape(TP, 2, W, 64)
    rmax = jnp.max(c2, axis=1)                                     # (TP, W, 64)
    cpair = rmax[:, :2 * W1, :].reshape(TP, W1, 2, 64)
    o_ref[...] = jnp.maximum(jnp.max(cpair, axis=2), 0.0).astype(o_ref.dtype)


# --------------------------------------------------------------------------
# Kernel B: conv3(64->128)+ReLU -> conv4(128->128) -> maxpool(2,2) -> ReLU.
# --------------------------------------------------------------------------
def block2_kernel(xpad_ref, w3_ref, b3_ref, w4_ref, b4_ref, o_ref, c3pad_ref,
                  *, P1, W1, TP):
    R4 = 2 * TP
    R3 = R4 + 2
    W2 = W1 // 2
    r0 = pl.multiple_of(pl.program_id(0) * R4, R4)

    xwin = xpad_ref[pl.ds(r0, R3 + 2), :, :]            # (R3+2, W1+2, 64) bf16

    # ---- conv3: 3 matmuls over kh, K = 3*64 = 192 ----
    c3 = None
    for kh in range(3):
        p = jnp.concatenate(
            [xwin[kh:kh + R3, kw:kw + W1, :] for kw in range(3)],
            axis=-1).reshape(R3 * W1, 192)
        t = jnp.dot(p, w3_ref[kh], preferred_element_type=jnp.float32)
        c3 = t if c3 is None else c3 + t
    c3 = jnp.maximum(c3 + b3_ref[...], 0.0).reshape(R3, W1, 128)

    # ---- column-padded conv3 scratch for conv4's zero padding ----
    zcol = jnp.zeros((R3, 1, 128), c3pad_ref.dtype)
    c3pad_ref[:, 0:1, :] = zcol
    c3pad_ref[:, W1 + 1:W1 + 2, :] = zcol
    c3pad_ref[:, 1:W1 + 1, :] = c3.astype(c3pad_ref.dtype)

    zrow = jnp.zeros((1, W1 + 2, 128), c3pad_ref.dtype)

    @pl.when(r0 == 0)
    def _():
        c3pad_ref[0:1, :, :] = zrow

    @pl.when(r0 + R4 >= P1)
    def _():
        c3pad_ref[R3 - 1:R3, :, :] = zrow

    # ---- conv4: 3 matmuls over kh, K = 3*128 = 384 (no ReLU before pool) ----
    c4 = None
    for kh in range(3):
        p = jnp.concatenate(
            [c3pad_ref[kh:kh + R4, kw:kw + W1, :] for kw in range(3)],
            axis=-1).reshape(R4 * W1, 384)
        t = jnp.dot(p, w4_ref[kh], preferred_element_type=jnp.float32)
        c4 = t if c4 is None else c4 + t

    # ---- MaxPool2d(2,2) then ReLU ----
    c4 = (c4 + b4_ref[...]).reshape(TP, 2, W1, 128)
    rmax = jnp.max(c4, axis=1)
    cpair = rmax[:, :2 * W2, :].reshape(TP, W2, 2, 128)
    o_ref[...] = jnp.maximum(jnp.max(cpair, axis=2), 0.0).astype(o_ref.dtype)


# --------------------------------------------------------------------------
# Head: fc1 (int8 weights, K-tiled, f32 acc, N split in two 128-halves) +
#       ReLU + fc2, fused.  Grid = (n_half=2, k_steps); the two partial
#       logits vectors are summed in the wrapper.
# --------------------------------------------------------------------------
def head_kernel(x_ref, w1_ref, s1_ref, b1_ref, w2_ref, o_ref, acc_ref):
    k = pl.program_id(1)

    @pl.when(k == 0)
    def _():
        acc_ref[...] = jnp.zeros_like(acc_ref)

    w = w1_ref[...].astype(jnp.bfloat16)                 # int8 -> bf16 dequant-free
    acc_ref[...] += jnp.dot(x_ref[...], w, preferred_element_type=jnp.float32)

    @pl.when(k == pl.num_programs(1) - 1)
    def _():
        h = jnp.maximum(acc_ref[...] * s1_ref[...] + b1_ref[...], 0.0)   # (1,128)
        o_ref[...] = jnp.dot(h.astype(jnp.bfloat16), w2_ref[...],
                             preferred_element_type=jnp.float32)


# --------------------------------------------------------------------------
# Tiling helpers / cost hints
# --------------------------------------------------------------------------
def _row_tile(p, max_rows):
    """Largest divisor of p that is <= max_rows (tile height in pooled rows).
    Degrades to 1 (correct but slow) if p is prime and > max_rows."""
    for t in range(min(max_rows, p), 0, -1):
        if p % t == 0:
            return t
    return 1


def _k_tile(fs, cap=256 * 128):
    """Largest multiple-of-128 divisor of fs that is <= cap and gives >=2 steps."""
    best, d, limit = 128, 128, min(cap, max(fs // 2, 128))
    while d <= limit:
        if fs % d == 0:
            best = d
        d += 128
    return best


def _cost(flops, bytes_accessed):
    return pl.CostEstimate(flops=int(flops), transcendentals=0,
                           bytes_accessed=int(bytes_accessed))


# --------------------------------------------------------------------------
# Parameter init (deterministic, synthetic).  Conv weights are pre-packed per
# kh-group in im2col layout (3, 3*cin, cout) bf16; fc1 weights are int8 with
# per-output-channel f32 scales (the head is weight-bandwidth bound); fc1 rows
# are in HWC flatten order (CHW->HWC is a one-time weight-row shuffle when
# porting torch weights); fc2 columns are zero-padded to 128.
# --------------------------------------------------------------------------
def init_params(key, H, W, out_classes=18):
    assert out_classes <= 128
    ks = jax.random.split(key, 12)

    def conv_wb(kw_key, kb_key, cin, cout):
        scale = (9.0 * cin) ** -0.5
        w = jax.random.normal(kw_key, (3, 3, cin, cout), jnp.float32) * scale
        b = jax.random.normal(kb_key, (1, cout), jnp.float32) * scale
        return w, b

    def lin_wb(kw_key, kb_key, fin, fout):
        scale = float(fin) ** -0.5
        w = jax.random.normal(kw_key, (fin, fout), jnp.float32) * scale
        b = jax.random.normal(kb_key, (1, fout), jnp.float32) * scale
        return w, b

    w1, b1 = conv_wb(ks[0], ks[1], 1, 32)
    w2, b2 = conv_wb(ks[2], ks[3], 32, 64)
    w3, b3 = conv_wb(ks[4], ks[5], 64, 128)
    w4, b4 = conv_wb(ks[6], ks[7], 128, 128)

    P2, W2 = (H // 2) // 2, (W // 2) // 2
    fs = 128 * P2 * W2                      # floor-mode pools -> matches torch fs
    fw1, fb1 = lin_wb(ks[8], ks[9], fs, 256)
    fw2, fb2 = lin_wb(ks[10], ks[11], 256, out_classes)

    # Per-output-channel int8 quantization of fc1 (perf-review item: the head
    # streams ~0.5 GB of fc1_w and is purely HBM-bound).
    s1 = jnp.maximum(jnp.max(jnp.abs(fw1), axis=0, keepdims=True), 1e-6) / 127.0
    q1 = jnp.clip(jnp.round(fw1 / s1), -127.0, 127.0).astype(jnp.int8)

    fc2_w = jnp.zeros((256, 128), jnp.float32).at[:, :out_classes].set(fw2)

    return {
        "c1_w": jnp.concatenate(
            [w1.reshape(9, 32), jnp.zeros((7, 32), jnp.float32)],
            axis=0).astype(jnp.bfloat16),                    # (16, 32), K padded
        "c1_b": b1,
        "c2_w": w2.reshape(3, 3 * 32, 64).astype(jnp.bfloat16),
        "c2_b": b2,
        "c3_w": w3.reshape(3, 3 * 64, 128).astype(jnp.bfloat16),
        "c3_b": b3,
        "c4_w": w4.reshape(3, 3 * 128, 128).astype(jnp.bfloat16),
        "c4_b": b4,
        "fc1_wq": q1,                                        # (fs, 256) int8
        "fc1_s": s1,                                         # (1, 256) f32
        "fc1_b": fb1,                                        # (1, 256) f32
        "fc2_w": fc2_w.astype(jnp.bfloat16),                 # (256, 128) bf16
        "fc2_b": fb2,                                        # (1, out_classes)
    }


# --------------------------------------------------------------------------
# Forward
# --------------------------------------------------------------------------
def musiclass_forward(spec, params, *, tile_rows_a=4, tile_rows_b=4):
    # TODO(synk): librosa melspectrogram / power_to_db in _spectrogram is host-side
    # numpy with no Pallas equivalent; the kernel takes the (n_mels, n_frames)
    # spectrogram directly as input.
    H, W = spec.shape
    P1, W1 = H // 2, W // 2
    P2, W2 = P1 // 2, W1 // 2
    TP1 = _row_tile(P1, tile_rows_a)
    TP2 = _row_tile(P2, tile_rows_b)

    # ----- fused block 1: conv1 + ReLU + conv2 + ReLU + maxpool -----
    xpad = jnp.pad(spec.astype(jnp.float32), ((2, 2), (1, 1)))
    pooled1 = pl.pallas_call(
        functools.partial(block1_kernel, H=H, W=W, TP=TP1),
        out_shape=jax.ShapeDtypeStruct((P1, W1, 64), jnp.bfloat16),
        grid=(P1 // TP1,),
        in_specs=[
            pl.BlockSpec(xpad.shape, lambda i: (0, 0)),
            pl.BlockSpec((16, 32), lambda i: (0, 0)),
            pl.BlockSpec((1, 32), lambda i: (0, 0)),
            pl.BlockSpec((3, 96, 64), lambda i: (0, 0, 0)),
            pl.BlockSpec((1, 64), lambda i: (0, 0)),
        ],
        out_specs=pl.BlockSpec((TP1, W1, 64), lambda i: (i, 0, 0)),
        scratch_shapes=[pltpu.VMEM((2 * TP1 + 2, W + 2, 32), jnp.bfloat16)],
        compiler_params=pltpu.CompilerParams(
            dimension_semantics=("parallel",), vmem_limit_bytes=VMEM_LIMIT),
        cost_estimate=_cost(
            2 * H * W * 9 * (1 * 32 + 32 * 64),
            xpad.size * 4 + 16 * 32 * 2 + 3 * 96 * 64 * 2 + P1 * W1 * 64 * 2),
    )(xpad, params["c1_w"], params["c1_b"], params["c2_w"], params["c2_b"])

    # ----- fused block 2: conv3 + ReLU + conv4 + maxpool + ReLU -----
    p1pad = jnp.pad(pooled1, ((2, 2), (1, 1), (0, 0)))
    pooled2 = pl.pallas_call(
        functools.partial(block2_kernel, P1=P1, W1=W1, TP=TP2),
        out_shape=jax.ShapeDtypeStruct((P2, W2, 128), jnp.bfloat16),
        grid=(P2 // TP2,),
        in_specs=[
            pl.BlockSpec(p1pad.shape, lambda i: (0, 0, 0)),
            pl.BlockSpec((3, 192, 128), lambda i: (0, 0, 0)),
            pl.BlockSpec((1, 128), lambda i: (0, 0)),
            pl.BlockSpec((3, 384, 128), lambda i: (0, 0, 0)),
            pl.BlockSpec((1, 128), lambda i: (0, 0)),
        ],
        out_specs=pl.BlockSpec((TP2, W2, 128), lambda i: (i, 0, 0)),
        scratch_shapes=[pltpu.VMEM((2 * TP2 + 2, W1 + 2, 128), jnp.bfloat16)],
        compiler_params=pltpu.CompilerParams(
            dimension_semantics=("parallel",), vmem_limit_bytes=VMEM_LIMIT),
        cost_estimate=_cost(
            2 * P1 * W1 * 9 * (64 * 128 + 128 * 128),
            p1pad.size * 2 + 3 * (192 + 384) * 128 * 2 + P2 * W2 * 128 * 2),
    )(p1pad, params["c3_w"], params["c3_b"], params["c4_w"], params["c4_b"])

    # ----- head: HWC flatten + fc1(int8 weights) + ReLU + fc2 -----
    feat = pooled2.reshape(1, -1)                       # (1, fs) bf16
    fs = feat.shape[1]
    out_classes = params["fc2_b"].shape[1]
    TK = _k_tile(fs)
    head = pl.pallas_call(
        head_kernel,
        out_shape=jax.ShapeDtypeStruct((1, 256), jnp.float32),
        grid=(2, fs // TK),
        in_specs=[
            pl.BlockSpec((1, TK), lambda j, k: (0, k)),
            pl.BlockSpec((TK, 128), lambda j, k: (k, j)),
            pl.BlockSpec((1, 128), lambda j, k: (0, j)),
            pl.BlockSpec((1, 128), lambda j, k: (0, j)),
            pl.BlockSpec((128, 128), lambda j, k: (j, 0)),
        ],
        out_specs=pl.BlockSpec((1, 128), lambda j, k: (0, j)),
        scratch_shapes=[pltpu.VMEM((1, 128), jnp.float32)],
        compiler_params=pltpu.CompilerParams(
            dimension_semantics=("parallel", "arbitrary"),
            vmem_limit_bytes=VMEM_LIMIT),
        cost_estimate=_cost(
            2 * fs * 256 + 2 * 256 * 128,
            fs * 2 + fs * 256 * 1 + 256 * 4 * 3 + 256 * 128 * 2 + 256 * 4),
    )(feat, params["fc1_wq"], params["fc1_s"], params["fc1_b"], params["fc2_w"])

    # Sum the two N-half partial logits and add the fc2 bias (tiny XLA add).
    logits = (head[:, :out_classes] + head[:, 128:128 + out_classes]
              + params["fc2_b"])
    return logits                                        # (1, out_classes)


if __name__ == "__main__":
    # Small shapes: 32 mel-bins x 32 frames (scaled-down 128 x 937); exercises
    # multi-tile grids in all three kernels (block1: 4 tiles, block2: 2 tiles,
    # head: 2 N-halves x 2 K-steps).
    H, W, OUT = 32, 32, 18
    key = jax.random.PRNGKey(0)
    kx, kp = jax.random.split(key)
    spec = jax.random.normal(kx, (H, W), jnp.float32)
    params = init_params(kp, H, W, out_classes=OUT)

    out = jax.jit(musiclass_forward)(spec, params)
    out = jax.block_until_ready(out)
    assert out.shape == (1, OUT) and out.dtype == jnp.float32
    assert bool(jnp.all(jnp.isfinite(out)))
    print("KERNEL_OK")
</pallas_src>

<mosaic_0001>
module attributes {stable_mosaic.version = 11 : i64} {
  func.func @block1_kernel(%arg0: i32, %arg1: memref<36x34xf32, #tpu.memory_space<vmem>>, %arg2: memref<16x32xbf16, #tpu.memory_space<vmem>>, %arg3: memref<1x32xf32, #tpu.memory_space<vmem>>, %arg4: memref<3x96x64xbf16, #tpu.memory_space<vmem>>, %arg5: memref<1x64xf32, #tpu.memory_space<vmem>>, %arg6: memref<4x16x64xbf16, #tpu.memory_space<vmem>>, %arg7: memref<10x34x32xbf16, #tpu.memory_space<vmem>>) attributes {dimension_semantics = [#tpu.dimension_semantics<parallel>], iteration_bounds = array<i64: 4>, scalar_prefetch = 0 : i64, scratch_operands = 1 : i64, tpu.core_type = #tpu.core_type<tc>, window_params = [{pipeline_mode = #tpu.pipeline_mode<synchronous>, transform_indices = @transform_0, window_bounds = array<i64: 36, 34>}, {pipeline_mode = #tpu.pipeline_mode<synchronous>, transform_indices = @transform_1, window_bounds = array<i64: 16, 32>}, {pipeline_mode = #tpu.pipeline_mode<synchronous>, transform_indices = @transform_2, window_bounds = array<i64: 1, 32>}, {pipeline_mode = #tpu.pipeline_mode<synchronous>, transform_indices = @transform_3, window_bounds = array<i64: 3, 96, 64>}, {pipeline_mode = #tpu.pipeline_mode<synchronous>, transform_indices = @transform_4, window_bounds = array<i64: 1, 64>}, {transform_indices = @transform_5, window_bounds = array<i64: 4, 16, 64>}]} {
    %c8_i32 = arith.constant 8 : i32
    %0 = arith.muli %arg0, %c8_i32 : i32
    %1 = tpu.assume_multiple %0, 8 : i32
    %2 = arith.index_cast %1 : i32 to index
    %c0 = arith.constant 0 : index
    %3 = vector.load %arg1[%2, %c0] : memref<36x34xf32, #tpu.memory_space<vmem>>, vector<12x34xf32>
    %4 = arith.truncf %3 : vector<12x34xf32> to vector<12x34xbf16>
    %5 = vector.extract_strided_slice %4 {offsets = [0, 0], sizes = [10, 32], strides = [1, 1]} : vector<12x34xbf16> to vector<10x32xbf16>
    %6 = vector.shape_cast %5 : vector<10x32xbf16> to vector<10x32x1xbf16>
    %7 = vector.extract_strided_slice %4 {offsets = [0, 1], sizes = [10, 32], strides = [1, 1]} : vector<12x34xbf16> to vector<10x32xbf16>
    %8 = vector.shape_cast %7 : vector<10x32xbf16> to vector<10x32x1xbf16>
    %9 = vector.extract_strided_slice %4 {offsets = [0, 2], sizes = [10, 32], strides = [1, 1]} : vector<12x34xbf16> to vector<10x32xbf16>
    %10 = vector.shape_cast %9 : vector<10x32xbf16> to vector<10x32x1xbf16>
    %11 = vector.extract_strided_slice %4 {offsets = [1, 0], sizes = [10, 32], strides = [1, 1]} : vector<12x34xbf16> to vector<10x32xbf16>
    %12 = vector.shape_cast %11 : vector<10x32xbf16> to vector<10x32x1xbf16>
    %13 = vector.extract_strided_slice %4 {offsets = [1, 1], sizes = [10, 32], strides = [1, 1]} : vector<12x34xbf16> to vector<10x32xbf16>
    %14 = vector.shape_cast %13 : vector<10x32xbf16> to vector<10x32x1xbf16>
    %15 = vector.extract_strided_slice %4 {offsets = [1, 2], sizes = [10, 32], strides = [1, 1]} : vector<12x34xbf16> to vector<10x32xbf16>
    %16 = vector.shape_cast %15 : vector<10x32xbf16> to vector<10x32x1xbf16>
    %17 = vector.extract_strided_slice %4 {offsets = [2, 0], sizes = [10, 32], strides = [1, 1]} : vector<12x34xbf16> to vector<10x32xbf16>
    %18 = vector.shape_cast %17 : vector<10x32xbf16> to vector<10x32x1xbf16>
    %19 = vector.extract_strided_slice %4 {offsets = [2, 1], sizes = [10, 32], strides = [1, 1]} : vector<12x34xbf16> to vector<10x32xbf16>
    %20 = vector.shape_cast %19 : vector<10x32xbf16> to vector<10x32x1xbf16>
    %21 = vector.extract_strided_slice %4 {offsets = [2, 2], sizes = [10, 32], strides = [1, 1]} : vector<12x34xbf16> to vector<10x32xbf16>
    %22 = vector.shape_cast %21 : vector<10x32xbf16> to vector<10x32x1xbf16>
    %cst = arith.constant 0.000000e+00 : bf16
    %23 = vector.broadcast %cst : bf16 to vector<10x32x7xbf16>
    %24 = tpu.concatenate %6, %8, %10, %12, %14, %16, %18, %20, %22, %23 in 2 : vector<10x32x1xbf16>, vector<10x32x1xbf16>, vector<10x32x1xbf16>, vector<10x32x1xbf16>, vector<10x32x1xbf16>, vector<10x32x1xbf16>, vector<10x32x1xbf16>, vector<10x32x1xbf16>, vector<10x32x1xbf16>, vector<10x32x7xbf16> -> vector<10x32x16xbf16>
    %25 = vector.shape_cast %24 : vector<10x32x16xbf16> to vector<320x16xbf16>
    %c0_0 = arith.constant 0 : index
    %c0_1 = arith.constant 0 : index
    %26 = vector.load %arg2[%c0_0, %c0_1] : memref<16x32xbf16, #tpu.memory_space<vmem>>, vector<16x32xbf16>
    %cst_2 = arith.constant dense<0.000000e+00> : vector<320x32xf32>
    %27 = tpu.matmul %25, %26, %cst_2 {dimension_numbers = #tpu.dot_dimension_numbers<[1], [0], [0], [1], [0, 0, 1, 1], [], []>} : vector<320x16xbf16>, vector<16x32xbf16>, vector<320x32xf32> -> vector<320x32xf32>
    %c0_3 = arith.constant 0 : index
    %c0_4 = arith.constant 0 : index
    %28 = vector.load %arg3[%c0_3, %c0_4] : memref<1x32xf32, #tpu.memory_space<vmem>>, vector<1x32xf32>
    %29 = vector.broadcast %28 : vector<1x32xf32> to vector<320x32xf32>
    %30 = arith.addf %27, %29 : vector<320x32xf32>
    %cst_5 = arith.constant 0.000000e+00 : f32
    %31 = vector.broadcast %cst_5 : f32 to vector<320x32xf32>
    %32 = arith.maximumf %30, %31 : vector<320x32xf32>
    %33 = vector.shape_cast %32 : vector<320x32xf32> to vector<10x32x32xf32>
    %cst_6 = arith.constant 0.000000e+00 : bf16
    %34 = vector.broadcast %cst_6 : bf16 to vector<10x1x32xbf16>
    %c0_7 = arith.constant 0 : index
    %c0_8 = arith.constant 0 : index
    %c0_9 = arith.constant 0 : index
    %35 = vector.load %arg7[%c0_7, %c0_8, %c0_9] : memref<10x34x32xbf16, #tpu.memory_space<vmem>>, vector<10x1x32xbf16>
    tpu.vector_store %arg7[%c0_7, %c0_8, %c0_9], %34 {strides = array<i32>} : memref<10x34x32xbf16, #tpu.memory_space<vmem>>, vector<10x1x32xbf16>,
    %c0_10 = arith.constant 0 : index
    %c33 = arith.constant 33 : index
    %c0_11 = arith.constant 0 : index
    %36 = vector.load %arg7[%c0_10, %c33, %c0_11] : memref<10x34x32xbf16, #tpu.memory_space<vmem>>, vector<10x1x32xbf16>
    tpu.vector_store %arg7[%c0_10, %c33, %c0_11], %34 {strides = array<i32>} : memref<10x34x32xbf16, #tpu.memory_space<vmem>>, vector<10x1x32xbf16>,
    %37 = arith.truncf %33 : vector<10x32x32xf32> to vector<10x32x32xbf16>
    %c0_12 = arith.constant 0 : index
    %c1 = arith.constant 1 : index
    %c0_13 = arith.constant 0 : index
    %38 = vector.load %arg7[%c0_12, %c1, %c0_13] : memref<10x34x32xbf16, #tpu.memory_space<vmem>>, vector<10x32x32xbf16>
    tpu.vector_store %arg7[%c0_12, %c1, %c0_13], %37 {strides = array<i32>} : memref<10x34x32xbf16, #tpu.memory_space<vmem>>, vector<10x32x32xbf16>,
    %cst_14 = arith.constant 0.000000e+00 : bf16
    %39 = vector.broadcast %cst_14 : bf16 to vector<1x34x32xbf16>
    %c0_i32 = arith.constant 0 : i32
    %40 = arith.cmpi eq, %1, %c0_i32 : i32
    %41 = arith.extui %40 : i1 to i32
    %c0_i32_15 = arith.constant 0 : i32
    %42 = arith.cmpi ne, %41, %c0_i32_15 : i32
    scf.if %42 {
      %c0_64 = arith.constant 0 : index
      %c0_65 = arith.constant 0 : index
      %c0_66 = arith.constant 0 : index
      %84 = vector.load %arg7[%c0_64, %c0_65, %c0_66] : memref<10x34x32xbf16, #tpu.memory_space<vmem>>, vector<1x34x32xbf16>
      tpu.vector_store %arg7[%c0_64, %c0_65, %c0_66], %39 {strides = array<i32>} : memref<10x34x32xbf16, #tpu.memory_space<vmem>>, vector<1x34x32xbf16>,
    } else {
    }
    %c8_i32_16 = arith.constant 8 : i32
    %43 = arith.addi %1, %c8_i32_16 : i32
    %c32_i32 = arith.constant 32 : i32
    %44 = arith.cmpi sge, %43, %c32_i32 : i32
    %45 = arith.extui %44 : i1 to i32
    %c0_i32_17 = arith.constant 0 : i32
    %46 = arith.cmpi ne, %45, %c0_i32_17 : i32
    scf.if %46 {
      %c9 = arith.constant 9 : index
      %c0_64 = arith.constant 0 : index
      %c0_65 = arith.constant 0 : index
      %84 = vector.load %arg7[%c9, %c0_64, %c0_65] : memref<10x34x32xbf16, #tpu.memory_space<vmem>>, vector<1x34x32xbf16>
      tpu.vector_store %arg7[%c9, %c0_64, %c0_65], %39 {strides = array<i32>} : memref<10x34x32xbf16, #tpu.memory_space<vmem>>, vector<1x34x32xbf16>,
    } else {
    }
    %c0_18 = arith.constant 0 : index
    %c0_19 = arith.constant 0 : index
    %c0_20 = arith.constant 0 : index
    %47 = vector.load %arg7[%c0_18, %c0_19, %c0_20] : memref<10x34x32xbf16, #tpu.memory_space<vmem>>, vector<8x32x32xbf16>
    %c0_21 = arith.constant 0 : index
    %c1_22 = arith.constant 1 : index
    %c0_23 = arith.constant 0 : index
    %48 = vector.load %arg7[%c0_21, %c1_22, %c0_23] : memref<10x34x32xbf16, #tpu.memory_space<vmem>>, vector<8x32x32xbf16>
    %c0_24 = arith.constant 0 : index
    %c2 = arith.constant 2 : index
    %c0_25 = arith.constant 0 : index
    %49 = vector.load %arg7[%c0_24, %c2, %c0_25] : memref<10x34x32xbf16, #tpu.memory_space<vmem>>, vector<8x32x32xbf16>
    %50 = tpu.concatenate %47, %48, %49 in 2 : vector<8x32x32xbf16>, vector<8x32x32xbf16>, vector<8x32x32xbf16> -> vector<8x32x96xbf16>
    %51 = vector.shape_cast %50 : vector<8x32x96xbf16> to vector<256x96xbf16>
    %c0_26 = arith.constant 0 : index
    %c0_27 = arith.constant 0 : index
    %c0_28 = arith.constant 0 : index
    %52 = vector.load %arg4[%c0_26, %c0_27, %c0_28] : memref<3x96x64xbf16, #tpu.memory_space<vmem>>, vector<1x96x64xbf16>
    %53 = vector.shape_cast %52 : vector<1x96x64xbf16> to vector<96x64xbf16>
    %cst_29 = arith.constant dense<0.000000e+00> : vector<256x64xf32>
    %54 = tpu.matmul %51, %53, %cst_29 {dimension_numbers = #tpu.dot_dimension_numbers<[1], [0], [0], [1], [0, 0, 1, 1], [], []>} : vector<256x96xbf16>, vector<96x64xbf16>, vector<256x64xf32> -> vector<256x64xf32>
    %c1_30 = arith.constant 1 : index
    %c0_31 = arith.constant 0 : index
    %c0_32 = arith.constant 0 : index
    %55 = vector.load %arg7[%c1_30, %c0_31, %c0_32] : memref<10x34x32xbf16, #tpu.memory_space<vmem>>, vector<8x32x32xbf16>
    %c1_33 = arith.constant 1 : index
    %c1_34 = arith.constant 1 : index
    %c0_35 = arith.constant 0 : index
    %56 = vector.load %arg7[%c1_33, %c1_34, %c0_35] : memref<10x34x32xbf16, #tpu.memory_space<vmem>>, vector<8x32x32xbf16>
    %c1_36 = arith.constant 1 : index
    %c2_37 = arith.constant 2 : index
    %c0_38 = arith.constant 0 : index
    %57 = vector.load %arg7[%c1_36, %c2_37, %c0_38] : memref<10x34x32xbf16, #tpu.memory_space<vmem>>, vector<8x32x32xbf16>
    %58 = tpu.concatenate %55, %56, %57 in 2 : vector<8x32x32xbf16>, vector<8x32x32xbf16>, vector<8x32x32xbf16> -> vector<8x32x96xbf16>
    %59 = vector.shape_cast %58 : vector<8x32x96xbf16> to vector<256x96xbf16>
    %c1_39 = arith.constant 1 : index
    %c0_40 = arith.constant 0 : index
    %c0_41 = arith.constant 0 : index
    %60 = vector.load %arg4[%c1_39, %c0_40, %c0_41] : memref<3x96x64xbf16, #tpu.memory_space<vmem>>, vector<1x96x64xbf16>
    %61 = vector.shape_cast %60 : vector<1x96x64xbf16> to vector<96x64xbf16>
    %cst_42 = arith.constant dense<0.000000e+00> : vector<256x64xf32>
    %62 = tpu.matmul %59, %61, %cst_42 {dimension_numbers = #tpu.dot_dimension_numbers<[1], [0], [0], [1], [0, 0, 1, 1], [], []>} : vector<256x96xbf16>, vector<96x64xbf16>, vector<256x64xf32> -> vector<256x64xf32>
    %63 = arith.addf %54, %62 : vector<256x64xf32>
    %c2_43 = arith.constant 2 : index
    %c0_44 = arith.constant 0 : index
    %c0_45 = arith.constant 0 : index
    %64 = vector.load %arg7[%c2_43, %c0_44, %c0_45] : memref<10x34x32xbf16, #tpu.memory_space<vmem>>, vector<8x32x32xbf16>
    %c2_46 = arith.constant 2 : index
    %c1_47 = arith.constant 1 : index
    %c0_48 = arith.constant 0 : index
    %65 = vector.load %arg7[%c2_46, %c1_47, %c0_48] : memref<10x34x32xbf16, #tpu.memory_space<vmem>>, vector<8x32x32xbf16>
    %c2_49 = arith.constant 2 : index
    %c2_50 = arith.constant 2 : index
    %c0_51 = arith.constant 0 : index
    %66 = vector.load %arg7[%c2_49, %c2_50, %c0_51] : memref<10x34x32xbf16, #tpu.memory_space<vmem>>, vector<8x32x32xbf16>
    %67 = tpu.concatenate %64, %65, %66 in 2 : vector<8x32x32xbf16>, vector<8x32x32xbf16>, vector<8x32x32xbf16> -> vector<8x32x96xbf16>
    %68 = vector.shape_cast %67 : vector<8x32x96xbf16> to vector<256x96xbf16>
    %c2_52 = arith.constant 2 : index
    %c0_53 = arith.constant 0 : index
    %c0_54 = arith.constant 0 : index
    %69 = vector.load %arg4[%c2_52, %c0_53, %c0_54] : memref<3x96x64xbf16, #tpu.memory_space<vmem>>, vector<1x96x64xbf16>
    %70 = vector.shape_cast %69 : vector<1x96x64xbf16> to vector<96x64xbf16>
    %cst_55 = arith.constant dense<0.000000e+00> : vector<256x64xf32>
    %71 = tpu.matmul %68, %70, %cst_55 {dimension_numbers = #tpu.dot_dimension_numbers<[1], [0], [0], [1], [0, 0, 1, 1], [], []>} : vector<256x96xbf16>, vector<96x64xbf16>, vector<256x64xf32> -> vector<256x64xf32>
    %72 = arith.addf %63, %71 : vector<256x64xf32>
    %c0_56 = arith.constant 0 : index
    %c0_57 = arith.constant 0 : index
    %73 = vector.load %arg5[%c0_56, %c0_57] : memref<1x64xf32, #tpu.memory_space<vmem>>, vector<1x64xf32>
    %74 = vector.broadcast %73 : vector<1x64xf32> to vector<256x64xf32>
    %75 = arith.addf %72, %74 : vector<256x64xf32>
    %76 = vector.shape_cast %75 : vector<256x64xf32> to vector<4x2x32x64xf32>
    %cst_58 = arith.constant dense<0xFF800000> : vector<4x32x64xf32>
    %77 = vector.multi_reduction <maximumf>, %76, %cst_58 [1] : vector<4x2x32x64xf32> to vector<4x32x64xf32>
    %78 = vector.shape_cast %77 : vector<4x32x64xf32> to vector<4x16x2x64xf32>
    %cst_59 = arith.constant dense<0xFF800000> : vector<4x16x64xf32>
    %79 = vector.multi_reduction <maximumf>, %78, %cst_59 [2] : vector<4x16x2x64xf32> to vector<4x16x64xf32>
    %cst_60 = arith.constant 0.000000e+00 : f32
    %80 = vector.broadcast %cst_60 : f32 to vector<4x16x64xf32>
    %81 = arith.maximumf %79, %80 : vector<4x16x64xf32>
    %82 = arith.truncf %81 : vector<4x16x64xf32> to vector<4x16x64xbf16>
    %c0_61 = arith.constant 0 : index
    %c0_62 = arith.constant 0 : index
    %c0_63 = arith.constant 0 : index
    %83 = vector.load %arg6[%c0_61, %c0_62, %c0_63] : memref<4x16x64xbf16, #tpu.memory_space<vmem>>, vector<4x16x64xbf16>
    tpu.vector_store %arg6[%c0_61, %c0_62, %c0_63], %82 {strides = array<i32>} : memref<4x16x64xbf16, #tpu.memory_space<vmem>>, vector<4x16x64xbf16>,
    return
  }
  func.func @transform_0(%arg0: i32) -> (i32, i32) {
    %c0_i32 = arith.constant 0 : i32
    %c0_i32_0 = arith.constant 0 : i32
    %c0_i32_1 = arith.constant 0 : i32
    return %c0_i32, %c0_i32_0 : i32, i32
  }
  func.func @transform_1(%arg0: i32) -> (i32, i32) {
    %c0_i32 = arith.constant 0 : i32
    %c0_i32_0 = arith.constant 0 : i32
    %c0_i32_1 = arith.constant 0 : i32
    return %c0_i32, %c0_i32_0 : i32, i32
  }
  func.func @transform_2(%arg0: i32) -> (i32, i32) {
    %c0_i32 = arith.constant 0 : i32
    %c0_i32_0 = arith.constant 0 : i32
    %c0_i32_1 = arith.constant 0 : i32
    return %c0_i32, %c0_i32_0 : i32, i32
  }
  func.func @transform_3(%arg0: i32) -> (i32, i32, i32) {
    %c0_i32 = arith.constant 0 : i32
    %c0_i32_0 = arith.constant 0 : i32
    %c0_i32_1 = arith.constant 0 : i32
    %c0_i32_2 = arith.constant 0 : i32
    return %c0_i32, %c0_i32_0, %c0_i32_1 : i32, i32, i32
  }
  func.func @transform_4(%arg0: i32) -> (i32, i32) {
    %c0_i32 = arith.constant 0 : i32
    %c0_i32_0 = arith.constant 0 : i32
    %c0_i32_1 = arith.constant 0 : i32
    return %c0_i32, %c0_i32_0 : i32, i32
  }
  func.func @transform_5(%arg0: i32) -> (i32, i32, i32) {
    %c0_i32 = arith.constant 0 : i32
    %c0_i32_0 = arith.constant 0 : i32
    %c0_i32_1 = arith.constant 0 : i32
    return %arg0, %c0_i32, %c0_i32_0 : i32, i32, i32
  }
}

module attributes {stable_mosaic.version = 11 : i64} {
  func.func @head_kernel(%arg0: i32, %arg1: i32, %arg2: memref<1x4096xbf16, #tpu.memory_space<vmem>>, %arg3: memref<4096x128xi8, #tpu.memory_space<vmem>>, %arg4: memref<1x128xf32, #tpu.memory_space<vmem>>, %arg5: memref<1x128xf32, #tpu.memory_space<vmem>>, %arg6: memref<128x128xbf16, #tpu.memory_space<vmem>>, %arg7: memref<1x128xf32, #tpu.memory_space<vmem>>, %arg8: memref<1x128xf32, #tpu.memory_space<vmem>>) attributes {dimension_semantics = [#tpu.dimension_semantics<parallel>, #tpu.dimension_semantics<arbitrary>], iteration_bounds = array<i64: 2, 2>, scalar_prefetch = 0 : i64, scratch_operands = 1 : i64, tpu.core_type = #tpu.core_type<tc>, window_params = [{transform_indices = @transform_0, window_bounds = array<i64: 1, 4096>}, {transform_indices = @transform_1, window_bounds = array<i64: 4096, 128>}, {transform_indices = @transform_2, window_bounds = array<i64: 1, 128>}, {transform_indices = @transform_3, window_bounds = array<i64: 1, 128>}, {transform_indices = @transform_4, window_bounds = array<i64: 128, 128>}, {transform_indices = @transform_5, window_bounds = array<i64: 1, 128>}]} {
    %c0_i32 = arith.constant 0 : i32
    %0 = arith.cmpi eq, %arg1, %c0_i32 : i32
    %1 = arith.extui %0 : i1 to i32
    %c0_i32_0 = arith.constant 0 : i32
    %2 = arith.cmpi ne, %1, %c0_i32_0 : i32
    scf.if %2 {
      %cst_9 = arith.constant 0.000000e+00 : f32
      %13 = vector.broadcast %cst_9 : f32 to vector<1x128xf32>
      %c0_10 = arith.constant 0 : index
      %c0_11 = arith.constant 0 : index
      %14 = vector.load %arg8[%c0_10, %c0_11] : memref<1x128xf32, #tpu.memory_space<vmem>>, vector<1x128xf32>
      tpu.vector_store %arg8[%c0_10, %c0_11], %13 {strides = array<i32>} : memref<1x128xf32, #tpu.memory_space<vmem>>, vector<1x128xf32>,
    } else {
    }
    %c0 = arith.constant 0 : index
    %c0_1 = arith.constant 0 : index
    %3 = vector.load %arg3[%c0, %c0_1] : memref<4096x128xi8, #tpu.memory_space<vmem>>, vector<4096x128xi8>
    %4 = arith.sitofp %3 : vector<4096x128xi8> to vector<4096x128xbf16>
    %c0_2 = arith.constant 0 : index
    %c0_3 = arith.constant 0 : index
    %5 = vector.load %arg8[%c0_2, %c0_3] : memref<1x128xf32, #tpu.memory_space<vmem>>, vector<1x128xf32>
    %c0_4 = arith.constant 0 : index
    %c0_5 = arith.constant 0 : index
    %6 = vector.load %arg2[%c0_4, %c0_5] : memref<1x4096xbf16, #tpu.memory_space<vmem>>, vector<1x4096xbf16>
    %cst = arith.constant dense<0.000000e+00> : vector<1x128xf32>
    %7 = tpu.matmul %6, %4, %cst {dimension_numbers = #tpu.dot_dimension_numbers<[1], [0], [0], [1], [0, 0, 1, 1], [], []>} : vector<1x4096xbf16>, vector<4096x128xbf16>, vector<1x128xf32> -> vector<1x128xf32>
    %8 = arith.addf %5, %7 : vector<1x128xf32>
    %c0_6 = arith.constant 0 : index
    %c0_7 = arith.constant 0 : index
    %9 = vector.load %arg8[%c0_6, %c0_7] : memref<1x128xf32, #tpu.memory_space<vmem>>, vector<1x128xf32>
    tpu.vector_store %arg8[%c0_6, %c0_7], %8 {strides = array<i32>} : memref<1x128xf32, #tpu.memory_space<vmem>>, vector<1x128xf32>,
    %c1_i32 = arith.constant 1 : i32
    %10 = arith.cmpi eq, %arg1, %c1_i32 : i32
    %11 = arith.extui %10 : i1 to i32
    %c0_i32_8 = arith.constant 0 : i32
    %12 = arith.cmpi ne, %11, %c0_i32_8 : i32
    scf.if %12 {
      %c0_9 = arith.constant 0 : index
      %c0_10 = arith.constant 0 : index
      %13 = vector.load %arg8[%c0_9, %c0_10] : memref<1x128xf32, #tpu.memory_space<vmem>>, vector<1x128xf32>
      %c0_11 = arith.constant 0 : index
      %c0_12 = arith.constant 0 : index
      %14 = vector.load %arg4[%c0_11, %c0_12] : memref<1x128xf32, #tpu.memory_space<vmem>>, vector<1x128xf32>
      %15 = arith.mulf %13, %14 : vector<1x128xf32>
      %c0_13 = arith.constant 0 : index
      %c0_14 = arith.constant 0 : index
      %16 = vector.load %arg5[%c0_13, %c0_14] : memref<1x128xf32, #tpu.memory_space<vmem>>, vector<1x128xf32>
      %17 = arith.addf %15, %16 : vector<1x128xf32>
      %cst_15 = arith.constant 0.000000e+00 : f32
      %18 = vector.broadcast %cst_15 : f32 to vector<1x128xf32>
      %19 = arith.maximumf %17, %18 : vector<1x128xf32>
      %20 = arith.truncf %19 : vector<1x128xf32> to vector<1x128xbf16>
      %c0_16 = arith.constant 0 : index
      %c0_17 = arith.constant 0 : index
      %21 = vector.load %arg6[%c0_16, %c0_17] : memref<128x128xbf16, #tpu.memory_space<vmem>>, vector<128x128xbf16>
      %cst_18 = arith.constant dense<0.000000e+00> : vector<1x128xf32>
      %22 = tpu.matmul %20, %21, %cst_18 {dimension_numbers = #tpu.dot_dimension_numbers<[1], [0], [0], [1], [0, 0, 1, 1], [], []>} : vector<1x128xbf16>, vector<128x128xbf16>, vector<1x128xf32> -> vector<1x128xf32>
      %c0_19 = arith.constant 0 : index
      %c0_20 = arith.constant 0 : index
      %23 = vector.load %arg7[%c0_19, %c0_20] : memref<1x128xf32, #tpu.memory_space<vmem>>, vector<1x128xf32>
      tpu.vector_store %arg7[%c0_19, %c0_20], %22 {strides = array<i32>} : memref<1x128xf32, #tpu.memory_space<vmem>>, vector<1x128xf32>,
    } else {
    }
    return
  }
  func.func @transform_0(%arg0: i32, %arg1: i32) -> (i32, i32) {
    %c0_i32 = arith.constant 0 : i32
    %c0_i32_0 = arith.constant 0 : i32
    return %c0_i32, %arg1 : i32, i32
  }
  func.func @transform_1(%arg0: i32, %arg1: i32) -> (i32, i32) {
    %c0_i32 = arith.constant 0 : i32
    return %arg1, %arg0 : i32, i32
  }
  func.func @transform_2(%arg0: i32, %arg1: i32) -> (i32, i32) {
    %c0_i32 = arith.constant 0 : i32
    %c0_i32_0 = arith.constant 0 : i32
    return %c0_i32, %arg0 : i32, i32
  }
  func.func @transform_3(%arg0: i32, %arg1: i32) -> (i32, i32) {
    %c0_i32 = arith.constant 0 : i32
    %c0_i32_0 = arith.constant 0 : i32
    return %c0_i32, %arg0 : i32, i32
  }
  func.func @transform_4(%arg0: i32, %arg1: i32) -> (i32, i32) {
    %c0_i32 = arith.constant 0 : i32
    %c0_i32_0 = arith.constant 0 : i32
    return %arg0, %c0_i32 : i32, i32
  }
  func.func @transform_5(%arg0: i32, %arg1: i32) -> (i32, i32) {
    %c0_i32 = arith.constant 0 : i32
    %c0_i32_0 = arith.constant 0 : i32
    return %c0_i32, %arg0 : i32, i32
  }
}

module attributes {stable_mosaic.version = 11 : i64} {
  func.func @block2_kernel(%arg0: i32, %arg1: memref<20x18x64xbf16, #tpu.memory_space<vmem>>, %arg2: memref<3x192x128xbf16, #tpu.memory_space<vmem>>, %arg3: memref<1x128xf32, #tpu.memory_space<vmem>>, %arg4: memref<3x384x128xbf16, #tpu.memory_space<vmem>>, %arg5: memref<1x128xf32, #tpu.memory_space<vmem>>, %arg6: memref<4x8x128xbf16, #tpu.memory_space<vmem>>, %arg7: memref<10x18x128xbf16, #tpu.memory_space<vmem>>) attributes {dimension_semantics = [#tpu.dimension_semantics<parallel>], iteration_bounds = array<i64: 2>, scalar_prefetch = 0 : i64, scratch_operands = 1 : i64, tpu.core_type = #tpu.core_type<tc>, window_params = [{pipeline_mode = #tpu.pipeline_mode<synchronous>, transform_indices = @transform_0, window_bounds = array<i64: 20, 18, 64>}, {pipeline_mode = #tpu.pipeline_mode<synchronous>, transform_indices = @transform_1, window_bounds = array<i64: 3, 192, 128>}, {pipeline_mode = #tpu.pipeline_mode<synchronous>, transform_indices = @transform_2, window_bounds = array<i64: 1, 128>}, {pipeline_mode = #tpu.pipeline_mode<synchronous>, transform_indices = @transform_3, window_bounds = array<i64: 3, 384, 128>}, {pipeline_mode = #tpu.pipeline_mode<synchronous>, transform_indices = @transform_4, window_bounds = array<i64: 1, 128>}, {transform_indices = @transform_5, window_bounds = array<i64: 4, 8, 128>}]} {
    %c8_i32 = arith.constant 8 : i32
    %0 = arith.muli %arg0, %c8_i32 : i32
    %1 = tpu.assume_multiple %0, 8 : i32
    %2 = arith.index_cast %1 : i32 to index
    %c0 = arith.constant 0 : index
    %c0_0 = arith.constant 0 : index
    %3 = vector.load %arg1[%2, %c0, %c0_0] : memref<20x18x64xbf16, #tpu.memory_space<vmem>>, vector<12x18x64xbf16>
    %4 = vector.extract_strided_slice %3 {offsets = [0, 0, 0], sizes = [10, 16, 64], strides = [1, 1, 1]} : vector<12x18x64xbf16> to vector<10x16x64xbf16>
    %5 = vector.extract_strided_slice %3 {offsets = [0, 1, 0], sizes = [10, 16, 64], strides = [1, 1, 1]} : vector<12x18x64xbf16> to vector<10x16x64xbf16>
    %6 = vector.extract_strided_slice %3 {offsets = [0, 2, 0], sizes = [10, 16, 64], strides = [1, 1, 1]} : vector<12x18x64xbf16> to vector<10x16x64xbf16>
    %7 = tpu.concatenate %4, %5, %6 in 2 : vector<10x16x64xbf16>, vector<10x16x64xbf16>, vector<10x16x64xbf16> -> vector<10x16x192xbf16>
    %8 = vector.shape_cast %7 : vector<10x16x192xbf16> to vector<160x192xbf16>
    %c0_1 = arith.constant 0 : index
    %c0_2 = arith.constant 0 : index
    %c0_3 = arith.constant 0 : index
    %9 = vector.load %arg2[%c0_1, %c0_2, %c0_3] : memref<3x192x128xbf16, #tpu.memory_space<vmem>>, vector<1x192x128xbf16>
    %10 = vector.shape_cast %9 : vector<1x192x128xbf16> to vector<192x128xbf16>
    %cst = arith.constant dense<0.000000e+00> : vector<160x128xf32>
    %11 = tpu.matmul %8, %10, %cst {dimension_numbers = #tpu.dot_dimension_numbers<[1], [0], [0], [1], [0, 0, 1, 1], [], []>} : vector<160x192xbf16>, vector<192x128xbf16>, vector<160x128xf32> -> vector<160x128xf32>
    %12 = vector.extract_strided_slice %3 {offsets = [1, 0, 0], sizes = [10, 16, 64], strides = [1, 1, 1]} : vector<12x18x64xbf16> to vector<10x16x64xbf16>
    %13 = vector.extract_strided_slice %3 {offsets = [1, 1, 0], sizes = [10, 16, 64], strides = [1, 1, 1]} : vector<12x18x64xbf16> to vector<10x16x64xbf16>
    %14 = vector.extract_strided_slice %3 {offsets = [1, 2, 0], sizes = [10, 16, 64], strides = [1, 1, 1]} : vector<12x18x64xbf16> to vector<10x16x64xbf16>
    %15 = tpu.concatenate %12, %13, %14 in 2 : vector<10x16x64xbf16>, vector<10x16x64xbf16>, vector<10x16x64xbf16> -> vector<10x16x192xbf16>
    %16 = vector.shape_cast %15 : vector<10x16x192xbf16> to vector<160x192xbf16>
    %c1 = arith.constant 1 : index
    %c0_4 = arith.constant 0 : index
    %c0_5 = arith.constant 0 : index
    %17 = vector.load %arg2[%c1, %c0_4, %c0_5] : memref<3x192x128xbf16, #tpu.memory_space<vmem>>, vector<1x192x128xbf16>
    %18 = vector.shape_cast %17 : vector<1x192x128xbf16> to vector<192x128xbf16>
    %cst_6 = arith.constant dense<0.000000e+00> : vector<160x128xf32>
    %19 = tpu.matmul %16, %18, %cst_6 {dimension_numbers = #tpu.dot_dimension_numbers<[1], [0], [0], [1], [0, 0, 1, 1], [], []>} : vector<160x192xbf16>, vector<192x128xbf16>, vector<160x128xf32> -> vector<160x128xf32>
    %20 = arith.addf %11, %19 : vector<160x128xf32>
    %21 = vector.extract_strided_slice %3 {offsets = [2, 0, 0], sizes = [10, 16, 64], strides = [1, 1, 1]} : vector<12x18x64xbf16> to vector<10x16x64xbf16>
    %22 = vector.extract_strided_slice %3 {offsets = [2, 1, 0], sizes = [10, 16, 64], strides = [1, 1, 1]} : vector<12x18x64xbf16> to vector<10x16x64xbf16>
    %23 = vector.extract_strided_slice %3 {offsets = [2, 2, 0], sizes = [10, 16, 64], strides = [1, 1, 1]} : vector<12x18x64xbf16> to vector<10x16x64xbf16>
    %24 = tpu.concatenate %21, %22, %23 in 2 : vector<10x16x64xbf16>, vector<10x16x64xbf16>, vector<10x16x64xbf16> -> vector<10x16x192xbf16>
    %25 = vector.shape_cast %24 : vector<10x16x192xbf16> to vector<160x192xbf16>
    %c2 = arith.constant 2 : index
    %c0_7 = arith.constant 0 : index
    %c0_8 = arith.constant 0 : index
    %26 = vector.load %arg2[%c2, %c0_7, %c0_8] : memref<3x192x128xbf16, #tpu.memory_space<vmem>>, vector<1x192x128xbf16>
    %27 = vector.shape_cast %26 : vector<1x192x128xbf16> to vector<192x128xbf16>
    %cst_9 = arith.constant dense<0.000000e+00> : vector<160x128xf32>
    %28 = tpu.matmul %25, %27, %cst_9 {dimension_numbers = #tpu.dot_dimension_numbers<[1], [0], [0], [1], [0, 0, 1, 1], [], []>} : vector<160x192xbf16>, vector<192x128xbf16>, vector<160x128xf32> -> vector<160x128xf32>
    %29 = arith.addf %20, %28 : vector<160x128xf32>
    %c0_10 = arith.constant 0 : index
    %c0_11 = arith.constant 0 : index
    %30 = vector.load %arg3[%c0_10, %c0_11] : memref<1x128xf32, #tpu.memory_space<vmem>>, vector<1x128xf32>
    %31 = vector.broadcast %30 : vector<1x128xf32> to vector<160x128xf32>
    %32 = arith.addf %29, %31 : vector<160x128xf32>
    %cst_12 = arith.constant 0.000000e+00 : f32
    %33 = vector.broadcast %cst_12 : f32 to vector<160x128xf32>
    %34 = arith.maximumf %32, %33 : vector<160x128xf32>
    %35 = vector.shape_cast %34 : vector<160x128xf32> to vector<10x16x128xf32>
    %cst_13 = arith.constant 0.000000e+00 : bf16
    %36 = vector.broadcast %cst_13 : bf16 to vector<10x1x128xbf16>
    %c0_14 = arith.constant 0 : index
    %c0_15 = arith.constant 0 : index
    %c0_16 = arith.constant 0 : index
    %37 = vector.load %arg7[%c0_14, %c0_15, %c0_16] : memref<10x18x128xbf16, #tpu.memory_space<vmem>>, vector<10x1x128xbf16>
    tpu.vector_store %arg7[%c0_14, %c0_15, %c0_16], %36 {strides = array<i32>} : memref<10x18x128xbf16, #tpu.memory_space<vmem>>, vector<10x1x128xbf16>,
    %c0_17 = arith.constant 0 : index
    %c17 = arith.constant 17 : index
    %c0_18 = arith.constant 0 : index
    %38 = vector.load %arg7[%c0_17, %c17, %c0_18] : memref<10x18x128xbf16, #tpu.memory_space<vmem>>, vector<10x1x128xbf16>
    tpu.vector_store %arg7[%c0_17, %c17, %c0_18], %36 {strides = array<i32>} : memref<10x18x128xbf16, #tpu.memory_space<vmem>>, vector<10x1x128xbf16>,
    %39 = arith.truncf %35 : vector<10x16x128xf32> to vector<10x16x128xbf16>
    %c0_19 = arith.constant 0 : index
    %c1_20 = arith.constant 1 : index
    %c0_21 = arith.constant 0 : index
    %40 = vector.load %arg7[%c0_19, %c1_20, %c0_21] : memref<10x18x128xbf16, #tpu.memory_space<vmem>>, vector<10x16x128xbf16>
    tpu.vector_store %arg7[%c0_19, %c1_20, %c0_21], %39 {strides = array<i32>} : memref<10x18x128xbf16, #tpu.memory_space<vmem>>, vector<10x16x128xbf16>,
    %cst_22 = arith.constant 0.000000e+00 : bf16
    %41 = vector.broadcast %cst_22 : bf16 to vector<1x18x128xbf16>
    %c0_i32 = arith.constant 0 : i32
    %42 = arith.cmpi eq, %1, %c0_i32 : i32
    %43 = arith.extui %42 : i1 to i32
    %c0_i32_23 = arith.constant 0 : i32
    %44 = arith.cmpi ne, %43, %c0_i32_23 : i32
    scf.if %44 {
      %c0_73 = arith.constant 0 : index
      %c0_74 = arith.constant 0 : index
      %c0_75 = arith.constant 0 : index
      %86 = vector.load %arg7[%c0_73, %c0_74, %c0_75] : memref<10x18x128xbf16, #tpu.memory_space<vmem>>, vector<1x18x128xbf16>
      tpu.vector_store %arg7[%c0_73, %c0_74, %c0_75], %41 {strides = array<i32>} : memref<10x18x128xbf16, #tpu.memory_space<vmem>>, vector<1x18x128xbf16>,
    } else {
    }
    %c8_i32_24 = arith.constant 8 : i32
    %45 = arith.addi %1, %c8_i32_24 : i32
    %c16_i32 = arith.constant 16 : i32
    %46 = arith.cmpi sge, %45, %c16_i32 : i32
    %47 = arith.extui %46 : i1 to i32
    %c0_i32_25 = arith.constant 0 : i32
    %48 = arith.cmpi ne, %47, %c0_i32_25 : i32
    scf.if %48 {
      %c9 = arith.constant 9 : index
      %c0_73 = arith.constant 0 : index
      %c0_74 = arith.constant 0 : index
      %86 = vector.load %arg7[%c9, %c0_73, %c0_74] : memref<10x18x128xbf16, #tpu.memory_space<vmem>>, vector<1x18x128xbf16>
      tpu.vector_store %arg7[%c9, %c0_73, %c0_74], %41 {strides = array<i32>} : memref<10x18x128xbf16, #tpu.memory_space<vmem>>, vector<1x18x128xbf16>,
    } else {
    }
    %c0_26 = arith.constant 0 : index
    %c0_27 = arith.constant 0 : index
    %c0_28 = arith.constant 0 : index
    %49 = vector.load %arg7[%c0_26, %c0_27, %c0_28] : memref<10x18x128xbf16, #tpu.memory_space<vmem>>, vector<8x16x128xbf16>
    %c0_29 = arith.constant 0 : index
    %c1_30 = arith.constant 1 : index
    %c0_31 = arith.constant 0 : index
    %50 = vector.load %arg7[%c0_29, %c1_30, %c0_31] : memref<10x18x128xbf16, #tpu.memory_space<vmem>>, vector<8x16x128xbf16>
    %c0_32 = arith.constant 0 : index
    %c2_33 = arith.constant 2 : index
    %c0_34 = arith.constant 0 : index
    %51 = vector.load %arg7[%c0_32, %c2_33, %c0_34] : memref<10x18x128xbf16, #tpu.memory_space<vmem>>, vector<8x16x128xbf16>
    %52 = tpu.concatenate %49, %50, %51 in 2 : vector<8x16x128xbf16>, vector<8x16x128xbf16>, vector<8x16x128xbf16> -> vector<8x16x384xbf16>
    %53 = vector.shape_cast %52 : vector<8x16x384xbf16> to vector<128x384xbf16>
    %c0_35 = arith.constant 0 : index
    %c0_36 = arith.constant 0 : index
    %c0_37 = arith.constant 0 : index
    %54 = vector.load %arg4[%c0_35, %c0_36, %c0_37] : memref<3x384x128xbf16, #tpu.memory_space<vmem>>, vector<1x384x128xbf16>
    %55 = vector.shape_cast %54 : vector<1x384x128xbf16> to vector<384x128xbf16>
    %cst_38 = arith.constant dense<0.000000e+00> : vector<128x128xf32>
    %56 = tpu.matmul %53, %55, %cst_38 {dimension_numbers = #tpu.dot_dimension_numbers<[1], [0], [0], [1], [0, 0, 1, 1], [], []>} : vector<128x384xbf16>, vector<384x128xbf16>, vector<128x128xf32> -> vector<128x128xf32>
    %c1_39 = arith.constant 1 : index
    %c0_40 = arith.constant 0 : index
    %c0_41 = arith.constant 0 : index
    %57 = vector.load %arg7[%c1_39, %c0_40, %c0_41] : memref<10x18x128xbf16, #tpu.memory_space<vmem>>, vector<8x16x128xbf16>
    %c1_42 = arith.constant 1 : index
    %c1_43 = arith.constant 1 : index
    %c0_44 = arith.constant 0 : index
    %58 = vector.load %arg7[%c1_42, %c1_43, %c0_44] : memref<10x18x128xbf16, #tpu.memory_space<vmem>>, vector<8x16x128xbf16>
    %c1_45 = arith.constant 1 : index
    %c2_46 = arith.constant 2 : index
    %c0_47 = arith.constant 0 : index
    %59 = vector.load %arg7[%c1_45, %c2_46, %c0_47] : memref<10x18x128xbf16, #tpu.memory_space<vmem>>, vector<8x16x128xbf16>
    %60 = tpu.concatenate %57, %58, %59 in 2 : vector<8x16x128xbf16>, vector<8x16x128xbf16>, vector<8x16x128xbf16> -> vector<8x16x384xbf16>
    %61 = vector.shape_cast %60 : vector<8x16x384xbf16> to vector<128x384xbf16>
    %c1_48 = arith.constant 1 : index
    %c0_49 = arith.constant 0 : index
    %c0_50 = arith.constant 0 : index
    %62 = vector.load %arg4[%c1_48, %c0_49, %c0_50] : memref<3x384x128xbf16, #tpu.memory_space<vmem>>, vector<1x384x128xbf16>
    %63 = vector.shape_cast %62 : vector<1x384x128xbf16> to vector<384x128xbf16>
    %cst_51 = arith.constant dense<0.000000e+00> : vector<128x128xf32>
    %64 = tpu.matmul %61, %63, %cst_51 {dimension_numbers = #tpu.dot_dimension_numbers<[1], [0], [0], [1], [0, 0, 1, 1], [], []>} : vector<128x384xbf16>, vector<384x128xbf16>, vector<128x128xf32> -> vector<128x128xf32>
    %65 = arith.addf %56, %64 : vector<128x128xf32>
    %c2_52 = arith.constant 2 : index
    %c0_53 = arith.constant 0 : index
    %c0_54 = arith.constant 0 : index
    %66 = vector.load %arg7[%c2_52, %c0_53, %c0_54] : memref<10x18x128xbf16, #tpu.memory_space<vmem>>, vector<8x16x128xbf16>
    %c2_55 = arith.constant 2 : index
    %c1_56 = arith.constant 1 : index
    %c0_57 = arith.constant 0 : index
    %67 = vector.load %arg7[%c2_55, %c1_56, %c0_57] : memref<10x18x128xbf16, #tpu.memory_space<vmem>>, vector<8x16x128xbf16>
    %c2_58 = arith.constant 2 : index
    %c2_59 = arith.constant 2 : index
    %c0_60 = arith.constant 0 : index
    %68 = vector.load %arg7[%c2_58, %c2_59, %c0_60] : memref<10x18x128xbf16, #tpu.memory_space<vmem>>, vector<8x16x128xbf16>
    %69 = tpu.concatenate %66, %67, %68 in 2 : vector<8x16x128xbf16>, vector<8x16x128xbf16>, vector<8x16x128xbf16> -> vector<8x16x384xbf16>
    %70 = vector.shape_cast %69 : vector<8x16x384xbf16> to vector<128x384xbf16>
    %c2_61 = arith.constant 2 : index
    %c0_62 = arith.constant 0 : index
    %c0_63 = arith.constant 0 : index
    %71 = vector.load %arg4[%c2_61, %c0_62, %c0_63] : memref<3x384x128xbf16, #tpu.memory_space<vmem>>, vector<1x384x128xbf16>
    %72 = vector.shape_cast %71 : vector<1x384x128xbf16> to vector<384x128xbf16>
    %cst_64 = arith.constant dense<0.000000e+00> : vector<128x128xf32>
    %73 = tpu.matmul %70, %72, %cst_64 {dimension_numbers = #tpu.dot_dimension_numbers<[1], [0], [0], [1], [0, 0, 1, 1], [], []>} : vector<128x384xbf16>, vector<384x128xbf16>, vector<128x128xf32> -> vector<128x128xf32>
    %74 = arith.addf %65, %73 : vector<128x128xf32>
    %c0_65 = arith.constant 0 : index
    %c0_66 = arith.constant 0 : index
    %75 = vector.load %arg5[%c0_65, %c0_66] : memref<1x128xf32, #tpu.memory_space<vmem>>, vector<1x128xf32>
    %76 = vector.broadcast %75 : vector<1x128xf32> to vector<128x128xf32>
    %77 = arith.addf %74, %76 : vector<128x128xf32>
    %78 = vector.shape_cast %77 : vector<128x128xf32> to vector<4x2x16x128xf32>
    %cst_67 = arith.constant dense<0xFF800000> : vector<4x16x128xf32>
    %79 = vector.multi_reduction <maximumf>, %78, %cst_67 [1] : vector<4x2x16x128xf32> to vector<4x16x128xf32>
    %80 = vector.shape_cast %79 : vector<4x16x128xf32> to vector<4x8x2x128xf32>
    %cst_68 = arith.constant dense<0xFF800000> : vector<4x8x128xf32>
    %81 = vector.multi_reduction <maximumf>, %80, %cst_68 [2] : vector<4x8x2x128xf32> to vector<4x8x128xf32>
    %cst_69 = arith.constant 0.000000e+00 : f32
    %82 = vector.broadcast %cst_69 : f32 to vector<4x8x128xf32>
    %83 = arith.maximumf %81, %82 : vector<4x8x128xf32>
    %84 = arith.truncf %83 : vector<4x8x128xf32> to vector<4x8x128xbf16>
    %c0_70 = arith.constant 0 : index
    %c0_71 = arith.constant 0 : index
    %c0_72 = arith.constant 0 : index
    %85 = vector.load %arg6[%c0_70, %c0_71, %c0_72] : memref<4x8x128xbf16, #tpu.memory_space<vmem>>, vector<4x8x128xbf16>
    tpu.vector_store %arg6[%c0_70, %c0_71, %c0_72], %84 {strides = array<i32>} : memref<4x8x128xbf16, #tpu.memory_space<vmem>>, vector<4x8x128xbf16>,
    return
  }
  func.func @transform_0(%arg0: i32) -> (i32, i32, i32) {
    %c0_i32 = arith.constant 0 : i32
    %c0_i32_0 = arith.constant 0 : i32
    %c0_i32_1 = arith.constant 0 : i32
    %c0_i32_2 = arith.constant 0 : i32
    return %c0_i32, %c0_i32_0, %c0_i32_1 : i32, i32, i32
  }
  func.func @transform_1(%arg0: i32) -> (i32, i32, i32) {
    %c0_i32 = arith.constant 0 : i32
    %c0_i32_0 = arith.constant 0 : i32
    %c0_i32_1 = arith.constant 0 : i32
    %c0_i32_2 = arith.constant 0 : i32
    return %c0_i32, %c0_i32_0, %c0_i32_1 : i32, i32, i32
  }
  func.func @transform_2(%arg0: i32) -> (i32, i32) {
    %c0_i32 = arith.constant 0 : i32
    %c0_i32_0 = arith.constant 0 : i32
    %c0_i32_1 = arith.constant 0 : i32
    return %c0_i32, %c0_i32_0 : i32, i32
  }
  func.func @transform_3(%arg0: i32) -> (i32, i32, i32) {
    %c0_i32 = arith.constant 0 : i32
    %c0_i32_0 = arith.constant 0 : i32
    %c0_i32_1 = arith.constant 0 : i32
    %c0_i32_2 = arith.constant 0 : i32
    return %c0_i32, %c0_i32_0, %c0_i32_1 : i32, i32, i32
  }
  func.func @transform_4(%arg0: i32) -> (i32, i32) {
    %c0_i32 = arith.constant 0 : i32
    %c0_i32_0 = arith.constant 0 : i32
    %c0_i32_1 = arith.constant 0 : i32
    return %c0_i32, %c0_i32_0 : i32, i32
  }
  func.func @transform_5(%arg0: i32) -> (i32, i32, i32) {
    %c0_i32 = arith.constant 0 : i32
    %c0_i32_0 = arith.constant 0 : i32
    %c0_i32_1 = arith.constant 0 : i32
    return %arg0, %c0_i32, %c0_i32_0 : i32, i32, i32
  }
}

</mosaic_0001>

<bundles_post_ra>
// kernel: musiclass_forward.5
= control target key start
LH: loop header
LB: loop body
LE: loop exit
PB: predicated region body
PF: predicated region fallthrough
CT: control target
= control target key end

     0   :  { %s3185_s0 = inlined_call_operand.vmem [shape: bf16[1,8192], index: 0, kind: input, shape index: {}]   ;;  %s3186_s1 = inlined_call_operand.hbm [shape: s8[8192,256], index: 1, kind: input, shape index: {}]   ;;  %s3187_s2 = inlined_call_operand.hbm [shape: f32[1,256], index: 2, kind: input, shape index: {}]   ;;  %s3188_s3 = inlined_call_operand.hbm [shape: f32[1,256], index: 3, kind: input, shape index: {}]   ;;  %s3189_s4 = inlined_call_operand.hbm [shape: bf16[256,128], index: 4, kind: input, shape index: {}]   ;;  %s3190_s5 = inlined_call_operand.vmem [shape: f32[1,256], index: 5, kind: output, shape index: {}]  }
   0x1   :  { %3198 = sst [smem:[#allocation17_spill]] %s3185_s0 }
   0x2   :  { %3199 = sst [smem:[#allocation18_spill]] %s3186_s1 }
   0x3   :  { %3200 = sst [smem:[#allocation19_spill]] %s3187_s2 }
   0x4   :  { %3201 = sst [smem:[#allocation20_spill]] %s3188_s3 }
   0x5   :  { %3202 = sst [smem:[#allocation21_spill]] %s3190_s5 }
   0x6   :  { %10 = vsyncpa [#allocation4], 0 }
   0x7   :  { %12 = vsyncpa [#allocation4 + $0x1], 0 }
   0x8   :  { %13 = vsyncpa [#allocation6], 0 }
   0x9   :  { %15 = vsyncpa [#allocation6 + $0x1], 0 }
   0xa   :  { %16 = vsyncpa [#allocation9], 0 }
   0xb   :  { %18 = vsyncpa [#allocation9 + $0x1], 0  ;;  %s2707_s18 = smov 0   ;;  %s2709_s19 = smov 0  }
   0xc   :  { %s2711_s20 = smov 0   ;;  %s2713_s21 = smov 0  }
   0xd   :  { %s2715_s22 = smov 0   ;;  %s2717_s23 = smov 0  }
   0xe   :  { %s2719_s24 = smov 0   ;;  %s2721_s25 = smov 0  }
   0xf   :  { %s2723_s26 = smov 0   ;;  %s2725_s27 = smov 0  }
  0x10   :  { %s2727_s28 = smov 0  }
  0x11 LB: > { %3203 = sst [smem:[#allocation13_spill]] %s2646_s24  ;;  %s3191_s29 = sadd.s32 4294967295, %s2662_s28   ;;  %s2662_s28 = sphi %s2727_s28, %s24_s28   ;;  %s2658_s27 = sphi %s2725_s27, %s3237_s27   ;;  %s2654_s26 = sphi %s2723_s26, %s3229_s26   ;;  %s2650_s25 = sphi %s2721_s25, %s3236_s25   ;;  %s2646_s24 = sphi %s2719_s24, %s3228_s24   ;;  %s2642_s23 = sphi %s2717_s23, %s3235_s23   ;;  %s2638_s22 = sphi %s2715_s22, %s3234_s22   ;;  %s2634_s21 = sphi %s2713_s21, %s3233_s21   ;;  %s2630_s20 = sphi %s2711_s20, %s3232_s20   ;;  %s2626_s19 = sphi %s2709_s19, %s3231_s19   ;;  %s2622_s18 = sphi %s2707_s18, %s3230_s18  }
  0x12   : > { %3204 = sst [smem:[#allocation14_spill]] %s2650_s25  ;;  %p78_p0 = scmp.ne.s32.totalorder %s2642_s23, %s2638_s22 }
  0x13   : > { %3205 = sst [smem:[#allocation15_spill]] %s2654_s26  ;;  %p79_p1 = scmp.eq.s32.totalorder %s2662_s28, 0 }
  0x14   : > { %p84_p2 = scmp.ne.s32.totalorder %s2638_s22, %s2634_s21  ;;  %p85_p3 = scmp.eq.s32.totalorder %s3191_s29, 0 }
  0x15   : > { %p80_p4 = por %p79_p1, %p78_p0  ;;  %p104_p5 = scmp.ne.s32.totalorder %s2630_s20, %s2626_s19 }
  0x16   : > { %p2770_p6 = por %p85_p3, %p84_p2  ;;  %p110_p7 = scmp.ne.s32.totalorder %s2626_s19, %s2622_s18 }
  0x17   : > { %p106_p8 = por %p104_p5, %p79_p1  ;;  %p2342_p10 = scmp.lt.s32.totalorder %s2662_s28, 4 }
  0x18   : > { %p2775_p9 = por %p110_p7, %p85_p3  ;;  %s243_s10 = sand.u32 1, %s2662_s28  }
  0x19   : > { %s2782_s11 = sand.u32 1, %s2630_s20   ;;  %p2784_p11 = pnand %p2342_p10, %p80_p4 }
  0x1a   : > { %s3207_s9 = scalar_select %p2775_p9, 1, 0 }
  0x1b   : > { %s1917_s13 = sshll.u32 %s2658_s27, 4  ;;  %s3209_s2 = sld [smem:[#allocation19_spill]] }
  0x1c   : > { %s246_s17 = scalar_lea.vmem [#allocation5], %s2782_s11  ;;  %p2793_p12 = pnand %p2342_p10, %p106_p8 }
  0x1d   : > { %s253_s18 = sshll.u32 %s246_s17, 4  ;;  %s3211_s3 = sld [smem:[#allocation20_spill]]  ;;  %s254_s18 = int_to_ptr.vmem [resolvable:$true] %s253_s18 }
  0x1e   : > { %p1922_p13 = scmp.ge.s32.totalorder %s2662_s28, 1  ;;  %s2803_s30 = scalar_lea.sflag [#allocation6], %s243_s10 }
  0x1f   : > { %p3196_p0 = pneg %p2793_p12  ;;  %s2465_s14 = scalar_lea.vmem %s254_s18, 16 }
  0x20   : > { %p2466_p1 = scmp.ne.s32.totalorder %s254_s18, %s2465_s14  ;;  %s2664_s15 = smov [#allocation5]  }
  0x21   : > { %s251_s16 = scalar_lea.hbm %s3209_s2, %s1917_s13  ;;  %s2470_s17 = sshll.u32 %s2664_s15, 4  ;;  %s2471_s17 = int_to_ptr.vmem [resolvable:$false] %s2470_s17 }
  0x22   : > { %p2468_p2 = pnand %p2466_p1, %p3196_p0  ;;  %s2472_s2 = scalar_lea.vmem %s2471_s17, 32 }
  0x23   : > { %s2800_s7 = scalar_lea.hbm %s3211_s3, %s1917_s13  ;;  %p2473_p4 = scmp.lt.s32.totalorder %s254_s18, %s2471_s17 }
  0x24   : > { %p2469_p3 = pneg %p2468_p2  ;;  %p2474_p5 = scmp.lt.s32.totalorder %s2472_s2, %s2465_s14 }
  0x26   : > { %p2475_p7 = por %p2474_p5, %p2473_p4 }
  0x28   : > { %p2476_p8 = pnand %p2475_p7, %p2469_p3 }
  0x2a   : > { %2479 = shalt.err (!%p2476_p8)
}
  0x2b   : > { %2335 = dma.hbm_to_vmem [thread:$0]  (!%p2793_p12), %s251_s16, 16, %s254_s18, %s2803_s30  }
  0x2c   : > { %p296_p10 = scmp.lt.s32.totalorder %s2662_s28, 5  ;;  %s33_s29 = sadd.s32 1, %s2654_s26 }
  0x2d   : > { %s220_s6 = sand.u32 1, %s2642_s23   ;;  %p34_p2 = scmp.ge.s32.totalorder %s33_s29, 2 }
  0x2e   : > { %p2816_p1 = pnand %p1922_p13, %p296_p10  ;;  %s1913_s10 = sshll.u32 %s220_s6, 10 }
  0x2f   : > { %s1938_s13 = sshll.u32 %s2654_s26, 8  ;;  %s3239_s29 = smov (%p34_p2, %s33_s29), 0 }
  0x30   : > { %3213 = sst [smem:[#allocation16_spill]] %s3239_s29  ;;  %s3214_s14 = sadd.s32 1, %s2658_s27 }
  0x31   : > { %s3241_s14 = smov (!%p34_p2, %s3214_s14), %s2658_s27  ;;  %s66_s16 = ssub.s32 %s2654_s26, %s3239_s29 }
  0x32   : > { %p38_p13 = scmp.ge.s32.totalorder %s3241_s14, 2  ;;  %s230_s18 = sadd.s32 %s2658_s27, %s1938_s13 }
  0x33   : > { %s1916_s15 = sshll.u32 %s230_s18, 7  ;;  %s224_s17 = scalar_lea.vmem [#allocation3], %s1913_s10 }
  0x34   : > { %s233_s3 = sshll.u32 %s224_s17, 4  ;;  %s3243_s14 = smov (%p38_p13, %s3241_s14), 0  ;;  %s2838_s3 = int_to_ptr.vmem [resolvable:$true] %s233_s3 }
  0x35   : > { %s3215_s1 = sld [smem:[#allocation18_spill]]  ;;  %s67_s24 = ssub.s32 %s2658_s27, %s3243_s14 }
  0x36   : > { %s68_s29 = sor.u32 %s67_s24, %s66_s16  ;;  %p95_p3 = scmp.eq.s32.totalorder %s67_s24, 0 }
  0x37   : > { %p69_p4 = scmp.eq.s32.totalorder %s68_s29, 0  ;;  %s3216_s13 = sadd.s32 1, %s2630_s20 }
  0x38   : > { %s2845_s10 = scalar_select %p95_p3, %s2630_s20, %s3216_s13  }
  0x39   : > { %s3217_s18 = sadd.s32 1, %s2642_s23  ;;  %s221_s26 = scalar_lea.sflag [#allocation4], %s220_s6 }
  0x3a   : > { %s2850_s17 = scalar_select %p69_p4, %s2642_s23, %s3217_s18  }
  0x3b   : > { %s2836_s25 = scalar_lea.hbm %s3215_s1, %s1916_s15  ;;  %p2482_p5 = pneg %p2784_p11 }
  0x3c   : > { %s2493_s0 = scalar_lea.vmem %s2838_s3, 16384  ;;  %s2665_s5 = smov [#allocation3]  }
  0x3d   : > { %p2494_p7 = scmp.ne.s32.totalorder %s2838_s3, %s2493_s0  ;;  %s2498_s15 = sshll.u32 %s2665_s5, 4  ;;  %s2499_s15 = int_to_ptr.vmem [resolvable:$false] %s2498_s15 }
  0x3e   : > { %s2500_s1 = scalar_lea.vmem %s2499_s15, 32768  ;;  %p2501_p2 = scmp.lt.s32.totalorder %s2838_s3, %s2499_s15 }
  0x3f   : > { %p2496_p8 = pnand %p2494_p7, %p2482_p5  ;;  %p2502_p13 = scmp.lt.s32.totalorder %s2500_s1, %s2493_s0 }
  0x41   : > { %p2497_p10 = pneg %p2496_p8  ;;  %p2503_p0 = por %p2502_p13, %p2501_p2 }
  0x43   : > { %p2504_p9 = pnand %p2503_p0, %p2497_p10 }
  0x45   : > { %2507 = shalt.err (!%p2504_p9)
}
  0x46   : > { %s2666_s24 = smov 256   ;;  %s2667_s29 = smov 128  }
  0x47   : > { %s2668_s6 = smov 8   ;;  %s263_s16 = scalar_lea.vmem [#allocation7], %s2782_s11 }
  0x48   : > { %2332 = dma.hbm_to_vmem [thread:$0]  (!%p2784_p11), %s2836_s25, 16384, %s2838_s3, %s221_s26, %s2666_s24, %s2667_s29, %s2668_s6  }
  0x49   : > { %s270_s13 = sshll.u32 %s263_s16, 4  ;;  %s1919_s18 = sshll.u32 %s2782_s11, 6  ;;  %s271_s13 = int_to_ptr.vmem [resolvable:$true] %s270_s13 }
  0x4a   : > { %s2521_s5 = scalar_lea.vmem %s271_s13, 16  ;;  %p3218_p0 = pneg %p2793_p12 }
  0x4b   : > { %p2522_p3 = scmp.ne.s32.totalorder %s271_s13, %s2521_s5  ;;  %s2669_s1 = smov [#allocation7]  }
  0x4c   : > { %s2526_s0 = sshll.u32 %s2669_s1, 4  ;;  %s2527_s0 = int_to_ptr.vmem [resolvable:$false] %s2526_s0 }
  0x4d   : > { %p2524_p9 = pnand %p2522_p3, %p3218_p0  ;;  %s2528_s15 = scalar_lea.vmem %s2527_s0, 32 }
  0x4e   : > { %p2529_p5 = scmp.lt.s32.totalorder %s271_s13, %s2527_s0  ;;  %p2530_p7 = scmp.lt.s32.totalorder %s2528_s15, %s2521_s5 }
  0x4f   : > { %p2525_p4 = pneg %p2524_p9 }
  0x50   : > { %p2531_p8 = por %p2530_p7, %p2529_p5 }
  0x52   : > { %p2532_p10 = pnand %p2531_p8, %p2525_p4 }
  0x54   : > { %2535 = shalt.err (!%p2532_p10)
}
  0x55   : > { %2338 = dma.hbm_to_vmem [thread:$0]  (!%p2793_p12), %s2800_s7, 16, %s271_s13, %s2803_s30  }
  0x56   : > { %s1939_s3 = sshll.u32 %s2658_s27, 10  ;;  %s281_s24 = scalar_lea.vmem [#allocation8], %s1919_s18 }
  0x57   : > { %s287_s12 = scalar_lea.hbm %s3189_s4, %s1939_s3  ;;  %s288_s29 = sshll.u32 %s281_s24, 4  ;;  %s289_s29 = int_to_ptr.vmem [resolvable:$true] %s288_s29 }
  0x58   : > { %s278_s6 = scalar_lea.sflag [#allocation9], %s2782_s11  ;;  %s2549_s16 = scalar_lea.vmem %s289_s29, 1024 }
  0x59   : > { %p2550_p11 = scmp.ne.s32.totalorder %s289_s29, %s2549_s16  ;;  %p3219_p2 = pmov %p3218_p0 }
  0x5a   : > { %s2670_s5 = smov [#allocation8]  }
  0x5b   : > { %p2552_p13 = pnand %p2550_p11, %p3219_p2  ;;  %s2554_s1 = sshll.u32 %s2670_s5, 4  ;;  %s2555_s1 = int_to_ptr.vmem [resolvable:$false] %s2554_s1 }
  0x5c   : > { %s2556_s0 = scalar_lea.vmem %s2555_s1, 2048  ;;  %p2557_p0 = scmp.lt.s32.totalorder %s289_s29, %s2555_s1 }
  0x5d   : > { %p2553_p3 = pneg %p2552_p13  ;;  %p2558_p9 = scmp.lt.s32.totalorder %s2556_s0, %s2549_s16 }
  0x5f   : > { %p2559_p4 = por %p2558_p9, %p2557_p0 }
  0x61   : > { %p2560_p5 = pnand %p2559_p4, %p2553_p3 }
  0x63   : > { %2563 = shalt.err (!%p2560_p5)
}
  0x64   : > { %s2671_s30 = smov 64   ;;  %s2672_s7 = smov 4  }
  0x65   : > { %2341 = dma.hbm_to_vmem [thread:$0]  (!%p2793_p12), %s287_s12, 1024, %s289_s29, %s278_s6, %s2671_s30, %s2671_s30, %s2672_s7  }
  0x66   : > { %300 = sbr.rel (%p2816_p1) target bundleno = 827 (0x33b), region = 40  ;;  %s302_s11 = sand.u32 (!%p2816_p1), 1, %s2638_s22  }
  0x67   : > { %s1923_s13 = sshll.u32 (!%p2816_p1), %s302_s11, 10  ;;  %s303_s18 = scalar_lea.sflag (!%p2816_p1), [#allocation4], %s302_s11 }
  0x68   : > { %s2883_s15 = scalar_lea.vmem (!%p2816_p1), [#allocation3], %s1923_s13 }
  0x6b   : > { %2609 = dma.done.wait (%p2770_p6), %s303_s18, 16384  }
  0x6c   : > { %2611 = vsyncadd (%p2770_p6), %s303_s18, 4294950912  ;;  %s3220_s3 = sadd.s32 4294967295, %s2662_s28   ;;  %s2892_s25 = sand.u32 1, %s2626_s19  }
  0x6d   : > { %s311_s21 = sand.u32 1, %s3220_s3   ;;  %s314_s26 = scalar_lea.vmem [#allocation5], %s2892_s25 }
  0x6e   : > { %s312_s2 = scalar_lea.sflag [#allocation6], %s311_s21  ;;  %p3221_p12 = scmp.ne.s32.totalorder %s3207_s9, 0 }
  0x70   : > { %2613 = dma.done.wait (%p3221_p12), %s312_s2, 32  }
  0x71   : > { %2615 = vsyncadd (%p3221_p12), %s312_s2, 4294967264  ;;  %s1924_s8 = sshll.u32 %s2892_s25, 6  ;;  %s322_s12 = scalar_lea.vmem [#allocation7], %s2892_s25 }
  0x72   : > { %s328_s24 = scalar_lea.sflag [#allocation9], %s2892_s25  ;;  %s2902_s29 = scalar_lea.vmem [#allocation8], %s1924_s8 }
  0x73   : > { %2617 = dma.done.wait (%p3221_p12), %s328_s24, 1024  }
  0x74   : > { %2619 = vsyncadd (%p3221_p12), %s328_s24, 4294966272  ;;  %s3222_s6 = sld [smem:[#allocation13_spill]] }
  0x75   : > { %s3223_s16 = sld [smem:[#allocation14_spill]] }
  0x76   : > { %s3224_s30 = sld [smem:[#allocation21_spill]] }
  0x77   : > { %s3225_s18 = sld [smem:[#allocation17_spill]] }
  0x7a   : > { %s1925_s5 = sshll.u32 %s3222_s6, 5  ;;  %p1926_p7 = scmp.ne.s32.totalorder %s3222_s6, 0 }
  0x7b   : > { %p380_p6 = scmp.lt.s32.totalorder %s3223_s16, 1  ;;  %p374_p1 = scmp.lt.s32.totalorder %s1925_s5, 63 }
  0x7c   : > { %387 = sbr.rel (%p1926_p7) target bundleno = 131 (0x83), region = 60 }
  0x7d   : > { %s3245_s16 = smov (!%p380_p6, %s3223_s16), 1  ;;  %s3247_s5 = smov (!%p374_p1, %s1925_s5), 63 }
  0x7e   : > { %s382_s7 = scalar_lea.vmem %s3224_s30, %s3245_s16  ;;  %s2920_s3 = scalar_lea.vmem %s3225_s18, %s3247_s5 }
  0x81   : > { %v2673_v0 = vmov 0.0  }
  0x82   : > { %388 = vst [vmem:[#allocation2] sm:$0x1] %v2673_v0 }
  0x83 PF: > { %v396_v1 = vld [vmem:[%s2883_s15 + $0x38] sm:$0xff]  ;;  %v395_v11 = vld [vmem:[%s2883_s15 + $0x30] sm:$0xff]  ;;  %v786_v19 = vlaneseq  ;;  %v2674_v24 = vmov 1966171168   ;;  %v394_v27 = vld [vmem:[%s2883_s15 + $0x28] sm:$0xff]  ;;  %s3226_s9 = sld [smem:[#allocation13_spill]] }
  0x84   : > { %v404_v2 = vld [vmem:[%s2883_s15 + $0x78] sm:$0xff]  ;;  %v531_v4 = vunpack.c.l.s8.bf16 %v396_v1  ;;  %v532_v5 = vunpack.c.h.s8.bf16 %v396_v1  ;;  %v403_v12 = vld [vmem:[%s2883_s15 + $0x70] sm:$0xff]  ;;  %v530_v15 = vunpack.c.h.s8.bf16 %v395_v11  ;;  %v529_v22 = vunpack.c.l.s8.bf16 %v395_v11  ;;  %v402_v28 = vld [vmem:[%s2883_s15 + $0x68] sm:$0xff] }
  0x85   : > { %v392_v3 = vld [vmem:[%s2883_s15 + $0x18] sm:$0xff]  ;;  %v547_v6 = vunpack.c.l.s8.bf16 %v404_v2  ;;  %v548_v7 = vunpack.c.h.s8.bf16 %v404_v2  ;;  %v546_v16 = vunpack.c.h.s8.bf16 %v403_v12  ;;  %v391_v17 = vld [vmem:[%s2883_s15 + $0x10] sm:$0xff]  ;;  %v545_v23 = vunpack.c.l.s8.bf16 %v403_v12  ;;  %v390_v35 = vld [vmem:[%s2883_s15 + $0x8] sm:$0xff] }
  0x86   : > { %v400_v8 = vld [vmem:[%s2883_s15 + $0x58] sm:$0xff]  ;;  %v524_v9 = vunpack.c.h.s8.bf16 %v392_v3  ;;  %1940 = vmatprep.subr.bf16.mxu0 %v532_v5  ;;  %v523_v13 = vunpack.c.l.s8.bf16 %v392_v3  ;;  %v399_v18 = vld [vmem:[%s2883_s15 + $0x50] sm:$0xff]  ;;  %v522_v20 = vunpack.c.h.s8.bf16 %v391_v17  ;;  %v784_v25 = vunpack.c.l.s4 %v2674_v24  ;;  %v398_v36 = vld [vmem:[%s2883_s15 + $0x48] sm:$0xff] }
  0x87   : > { %v540_v10 = vunpack.c.h.s8.bf16 %v400_v8  ;;  %1962 = vmatprep.subr.bf16.mxu1 %v548_v7  ;;  %v539_v14 = vunpack.c.l.s8.bf16 %v400_v8  ;;  %v538_v21 = vunpack.c.h.s8.bf16 %v399_v18  ;;  %v787_v26 = vshrl.u32 %v786_v19, 7  ;;  %v774_v32 = vld [vmem:[%s2920_s3] sm:$0xff]  ;;  %v411_v12 = vld [vmem:[%s2883_s15 + $0xb0] sm:$0xff] }
  0x88   : > { %1941 = vmatpush3.bf16.msra.mxu0 %v524_v9  ;;  %v785_v29 = vunpack.c.0.s8 %v784_v25  ;;  %v521_v30 = vunpack.c.l.s8.bf16 %v391_v17  ;;  %v537_v31 = vunpack.c.l.s8.bf16 %v399_v18  ;;  %v528_v33 = vunpack.c.h.s8.bf16 %v394_v27  ;;  %v393_v44 = vld [vmem:[%s2883_s15 + $0x20] sm:$0xff]  ;;  %v412_v60 = vld [vmem:[%s2883_s15 + $0xb8] sm:$0xff]  ;;  %v407_v19 = vld [vmem:[%s2883_s15 + $0x90] sm:$0xff] }
  0x89   : > { %1963 = vmatpush3.bf16.msra.mxu1 %v540_v10  ;;  %1942 = vmatprep.subr.bf16.mxu0 %v531_v4  ;;  %v544_v34 = vunpack.c.h.s8.bf16 %v402_v28  ;;  %v520_v39 = vunpack.c.h.s8.bf16 %v390_v35  ;;  %v536_v40 = vunpack.c.h.s8.bf16 %v398_v36  ;;  %v527_v41 = vunpack.c.l.s8.bf16 %v394_v27  ;;  %v401_v45 = vld [vmem:[%s2883_s15 + $0x60] sm:$0xff]  ;;  %v420_v61 = vld [vmem:[%s2883_s15 + $0xf8] sm:$0xff]  ;;  %v410_v25 = vld [vmem:[%s2883_s15 + $0xa8] sm:$0xff]  ;;  %p1927_p8 = scmp.ne.s32.totalorder %s3226_s9, 1 }
  0x8a   : > { %1964 = vmatprep.subr.bf16.mxu1 %v547_v6  ;;  %v2936_v37 = vsub.s32 %v785_v29, %v787_v26  ;;  %v543_v42 = vunpack.c.l.s8.bf16 %v402_v28  ;;  %v782_v46 = vcombine.high %v774_v32, %v774_v32  ;;  %v519_v48 = vunpack.c.l.s8.bf16 %v390_v35  ;;  %v389_v52 = vld [vmem:[%s2883_s15] sm:$0xff]  ;;  %v408_v4 = vld [vmem:[%s2883_s15 + $0x98] sm:$0xff]  ;;  %v418_v26 = vld [vmem:[%s2883_s15 + $0xe8] sm:$0xff] }
  0x8b   : > { %v535_v49 = vunpack.c.l.s8.bf16 %v398_v36  ;;  %v526_v50 = vunpack.c.h.s8.bf16 %v393_v44  ;;  %v542_v51 = vunpack.c.h.s8.bf16 %v401_v45  ;;  %v397_v53 = vld [vmem:[%s2883_s15 + $0x40] sm:$0xff]  ;;  %v518_v56 = vunpack.c.h.s8.bf16 %v389_v52  ;;  %v416_v5 = vld [vmem:[%s2883_s15 + $0xd8] sm:$0xff] }
  0x8c   : > { %1943 = vmatpush3.bf16.msra.mxu0 %v523_v13  ;;  %v789_v38 = vrot.slane %v774_v32, %v2936_v37  ;;  %v2945_v55 = vrot.slane %v782_v46, %v2936_v37  ;;  %v534_v57 = vunpack.c.h.s8.bf16 %v397_v53  ;;  %v525_v58 = vunpack.c.l.s8.bf16 %v393_v44  ;;  %v419_v13 = vld [vmem:[%s2883_s15 + $0xf0] sm:$0xff]  ;;  %v414_v32 = vld [vmem:[%s2883_s15 + $0xc8] sm:$0xff]  ;;  %v413_v46 = vld [vmem:[%s2883_s15 + $0xc0] sm:$0xff] }
  0x8d   : > { %1965 = vmatpush3.bf16.msra.mxu1 %v539_v14  ;;  %1944 = vmatprep.subr.bf16.mxu0 %v530_v15  ;;  %v541_v59 = vunpack.c.l.s8.bf16 %v401_v45  ;;  %v517_v0 = vunpack.c.l.s8.bf16 %v389_v52  ;;  %v533_v1 = vunpack.c.l.s8.bf16 %v397_v53  ;;  %v564_v2 = vunpack.c.h.s8.bf16 %v412_v60  ;;  %v405_v45 = vld [vmem:[%s2883_s15 + $0x80] sm:$0xff]  ;;  %v428_v52 = vld [vmem:[%s2883_s15 + $0x138] sm:$0xff] }
  0x8e   : > { %1966 = vmatprep.subr.bf16.mxu1 %v546_v16  ;;  %v797_v43 = vcombine.high %v789_v38, %v789_v38  ;;  %v798_v62 = vcombine.high %v2945_v55, %v2945_v55  ;;  %v805_v63 = vrot.slane %v789_v38, %v2936_v37  ;;  %v580_v3 = vunpack.c.h.s8.bf16 %v420_v61  ;;  %v409_v38 = vld [vmem:[%s2883_s15 + $0xa0] sm:$0xff]  ;;  %v436_v53 = vld [vmem:[%s2883_s15 + $0x178] sm:$0xff] }
  0x8f   : > { %v556_v8 = vunpack.c.h.s8.bf16 %v408_v4  ;;  %v572_v9 = vunpack.c.h.s8.bf16 %v416_v5  ;;  %v563_v10 = vunpack.c.l.s8.bf16 %v412_v60  ;;  %v579_v11 = vunpack.c.l.s8.bf16 %v420_v61  ;;  %v424_v61 = vld [vmem:[%s2883_s15 + $0x118] sm:$0xff] }
  0x90   : > { %1945 = vmatpush3.bf16.msra.mxu0 %v522_v20  ;;  %v819_v47 = vrot.slane %v797_v43, %v2936_v37  ;;  %v826_v6 = vrot.slane %v798_v62, %v2936_v37  ;;  %v827_v7 = vcombine.high %v805_v63, %v805_v63  ;;  %v555_v15 = vunpack.c.l.s8.bf16 %v408_v4  ;;  %v415_v20 = vld [vmem:[%s2883_s15 + $0xd0] sm:$0xff]  ;;  %v432_v62 = vld [vmem:[%s2883_s15 + $0x158] sm:$0xff] }
  0x91   : > { %1967 = vmatpush3.bf16.msra.mxu1 %v538_v21  ;;  %1946 = vmatprep.subr.bf16.mxu0 %v529_v22  ;;  %v571_v16 = vunpack.c.l.s8.bf16 %v416_v5  ;;  %v562_v17 = vunpack.c.h.s8.bf16 %v411_v12  ;;  %v578_v18 = vunpack.c.h.s8.bf16 %v419_v13  ;;  %v554_v21 = vunpack.c.h.s8.bf16 %v407_v19  ;;  %v427_v4 = vld [vmem:[%s2883_s15 + $0x130] sm:$0xff] }
  0x92   : > { %1968 = vmatprep.subr.bf16.mxu1 %v545_v23  ;;  %v829_v54 = vcombine.high %v819_v47, %v819_v47  ;;  %1042 = vmatprep.mubr.bf16.mxu0 %v819_v47  ;;  %v830_v14 = vcombine.high %v826_v6, %v826_v6  ;;  %v570_v22 = vunpack.c.h.s8.bf16 %v415_v20  ;;  %v561_v23 = vunpack.c.l.s8.bf16 %v411_v12  ;;  %v435_v5 = vld [vmem:[%s2883_s15 + $0x170] sm:$0xff] }
  0x93   : > { %v577_v24 = vunpack.c.l.s8.bf16 %v419_v13  ;;  %v553_v27 = vunpack.c.l.s8.bf16 %v407_v19  ;;  %v569_v28 = vunpack.c.l.s8.bf16 %v415_v20  ;;  %v560_v29 = vunpack.c.h.s8.bf16 %v410_v25  ;;  %v431_v12 = vld [vmem:[%s2883_s15 + $0x150] sm:$0xff] }
  0x94   : > { %1947 = vmatpush3.bf16.msra.mxu0 %v521_v30  ;;  %1082 = vmatprep.mubr.bf16.mxu1 %v829_v54  ;;  %v576_v30 = vunpack.c.h.s8.bf16 %v418_v26  ;;  %v559_v35 = vunpack.c.l.s8.bf16 %v410_v25  ;;  %v575_v36 = vunpack.c.l.s8.bf16 %v418_v26  ;;  %v558_v43 = vunpack.c.h.s8.bf16 %v409_v38 }
  0x95   : > { %1969 = vmatpush3.bf16.msra.mxu1 %v537_v31  ;;  %1948 = vmatprep.subr.bf16.mxu0 %v528_v33  ;;  %v406_v31 = vld [vmem:[%s2883_s15 + $0x88] sm:$0xff]  ;;  %v612_v60 = vunpack.c.h.s8.bf16 %v436_v53  ;;  %v601_v20 = vunpack.c.l.s8.bf16 %v431_v12 }
  0x96   : > { %1970 = vmatprep.subr.bf16.mxu1 %v544_v34  ;;  %v552_v33 = vunpack.c.h.s8.bf16 %v406_v31  ;;  %v568_v34 = vunpack.c.h.s8.bf16 %v414_v32 }
  0x98   : > { %1949 = vmatpush3.bf16.msra.mxu0 %v520_v39  ;;  %v417_v39 = vld [vmem:[%s2883_s15 + $0xe0] sm:$0xff] }
  0x99   : > { %1971 = vmatpush3.bf16.msra.mxu1 %v536_v40  ;;  %1950 = vmatprep.subr.bf16.mxu0 %v527_v41  ;;  %v2966_v40 = vld [vmem:[%s2920_s3 + $0x8] sm:$0xff]  ;;  %v551_v41 = vunpack.c.l.s8.bf16 %v406_v31  ;;  %v574_v44 = vunpack.c.h.s8.bf16 %v417_v39 }
  0x9a   : > { %1972 = vmatprep.subr.bf16.mxu1 %v543_v42  ;;  %v567_v42 = vunpack.c.l.s8.bf16 %v414_v32  ;;  %v2972_v47 = vrot.slane %v2966_v40, %v2936_v37  ;;  %v831_v31 = vcombine.high %v2966_v40, %v2966_v40 }
  0x9c   : > { %1951 = vmatpush3.bf16.msra.mxu0 %v519_v48  ;;  %v550_v48 = vunpack.c.h.s8.bf16 %v405_v45  ;;  %v846_v54 = vcombine.high %v2972_v47, %v2972_v47 }
  0x9d   : > { %1973 = vmatpush3.bf16.msra.mxu1 %v535_v49  ;;  %1952 = vmatprep.subr.bf16.mxu0 %v526_v50  ;;  %v566_v49 = vunpack.c.h.s8.bf16 %v413_v46  ;;  %v557_v50 = vunpack.c.l.s8.bf16 %v409_v38  ;;  %v429_v38 = vld [vmem:[%s2883_s15 + $0x140] sm:$0xff] }
  0x9e   : > { %1974 = vmatprep.subr.bf16.mxu1 %v542_v51  ;;  %v573_v51 = vunpack.c.l.s8.bf16 %v417_v39  ;;  %v2998_v39 = vrot.slane %v831_v31, %v2936_v37 }
  0xa0   : > { %1953 = vmatpush3.bf16.msra.mxu0 %v518_v56  ;;  %v812_v56 = vrot.slane %v2945_v55, %v2936_v37  ;;  %v595_v55 = vunpack.c.l.s8.bf16 %v428_v52 }
  0xa1   : > { %1975 = vmatpush3.bf16.msra.mxu1 %v534_v57  ;;  %1954 = vmatprep.subr.bf16.mxu0 %v525_v58  ;;  %v549_v57 = vunpack.c.l.s8.bf16 %v405_v45  ;;  %v565_v58 = vunpack.c.l.s8.bf16 %v413_v46  ;;  %v452_v45 = vld [vmem:[%s2883_s15 + $0x1f8] sm:$0xff]  ;;  %v847_v46 = vcombine.high %v2998_v39, %v2998_v39 }
  0xa2   : > { %1976 = vmatprep.subr.bf16.mxu1 %v541_v59  ;;  %v596_v59 = vunpack.c.h.s8.bf16 %v428_v52  ;;  %v644_v52 = vunpack.c.h.s8.bf16 %v452_v45 }
  0xa4   : > { %1955 = vmatpush3.bf16.msra.mxu0 %v517_v0  ;;  %v828_v0 = vcombine.high %v812_v56, %v812_v56 }
  0xa5   : > { %1977 = vmatpush3.bf16.msra.mxu1 %v533_v1  ;;  %1984 = vmatprep.subr.bf16.mxu0 %v564_v2  ;;  %v588_v1 = vunpack.c.h.s8.bf16 %v424_v61  ;;  %v604_v2 = vunpack.c.h.s8.bf16 %v432_v62 }
  0xa6   : > { %2006 = vmatprep.subr.bf16.mxu1 %v580_v3  ;;  %v611_v3 = vunpack.c.l.s8.bf16 %v436_v53  ;;  %v440_v53 = vld [vmem:[%s2883_s15 + $0x198] sm:$0xff] }
  0xa7   : > { %1043 = vmatmul.mubr.bf16.vlgmr.msra.gmra.mxu0 %v805_v63  ;;  %v868_v63 = vrot.slane %v846_v54, %v2936_v37  ;;  %v448_v54 = vld [vmem:[%s2883_s15 + $0x1d8] sm:$0xff] }
  0xa8   : > { %1083 = vmatmul.mubr.bf16.vlgmr.msra.gmra.mxu1 %v827_v7  ;;  %1985 = vmatpush3.bf16.msra.mxu0 %v556_v8  ;;  %v587_v7 = vunpack.c.l.s8.bf16 %v424_v61  ;;  %v603_v8 = vunpack.c.l.s8.bf16 %v432_v62  ;;  %v443_v61 = vld [vmem:[%s2883_s15 + $0x1b0] sm:$0xff] }
  0xa9   : > { %2007 = vmatpush3.bf16.msra.mxu1 %v572_v9  ;;  %1986 = vmatprep.subr.bf16.mxu0 %v563_v10  ;;  %v594_v9 = vunpack.c.h.s8.bf16 %v427_v4  ;;  %v610_v10 = vunpack.c.h.s8.bf16 %v435_v5  ;;  %v451_v62 = vld [vmem:[%s2883_s15 + $0x1f0] sm:$0xff] }
  0xaa   : > { %2008 = vmatprep.subr.bf16.mxu1 %v579_v11  ;;  %1122 = vmatprep.mubr.bf16.mxu0 %v826_v6  ;;  %v878_v6 = vcombine.high %v868_v63, %v868_v63  ;;  %v423_v11 = vld [vmem:[%s2883_s15 + $0x110] sm:$0xff] }
  0xab   : > { %1162 = vmatprep.mubr.bf16.mxu1 %v830_v14  ;;  %v586_v13 = vunpack.c.h.s8.bf16 %v423_v11  ;;  %v602_v14 = vunpack.c.h.s8.bf16 %v431_v12  ;;  %v585_v19 = vunpack.c.l.s8.bf16 %v423_v11 }
  0xac   : > { %1987 = vmatpush3.bf16.msra.mxu0 %v555_v15  ;;  %v593_v15 = vunpack.c.l.s8.bf16 %v427_v4  ;;  %v447_v4 = vld [vmem:[%s2883_s15 + $0x1d0] sm:$0xff] }
  0xad   : > { %2009 = vmatpush3.bf16.msra.mxu1 %v571_v16  ;;  %1988 = vmatprep.subr.bf16.mxu0 %v562_v17  ;;  %v609_v16 = vunpack.c.l.s8.bf16 %v435_v5  ;;  %v426_v17 = vld [vmem:[%s2883_s15 + $0x128] sm:$0xff]  ;;  %v633_v12 = vunpack.c.l.s8.bf16 %v447_v4 }
  0xae   : > { %2010 = vmatprep.subr.bf16.mxu1 %v578_v18  ;;  %v434_v18 = vld [vmem:[%s2883_s15 + $0x168] sm:$0xff] }
  0xb0   : > { %1989 = vmatpush3.bf16.msra.mxu0 %v554_v21  ;;  %v592_v21 = vunpack.c.h.s8.bf16 %v426_v17 }
  0xb1   : > { %2011 = vmatpush3.bf16.msra.mxu1 %v570_v22  ;;  %1990 = vmatprep.subr.bf16.mxu0 %v561_v23  ;;  %v608_v22 = vunpack.c.h.s8.bf16 %v434_v18  ;;  %v422_v23 = vld [vmem:[%s2883_s15 + $0x108] sm:$0xff] }
  0xb2   : > { %2012 = vmatprep.subr.bf16.mxu1 %v577_v24  ;;  %v430_v24 = vld [vmem:[%s2883_s15 + $0x148] sm:$0xff]  ;;  %v584_v25 = vunpack.c.h.s8.bf16 %v422_v23  ;;  %v583_v32 = vunpack.c.l.s8.bf16 %v422_v23 }
  0xb3   : > { %v600_v26 = vunpack.c.h.s8.bf16 %v430_v24  ;;  %v3020_v23 = vld [vmem:[%s2920_s3 + $0x10] sm:$0xff] }
  0xb4   : > { %1991 = vmatpush3.bf16.msra.mxu0 %v553_v27  ;;  %v591_v27 = vunpack.c.l.s8.bf16 %v426_v17 }
  0xb5   : > { %2013 = vmatpush3.bf16.msra.mxu1 %v569_v28  ;;  %1992 = vmatprep.subr.bf16.mxu0 %v560_v29  ;;  %v607_v28 = vunpack.c.l.s8.bf16 %v434_v18  ;;  %v425_v29 = vld [vmem:[%s2883_s15 + $0x120] sm:$0xff] }
  0xb6   : > { %2014 = vmatprep.subr.bf16.mxu1 %v576_v30  ;;  %v433_v30 = vld [vmem:[%s2883_s15 + $0x160] sm:$0xff]  ;;  %v589_v40 = vunpack.c.l.s8.bf16 %v425_v29 }
  0xb8   : > { %1993 = vmatpush3.bf16.msra.mxu0 %v552_v33  ;;  %v599_v33 = vunpack.c.l.s8.bf16 %v430_v24 }
  0xb9   : > { %2015 = vmatpush3.bf16.msra.mxu1 %v568_v34  ;;  %1994 = vmatprep.subr.bf16.mxu0 %v559_v35  ;;  %v590_v34 = vunpack.c.h.s8.bf16 %v425_v29  ;;  %v606_v35 = vunpack.c.h.s8.bf16 %v433_v30  ;;  %v445_v29 = vld [vmem:[%s2883_s15 + $0x1c0] sm:$0xff] }
  0xba   : > { %2016 = vmatprep.subr.bf16.mxu1 %v575_v36  ;;  %v421_v36 = vld [vmem:[%s2883_s15 + $0x100] sm:$0xff] }
  0xbc   : > { %1995 = vmatpush3.bf16.msra.mxu0 %v551_v41  ;;  %v582_v41 = vunpack.c.h.s8.bf16 %v421_v36 }
  0xbd   : > { %2017 = vmatpush3.bf16.msra.mxu1 %v567_v42  ;;  %1996 = vmatprep.subr.bf16.mxu0 %v558_v43  ;;  %v598_v42 = vunpack.c.h.s8.bf16 %v429_v38  ;;  %v605_v43 = vunpack.c.l.s8.bf16 %v433_v30  ;;  %v3026_v30 = vrot.slane %v3020_v23, %v2936_v37 }
  0xbe   : > { %2018 = vmatprep.subr.bf16.mxu1 %v574_v44  ;;  %v444_v44 = vld [vmem:[%s2883_s15 + $0x1b8] sm:$0xff] }
  0xc0   : > { %1997 = vmatpush3.bf16.msra.mxu0 %v550_v48  ;;  %v854_v48 = vrot.slane %v2972_v47, %v2936_v37  ;;  %v627_v47 = vunpack.c.l.s8.bf16 %v444_v44 }
  0xc1   : > { %2019 = vmatpush3.bf16.msra.mxu1 %v566_v49  ;;  %1998 = vmatprep.subr.bf16.mxu0 %v557_v50  ;;  %v581_v49 = vunpack.c.l.s8.bf16 %v421_v36  ;;  %v597_v50 = vunpack.c.l.s8.bf16 %v429_v38  ;;  %v468_v36 = vld [vmem:[%s2883_s15 + $0x278] sm:$0xff]  ;;  %v895_v38 = vcombine.high %v3026_v30, %v3026_v30 }
  0xc2   : > { %2020 = vmatprep.subr.bf16.mxu1 %v573_v51  ;;  %v628_v51 = vunpack.c.h.s8.bf16 %v444_v44  ;;  %v676_v44 = vunpack.c.h.s8.bf16 %v468_v36 }
  0xc4   : > { %1999 = vmatpush3.bf16.msra.mxu0 %v549_v57  ;;  %v876_v57 = vcombine.high %v854_v48, %v854_v48 }
  0xc5   : > { %2021 = vmatpush3.bf16.msra.mxu1 %v565_v58  ;;  %2028 = vmatprep.subr.bf16.mxu0 %v596_v59  ;;  %v620_v58 = vunpack.c.h.s8.bf16 %v440_v53  ;;  %v636_v59 = vunpack.c.h.s8.bf16 %v448_v54 }
  0xc6   : > { %2050 = vmatprep.subr.bf16.mxu1 %v612_v60  ;;  %v643_v60 = vunpack.c.l.s8.bf16 %v452_v45  ;;  %v456_v45 = vld [vmem:[%s2883_s15 + $0x218] sm:$0xff] }
  0xc7   : > { %1123 = vmatmul.mubr.bf16.vlgmr.msra.gmra.mxu0 %v812_v56  ;;  %v875_v56 = vrot.slane %v847_v46, %v2936_v37  ;;  %v464_v46 = vld [vmem:[%s2883_s15 + $0x258] sm:$0xff] }
  0xc8   : > { %1163 = vmatmul.mubr.bf16.vlgmr.msra.gmra.mxu1 %v828_v0  ;;  %2029 = vmatpush3.bf16.msra.mxu0 %v588_v1  ;;  %v619_v0 = vunpack.c.l.s8.bf16 %v440_v53  ;;  %v635_v1 = vunpack.c.l.s8.bf16 %v448_v54  ;;  %v459_v53 = vld [vmem:[%s2883_s15 + $0x230] sm:$0xff] }
  0xc9   : > { %2051 = vmatpush3.bf16.msra.mxu1 %v604_v2  ;;  %2030 = vmatprep.subr.bf16.mxu0 %v595_v55  ;;  %v626_v2 = vunpack.c.h.s8.bf16 %v443_v61  ;;  %v642_v55 = vunpack.c.h.s8.bf16 %v451_v62  ;;  %v467_v54 = vld [vmem:[%s2883_s15 + $0x270] sm:$0xff] }
  0xca   : > { %2052 = vmatprep.subr.bf16.mxu1 %v611_v3  ;;  %1202 = vmatprep.mubr.bf16.mxu0 %v868_v63  ;;  %v879_v63 = vcombine.high %v875_v56, %v875_v56  ;;  %v439_v3 = vld [vmem:[%s2883_s15 + $0x190] sm:$0xff] }
  0xcb   : > { %1242 = vmatprep.mubr.bf16.mxu1 %v878_v6  ;;  %v618_v5 = vunpack.c.h.s8.bf16 %v439_v3  ;;  %v634_v6 = vunpack.c.h.s8.bf16 %v447_v4  ;;  %v617_v11 = vunpack.c.l.s8.bf16 %v439_v3 }
  0xcc   : > { %2031 = vmatpush3.bf16.msra.mxu0 %v587_v7  ;;  %v625_v7 = vunpack.c.l.s8.bf16 %v443_v61  ;;  %v463_v61 = vld [vmem:[%s2883_s15 + $0x250] sm:$0xff] }
  0xcd   : > { %2053 = vmatpush3.bf16.msra.mxu1 %v603_v8  ;;  %2032 = vmatprep.subr.bf16.mxu0 %v594_v9  ;;  %v641_v8 = vunpack.c.l.s8.bf16 %v451_v62  ;;  %v442_v9 = vld [vmem:[%s2883_s15 + $0x1a8] sm:$0xff]  ;;  %v665_v4 = vunpack.c.l.s8.bf16 %v463_v61 }
  0xce   : > { %2054 = vmatprep.subr.bf16.mxu1 %v610_v10  ;;  %v450_v10 = vld [vmem:[%s2883_s15 + $0x1e8] sm:$0xff] }
  0xd0   : > { %2033 = vmatpush3.bf16.msra.mxu0 %v586_v13  ;;  %v624_v13 = vunpack.c.h.s8.bf16 %v442_v9 }
  0xd1   : > { %2055 = vmatpush3.bf16.msra.mxu1 %v602_v14  ;;  %2034 = vmatprep.subr.bf16.mxu0 %v593_v15  ;;  %v640_v14 = vunpack.c.h.s8.bf16 %v450_v10  ;;  %v438_v15 = vld [vmem:[%s2883_s15 + $0x188] sm:$0xff] }
  0xd2   : > { %2056 = vmatprep.subr.bf16.mxu1 %v609_v16  ;;  %v446_v16 = vld [vmem:[%s2883_s15 + $0x1c8] sm:$0xff]  ;;  %v616_v17 = vunpack.c.h.s8.bf16 %v438_v15  ;;  %v615_v24 = vunpack.c.l.s8.bf16 %v438_v15  ;;  %v880_v15 = vcombine.high %v3020_v23, %v3020_v23 }
  0xd3   : > { %v632_v18 = vunpack.c.h.s8.bf16 %v446_v16 }
  0xd4   : > { %2035 = vmatpush3.bf16.msra.mxu0 %v585_v19  ;;  %v623_v19 = vunpack.c.l.s8.bf16 %v442_v9 }
  0xd5   : > { %2057 = vmatpush3.bf16.msra.mxu1 %v601_v20  ;;  %2036 = vmatprep.subr.bf16.mxu0 %v592_v21  ;;  %v639_v20 = vunpack.c.l.s8.bf16 %v450_v10  ;;  %v441_v21 = vld [vmem:[%s2883_s15 + $0x1a0] sm:$0xff] }
  0xd6   : > { %2058 = vmatprep.subr.bf16.mxu1 %v608_v22  ;;  %v449_v22 = vld [vmem:[%s2883_s15 + $0x1e0] sm:$0xff] }
  0xd8   : > { %2037 = vmatpush3.bf16.msra.mxu0 %v584_v25  ;;  %v631_v25 = vunpack.c.l.s8.bf16 %v446_v16 }
  0xd9   : > { %2059 = vmatpush3.bf16.msra.mxu1 %v600_v26  ;;  %2038 = vmatprep.subr.bf16.mxu0 %v591_v27  ;;  %v622_v26 = vunpack.c.h.s8.bf16 %v441_v21  ;;  %v638_v27 = vunpack.c.h.s8.bf16 %v449_v22 }
  0xda   : > { %2060 = vmatprep.subr.bf16.mxu1 %v607_v28  ;;  %v437_v28 = vld [vmem:[%s2883_s15 + $0x180] sm:$0xff] }
  0xdb   : > { %v614_v31 = vunpack.c.h.s8.bf16 %v437_v28 }
  0xdc   : > { %2039 = vmatpush3.bf16.msra.mxu0 %v583_v32  ;;  %v630_v32 = vunpack.c.h.s8.bf16 %v445_v29 }
  0xdd   : > { %2061 = vmatpush3.bf16.msra.mxu1 %v599_v33  ;;  %2040 = vmatprep.subr.bf16.mxu0 %v590_v34  ;;  %v621_v33 = vunpack.c.l.s8.bf16 %v441_v21  ;;  %v637_v34 = vunpack.c.l.s8.bf16 %v449_v22  ;;  %v461_v21 = vld [vmem:[%s2883_s15 + $0x240] sm:$0xff]  ;;  %v3052_v22 = vrot.slane %v880_v15, %v2936_v37 }
  0xde   : > { %2062 = vmatprep.subr.bf16.mxu1 %v606_v35  ;;  %v460_v35 = vld [vmem:[%s2883_s15 + $0x238] sm:$0xff] }
  0xe0   : > { %2041 = vmatpush3.bf16.msra.mxu0 %v582_v41  ;;  %v861_v41 = vrot.slane %v2998_v39, %v2936_v37  ;;  %v659_v39 = vunpack.c.l.s8.bf16 %v460_v35 }
  0xe1   : > { %2063 = vmatpush3.bf16.msra.mxu1 %v598_v42  ;;  %2042 = vmatprep.subr.bf16.mxu0 %v589_v40  ;;  %v613_v42 = vunpack.c.l.s8.bf16 %v437_v28  ;;  %v629_v40 = vunpack.c.l.s8.bf16 %v445_v29  ;;  %v484_v28 = vld [vmem:[%s2883_s15 + $0x2f8] sm:$0xff]  ;;  %v896_v29 = vcombine.high %v3052_v22, %v3052_v22 }
  0xe2   : > { %2064 = vmatprep.subr.bf16.mxu1 %v605_v43  ;;  %v660_v43 = vunpack.c.h.s8.bf16 %v460_v35  ;;  %v708_v35 = vunpack.c.h.s8.bf16 %v484_v28 }
  0xe4   : > { %2043 = vmatpush3.bf16.msra.mxu0 %v581_v49  ;;  %v877_v49 = vcombine.high %v861_v41, %v861_v41 }
  0xe5   : > { %2065 = vmatpush3.bf16.msra.mxu1 %v597_v50  ;;  %2072 = vmatprep.subr.bf16.mxu0 %v628_v51  ;;  %v652_v50 = vunpack.c.h.s8.bf16 %v456_v45  ;;  %v668_v51 = vunpack.c.h.s8.bf16 %v464_v46 }
  0xe6   : > { %2094 = vmatprep.subr.bf16.mxu1 %v644_v52  ;;  %v675_v52 = vunpack.c.l.s8.bf16 %v468_v36  ;;  %v472_v36 = vld [vmem:[%s2883_s15 + $0x298] sm:$0xff] }
  0xe7   : > { %1203 = vmatmul.mubr.bf16.vlgmr.msra.gmra.mxu0 %v854_v48  ;;  %v917_v48 = vrot.slane %v895_v38, %v2936_v37  ;;  %v480_v38 = vld [vmem:[%s2883_s15 + $0x2d8] sm:$0xff] }
  0xe8   : > { %1243 = vmatmul.mubr.bf16.vlgmr.msra.gmra.mxu1 %v876_v57  ;;  %2073 = vmatpush3.bf16.msra.mxu0 %v620_v58  ;;  %v651_v57 = vunpack.c.l.s8.bf16 %v456_v45  ;;  %v667_v58 = vunpack.c.l.s8.bf16 %v464_v46  ;;  %v475_v45 = vld [vmem:[%s2883_s15 + $0x2b0] sm:$0xff] }
  0xe9   : > { %2095 = vmatpush3.bf16.msra.mxu1 %v636_v59  ;;  %2074 = vmatprep.subr.bf16.mxu0 %v627_v47  ;;  %v658_v59 = vunpack.c.h.s8.bf16 %v459_v53  ;;  %v674_v47 = vunpack.c.h.s8.bf16 %v467_v54  ;;  %v483_v46 = vld [vmem:[%s2883_s15 + $0x2f0] sm:$0xff] }
  0xea   : > { %2096 = vmatprep.subr.bf16.mxu1 %v643_v60  ;;  %1282 = vmatprep.mubr.bf16.mxu0 %v875_v56  ;;  %v927_v56 = vcombine.high %v917_v48, %v917_v48  ;;  %v455_v60 = vld [vmem:[%s2883_s15 + $0x210] sm:$0xff] }
  0xeb   : > { %1322 = vmatprep.mubr.bf16.mxu1 %v879_v63  ;;  %v650_v62 = vunpack.c.h.s8.bf16 %v455_v60  ;;  %v666_v63 = vunpack.c.h.s8.bf16 %v463_v61  ;;  %v649_v3 = vunpack.c.l.s8.bf16 %v455_v60 }
  0xec   : > { %2075 = vmatpush3.bf16.msra.mxu0 %v619_v0  ;;  %v657_v0 = vunpack.c.l.s8.bf16 %v459_v53  ;;  %v479_v53 = vld [vmem:[%s2883_s15 + $0x2d0] sm:$0xff] }
  0xed   : > { %2097 = vmatpush3.bf16.msra.mxu1 %v635_v1  ;;  %2076 = vmatprep.subr.bf16.mxu0 %v626_v2  ;;  %v673_v1 = vunpack.c.l.s8.bf16 %v467_v54  ;;  %v458_v2 = vld [vmem:[%s2883_s15 + $0x228] sm:$0xff]  ;;  %v697_v61 = vunpack.c.l.s8.bf16 %v479_v53 }
  0xee   : > { %2098 = vmatprep.subr.bf16.mxu1 %v642_v55  ;;  %v466_v55 = vld [vmem:[%s2883_s15 + $0x268] sm:$0xff] }
  0xf0   : > { %2077 = vmatpush3.bf16.msra.mxu0 %v618_v5  ;;  %v656_v5 = vunpack.c.h.s8.bf16 %v458_v2 }
  0xf1   : > { %2099 = vmatpush3.bf16.msra.mxu1 %v634_v6  ;;  %2078 = vmatprep.subr.bf16.mxu0 %v625_v7  ;;  %v672_v6 = vunpack.c.h.s8.bf16 %v466_v55  ;;  %v454_v7 = vld [vmem:[%s2883_s15 + $0x208] sm:$0xff] }
  0xf2   : > { %2100 = vmatprep.subr.bf16.mxu1 %v641_v8  ;;  %v462_v8 = vld [vmem:[%s2883_s15 + $0x248] sm:$0xff]  ;;  %v648_v9 = vunpack.c.h.s8.bf16 %v454_v7  ;;  %v647_v16 = vunpack.c.l.s8.bf16 %v454_v7  ;;  %v3074_v7 = vld [vmem:[%s2920_s3 + $0x18] sm:$0xff] }
  0xf3   : > { %v664_v10 = vunpack.c.h.s8.bf16 %v462_v8 }
  0xf4   : > { %2079 = vmatpush3.bf16.msra.mxu0 %v617_v11  ;;  %v655_v11 = vunpack.c.l.s8.bf16 %v458_v2 }
  0xf5   : > { %2101 = vmatpush3.bf16.msra.mxu1 %v633_v12  ;;  %2080 = vmatprep.subr.bf16.mxu0 %v624_v13  ;;  %v671_v12 = vunpack.c.l.s8.bf16 %v466_v55  ;;  %v457_v13 = vld [vmem:[%s2883_s15 + $0x220] sm:$0xff] }
  0xf6   : > { %2102 = vmatprep.subr.bf16.mxu1 %v640_v14  ;;  %v465_v14 = vld [vmem:[%s2883_s15 + $0x260] sm:$0xff]  ;;  %v653_v23 = vunpack.c.l.s8.bf16 %v457_v13 }
  0xf8   : > { %2081 = vmatpush3.bf16.msra.mxu0 %v616_v17  ;;  %v663_v17 = vunpack.c.l.s8.bf16 %v462_v8 }
  0xf9   : > { %2103 = vmatpush3.bf16.msra.mxu1 %v632_v18  ;;  %2082 = vmatprep.subr.bf16.mxu0 %v623_v19  ;;  %v654_v18 = vunpack.c.h.s8.bf16 %v457_v13  ;;  %v670_v19 = vunpack.c.h.s8.bf16 %v465_v14  ;;  %v477_v13 = vld [vmem:[%s2883_s15 + $0x2c0] sm:$0xff] }
  0xfa   : > { %2104 = vmatprep.subr.bf16.mxu1 %v639_v20  ;;  %v453_v20 = vld [vmem:[%s2883_s15 + $0x200] sm:$0xff] }
  0xfc   : > { %2083 = vmatpush3.bf16.msra.mxu0 %v615_v24  ;;  %v646_v24 = vunpack.c.h.s8.bf16 %v453_v20 }
  0xfd   : > { %2105 = vmatpush3.bf16.msra.mxu1 %v631_v25  ;;  %2084 = vmatprep.subr.bf16.mxu0 %v622_v26  ;;  %v662_v25 = vunpack.c.h.s8.bf16 %v461_v21  ;;  %v669_v26 = vunpack.c.l.s8.bf16 %v465_v14  ;;  %v3080_v14 = vrot.slane %v3074_v7, %v2936_v37 }
  0xfe   : > { %2106 = vmatprep.subr.bf16.mxu1 %v638_v27  ;;  %v476_v27 = vld [vmem:[%s2883_s15 + $0x2b8] sm:$0xff] }
 0x100   : > { %2085 = vmatpush3.bf16.msra.mxu0 %v614_v31  ;;  %v903_v31 = vrot.slane %v3026_v30, %v2936_v37  ;;  %v691_v30 = vunpack.c.l.s8.bf16 %v476_v27 }
 0x101   : > { %2107 = vmatpush3.bf16.msra.mxu1 %v630_v32  ;;  %2086 = vmatprep.subr.bf16.mxu0 %v621_v33  ;;  %v645_v32 = vunpack.c.l.s8.bf16 %v453_v20  ;;  %v661_v33 = vunpack.c.l.s8.bf16 %v461_v21  ;;  %v500_v20 = vld [vmem:[%s2883_s15 + $0x378] sm:$0xff]  ;;  %v944_v21 = vcombine.high %v3080_v14, %v3080_v14 }
 0x102   : > { %2108 = vmatprep.subr.bf16.mxu1 %v637_v34  ;;  %v692_v34 = vunpack.c.h.s8.bf16 %v476_v27  ;;  %v740_v27 = vunpack.c.h.s8.bf16 %v500_v20 }
 0x104   : > { %2087 = vmatpush3.bf16.msra.mxu0 %v613_v42  ;;  %v925_v42 = vcombine.high %v903_v31, %v903_v31 }
 0x105   : > { %2109 = vmatpush3.bf16.msra.mxu1 %v629_v40  ;;  %2116 = vmatprep.subr.bf16.mxu0 %v660_v43  ;;  %v684_v40 = vunpack.c.h.s8.bf16 %v472_v36  ;;  %v700_v43 = vunpack.c.h.s8.bf16 %v480_v38 }
 0x106   : > { %2138 = vmatprep.subr.bf16.mxu1 %v676_v44  ;;  %v707_v44 = vunpack.c.l.s8.bf16 %v484_v28  ;;  %v488_v28 = vld [vmem:[%s2883_s15 + $0x318] sm:$0xff] }
 0x107   : > { %1283 = vmatmul.mubr.bf16.vlgmr.msra.gmra.mxu0 %v861_v41  ;;  %v924_v41 = vrot.slane %v896_v29, %v2936_v37  ;;  %v496_v29 = vld [vmem:[%s2883_s15 + $0x358] sm:$0xff] }
 0x108   : > { %1323 = vmatmul.mubr.bf16.vlgmr.msra.gmra.mxu1 %v877_v49  ;;  %2117 = vmatpush3.bf16.msra.mxu0 %v652_v50  ;;  %v683_v49 = vunpack.c.l.s8.bf16 %v472_v36  ;;  %v699_v50 = vunpack.c.l.s8.bf16 %v480_v38  ;;  %v491_v36 = vld [vmem:[%s2883_s15 + $0x330] sm:$0xff] }
 0x109   : > { %2139 = vmatpush3.bf16.msra.mxu1 %v668_v51  ;;  %2118 = vmatprep.subr.bf16.mxu0 %v659_v39  ;;  %v690_v51 = vunpack.c.h.s8.bf16 %v475_v45  ;;  %v706_v39 = vunpack.c.h.s8.bf16 %v483_v46  ;;  %v499_v38 = vld [vmem:[%s2883_s15 + $0x370] sm:$0xff] }
 0x10a   : > { %2140 = vmatprep.subr.bf16.mxu1 %v675_v52  ;;  %1362 = vmatprep.mubr.bf16.mxu0 %v917_v48  ;;  %v928_v48 = vcombine.high %v924_v41, %v924_v41  ;;  %v471_v52 = vld [vmem:[%s2883_s15 + $0x290] sm:$0xff] }
 0x10b   : > { %1402 = vmatprep.mubr.bf16.mxu1 %v927_v56  ;;  %v682_v54 = vunpack.c.h.s8.bf16 %v471_v52  ;;  %v698_v56 = vunpack.c.h.s8.bf16 %v479_v53  ;;  %v681_v60 = vunpack.c.l.s8.bf16 %v471_v52 }
 0x10c   : > { %2119 = vmatpush3.bf16.msra.mxu0 %v651_v57  ;;  %v689_v57 = vunpack.c.l.s8.bf16 %v475_v45  ;;  %v495_v45 = vld [vmem:[%s2883_s15 + $0x350] sm:$0xff] }
 0x10d   : > { %2141 = vmatpush3.bf16.msra.mxu1 %v667_v58  ;;  %2120 = vmatprep.subr.bf16.mxu0 %v658_v59  ;;  %v705_v58 = vunpack.c.l.s8.bf16 %v483_v46  ;;  %v474_v59 = vld [vmem:[%s2883_s15 + $0x2a8] sm:$0xff]  ;;  %v729_v53 = vunpack.c.l.s8.bf16 %v495_v45 }
 0x10e   : > { %2142 = vmatprep.subr.bf16.mxu1 %v674_v47  ;;  %v482_v47 = vld [vmem:[%s2883_s15 + $0x2e8] sm:$0xff] }
 0x110   : > { %2121 = vmatpush3.bf16.msra.mxu0 %v650_v62  ;;  %v688_v62 = vunpack.c.h.s8.bf16 %v474_v59 }
 0x111   : > { %2143 = vmatpush3.bf16.msra.mxu1 %v666_v63  ;;  %2122 = vmatprep.subr.bf16.mxu0 %v657_v0  ;;  %v704_v63 = vunpack.c.h.s8.bf16 %v482_v47  ;;  %v470_v0 = vld [vmem:[%s2883_s15 + $0x288] sm:$0xff] }
 0x112   : > { %2144 = vmatprep.subr.bf16.mxu1 %v673_v1  ;;  %v478_v1 = vld [vmem:[%s2883_s15 + $0x2c8] sm:$0xff]  ;;  %v680_v2 = vunpack.c.h.s8.bf16 %v470_v0  ;;  %v679_v8 = vunpack.c.l.s8.bf16 %v470_v0  ;;  %v929_v0 = vcombine.high %v3074_v7, %v3074_v7 }
 0x113   : > { %v696_v55 = vunpack.c.h.s8.bf16 %v478_v1 }
 0x114   : > { %2123 = vmatpush3.bf16.msra.mxu0 %v649_v3  ;;  %v687_v3 = vunpack.c.l.s8.bf16 %v474_v59 }
 0x115   : > { %2145 = vmatpush3.bf16.msra.mxu1 %v665_v4  ;;  %2124 = vmatprep.subr.bf16.mxu0 %v656_v5  ;;  %v703_v4 = vunpack.c.l.s8.bf16 %v482_v47  ;;  %v473_v5 = vld [vmem:[%s2883_s15 + $0x2a0] sm:$0xff] }
 0x116   : > { %2146 = vmatprep.subr.bf16.mxu1 %v672_v6  ;;  %v481_v6 = vld [vmem:[%s2883_s15 + $0x2e0] sm:$0xff] }
 0x118   : > { %2125 = vmatpush3.bf16.msra.mxu0 %v648_v9  ;;  %v695_v9 = vunpack.c.l.s8.bf16 %v478_v1 }
 0x119   : > { %2147 = vmatpush3.bf16.msra.mxu1 %v664_v10  ;;  %2126 = vmatprep.subr.bf16.mxu0 %v655_v11  ;;  %v686_v10 = vunpack.c.h.s8.bf16 %v473_v5  ;;  %v702_v11 = vunpack.c.h.s8.bf16 %v481_v6 }
 0x11a   : > { %2148 = vmatprep.subr.bf16.mxu1 %v671_v12  ;;  %v469_v12 = vld [vmem:[%s2883_s15 + $0x280] sm:$0xff] }
 0x11b   : > { %v678_v15 = vunpack.c.h.s8.bf16 %v469_v12 }
 0x11c   : > { %2127 = vmatpush3.bf16.msra.mxu0 %v647_v16  ;;  %v694_v16 = vunpack.c.h.s8.bf16 %v477_v13 }
 0x11d   : > { %2149 = vmatpush3.bf16.msra.mxu1 %v663_v17  ;;  %2128 = vmatprep.subr.bf16.mxu0 %v654_v18  ;;  %v685_v17 = vunpack.c.l.s8.bf16 %v473_v5  ;;  %v701_v18 = vunpack.c.l.s8.bf16 %v481_v6  ;;  %v493_v5 = vld [vmem:[%s2883_s15 + $0x340] sm:$0xff]  ;;  %v3106_v6 = vrot.slane %v929_v0, %v2936_v37 }
 0x11e   : > { %2150 = vmatprep.subr.bf16.mxu1 %v670_v19  ;;  %v492_v19 = vld [vmem:[%s2883_s15 + $0x338] sm:$0xff] }
 0x120   : > { %2129 = vmatpush3.bf16.msra.mxu0 %v646_v24  ;;  %v910_v24 = vrot.slane %v3052_v22, %v2936_v37  ;;  %v723_v22 = vunpack.c.l.s8.bf16 %v492_v19 }
 0x121   : > { %2151 = vmatpush3.bf16.msra.mxu1 %v662_v25  ;;  %2130 = vmatprep.subr.bf16.mxu0 %v653_v23  ;;  %v677_v25 = vunpack.c.l.s8.bf16 %v469_v12  ;;  %v693_v23 = vunpack.c.l.s8.bf16 %v477_v13  ;;  %v516_v12 = vld [vmem:[%s2883_s15 + $0x3f8] sm:$0xff]  ;;  %v945_v13 = vcombine.high %v3106_v6, %v3106_v6 }
 0x122   : > { %2152 = vmatprep.subr.bf16.mxu1 %v669_v26  ;;  %v724_v26 = vunpack.c.h.s8.bf16 %v492_v19  ;;  %v772_v19 = vunpack.c.h.s8.bf16 %v516_v12 }
 0x124   : > { %2131 = vmatpush3.bf16.msra.mxu0 %v645_v32  ;;  %v926_v32 = vcombine.high %v910_v24, %v910_v24 }
 0x125   : > { %2153 = vmatpush3.bf16.msra.mxu1 %v661_v33  ;;  %2160 = vmatprep.subr.bf16.mxu0 %v692_v34  ;;  %v716_v33 = vunpack.c.h.s8.bf16 %v488_v28  ;;  %v732_v34 = vunpack.c.h.s8.bf16 %v496_v29 }
 0x126   : > { %2182 = vmatprep.subr.bf16.mxu1 %v708_v35  ;;  %v739_v35 = vunpack.c.l.s8.bf16 %v500_v20  ;;  %v504_v20 = vld [vmem:[%s2883_s15 + $0x398] sm:$0xff] }
 0x127   : > { %1363 = vmatmul.mubr.bf16.vlgmr.msra.gmra.mxu0 %v903_v31  ;;  %v966_v31 = vrot.slane %v944_v21, %v2936_v37  ;;  %v512_v21 = vld [vmem:[%s2883_s15 + $0x3d8] sm:$0xff] }
 0x128   : > { %1403 = vmatmul.mubr.bf16.vlgmr.msra.gmra.mxu1 %v925_v42  ;;  %2161 = vmatpush3.bf16.msra.mxu0 %v684_v40  ;;  %v715_v42 = vunpack.c.l.s8.bf16 %v488_v28  ;;  %v731_v40 = vunpack.c.l.s8.bf16 %v496_v29  ;;  %v507_v28 = vld [vmem:[%s2883_s15 + $0x3b0] sm:$0xff] }
 0x129   : > { %2183 = vmatpush3.bf16.msra.mxu1 %v700_v43  ;;  %2162 = vmatprep.subr.bf16.mxu0 %v691_v30  ;;  %v722_v43 = vunpack.c.h.s8.bf16 %v491_v36  ;;  %v738_v30 = vunpack.c.h.s8.bf16 %v499_v38  ;;  %v515_v29 = vld [vmem:[%s2883_s15 + $0x3f0] sm:$0xff] }
 0x12a   : > { %2184 = vmatprep.subr.bf16.mxu1 %v707_v44  ;;  %1442 = vmatprep.mubr.bf16.mxu0 %v924_v41  ;;  %v976_v41 = vcombine.high %v966_v31, %v966_v31  ;;  %v487_v44 = vld [vmem:[%s2883_s15 + $0x310] sm:$0xff] }
 0x12b   : > { %1482 = vmatprep.mubr.bf16.mxu1 %v928_v48  ;;  %v714_v46 = vunpack.c.h.s8.bf16 %v487_v44  ;;  %v730_v48 = vunpack.c.h.s8.bf16 %v495_v45  ;;  %v713_v52 = vunpack.c.l.s8.bf16 %v487_v44 }
 0x12c   : > { %2163 = vmatpush3.bf16.msra.mxu0 %v683_v49  ;;  %v721_v49 = vunpack.c.l.s8.bf16 %v491_v36 }
 0x12d   : > { %2185 = vmatpush3.bf16.msra.mxu1 %v699_v50  ;;  %2164 = vmatprep.subr.bf16.mxu0 %v690_v51  ;;  %v737_v50 = vunpack.c.l.s8.bf16 %v499_v38  ;;  %v490_v51 = vld [vmem:[%s2883_s15 + $0x328] sm:$0xff]  ;;  %v754_v38 = vunpack.c.h.s8.bf16 %v507_v28 }
 0x12e   : > { %2186 = vmatprep.subr.bf16.mxu1 %v706_v39  ;;  %v498_v39 = vld [vmem:[%s2883_s15 + $0x368] sm:$0xff] }
 0x130   : > { %2165 = vmatpush3.bf16.msra.mxu0 %v682_v54  ;;  %v720_v54 = vunpack.c.h.s8.bf16 %v490_v51 }
 0x131   : > { %2187 = vmatpush3.bf16.msra.mxu1 %v698_v56  ;;  %2166 = vmatprep.subr.bf16.mxu0 %v689_v57  ;;  %v736_v56 = vunpack.c.h.s8.bf16 %v498_v39  ;;  %v486_v57 = vld [vmem:[%s2883_s15 + $0x308] sm:$0xff] }
 0x132   : > { %2188 = vmatprep.subr.bf16.mxu1 %v705_v58  ;;  %v494_v58 = vld [vmem:[%s2883_s15 + $0x348] sm:$0xff]  ;;  %v712_v59 = vunpack.c.h.s8.bf16 %v486_v57  ;;  %v711_v1 = vunpack.c.l.s8.bf16 %v486_v57 }
 0x133   : > { %v728_v47 = vunpack.c.h.s8.bf16 %v494_v58 }
 0x134   : > { %2167 = vmatpush3.bf16.msra.mxu0 %v681_v60  ;;  %v719_v60 = vunpack.c.l.s8.bf16 %v490_v51 }
 0x135   : > { %2189 = vmatpush3.bf16.msra.mxu1 %v697_v61  ;;  %2168 = vmatprep.subr.bf16.mxu0 %v688_v62  ;;  %v735_v61 = vunpack.c.l.s8.bf16 %v498_v39  ;;  %v489_v62 = vld [vmem:[%s2883_s15 + $0x320] sm:$0xff]  ;;  %v753_v39 = vunpack.c.l.s8.bf16 %v507_v28 }
 0x136   : > { %2190 = vmatprep.subr.bf16.mxu1 %v704_v63  ;;  %v497_v63 = vld [vmem:[%s2883_s15 + $0x360] sm:$0xff]  ;;  %v717_v7 = vunpack.c.l.s8.bf16 %v489_v62 }
 0x138   : > { %2169 = vmatpush3.bf16.msra.mxu0 %v680_v2  ;;  %v727_v2 = vunpack.c.l.s8.bf16 %v494_v58 }
 0x139   : > { %2191 = vmatpush3.bf16.msra.mxu1 %v696_v55  ;;  %2170 = vmatprep.subr.bf16.mxu0 %v687_v3  ;;  %v718_v55 = vunpack.c.h.s8.bf16 %v489_v62  ;;  %v734_v3 = vunpack.c.h.s8.bf16 %v497_v63 }
 0x13a   : > { %2192 = vmatprep.subr.bf16.mxu1 %v703_v4  ;;  %v485_v4 = vld [vmem:[%s2883_s15 + $0x300] sm:$0xff] }
 0x13c   : > { %2171 = vmatpush3.bf16.msra.mxu0 %v679_v8  ;;  %v710_v8 = vunpack.c.h.s8.bf16 %v485_v4 }
 0x13d   : > { %2193 = vmatpush3.bf16.msra.mxu1 %v695_v9  ;;  %2172 = vmatprep.subr.bf16.mxu0 %v686_v10  ;;  %v726_v9 = vunpack.c.h.s8.bf16 %v493_v5  ;;  %v733_v10 = vunpack.c.l.s8.bf16 %v497_v63 }
 0x13e   : > { %2194 = vmatprep.subr.bf16.mxu1 %v702_v11  ;;  %v508_v11 = vld [vmem:[%s2883_s15 + $0x3b8] sm:$0xff] }
 0x140   : > { %2173 = vmatpush3.bf16.msra.mxu0 %v678_v15  ;;  %v952_v15 = vrot.slane %v3080_v14, %v2936_v37  ;;  %v755_v14 = vunpack.c.l.s8.bf16 %v508_v11 }
 0x141   : > { %2195 = vmatpush3.bf16.msra.mxu1 %v694_v16  ;;  %2174 = vmatprep.subr.bf16.mxu0 %v685_v17  ;;  %v709_v16 = vunpack.c.l.s8.bf16 %v485_v4  ;;  %v725_v17 = vunpack.c.l.s8.bf16 %v493_v5 }
 0x142   : > { %2196 = vmatprep.subr.bf16.mxu1 %v701_v18  ;;  %v756_v18 = vunpack.c.h.s8.bf16 %v508_v11 }
 0x144   : > { %2175 = vmatpush3.bf16.msra.mxu0 %v677_v25  ;;  %v974_v25 = vcombine.high %v952_v15, %v952_v15 }
 0x145   : > { %2197 = vmatpush3.bf16.msra.mxu1 %v693_v23  ;;  %2204 = vmatprep.subr.bf16.mxu0 %v724_v26  ;;  %v748_v23 = vunpack.c.h.s8.bf16 %v504_v20  ;;  %v764_v26 = vunpack.c.h.s8.bf16 %v512_v21 }
 0x146   : > { %2226 = vmatprep.subr.bf16.mxu1 %v740_v27  ;;  %v771_v27 = vunpack.c.l.s8.bf16 %v516_v12 }
 0x147   : > { %1443 = vmatmul.mubr.bf16.vlgmr.msra.gmra.mxu0 %v910_v24  ;;  %v973_v24 = vrot.slane %v945_v13, %v2936_v37  ;;  %v959_v13 = vrot.slane %v3106_v6, %v2936_v37 }
 0x148   : > { %1483 = vmatmul.mubr.bf16.vlgmr.msra.gmra.mxu1 %v926_v32  ;;  %2205 = vmatpush3.bf16.msra.mxu0 %v716_v33 }
 0x149   : > { %2227 = vmatpush3.bf16.msra.mxu1 %v732_v34  ;;  %2206 = vmatprep.subr.bf16.mxu0 %v723_v22  ;;  %v747_v34 = vunpack.c.l.s8.bf16 %v504_v20  ;;  %v763_v22 = vunpack.c.l.s8.bf16 %v512_v21 }
 0x14a   : > { %2228 = vmatprep.subr.bf16.mxu1 %v739_v35  ;;  %1522 = vmatprep.mubr.bf16.mxu0 %v966_v31  ;;  %v977_v31 = vcombine.high %v973_v24, %v973_v24 }
 0x14b   : > { %1562 = vmatprep.mubr.bf16.mxu1 %v976_v41  ;;  %v770_v41 = vunpack.c.h.s8.bf16 %v515_v29 }
 0x14c   : > { %2207 = vmatpush3.bf16.msra.mxu0 %v715_v42  ;;  %v503_v42 = vld [vmem:[%s2883_s15 + $0x390] sm:$0xff] }
 0x14d   : > { %2229 = vmatpush3.bf16.msra.mxu1 %v731_v40  ;;  %2208 = vmatprep.subr.bf16.mxu0 %v722_v43  ;;  %v511_v40 = vld [vmem:[%s2883_s15 + $0x3d0] sm:$0xff] }
 0x14e   : > { %2230 = vmatprep.subr.bf16.mxu1 %v738_v30  ;;  %v761_v57 = vunpack.c.l.s8.bf16 %v511_v40 }
 0x150   : > { %2209 = vmatpush3.bf16.msra.mxu0 %v714_v46 }
 0x151   : > { %2231 = vmatpush3.bf16.msra.mxu1 %v730_v48  ;;  %2210 = vmatprep.subr.bf16.mxu0 %v721_v49  ;;  %v746_v48 = vunpack.c.h.s8.bf16 %v503_v42  ;;  %v762_v49 = vunpack.c.h.s8.bf16 %v511_v40 }
 0x152   : > { %2232 = vmatprep.subr.bf16.mxu1 %v737_v50 }
 0x154   : > { %2211 = vmatpush3.bf16.msra.mxu0 %v713_v52  ;;  %v769_v52 = vunpack.c.l.s8.bf16 %v515_v29 }
 0x155   : > { %2233 = vmatpush3.bf16.msra.mxu1 %v729_v53  ;;  %2212 = vmatprep.subr.bf16.mxu0 %v720_v54  ;;  %v506_v53 = vld [vmem:[%s2883_s15 + $0x3a8] sm:$0xff] }
 0x156   : > { %2234 = vmatprep.subr.bf16.mxu1 %v736_v56  ;;  %v514_v54 = vld [vmem:[%s2883_s15 + $0x3e8] sm:$0xff]  ;;  %v745_v56 = vunpack.c.l.s8.bf16 %v503_v42  ;;  %v752_v58 = vunpack.c.h.s8.bf16 %v506_v53  ;;  %v751_v63 = vunpack.c.l.s8.bf16 %v506_v53 }
 0x157   : > { %v767_v0 = vunpack.c.l.s8.bf16 %v514_v54 }
 0x158   : > { %2213 = vmatpush3.bf16.msra.mxu0 %v712_v59  ;;  %v768_v59 = vunpack.c.h.s8.bf16 %v514_v54 }
 0x159   : > { %2235 = vmatpush3.bf16.msra.mxu1 %v728_v47  ;;  %2214 = vmatprep.subr.bf16.mxu0 %v719_v60  ;;  %v502_v47 = vld [vmem:[%s2883_s15 + $0x388] sm:$0xff] }
 0x15a   : > { %2236 = vmatprep.subr.bf16.mxu1 %v735_v61  ;;  %v510_v60 = vld [vmem:[%s2883_s15 + $0x3c8] sm:$0xff]  ;;  %v744_v61 = vunpack.c.h.s8.bf16 %v502_v47 }
 0x15b   : > { %v760_v62 = vunpack.c.h.s8.bf16 %v510_v60 }
 0x15c   : > { %2215 = vmatpush3.bf16.msra.mxu0 %v711_v1  ;;  %v505_v1 = vld [vmem:[%s2883_s15 + $0x3a0] sm:$0xff] }
 0x15d   : > { %2237 = vmatpush3.bf16.msra.mxu1 %v727_v2  ;;  %2216 = vmatprep.subr.bf16.mxu0 %v718_v55  ;;  %v513_v2 = vld [vmem:[%s2883_s15 + $0x3e0] sm:$0xff]  ;;  %v743_v55 = vunpack.c.l.s8.bf16 %v502_v47  ;;  %v750_v4 = vunpack.c.h.s8.bf16 %v505_v1  ;;  %v749_v11 = vunpack.c.l.s8.bf16 %v505_v1 }
 0x15e   : > { %2238 = vmatprep.subr.bf16.mxu1 %v734_v3  ;;  %v759_v3 = vunpack.c.l.s8.bf16 %v510_v60  ;;  %v766_v5 = vunpack.c.h.s8.bf16 %v513_v2  ;;  %v765_v12 = vunpack.c.l.s8.bf16 %v513_v2 }
 0x160   : > { %2217 = vmatpush3.bf16.msra.mxu0 %v710_v8  ;;  %v501_v8 = vld [vmem:[%s2883_s15 + $0x380] sm:$0xff] }
 0x161   : > { %2239 = vmatpush3.bf16.msra.mxu1 %v726_v9  ;;  %2218 = vmatprep.subr.bf16.mxu0 %v717_v7  ;;  %v509_v9 = vld [vmem:[%s2883_s15 + $0x3c0] sm:$0xff]  ;;  %v742_v7 = vunpack.c.h.s8.bf16 %v501_v8 }
 0x162   : > { %2240 = vmatprep.subr.bf16.mxu1 %v733_v10  ;;  %v758_v10 = vunpack.c.h.s8.bf16 %v509_v9 }
 0x164   : > { %2219 = vmatpush3.bf16.msra.mxu0 %v709_v16  ;;  %v757_v16 = vunpack.c.l.s8.bf16 %v509_v9 }
 0x165   : > { %2241 = vmatpush3.bf16.msra.mxu1 %v725_v17  ;;  %2248 = vmatprep.subr.bf16.mxu0 %v756_v18  ;;  %v975_v17 = vcombine.high %v959_v13, %v959_v13 }
 0x166   : > { %2270 = vmatprep.subr.bf16.mxu1 %v772_v19 }
 0x167   : > { %v1956_v32 = vpop.f32.mrf.mxu0  ;;  %1523 = vmatmul.mubr.bf16.vlgmr.msra.gmra.mxu0 %v952_v15  ;;  %v741_v15 = vunpack.c.l.s8.bf16 %v501_v8 }
 0x168   : > { %v1978_v33 = vpop.f32.mrf.mxu1  ;;  %1563 = vmatmul.mubr.bf16.vlgmr.msra.gmra.mxu1 %v974_v25  ;;  %2249 = vmatpush3.bf16.msra.mxu0 %v748_v23 }
 0x169   : > { %2271 = vmatpush3.bf16.msra.mxu1 %v764_v26  ;;  %v1957_v35 = vpop.f32.mrf.mxu0  ;;  %2250 = vmatprep.subr.bf16.mxu0 %v755_v14 }
 0x16a   : > { %v1979_v36 = vpop.f32.mrf.mxu1  ;;  %2272 = vmatprep.subr.bf16.mxu1 %v771_v27  ;;  %v1958_v43 = vadd.f32 %v1957_v35, %v1956_v32  ;;  %1602 = vmatprep.mubr.bf16.mxu0 %v973_v24 }
 0x16b   : > { %v1980_v30 = vadd.f32 %v1979_v36, %v1978_v33  ;;  %1642 = vmatprep.mubr.bf16.mxu1 %v977_v31  ;;  %v1959_v44 = vpop.f32.mrf.mxu0 }
 0x16c   : > { %v1981_v45 = vpop.f32.mrf.mxu1  ;;  %2251 = vmatpush3.bf16.msra.mxu0 %v747_v34 }
 0x16d   : > { %v3121_v46 = vadd.f32 %v1980_v30, %v1958_v43  ;;  %2273 = vmatpush3.bf16.msra.mxu1 %v763_v22  ;;  %v1960_v50 = vpop.f32.mrf.mxu0  ;;  %2252 = vmatprep.subr.bf16.mxu0 %v754_v38 }
 0x16e   : > { %v1982_v51 = vpop.f32.mrf.mxu1  ;;  %2274 = vmatprep.subr.bf16.mxu1 %v770_v41 }
 0x170   : > { %2253 = vmatpush3.bf16.msra.mxu0 %v746_v48 }
 0x171   : > { %2275 = vmatpush3.bf16.msra.mxu1 %v762_v49  ;;  %2254 = vmatprep.subr.bf16.mxu0 %v753_v39 }
 0x172   : > { %2276 = vmatprep.subr.bf16.mxu1 %v769_v52 }
 0x174   : > { %2255 = vmatpush3.bf16.msra.mxu0 %v745_v56 }
 0x175   : > { %2277 = vmatpush3.bf16.msra.mxu1 %v761_v57  ;;  %2256 = vmatprep.subr.bf16.mxu0 %v752_v58 }
 0x176   : > { %2278 = vmatprep.subr.bf16.mxu1 %v768_v59 }
 0x178   : > { %2257 = vmatpush3.bf16.msra.mxu0 %v744_v61 }
 0x179   : > { %2279 = vmatpush3.bf16.msra.mxu1 %v760_v62  ;;  %2258 = vmatprep.subr.bf16.mxu0 %v751_v63 }
 0x17a   : > { %2280 = vmatprep.subr.bf16.mxu1 %v767_v0 }
 0x17c   : > { %2259 = vmatpush3.bf16.msra.mxu0 %v743_v55 }
 0x17d   : > { %2281 = vmatpush3.bf16.msra.mxu1 %v759_v3  ;;  %2260 = vmatprep.subr.bf16.mxu0 %v750_v4 }
 0x17e   : > { %2282 = vmatprep.subr.bf16.mxu1 %v766_v5 }
 0x180   : > { %2261 = vmatpush3.bf16.msra.mxu0 %v742_v7 }
 0x181   : > { %2283 = vmatpush3.bf16.msra.mxu1 %v758_v10  ;;  %2262 = vmatprep.subr.bf16.mxu0 %v749_v11 }
 0x182   : > { %2284 = vmatprep.subr.bf16.mxu1 %v765_v12 }
 0x184   : > { %2263 = vmatpush3.bf16.msra.mxu0 %v741_v15 }
 0x185   : > { %2285 = vmatpush3.bf16.msra.mxu1 %v757_v16 }
 0x187   : > { %v2000_v18 = vpop.f32.mrf.mxu0  ;;  %1603 = vmatmul.mubr.bf16.vlgmr.msra.gmra.mxu0 %v959_v13 }
 0x188   : > { %v2022_v19 = vpop.f32.mrf.mxu1  ;;  %1643 = vmatmul.mubr.bf16.vlgmr.msra.gmra.mxu1 %v975_v17 }
 0x189   : > { %v2001_v20 = vpop.f32.mrf.mxu0 }
 0x18a   : > { %v2023_v21 = vpop.f32.mrf.mxu1  ;;  %v2002_v24 = vadd.f32 %v2001_v20, %v2000_v18 }
 0x18b   : > { %v2024_v25 = vadd.f32 %v2023_v21, %v2022_v19  ;;  %v2003_v23 = vpop.f32.mrf.mxu0 }
 0x18c   : > { %v2025_v26 = vpop.f32.mrf.mxu1  ;;  %v1125_v37 = vadd.f32 %v2002_v24, %v3121_v46 }
 0x18d   : > { %v2004_v6 = vpop.f32.mrf.mxu0 }
 0x18e   : > { %v2026_v14 = vpop.f32.mrf.mxu1  ;;  %v1165_v27 = vadd.f32 %v2024_v25, %v1125_v37 }
 0x1a7   : > { %v2044_v28 = vpop.f32.mrf.mxu0 }
 0x1a8   : > { %v2066_v29 = vpop.f32.mrf.mxu1 }
 0x1a9   : > { %v2045_v31 = vpop.f32.mrf.mxu0 }
 0x1aa   : > { %v2067_v32 = vpop.f32.mrf.mxu1  ;;  %v2046_v33 = vadd.f32 %v2045_v31, %v2044_v28 }
 0x1ab   : > { %v2068_v34 = vadd.f32 %v2067_v32, %v2066_v29  ;;  %v2047_v22 = vpop.f32.mrf.mxu0 }
 0x1ac   : > { %v2069_v35 = vpop.f32.mrf.mxu1  ;;  %v1205_v36 = vadd.f32 %v2046_v33, %v1165_v27 }
 0x1ad   : > { %v2048_v38 = vpop.f32.mrf.mxu0 }
 0x1ae   : > { %v2070_v41 = vpop.f32.mrf.mxu1  ;;  %v1245_v42 = vadd.f32 %v2068_v34, %v1205_v36  ;;  %v773_v34 = vld [vmem:[#allocation2] sm:$0x1] }
 0x1c7   : > { %v2088_v40 = vpop.f32.mrf.mxu0 }
 0x1c8   : > { %v2110_v43 = vpop.f32.mrf.mxu1 }
 0x1c9   : > { %v2089_v30 = vpop.f32.mrf.mxu0 }
 0x1ca   : > { %v2111_v44 = vpop.f32.mrf.mxu1  ;;  %v2090_v45 = vadd.f32 %v2089_v30, %v2088_v40 }
 0x1cb   : > { %v2112_v46 = vadd.f32 %v2111_v44, %v2110_v43  ;;  %v2091_v48 = vpop.f32.mrf.mxu0 }
 0x1cc   : > { %v2113_v49 = vpop.f32.mrf.mxu1  ;;  %v1285_v50 = vadd.f32 %v2090_v45, %v1245_v42 }
 0x1cd   : > { %v2092_v51 = vpop.f32.mrf.mxu0 }
 0x1ce   : > { %v2114_v39 = vpop.f32.mrf.mxu1  ;;  %v1325_v52 = vadd.f32 %v2112_v46, %v1285_v50 }
 0x1e7   : > { %v2132_v53 = vpop.f32.mrf.mxu0 }
 0x1e8   : > { %v2154_v54 = vpop.f32.mrf.mxu1 }
 0x1e9   : > { %v2133_v56 = vpop.f32.mrf.mxu0 }
 0x1ea   : > { %v2155_v57 = vpop.f32.mrf.mxu1  ;;  %v2134_v58 = vadd.f32 %v2133_v56, %v2132_v53 }
 0x1eb   : > { %v2156_v59 = vadd.f32 %v2155_v57, %v2154_v54  ;;  %v2135_v47 = vpop.f32.mrf.mxu0 }
 0x1ec   : > { %v2157_v60 = vpop.f32.mrf.mxu1  ;;  %v1365_v61 = vadd.f32 %v2134_v58, %v1325_v52 }
 0x1ed   : > { %v2136_v62 = vpop.f32.mrf.mxu0 }
 0x1ee   : > { %v2158_v63 = vpop.f32.mrf.mxu1  ;;  %v1405_v0 = vadd.f32 %v2156_v59, %v1365_v61 }
 0x207   : > { %v2176_v1 = vpop.f32.mrf.mxu0 }
 0x208   : > { %v2198_v2 = vpop.f32.mrf.mxu1 }
 0x209   : > { %v2177_v55 = vpop.f32.mrf.mxu0 }
 0x20a   : > { %v2199_v3 = vpop.f32.mrf.mxu1  ;;  %v2178_v18 = vadd.f32 %v2177_v55, %v2176_v1 }
 0x20b   : > { %v2179_v4 = vpop.f32.mrf.mxu0  ;;  %v2200_v20 = vadd.f32 %v2199_v3, %v2198_v2 }
 0x20c   : > { %v2201_v5 = vpop.f32.mrf.mxu1  ;;  %v1445_v19 = vadd.f32 %v2178_v18, %v1405_v0 }
 0x20d   : > { %v2180_v8 = vpop.f32.mrf.mxu0 }
 0x20e   : > { %v2202_v9 = vpop.f32.mrf.mxu1  ;;  %v1485_v24 = vadd.f32 %v2200_v20, %v1445_v19 }
 0x227   : > { %v2220_v7 = vpop.f32.mrf.mxu0 }
 0x228   : > { %v2242_v10 = vpop.f32.mrf.mxu1 }
 0x229   : > { %v2221_v11 = vpop.f32.mrf.mxu0 }
 0x22a   : > { %v2243_v12 = vpop.f32.mrf.mxu1  ;;  %v2222_v21 = vadd.f32 %v2221_v11, %v2220_v7 }
 0x22b   : > { %v2223_v13 = vpop.f32.mrf.mxu0  ;;  %v2244_v23 = vadd.f32 %v2243_v12, %v2242_v10 }
 0x22c   : > { %v2245_v15 = vpop.f32.mrf.mxu1  ;;  %v1525_v25 = vadd.f32 %v2222_v21, %v1485_v24 }
 0x22d   : > { %v2224_v16 = vpop.f32.mrf.mxu0 }
 0x22e   : > { %v2246_v17 = vpop.f32.mrf.mxu1  ;;  %v1565_v27 = vadd.f32 %v2244_v23, %v1525_v25 }
 0x247   : > { %v2264_v26 = vpop.f32.mrf.mxu0 }
 0x248   : > { %v2286_v37 = vpop.f32.mrf.mxu1 }
 0x249   : > { %v2265_v6 = vpop.f32.mrf.mxu0 }
 0x24a   : > { %v2287_v14 = vpop.f32.mrf.mxu1  ;;  %v2266_v28 = vadd.f32 %v2265_v6, %v2264_v26 }
 0x24b   : > { %v2267_v29 = vpop.f32.mrf.mxu0  ;;  %v2288_v33 = vadd.f32 %v2287_v14, %v2286_v37 }
 0x24c   : > { %v2289_v31 = vpop.f32.mrf.mxu1  ;;  %v1605_v32 = vadd.f32 %v2266_v28, %v1565_v27 }
 0x24d   : > { %v2268_v22 = vpop.f32.mrf.mxu0 }
 0x24e   : > { %v2290_v35 = vpop.f32.mrf.mxu1  ;;  %v1645_v36 = vadd.f32 %v2288_v33, %v1605_v32  ;;  %1655 = sbr.rel (%p1927_p8) target bundleno = 827 (0x33b), region = 64 }
 0x250   : > { %v1650_v38 = vadd.f32 %v1645_v36, %v773_v34 }
 0x252   : > { %1651 = vst [vmem:[#allocation2] sm:$0x1] %v1650_v38 }
 0x253   : > { %v2444_v41 = vld [vmem:[%s2902_s29 + $0x38] sm:$0xff]   ;;  %v2675_v42 = vmov 0.0   ;;  %v2445_v40 = vld [vmem:[%s2902_s29 + $0x30] sm:$0xff]   ;;  %vm2676_vm0 = vmmov 0   ;;  %v2446_v43 = vld [vmem:[%s2902_s29 + $0x28] sm:$0xff]  }
 0x254   : > { %2301 = vmatprep.subr.bf16.mxu0 %v2675_v42  ;;  %2317 = vmatprep.mubr.msk.bf16.mxu0 %vm2676_vm0, %v2675_v42  ;;  %v2447_v30 = vld [vmem:[%s2902_s29 + $0x20] sm:$0xff]   ;;  %v2448_v44 = vld [vmem:[%s2902_s29 + $0x18] sm:$0xff]   ;;  %v2449_v49 = vld [vmem:[%s2902_s29 + $0x10] sm:$0xff]  }
 0x255   : > { %2302 = vmatpush3.bf16.msra.mxu0 %v2444_v41  ;;  %v1657_v46 = vld [vmem:[%s314_s26] sm:$0x1]  ;;  %v2450_v39 = vld [vmem:[%s2902_s29 + $0x8] sm:$0xff]   ;;  %v2451_v53 = vld [vmem:[%s2902_s29] sm:$0xff]  }
 0x256   : > { %2303 = vmatprep.subr.bf16.mxu0 %v2675_v42  ;;  %v1659_v50 = vld [vmem:[%s322_s12] sm:$0x1] }
 0x259   : > { %2304 = vmatpush3.bf16.msra.mxu0 %v2445_v40  ;;  %v1656_v45 = vld [vmem:[#allocation2] sm:$0x1] }
 0x25a   : > { %2305 = vmatprep.subr.bf16.mxu0 %v2675_v42  ;;  %v1658_v48 = vmul.f32 %v1657_v46, %v1656_v45 }
 0x25c   : > { %v1660_v51 = vadd.f32 %v1659_v50, %v1658_v48 }
 0x25d   : > { %2306 = vmatpush3.bf16.msra.mxu0 %v2446_v43 }
 0x25e   : > { %2307 = vmatprep.subr.bf16.mxu0 %v2675_v42  ;;  %v1661_v52 = vmax.f32 %v1660_v51, 0.0 }
 0x260   : > { %v1662_v54 = vpack.c.bf16 %v1661_v52, %v1661_v52 }
 0x261   : > { %2308 = vmatpush3.bf16.msra.mxu0 %v2447_v30 }
 0x262   : > { %2309 = vmatprep.subr.bf16.mxu0 %v2675_v42 }
 0x265   : > { %2310 = vmatpush3.bf16.msra.mxu0 %v2448_v44 }
 0x266   : > { %2311 = vmatprep.subr.bf16.mxu0 %v2675_v42 }
 0x269   : > { %2312 = vmatpush3.bf16.msra.mxu0 %v2449_v49 }
 0x26a   : > { %2313 = vmatprep.subr.bf16.mxu0 %v2675_v42 }
 0x26d   : > { %2314 = vmatpush3.bf16.msra.mxu0 %v2450_v39 }
 0x26e   : > { %2315 = vmatprep.subr.bf16.mxu0 %v2675_v42 }
 0x271   : > { %2316 = vmatpush3.bf16.msra.mxu0 %v2451_v53 }
 0x274   : > { %2318 = vmatmul.mubr.bf16.vlgmr.msra.gmra.mxu0 %v1662_v54 }
 0x334   : > { %v1761_v56 = vpop.f32.mrf.mxu0 }
 0x335   : > { %1767 = vst [vmem:[%s382_s7] sm:$0x1] %v1761_v56 }
 0x336   : > { %v2319_v57 = vpop.f32.mrf.mxu0 }
 0x338   : > { %v1764_v58 = vpop.f32.mrf.mxu0 }
 0x33a   : > { %v2320_v59 = vpop.f32.mrf.mxu0 }
 0x33b PF: > { %s24_s28 = sadd.s32 1, %s2662_s28   ;;  %s3228_s24 = sld [smem:[#allocation15_spill]] }
 0x33c   : > { %p21_p10 = scmp.ge.s32.totalorder %s24_s28, 6   ;;  %s3229_s26 = sld [smem:[#allocation16_spill]] }
 0x33d   : > { %s3230_s18 = smov %s2626_s19  ;;  %s3231_s19 = smov %s2630_s20 }
 0x33e   : > { %s3232_s20 = smov %s2845_s10  ;;  %s3233_s21 = smov %s2638_s22 }
 0x33f   : > { %s3234_s22 = smov %s2642_s23  ;;  %s3235_s23 = smov %s2850_s17 }
 0x340   : > { %s3236_s25 = smov %s2658_s27  ;;  %s3237_s27 = smov %s3243_s14 }
 0x341   :  { %23 = sbr.rel (!%p21_p10) target bundleno = 17 (0x11), region = 128 }
 0x346   :  { %1785 = vsyncpa [#allocation4], 1 }
 0x347   :  { %1787 = vsyncpa [#allocation4 + $0x1], 1 }
 0x348   :  { %1788 = vsyncpa [#allocation6], 1 }
 0x349   :  { %1790 = vsyncpa [#allocation6 + $0x1], 1 }
 0x34a   :  { %1791 = vsyncpa [#allocation9], 1 }
 0x34b   :  { %1793 = vsyncpa [#allocation9 + $0x1], 1 }

// kernel: musiclass_forward.4
= control target key start
LH: loop header
LB: loop body
LE: loop exit
PB: predicated region body
PF: predicated region fallthrough
CT: control target
= control target key end

     0   :  { %10 = vsyncpa [#allocation4], 0  ;;  %s6926_s0 = inlined_call_operand.vmem [shape: bf16[20,18,64], index: 0, kind: input, shape index: {}]   ;;  %s6927_s1 = inlined_call_operand.hbm [shape: bf16[3,192,128], index: 1, kind: input, shape index: {}]   ;;  %s6928_s2 = inlined_call_operand.hbm [shape: f32[1,128], index: 2, kind: input, shape index: {}]   ;;  %s6929_s3 = inlined_call_operand.hbm [shape: bf16[3,384,128], index: 3, kind: input, shape index: {}]   ;;  %s6930_s4 = inlined_call_operand.hbm [shape: f32[1,128], index: 4, kind: input, shape index: {}]   ;;  %s6931_s5 = inlined_call_operand.vmem [shape: bf16[8,8,128], index: 5, kind: output, shape index: {}]  }
   0x1   :  { %11 = vsyncpa [#allocation6], 0 }
   0x2   :  { %12 = vsyncpa [#allocation9], 0  ;;  %s5639_s18 = smov 0  }
   0x3 LB: > { %s5598_s19 = smov [#allocation5]   ;;  %s5645_s21 = sadd.s32 4294967295, %s5596_s18   ;;  %s5596_s18 = sphi %s5639_s18, %s18_s18  }
   0x4   : > { %s183_s20 = sshll.u32 %s5598_s19, 4  ;;  %p4518_p0 = scmp.ge.s32.totalorder %s5596_s18, 1  ;;  %s184_s20 = int_to_ptr.vmem [resolvable:$true] %s183_s20 }
   0x5   : > { %p154_p1 = scmp.lt.s32.totalorder %s5596_s18, 3  ;;  %p5243_p2 = scmp.eq.s32.totalorder %s5645_s21, 0 }
   0x6   : > { %s5599_s23 = smov [#allocation3]   ;;  %s5600_s26 = smov [#allocation7]  }
   0x7   : > { %p5650_p3 = pnand %p4518_p0, %p154_p1  ;;  %s169_s24 = sshll.u32 %s5599_s23, 4  ;;  %s5656_s24 = int_to_ptr.vmem [resolvable:$true] %s169_s24 }
   0x8   : > { %s193_s27 = sshll.u32 %s5600_s26, 4  ;;  %s5601_s28 = smov [#allocation8]   ;;  %s5664_s27 = int_to_ptr.vmem [resolvable:$true] %s193_s27 }
   0x9   : > { %p5230_p4 = pneg %p5650_p3  ;;  %s5666_s29 = sshll.u32 %s5601_s28, 4  ;;  %s208_s29 = int_to_ptr.vmem [resolvable:$true] %s5666_s29 }
   0xa   : > { %s5485_s30 = scalar_lea.vmem %s184_s20, 16  ;;  %s5492_s6 = scalar_lea.vmem %s184_s20, 32 }
   0xb   : > { %p5660_p5 = pnand %p5243_p2, %p5230_p4  ;;  %p5486_p7 = scmp.ne.s32.totalorder %s184_s20, %s5485_s30 }
   0xc   : > { %p5493_p10 = scmp.lt.s32.totalorder %s184_s20, %s184_s20  ;;  %p5494_p11 = scmp.lt.s32.totalorder %s5492_s6, %s5485_s30 }
   0xd   : > { %p5476_p6 = pneg %p5660_p5 }
   0xe   : > { %p5495_p12 = por %p5494_p11, %p5493_p10 }
   0xf   : > { %p5488_p8 = pnand %p5486_p7, %p5476_p6 }
  0x11   : > { %p5489_p9 = pneg %p5488_p8 }
  0x13   : > { %p5496_p13 = pnand %p5495_p12, %p5489_p9 }
  0x15   : > { %5499 = shalt.err (!%p5496_p13)
}
  0x16   : > { %5236 = dma.hbm_to_vmem [thread:$0]  (!%p5660_p5), %s6928_s2, 16, %s184_s20, [#allocation6]  }
  0x17   : > { %s5511_s9 = scalar_lea.vmem %s5656_s24, 4608  ;;  %p5519_p7 = scmp.lt.s32.totalorder %s5656_s24, %s5656_s24 }
  0x18   : > { %p5512_p0 = scmp.ne.s32.totalorder %s5656_s24, %s5511_s9  ;;  %p5520_p8 = scmp.lt.s32.totalorder %s5511_s9, %s5511_s9 }
  0x1a   : > { %p5514_p1 = pnand %p5512_p0, %p5476_p6  ;;  %p5521_p9 = por %p5520_p8, %p5519_p7 }
  0x1c   : > { %p5515_p4 = pneg %p5514_p1 }
  0x1e   : > { %p5522_p10 = pnand %p5521_p9, %p5515_p4 }
  0x20   : > { %5525 = shalt.err (!%p5522_p10)
}
  0x21   : > { %s5602_s10 = smov 64   ;;  %s5603_s11 = smov 4  }
  0x22   : > { %5233 = dma.hbm_to_vmem [thread:$0]  (!%p5660_p5), %s6927_s1, 4608, %s5656_s24, [#allocation4], %s5602_s10, %s5602_s10, %s5603_s11  }
  0x23   : > { %s5537_s14 = scalar_lea.vmem %s5664_s27, 9216  ;;  %p5545_p0 = scmp.lt.s32.totalorder %s5664_s27, %s5664_s27 }
  0x24   : > { %p5538_p11 = scmp.ne.s32.totalorder %s5664_s27, %s5537_s14  ;;  %p5546_p1 = scmp.lt.s32.totalorder %s5537_s14, %s5537_s14 }
  0x26   : > { %p5540_p12 = pnand %p5538_p11, %p5476_p6  ;;  %p5547_p4 = por %p5546_p1, %p5545_p0 }
  0x28   : > { %p5541_p13 = pneg %p5540_p12 }
  0x2a   : > { %p5548_p7 = pnand %p5547_p4, %p5541_p13 }
  0x2c   : > { %5551 = shalt.err (!%p5548_p7)
}
  0x2d   : > { %5239 = dma.hbm_to_vmem [thread:$0]  (!%p5660_p5), %s6929_s3, 9216, %s5664_s27, [#allocation6], %s5602_s10, %s5602_s10, %s5603_s11  }
  0x2e   : > { %s5563_s17 = scalar_lea.vmem %s208_s29, 16  ;;  %s5570_s19 = scalar_lea.vmem %s208_s29, 32 }
  0x2f   : > { %p5564_p8 = scmp.ne.s32.totalorder %s208_s29, %s5563_s17  ;;  %p5571_p11 = scmp.lt.s32.totalorder %s208_s29, %s208_s29 }
  0x30   : > { %p5572_p12 = scmp.lt.s32.totalorder %s5570_s19, %s5563_s17 }
  0x31   : > { %p5566_p9 = pnand %p5564_p8, %p5476_p6 }
  0x32   : > { %p5573_p13 = por %p5572_p12, %p5571_p11 }
  0x33   : > { %p5567_p10 = pneg %p5566_p9 }
  0x35   : > { %p5574_p0 = pnand %p5573_p13, %p5567_p10 }
  0x37   : > { %5577 = shalt.err (!%p5574_p0)
}
  0x38   : > { %5242 = dma.hbm_to_vmem [thread:$0]  (!%p5660_p5), %s6930_s4, 16, %s208_s29, [#allocation9]  }
  0x39   : > { %220 = sbr.rel (%p5650_p3) target bundleno = 1070 (0x42e), region = 40 }
  0x3e   : > { %5583 = dma.done.wait (%p5243_p2), [#allocation4], 4608  }
  0x3f   : > { %5585 = vsyncadd (%p5243_p2), [#allocation4], 4294962688 }
  0x40   : > { %5587 = dma.done.wait (%p5243_p2), [#allocation6], 9232  }
  0x41   : > { %5589 = vsyncadd (%p5243_p2), [#allocation6], 4294958064 }
  0x42   : > { %5591 = dma.done.wait (%p5243_p2), [#allocation9], 16  }
  0x43   : > { %5593 = vsyncadd (%p5243_p2), [#allocation9], 4294967280  ;;  %s4825_s22 = smul.u32 96, %s5645_s21  ;;  %s4528_s24 = sshll.u32 %s5645_s21, 2  ;;  %v5604_v0 = vmov 0   ;;  %vm523_vm1 = vcmask 1046528  }
  0x44   : > { %s4530_s25 = sshll.u32 %s5645_s21, 3  ;;  %p256_p3 = scmp.lt.s32.totalorder %s4528_s24, 7  ;;  %764 = vmatprep.subr.bf16.mxu0 %v5604_v0  ;;  %952 = vmatprep.subr.bf16.mxu1 %v5604_v0  ;;  %vm382_vm0 = vsmask.f32 7424  ;;  %vm554_vm2 = vcmask 523264   ;;  %vm1373_vm3 = vcmask 1040384  }
  0x45   : > { %s5735_s28 = scalar_lea.vmem %s6926_s0, %s4825_s22  ;;  %s5605_s8 = smov 64   ;;  %vm1374_vm4 = vsmask.f32 256  ;;  %vm1406_vm6 = vsmask.f32 7938  ;;  %vm1700_vm8 = vcmask 1043456  }
  0x46   : > { %s6943_s24 = smov (!%p256_p3, %s4528_s24), 7  ;;  %v5743_v1 = vld [vmem:[%s5735_s28 + $0xc] sm:$0xff]   ;;  %v5746_v2 = vld [vmem:[%s5735_s28 + $0x14] ss:$0 sps:$4 sm:$0x11]   ;;  %v5749_v3 = vld [vmem:[%s5735_s28 + $0x18] sm:$0xff]  }
  0x47   : > { %s4529_s29 = sshll.u32 %s6943_s24, 2  ;;  %v396_v4 = vshrl.u32 %v5743_v1, 16  ;;  %v398_v5 = vshll.u32 %v5743_v1, 16  ;;  %v403_v6 = vshll.u32 %v5746_v2, 16  ;;  %v408_v8 = vshrl.u32 %v5749_v3, 16  ;;  %v5761_v13 = vld [vmem:[%s5735_s28 + $0x3c] sm:$0xff]   ;;  %vm6054_vm5 = vmand %vm1373_vm3, %vm1374_vm4 }
  0x48   : > { %s5740_s7 = scalar_lea.vmem %s6931_s5, %s4529_s29  ;;  %v5755_v7 = vld [vmem:[%s5735_s28 + $0x20] ss:$0 sps:$4 sm:$0x11]   ;;  %v410_v9 = vshll.u32 %v5749_v3, 16  ;;  %v444_v18 = vshrl.u32 %v5761_v13, 16  ;;  %v446_v19 = vshll.u32 %v5761_v13, 16  ;;  %vm6061_vm7 = vmand %vm1373_vm3, %vm1406_vm6 }
  0x49   : > { %v400_v10 = vrot.slane %v398_v5, 1  ;;  %v405_v11 = vrot.slane %v403_v6, 1  ;;  %v415_v12 = vshll.u32 %v5755_v7, 16  ;;  %v5764_v15 = vld [vmem:[%s5735_s28 + $0x44] ss:$0 sps:$4 sm:$0x11]   ;;  %vm6192_vm9 = vmand %vm1700_vm8, %vm1406_vm6 }
  0x4a   : > { %v412_v14 = vrot.slane %v410_v9, 1  ;;  %v5769_v20 = vld [vmem:[%s5735_s28 + $0x54] sm:$0xff]   ;;  %v451_v22 = vshll.u32 %v5764_v15, 16  ;;  %v5773_v23 = vld [vmem:[%s5735_s28 + $0x5c] ss:$0 sps:$4 sm:$0x11]  }
  0x4b   : > { %v401_v16 = vor.u32 %v400_v10, %v396_v4  ;;  %v417_v17 = vrot.slane %v415_v12, 1  ;;  %v448_v25 = vrot.slane %v446_v19, 1  ;;  %v468_v26 = vshrl.u32 %v5769_v20, 16  ;;  %v5779_v28 = vld [vmem:[%s5735_s28 + $0x24] sm:$0xff]   ;;  %v5790_v38 = vld [vmem:[%s5735_s28 + $0x6c] sm:$0xff]   ;;  %p4644_p2 = scmp.ne.s32.totalorder %s4530_s25, 0 }
  0x4c   : > { %v413_v21 = vor.u32 %v412_v14, %v408_v8  ;;  %v470_v27 = vshll.u32 %v5769_v20, 16  ;;  %v453_v30 = vrot.slane %v451_v22, 1  ;;  %v475_v31 = vshll.u32 %v5773_v23, 16  ;;  %v5785_v34 = vld [vmem:[%s5735_s28 + $0x2c] ss:$0 sps:$4 sm:$0x11]  }
  0x4d   : > { %v406_v24 = vsel %vm382_vm0, %v401_v16, %v405_v11  ;;  %v449_v32 = vor.u32 %v448_v25, %v444_v18  ;;  %v420_v35 = vshrl.u32 %v5779_v28, 16  ;;  %v422_v36 = vshll.u32 %v5779_v28, 16  ;;  %v5795_v41 = vld [vmem:[%s5735_s28 + $0x74] ss:$0 sps:$4 sm:$0x11]   ;;  %v5800_v44 = vld [vmem:[%s5735_s28] sm:$0xff]  }
  0x4e   : > { %505 = vrot.lane.b32.xlu0 %v406_v24, %s5605_s8  ;;  %v418_v29 = vsel %vm382_vm0, %v413_v21, %v417_v17  ;;  %v472_v33 = vrot.slane %v470_v27, 1  ;;  %v477_v37 = vrot.slane %v475_v31, 1  ;;  %v427_v40 = vshll.u32 %v5785_v34, 16  ;;  %v5804_v49 = vld [vmem:[%s5735_s28 + $0x30] sm:$0xff]   ;;  %v5819_v61 = vld [vmem:[%s5735_s28 + $0x48] sm:$0xff]   ;;  %v5835_v21 = vld [vmem:[%s5735_s28 + $0x60] sm:$0xff]  }
  0x4f   : > { %v424_v39 = vrot.slane %v422_v36, 1  ;;  %v492_v42 = vshrl.u32 %v5790_v38, 16  ;;  %v494_v43 = vshll.u32 %v5790_v38, 16  ;;  %v454_v45 = vsel %vm382_vm0, %v449_v32, %v453_v30  ;;  %v5808_v52 = vld [vmem:[%s5735_s28 + $0x8] ss:$0 sps:$4 sm:$0x11]  }
  0x50   : > { %v473_v46 = vor.u32 %v472_v33, %v468_v26  ;;  %v429_v48 = vrot.slane %v427_v40, 1  ;;  %v499_v51 = vshll.u32 %v5795_v41, 16  ;;  %v384_v53 = vshrl.u32 %v5800_v44, 16  ;;  %v5823_v4 = vld [vmem:[%s5735_s28 + $0x38] ss:$0 sps:$4 sm:$0x11]  }
  0x51   : > { %v425_v47 = vor.u32 %v424_v39, %v420_v35  ;;  %v496_v50 = vrot.slane %v494_v43, 1  ;;  %v386_v55 = vshll.u32 %v5800_v44, 16  ;;  %v432_v56 = vshrl.u32 %v5804_v49, 16  ;;  %v5827_v9 = vld [vmem:[%s5735_s28 + $0x50] ss:$0 sps:$4 sm:$0x11]  }
  0x52   : > { %507 = vrot.lane.b32.xlu0 %v418_v29, %s5605_s8  ;;  %v501_v58 = vrot.slane %v499_v51, 1  ;;  %v391_v59 = vshll.u32 %v5808_v52, 16  ;;  %v434_v60 = vshll.u32 %v5804_v49, 16  ;;  %v478_v62 = vsel %vm382_vm0, %v473_v46, %v477_v37  ;;  %v5838_v22 = vld [vmem:[%s5735_s28 + $0x68] ss:$0 sps:$4 sm:$0x11]  }
  0x53   : > { %v430_v54 = vsel %vm382_vm0, %v425_v47, %v429_v48  ;;  %v497_v57 = vor.u32 %v496_v50, %v492_v42  ;;  %v388_v63 = vrot.slane %v386_v55, 1  ;;  %v439_v8 = vshll.u32 %v5823_v4, 16  ;;  %v5290_v24 = vld [vmem:[#allocation3 + $0x98] sm:$0xff]   ;;  %v5291_v32 = vld [vmem:[#allocation3 + $0x90] sm:$0xff]   ;;  %v5847_v33 = vld [vmem:[%s5735_s28 + $0x78] sm:$0xff]  }
  0x54   : > { %509 = vrot.lane.b32.xlu1 %v430_v54, %s5605_s8  ;;  %v393_v5 = vrot.slane %v391_v59, 1  ;;  %v436_v6 = vrot.slane %v434_v60, 1  ;;  %v456_v10 = vshrl.u32 %v5819_v61, 16  ;;  %v458_v11 = vshll.u32 %v5819_v61, 16  ;;  %765 = vmatpush1.bf16.msra.mxu0 %v5290_v24  ;;  %v5294_v48 = vld [vmem:[#allocation3 + $0x88] sm:$0xff]   ;;  %v5298_v54 = vld [vmem:[#allocation3 + $0x38] sm:$0xff]  }
  0x55   : > { %v502_v12 = vsel %vm382_vm0, %v497_v57, %v501_v58  ;;  %v389_v16 = vor.u32 %v388_v63, %v384_v53  ;;  %v441_v17 = vrot.slane %v439_v8, 1  ;;  %v463_v19 = vshll.u32 %v5827_v9, 16  ;;  %766 = vmatprep.subr.bf16.mxu0 %v5604_v0  ;;  %v5853_v40 = vld [vmem:[%s5735_s28 + $0x80] ss:$0 sps:$4 sm:$0x11]   ;;  %953 = vmatpush1.bf16.msra.mxu1 %v5298_v54  ;;  %v5300_v59 = vld [vmem:[#allocation3 + $0x30] sm:$0xff]  }
  0x56   : > { %513 = vrot.lane.b32.xlu0 %v454_v45, %s5605_s8  ;;  %v437_v14 = vor.u32 %v436_v6, %v432_v56  ;;  %v460_v18 = vrot.slane %v458_v11, 1  ;;  %v480_v29 = vshrl.u32 %v5835_v21, 16  ;;  %v482_v30 = vshll.u32 %v5835_v21, 16  ;;  %v5295_v56 = vld [vmem:[#allocation3 + $0x80] sm:$0xff]   ;;  %954 = vmatprep.subr.bf16.mxu1 %v5604_v0  ;;  %v5297_v6 = vld [vmem:[#allocation3 + $0x70] sm:$0xff]   ;;  %v5299_v11 = vld [vmem:[#allocation3 + $0x68] sm:$0xff]  }
  0x57   : > { %v465_v27 = vrot.slane %v463_v19, 1  ;;  %v487_v31 = vshll.u32 %v5838_v22, 16  ;;  %v394_v35 = vsel %vm382_vm0, %v389_v16, %v393_v5  ;;  %v618_v42 = vshrl.u32 %v5847_v33, 16  ;;  %v5303_v16 = vld [vmem:[#allocation3 + $0xb8] sm:$0xff]   ;;  %v5889_v19 = vld [vmem:[%s5735_s28 + $0x84] sm:$0xff]   ;;  %v5312_v24 = vld [vmem:[#allocation3] sm:$0xff]  }
  0x58   : > { %v442_v25 = vsel %vm382_vm0, %v437_v14, %v441_v17  ;;  %v461_v26 = vor.u32 %v460_v18, %v456_v10  ;;  %v484_v37 = vrot.slane %v482_v30, 1  ;;  %v620_v43 = vshll.u32 %v5847_v33, 16  ;;  %767 = vmatpush1.bf16.msra.mxu0 %v5291_v32  ;;  %v5304_v10 = vld [vmem:[#allocation3 + $0x20] sm:$0xff]   ;;  %v5308_v14 = vld [vmem:[#allocation3 + $0x10] sm:$0xff]   ;;  %v5310_v17 = vld [vmem:[#allocation3 + $0x8] sm:$0xff]  }
  0x59   : > { %511 = vrot.lane.b32.xlu1 %v442_v25, %s5605_s8  ;;  %v489_v39 = vrot.slane %v487_v31, 1  ;;  %v625_v46 = vshll.u32 %v5853_v40, 16  ;;  %768 = vmatprep.subr.bf16.mxu0 %v5604_v0  ;;  %v527_v55 = vrot.slane %v5743_v1, 1  ;;  %v528_v57 = vrot.slane %v5746_v2, 1  ;;  %v5302_v2 = vld [vmem:[#allocation3 + $0x28] sm:$0xff]   ;;  %v5305_v18 = vld [vmem:[#allocation3 + $0xb0] sm:$0xff]  }
  0x5a   : > { %517 = vrot.lane.b32.xlu0 %v478_v62, %s5605_s8  ;;  %v466_v36 = vsel %vm382_vm0, %v461_v26, %v465_v27  ;;  %v485_v45 = vor.u32 %v484_v37, %v480_v29  ;;  %v622_v47 = vrot.slane %v620_v43, 1  ;;  %v5296_v62 = vld [vmem:[#allocation3 + $0x78] sm:$0xff]   ;;  %955 = vmatpush1.bf16.msra.mxu1 %v5300_v59  ;;  %v524_v63 = vrot.slane %v5800_v44, 1  ;;  %v5892_v25 = vld [vmem:[%s5735_s28 + $0x8c] ss:$0 sps:$4 sm:$0x11]  }
  0x5b   : > { %v627_v51 = vrot.slane %v625_v46, 1  ;;  %v5869_v60 = vsel %vm523_vm1, %v527_v55, %v528_v57  ;;  %956 = vmatprep.subr.bf16.mxu1 %v5604_v0  ;;  %v525_v5 = vrot.slane %v5808_v52, 1  ;;  %v5301_v52 = vld [vmem:[#allocation3 + $0x60] sm:$0xff]   ;;  %v1074_v26 = vshrl.u32 %v5889_v19, 16  ;;  %v5307_v31 = vld [vmem:[#allocation3 + $0xa8] sm:$0xff]   ;;  %v5314_v54 = vld [vmem:[#allocation3 + $0xf0] sm:$0xff]  }
  0x5c   : > { %v490_v50 = vsel %vm382_vm0, %v485_v45, %v489_v39  ;;  %v623_v53 = vor.u32 %v622_v47, %v618_v42  ;;  %769 = vmatpush1.bf16.msra.mxu0 %v5294_v48  ;;  %4567 = vmatprep.mubr.msk.bf16.mxu0 %vm554_vm2, %v5869_v60  ;;  %v1076_v27 = vshll.u32 %v5889_v19, 16  ;;  %v1081_v29 = vshll.u32 %v5892_v25, 16  ;;  %v5309_v39 = vld [vmem:[#allocation3 + $0xa0] sm:$0xff]   ;;  %v5315_v42 = vld [vmem:[#allocation3 + $0x50] sm:$0xff]   ;;  %v5316_v43 = vld [vmem:[#allocation3 + $0x48] sm:$0xff]  }
  0x5d   : > { %515 = vrot.lane.b32.xlu1 %v466_v36, %s5605_s8  ;;  %770 = vmatprep.subr.bf16.mxu0 %v5604_v0  ;;  %v526_v8 = vsel %vm523_vm1, %v524_v63, %v525_v5  ;;  %v5318_v45 = vld [vmem:[#allocation3 + $0x40] sm:$0xff]   ;;  %v530_v46 = vrot.slane %v5749_v3, 1  ;;  %v531_v47 = vrot.slane %v5755_v7, 1  ;;  %v5311_v48 = vld [vmem:[#allocation3 + $0xf8] sm:$0xff]   ;;  %v534_v7 = vrot.slane %v5785_v34, 1 }
  0x5e   : > { %521 = vrot.lane.b32.xlu0 %v502_v12, %s5605_s8  ;;  %v628_v58 = vsel %vm382_vm0, %v623_v53, %v627_v51  ;;  %957 = vmatpush1.bf16.msra.mxu1 %v5302_v2  ;;  %v5306_v12 = vld [vmem:[#allocation3 + $0x18] sm:$0xff]   ;;  %v1078_v30 = vrot.slane %v1076_v27, 1  ;;  %v1083_v32 = vrot.slane %v1081_v29, 1  ;;  %v537_v63 = vrot.slane %v5823_v4, 1  ;;  %v5321_v4 = vld [vmem:[#allocation3 + $0xd0] sm:$0xff]  }
  0x5f   : > { %958 = vmatprep.subr.bf16.mxu1 %v5604_v0  ;;  %4589 = vmatprep.mubr.msk.bf16.mxu1 %vm554_vm2, %v526_v8  ;;  %v5911_v51 = vsel %vm523_vm1, %v530_v46, %v531_v47  ;;  %v546_v29 = vrot.slane %v5773_v23, 1  ;;  %v5329_v23 = vld [vmem:[#allocation3 + $0x100] sm:$0xff]   ;;  %vm1498_vm10 = vsmask.f32 4368 }
  0x60   : > { %771 = vmatpush1.bf16.msra.mxu0 %v5295_v56  ;;  %v1079_v36 = vor.u32 %v1078_v30, %v1074_v26  ;;  %v533_v56 = vrot.slane %v5779_v28, 1  ;;  %vm6204_vm11 = vmor %vm1374_vm4, %vm1498_vm10 }
  0x61   : > { %519 = vrot.lane.b32.xlu1 %v490_v50, %s5605_s8  ;;  %772 = vmatprep.subr.bf16.mxu0 %v5604_v0 }
  0x62   : > { %503 = vrot.lane.b32.xlu0 %v394_v35, %s5605_s8  ;;  %959 = vmatpush1.bf16.msra.mxu1 %v5304_v10  ;;  %v5313_v35 = vld [vmem:[#allocation3 + $0x58] sm:$0xff]   ;;  %v1084_v37 = vsel %vm382_vm0, %v1079_v36, %v1083_v32  ;;  %v5926_v59 = vsel %vm523_vm1, %v533_v56, %v534_v7  ;;  %v549_v36 = vrot.slane %v5838_v22, 1  ;;  %v551_v22 = vrot.slane %v5790_v38, 1  ;;  %v1379_v56 = vld [vmem:[#allocation2 + $0xc] sm:$0x1] }
  0x63   : > { %960 = vmatprep.subr.bf16.mxu1 %v5604_v0  ;;  %v1380_v7 = vsel %vm6054_vm5, 0, %v1379_v56 }
  0x64   : > { %773 = vmatpush1.bf16.msra.mxu0 %v5296_v62  ;;  %v5319_v62 = vld [vmem:[#allocation3 + $0xe0] sm:$0xff]   ;;  %1381 = vst [vmem:[#allocation2 + $0xc] sm:$0x1] %v1380_v7 }
  0x65   : > { %629 = vrot.lane.b32.xlu1 %v628_v58, %s5605_s8  ;;  %774 = vmatprep.subr.bf16.mxu0 %v5604_v0  ;;  %v5317_v58 = vld [vmem:[#allocation3 + $0xe8] sm:$0xff]  }
  0x66   : > { %961 = vmatpush1.bf16.msra.mxu1 %v5306_v12 }
  0x67   : > { %962 = vmatprep.subr.bf16.mxu1 %v5604_v0 }
  0x68   : > { %775 = vmatpush1.bf16.msra.mxu0 %v5297_v6  ;;  %v5320_v6 = vld [vmem:[#allocation3 + $0xd8] sm:$0xff]  }
  0x69   : > { %776 = vmatprep.subr.bf16.mxu0 %v5604_v0  ;;  %1085 = vrot.lane.b32.xlu1 %v1084_v37, %s5605_s8 }
  0x6a   : > { %963 = vmatpush1.bf16.msra.mxu1 %v5308_v14 }
  0x6b   : > { %964 = vmatprep.subr.bf16.mxu1 %v5604_v0 }
  0x6c   : > { %777 = vmatpush1.bf16.msra.mxu0 %v5299_v11 }
  0x6d   : > { %778 = vmatprep.subr.bf16.mxu0 %v5604_v0 }
  0x6e   : > { %965 = vmatpush1.bf16.msra.mxu1 %v5310_v17  ;;  %v5324_v17 = vld [vmem:[#allocation3 + $0xc8] sm:$0xff]  }
  0x6f   : > { %966 = vmatprep.subr.bf16.mxu1 %v5604_v0 }
  0x70   : > { %779 = vmatpush1.bf16.msra.mxu0 %v5301_v52  ;;  %v540_v52 = vrot.slane %v5764_v15, 1  ;;  %v5325_v15 = vld [vmem:[#allocation3 + $0xc0] sm:$0xff]  }
  0x71   : > { %788 = vmatprep.subr.bf16.mxu0 %v5604_v0 }
  0x72   : > { %967 = vmatpush1.bf16.msra.mxu1 %v5312_v24  ;;  %v5326_v24 = vld [vmem:[#allocation3 + $0x118] sm:$0xff]  }
  0x73   : > { %976 = vmatprep.subr.bf16.mxu1 %v5604_v0 }
  0x74   : > { %789 = vmatpush2.bf16.msra.mxu0 %v5303_v16 }
  0x75   : > { %790 = vmatprep.subr.bf16.mxu0 %v5604_v0 }
  0x76   : > { %977 = vmatpush2.bf16.msra.mxu1 %v5313_v35  ;;  %v548_v35 = vrot.slane %v5835_v21, 1 }
  0x77   : > { %978 = vmatprep.subr.bf16.mxu1 %v5604_v0 }
  0x78   : > { %791 = vmatpush2.bf16.msra.mxu0 %v5305_v18  ;;  %v550_v37 = vsel %vm523_vm1, %v548_v35, %v549_v36 }
  0x79   : > { %792 = vmatprep.subr.bf16.mxu0 %v5604_v0 }
  0x7a   : > { %979 = vmatpush2.bf16.msra.mxu1 %v5315_v42 }
  0x7b   : > { %980 = vmatprep.subr.bf16.mxu1 %v5604_v0 }
  0x7c   : > { %793 = vmatpush2.bf16.msra.mxu0 %v5307_v31  ;;  %v5328_v31 = vld [vmem:[#allocation3 + $0x108] sm:$0xff]  }
  0x7d   : > { %794 = vmatprep.subr.bf16.mxu0 %v5604_v0 }
  0x7e   : > { %981 = vmatpush2.bf16.msra.mxu1 %v5316_v43  ;;  %v631_v43 = vrot.slane %v5847_v33, 1 }
  0x7f   : > { %982 = vmatprep.subr.bf16.mxu1 %v5604_v0 }
  0x80   : > { %795 = vmatpush2.bf16.msra.mxu0 %v5309_v39 }
  0x81   : > { %1193 = vmatprep.subr.bf16.mxu0 %v5604_v0 }
  0x82   : > { %983 = vmatpush2.bf16.msra.mxu1 %v5318_v45  ;;  %v632_v45 = vrot.slane %v5853_v40, 1 }
  0xc0   : > { %v506_v50 = vpop.permute.xlu0 %505 }
  0xc1   : > { %v559_v53 = vsel %vm554_vm2, %v5743_v1, %v506_v50 }
  0xc2   : > { %797 = vmatmul.mubr.bf16.vlgmr.msra.gmra.mxu0 %v559_v53 }
  0xc3   : > { %1194 = vmatpush1.bf16.msra.mxu0 %v5311_v48  ;;  %4568 = vmatprep.mubr.msk.bf16.mxu0 %vm554_vm2, %v5911_v51 }
  0xc4   : > { %v508_v55 = vpop.permute.xlu0 %507  ;;  %1195 = vmatprep.subr.bf16.mxu0 %v5604_v0 }
  0xc5   : > { %v5922_v57 = vsel %vm554_vm2, %v5749_v3, %v508_v55  ;;  %v536_v3 = vrot.slane %v5804_v49, 1  ;;  %v1408_v55 = vld [vmem:[#allocation2 + $0x8] sm:$0x1] }
  0xc6   : > { %v510_v2 = vpop.permute.xlu1 %509 }
  0xc7   : > { %1196 = vmatpush1.bf16.msra.mxu0 %v5314_v54  ;;  %v5938_v5 = vsel %vm554_vm2, %v5779_v28, %v510_v2  ;;  %v5943_v10 = vsel %vm523_vm1, %v536_v3, %v537_v63  ;;  %v539_v28 = vrot.slane %v5761_v13, 1  ;;  %v1385_v2 = vld [vmem:[#allocation2 + $0x24] sm:$0x1]  ;;  %v1417_v63 = vld [vmem:[#allocation2 + $0x2c] sm:$0x1] }
  0xc8   : > { %v514_v1 = vpop.permute.xlu0 %513  ;;  %1197 = vmatprep.subr.bf16.mxu0 %v5604_v0  ;;  %v1386_v3 = vsel %vm6054_vm5, 0, %v1385_v2 }
  0xc9   : > { %v5961_v18 = vsel %vm523_vm1, %v539_v28, %v540_v52  ;;  %1387 = vst [vmem:[#allocation2 + $0x24] sm:$0x1] %v1386_v3 }
  0xca   : > { %805 = vmatmul.mubr.bf16.gmra.mxu0 %v5922_v57 }
  0xcb   : > { %1198 = vmatpush1.bf16.msra.mxu0 %v5317_v58  ;;  %4569 = vmatprep.mubr.msk.bf16.mxu0 %vm554_vm2, %v5926_v59  ;;  %v512_v12 = vpop.permute.xlu1 %511 }
  0xcc   : > { %v5931_v34 = vpop.permute.xlu0 %517  ;;  %1199 = vmatprep.subr.bf16.mxu0 %v5604_v0  ;;  %v5956_v16 = vsel %vm554_vm2, %v5804_v49, %v512_v12  ;;  %v543_v49 = vrot.slane %v5827_v9, 1  ;;  %v5327_v9 = vld [vmem:[#allocation3 + $0x110] sm:$0xff]  }
  0xcf   : > { %1200 = vmatpush1.bf16.msra.mxu0 %v5319_v62  ;;  %v516_v27 = vpop.permute.xlu1 %515  ;;  %v1414_v62 = vld [vmem:[#allocation2 + $0x20] sm:$0x1] }
  0xd0   : > { %v5940_v8 = vpop.permute.xlu0 %521  ;;  %1201 = vmatprep.subr.bf16.mxu0 %v5604_v0  ;;  %v574_v30 = vsel %vm554_vm2, %v5819_v61, %v516_v27 }
  0xd2   : > { %813 = vmatmul.mubr.bf16.gmra.mxu0 %v5938_v5 }
  0xd3   : > { %4570 = vmatprep.mubr.msk.bf16.mxu0 %vm554_vm2, %v5943_v10  ;;  %1202 = vmatpush1.bf16.msra.mxu0 %v5320_v6  ;;  %v520_v39 = vpop.permute.xlu1 %519  ;;  %v1388_v6 = vld [vmem:[#allocation2 + $0x30] sm:$0x1] }
  0xd4   : > { %v504_v11 = vpop.permute.xlu0 %503  ;;  %1203 = vmatprep.subr.bf16.mxu0 %v5604_v0  ;;  %v580_v42 = vsel %vm554_vm2, %v5835_v21, %v520_v39  ;;  %v633_v21 = vsel %vm523_vm1, %v631_v43, %v632_v45  ;;  %v1400_v39 = vld [vmem:[#allocation2 + $0x60] sm:$0x1]  ;;  %v1432_v45 = vld [vmem:[#allocation2 + $0x68] sm:$0x1] }
  0xd5   : > { %v556_v14 = vsel %vm554_vm2, %v5800_v44, %v504_v11  ;;  %v542_v44 = vrot.slane %v5819_v61, 1  ;;  %v577_v61 = vsel %vm554_vm2, %v5769_v20, %v5931_v34  ;;  %v1415_v34 = vsel %vm6061_vm7, 0, %v1414_v62  ;;  %v1391_v11 = vld [vmem:[#allocation2 + $0x3c] sm:$0x1] }
  0xd6   : > { %985 = vmatmul.mubr.bf16.vlgmr.msra.gmra.mxu1 %v556_v14  ;;  %1416 = vst [vmem:[#allocation2 + $0x20] sm:$0x1] %v1415_v34  ;;  %v1392_v12 = vsel %vm6054_vm5, 0, %v1391_v11  ;;  %v1423_v14 = vld [vmem:[#allocation2 + $0x44] sm:$0x1] }
  0xd7   : > { %4590 = vmatprep.mubr.msk.bf16.mxu1 %vm554_vm2, %v5869_v60  ;;  %1204 = vmatpush1.bf16.msra.mxu0 %v5321_v4  ;;  %v5972_v60 = vsel %vm554_vm2, %v5761_v13, %v514_v1  ;;  %v5977_v26 = vsel %vm523_vm1, %v542_v44, %v543_v49  ;;  %v545_v13 = vrot.slane %v5769_v20, 1  ;;  %v630_v46 = vpop.permute.xlu1 %629  ;;  %v1382_v1 = vld [vmem:[#allocation2 + $0x18] sm:$0x1]  ;;  %1393 = vst [vmem:[#allocation2 + $0x3c] sm:$0x1] %v1392_v12 }
  0xd8   : > { %1205 = vmatprep.subr.bf16.mxu0 %v5604_v0  ;;  %v635_v47 = vsel %vm554_vm2, %v5847_v33, %v630_v46  ;;  %v1088_v33 = vrot.slane %v5892_v25, 1 }
  0xd9   : > { %v547_v32 = vsel %vm523_vm1, %v545_v13, %v546_v29  ;;  %v1397_v13 = vld [vmem:[#allocation2 + $0x54] sm:$0x1] }
  0xda   : > { %821 = vmatmul.mubr.bf16.gmra.mxu0 %v5956_v16  ;;  %v1398_v29 = vsel %vm6054_vm5, 0, %v1397_v13 }
  0xdb   : > { %4571 = vmatprep.mubr.msk.bf16.mxu0 %vm554_vm2, %v5961_v18  ;;  %1206 = vmatpush1.bf16.msra.mxu0 %v5324_v17  ;;  %v1086_v48 = vpop.permute.xlu1 %1085  ;;  %1399 = vst [vmem:[#allocation2 + $0x54] sm:$0x1] %v1398_v29 }
  0xdc   : > { %1207 = vmatprep.subr.bf16.mxu0 %v5604_v0  ;;  %v1091_v50 = vsel %vm554_vm2, %v5889_v19, %v1086_v48 }
  0xde   : > { %993 = vmatmul.mubr.bf16.gmra.mxu1 %v559_v53  ;;  %v1376_v53 = vld [vmem:[#allocation2] sm:$0x1] }
  0xdf   : > { %4591 = vmatprep.mubr.msk.bf16.mxu1 %vm554_vm2, %v5911_v51  ;;  %1208 = vmatpush1.bf16.msra.mxu0 %v5325_v15  ;;  %v1377_v25 = vsel %vm6054_vm5, 0, %v1376_v53  ;;  %v1394_v15 = vld [vmem:[#allocation2 + $0x48] sm:$0x1] }
  0xe0   : > { %1217 = vmatprep.subr.bf16.mxu0 %v5604_v0  ;;  %1378 = vst [vmem:[#allocation2] sm:$0x1] %v1377_v25  ;;  %v1395_v44 = vsel %vm6054_vm5, 0, %v1394_v15 }
  0xe1   : > { %1396 = vst [vmem:[#allocation2 + $0x48] sm:$0x1] %v1395_v44 }
  0xe2   : > { %829 = vmatmul.mubr.bf16.gmra.mxu0 %v5972_v60 }
  0xe3   : > { %4572 = vmatprep.mubr.msk.bf16.mxu0 %vm554_vm2, %v5977_v26  ;;  %1218 = vmatpush2.bf16.msra.mxu0 %v5326_v24  ;;  %v1426_v24 = vld [vmem:[#allocation2 + $0x50] sm:$0x1] }
  0xe4   : > { %1219 = vmatprep.subr.bf16.mxu0 %v5604_v0 }
  0xe6   : > { %1001 = vmatmul.mubr.bf16.gmra.mxu1 %v5922_v57 }
  0xe7   : > { %4592 = vmatprep.mubr.msk.bf16.mxu1 %vm554_vm2, %v5926_v59  ;;  %1220 = vmatpush2.bf16.msra.mxu0 %v5327_v9 }
  0xe8   : > { %1221 = vmatprep.subr.bf16.mxu0 %v5604_v0 }
  0xea   : > { %837 = vmatmul.mubr.bf16.gmra.mxu0 %v574_v30 }
  0xeb   : > { %4573 = vmatprep.mubr.msk.bf16.mxu0 %vm554_vm2, %v547_v32  ;;  %1222 = vmatpush2.bf16.msra.mxu0 %v5328_v31 }
  0xec   : > { %1223 = vmatprep.subr.bf16.mxu0 %v5604_v0  ;;  %v552_v0 = vrot.slane %v5795_v41, 1  ;;  %v583_v41 = vsel %vm554_vm2, %v5790_v38, %v5940_v8  ;;  %v1087_v38 = vrot.slane %v5889_v19, 1  ;;  %v1409_v19 = vsel %vm6061_vm7, 0, %v1408_v55  ;;  %v1435_v55 = vld [vmem:[#allocation2 + $0x74] sm:$0x1] }
  0xed   : > { %1410 = vst [vmem:[#allocation2 + $0x8] sm:$0x1] %v1409_v19  ;;  %v1389_v8 = vsel %vm6054_vm5, 0, %v1388_v6  ;;  %v1436_v19 = vsel %vm6061_vm7, 0, %v1435_v55 }
  0xee   : > { %1009 = vmatmul.mubr.bf16.gmra.mxu1 %v5938_v5  ;;  %v553_v20 = vsel %vm523_vm1, %v551_v22, %v552_v0  ;;  %v1089_v40 = vsel %vm523_vm1, %v1087_v38, %v1088_v33  ;;  %1390 = vst [vmem:[#allocation2 + $0x30] sm:$0x1] %v1389_v8  ;;  %v1401_v22 = vsel %vm6054_vm5, 0, %v1400_v39  ;;  %v1403_v33 = vld [vmem:[#allocation2 + $0x6c] sm:$0x1] }
  0xef   : > { %4593 = vmatprep.mubr.msk.bf16.mxu1 %vm554_vm2, %v5943_v10  ;;  %1224 = vmatpush2.bf16.msra.mxu0 %v5329_v23  ;;  %1402 = vst [vmem:[#allocation2 + $0x60] sm:$0x1] %v1401_v22  ;;  %1437 = vst [vmem:[#allocation2 + $0x74] sm:$0x1] %v1436_v19 }
  0xf2   : > { %845 = vmatmul.mubr.bf16.gmra.mxu0 %v577_v61 }
  0xf3   : > { %4574 = vmatprep.mubr.msk.bf16.mxu0 %vm554_vm2, %v550_v37 }
  0xf6   : > { %1017 = vmatmul.mubr.bf16.gmra.mxu1 %v5956_v16 }
  0xf7   : > { %4594 = vmatprep.mubr.msk.bf16.mxu1 %vm554_vm2, %v5961_v18 }
  0xfa   : > { %853 = vmatmul.mubr.bf16.gmra.mxu0 %v580_v42 }
  0xfb   : > { %4575 = vmatprep.mubr.msk.bf16.mxu0 %vm554_vm2, %v553_v20 }
  0xfe   : > { %1025 = vmatmul.mubr.bf16.gmra.mxu1 %v5972_v60 }
  0xff   : > { %4595 = vmatprep.mubr.msk.bf16.mxu1 %vm554_vm2, %v5977_v26 }
 0x102   : > { %861 = vmatmul.mubr.bf16.gmra.mxu0 %v583_v41 }
 0x103   : > { %4576 = vmatprep.mubr.msk.bf16.mxu0 %vm554_vm2, %v633_v21 }
 0x106   : > { %1033 = vmatmul.mubr.bf16.gmra.mxu1 %v574_v30 }
 0x107   : > { %4596 = vmatprep.mubr.msk.bf16.mxu1 %vm554_vm2, %v547_v32 }
 0x10a   : > { %869 = vmatmul.mubr.bf16.gmra.mxu0 %v635_v47 }
 0x10b   : > { %4613 = vmatprep.mubr.msk.bf16.mxu0 %vm554_vm2, %v5911_v51 }
 0x10e   : > { %1041 = vmatmul.mubr.bf16.gmra.mxu1 %v577_v61 }
 0x10f   : > { %4597 = vmatprep.mubr.msk.bf16.mxu1 %vm554_vm2, %v550_v37 }
 0x112   : > { %1226 = vmatmul.mubr.bf16.vlgmr.msra.gmra.mxu0 %v5922_v57  ;;  %v1411_v57 = vld [vmem:[#allocation2 + $0x14] sm:$0x1] }
 0x113   : > { %4614 = vmatprep.mubr.msk.bf16.mxu0 %vm554_vm2, %v5926_v59  ;;  %v1412_v58 = vsel %vm6061_vm7, 0, %v1411_v57  ;;  %v1383_v59 = vsel %vm6054_vm5, 0, %v1382_v1 }
 0x114   : > { %1413 = vst [vmem:[#allocation2 + $0x14] sm:$0x1] %v1412_v58  ;;  %1384 = vst [vmem:[#allocation2 + $0x18] sm:$0x1] %v1383_v59 }
 0x116   : > { %1049 = vmatmul.mubr.bf16.gmra.mxu1 %v580_v42 }
 0x117   : > { %4598 = vmatprep.mubr.msk.bf16.mxu1 %vm554_vm2, %v553_v20 }
 0x11a   : > { %1234 = vmatmul.mubr.bf16.gmra.mxu0 %v5938_v5  ;;  %v1418_v5 = vsel %vm6061_vm7, 0, %v1417_v63 }
 0x11b   : > { %4615 = vmatprep.mubr.msk.bf16.mxu0 %vm554_vm2, %v5943_v10  ;;  %1419 = vst [vmem:[#allocation2 + $0x2c] sm:$0x1] %v1418_v5  ;;  %v1420_v10 = vld [vmem:[#allocation2 + $0x38] sm:$0x1] }
 0x11c   : > { %v1421_v4 = vsel %vm6061_vm7, 0, %v1420_v10 }
 0x11d   : > { %1422 = vst [vmem:[#allocation2 + $0x38] sm:$0x1] %v1421_v4 }
 0x11e   : > { %1057 = vmatmul.mubr.bf16.gmra.mxu1 %v583_v41 }
 0x122   : > { %1242 = vmatmul.mubr.bf16.gmra.mxu0 %v5956_v16  ;;  %v1424_v16 = vsel %vm6061_vm7, 0, %v1423_v14 }
 0x123   : > { %4616 = vmatprep.mubr.msk.bf16.mxu0 %vm554_vm2, %v5961_v18  ;;  %1425 = vst [vmem:[#allocation2 + $0x44] sm:$0x1] %v1424_v16 }
 0x12a   : > { %1250 = vmatmul.mubr.bf16.gmra.mxu0 %v5972_v60 }
 0x12b   : > { %4617 = vmatprep.mubr.msk.bf16.mxu0 %vm554_vm2, %v5977_v26  ;;  %v1427_v26 = vsel %vm6061_vm7, 0, %v1426_v24 }
 0x12c   : > { %1428 = vst [vmem:[#allocation2 + $0x50] sm:$0x1] %v1427_v26 }
 0x132   : > { %1258 = vmatmul.mubr.bf16.gmra.mxu0 %v574_v30 }
 0x133   : > { %4618 = vmatprep.mubr.msk.bf16.mxu0 %vm554_vm2, %v547_v32  ;;  %v1429_v32 = vld [vmem:[#allocation2 + $0x5c] sm:$0x1] }
 0x134   : > { %v1430_v23 = vsel %vm6061_vm7, 0, %v1429_v32 }
 0x135   : > { %1431 = vst [vmem:[#allocation2 + $0x5c] sm:$0x1] %v1430_v23 }
 0x13a   : > { %1266 = vmatmul.mubr.bf16.gmra.mxu0 %v577_v61 }
 0x13b   : > { %4619 = vmatprep.mubr.msk.bf16.mxu0 %vm554_vm2, %v550_v37 }
 0x142   : > { %1274 = vmatmul.mubr.bf16.gmra.mxu0 %v580_v42 }
 0x143   : > { %4620 = vmatprep.mubr.msk.bf16.mxu0 %vm554_vm2, %v553_v20 }
 0x14a   : > { %1282 = vmatmul.mubr.bf16.gmra.mxu0 %v583_v41  ;;  %v1433_v41 = vsel %vm6061_vm7, 0, %v1432_v45 }
 0x14b   : > { %4621 = vmatprep.mubr.msk.bf16.mxu0 %vm554_vm2, %v633_v21  ;;  %1434 = vst [vmem:[#allocation2 + $0x68] sm:$0x1] %v1433_v41 }
 0x152   : > { %1290 = vmatmul.mubr.bf16.gmra.mxu0 %v635_v47 }
 0x153   : > { %4622 = vmatprep.mubr.msk.bf16.mxu0 %vm554_vm2, %v1089_v40  ;;  %v1404_v40 = vsel %vm6054_vm5, 0, %v1403_v33 }
 0x154   : > { %1405 = vst [vmem:[#allocation2 + $0x6c] sm:$0x1] %v1404_v40 }
 0x15a   : > { %1298 = vmatmul.mubr.bf16.gmra.mxu0 %v1091_v50 }
 0x182   : > { %v6085_v28 = vpop.f32.mrf.mxu0 }
 0x184   : > { %v800_v52 = vpop.f32.mrf.mxu0 }
 0x186   : > { %v6089_v17 = vpop.f32.mrf.mxu0 }
 0x188   : > { %v803_v18 = vpop.f32.mrf.mxu0 }
 0x18a   : > { %v6093_v49 = vpop.f32.mrf.mxu0 }
 0x18c   : > { %v808_v60 = vpop.f32.mrf.mxu0 }
 0x18e   : > { %v6097_v9 = vpop.f32.mrf.mxu0 }
 0x190   : > { %v811_v27 = vpop.f32.mrf.mxu0 }
 0x192   : > { %v6101_v30 = vpop.f32.mrf.mxu0 }
 0x194   : > { %v816_v31 = vpop.f32.mrf.mxu0 }
 0x196   : > { %v6105_v35 = vpop.f32.mrf.mxu0  ;;  %v6107_v36 = vpop.f32.mrf.mxu1 }
 0x197   : > { %v987_v33 = vadd.f32 %v6107_v36, %v6085_v28 }
 0x198   : > { %v819_v61 = vpop.f32.mrf.mxu0  ;;  %v988_v37 = vpop.f32.mrf.mxu1 }
 0x19a   : > { %v6111_v0 = vpop.f32.mrf.mxu0  ;;  %v6113_v42 = vpop.f32.mrf.mxu1 }
 0x19c   : > { %v824_v20 = vpop.f32.mrf.mxu0  ;;  %v991_v43 = vpop.f32.mrf.mxu1 }
 0x19e   : > { %v6117_v21 = vpop.f32.mrf.mxu0  ;;  %v6119_v46 = vpop.f32.mrf.mxu1 }
 0x1a0   : > { %v827_v47 = vpop.f32.mrf.mxu0  ;;  %v996_v38 = vpop.f32.mrf.mxu1 }
 0x1a2   : > { %v6123_v48 = vpop.f32.mrf.mxu0  ;;  %v6125_v50 = vpop.f32.mrf.mxu1 }
 0x1a4   : > { %v832_v53 = vpop.f32.mrf.mxu0  ;;  %v999_v25 = vpop.f32.mrf.mxu1 }
 0x1a5   : > { %v6177_v25 = vld [vmem:[#allocation5] ss:$0 sm:$0xff] }
 0x1a6   : > { %v6129_v56 = vpop.f32.mrf.mxu0  ;;  %v6131_v7 = vpop.f32.mrf.mxu1 }
 0x1a8   : > { %v835_v57 = vpop.f32.mrf.mxu0  ;;  %v1004_v58 = vpop.f32.mrf.mxu1 }
 0x1a9   : > { %v990_v58 = vadd.f32 %v6113_v42, %v6089_v17 }
 0x1aa   : > { %v6133_v1 = vpop.f32.mrf.mxu0  ;;  %v6135_v59 = vpop.f32.mrf.mxu1 }
 0x1ac   : > { %v840_v62 = vpop.f32.mrf.mxu0  ;;  %v1007_v34 = vpop.f32.mrf.mxu1 }
 0x1ae   : > { %v6137_v2 = vpop.f32.mrf.mxu0  ;;  %v6139_v3 = vpop.f32.mrf.mxu1 }
 0x1b0   : > { %v843_v63 = vpop.f32.mrf.mxu0  ;;  %v1012_v54 = vpop.f32.mrf.mxu1 }
 0x1b2   : > { %v6141_v5 = vpop.f32.mrf.mxu0  ;;  %v6143_v6 = vpop.f32.mrf.mxu1 }
 0x1b4   : > { %v848_v8 = vpop.f32.mrf.mxu0  ;;  %v1015_v10 = vpop.f32.mrf.mxu1 }
 0x1b6   : > { %v6145_v4 = vpop.f32.mrf.mxu0  ;;  %v6147_v11 = vpop.f32.mrf.mxu1 }
 0x1b8   : > { %v851_v12 = vpop.f32.mrf.mxu0  ;;  %v1020_v52 = vpop.f32.mrf.mxu1 }
 0x1b9   : > { %v995_v52 = vadd.f32 %v6119_v46, %v6093_v49  ;;  %v1702_v49 = vld [vmem:[#allocation2] sm:$0xf] }
 0x1ba   : > { %v6149_v14 = vpop.f32.mrf.mxu0  ;;  %v6151_v16 = vpop.f32.mrf.mxu1 }
 0x1bc   : > { %v856_v18 = vpop.f32.mrf.mxu0  ;;  %v1023_v15 = vpop.f32.mrf.mxu1 }
 0x1be   : > { %v6153_v44 = vpop.f32.mrf.mxu0  ;;  %v6155_v60 = vpop.f32.mrf.mxu1 }
 0x1c0   : > { %v859_v24 = vpop.f32.mrf.mxu0  ;;  %v1028_v26 = vpop.f32.mrf.mxu1 }
 0x1c2   : > { %v6157_v27 = vpop.f32.mrf.mxu0  ;;  %v6159_v13 = vpop.f32.mrf.mxu1 }
 0x1c4   : > { %v864_v29 = vpop.f32.mrf.mxu0  ;;  %v1031_v31 = vpop.f32.mrf.mxu1 }
 0x1c6   : > { %v6161_v32 = vpop.f32.mrf.mxu0  ;;  %v6163_v23 = vpop.f32.mrf.mxu1 }
 0x1c8   : > { %v867_v61 = vpop.f32.mrf.mxu0  ;;  %v1036_v37 = vpop.f32.mrf.mxu1 }
 0x1ca   : > { %v6165_v39 = vpop.f32.mrf.mxu0  ;;  %v6167_v22 = vpop.f32.mrf.mxu1 }
 0x1cc   : > { %v872_v20 = vpop.f32.mrf.mxu0  ;;  %v1039_v43 = vpop.f32.mrf.mxu1 }
 0x1cd   : > { %v998_v20 = vadd.f32 %v6125_v50, %v6097_v9  ;;  %v1003_v9 = vadd.f32 %v6131_v7, %v6101_v30 }
 0x1ce   : > { %v6169_v45 = vpop.f32.mrf.mxu0  ;;  %v6171_v41 = vpop.f32.mrf.mxu1 }
 0x1d0   : > { %v875_v47 = vpop.f32.mrf.mxu0  ;;  %v1044_v38 = vpop.f32.mrf.mxu1 }
 0x1d2   : > { %v6175_v40 = vpop.f32.mrf.mxu1  ;;  %v1227_v53 = vpop.f32.mrf.mxu0 }
 0x1d3   : > { %v1306_v55 = vadd.f32 %v1227_v53, %v987_v33 }
 0x1d4   : > { %v1047_v19 = vpop.f32.mrf.mxu1  ;;  %v1229_v57 = vpop.f32.mrf.mxu0 }
 0x1d5   : > { %v1333_v62 = vadd.f32 %v6177_v25, %v1306_v55 }
 0x1d6   : > { %v6182_v34 = vpop.f32.mrf.mxu1  ;;  %v1230_v63 = vpop.f32.mrf.mxu0 }
 0x1d7   : > { %v1353_v54 = vmax.f32 %v1333_v62, 0.0  ;;  %v1307_v8 = vadd.f32 %v1230_v63, %v990_v58 }
 0x1d8   : > { %v1052_v10 = vpop.f32.mrf.mxu1  ;;  %v1232_v28 = vpop.f32.mrf.mxu0 }
 0x1d9   : > { %v4826_v36 = vpack.c.bf16 %v1353_v54, %v1353_v54  ;;  %v1334_v12 = vadd.f32 %v6177_v25, %v1307_v8  ;;  %v1706_v8 = vld [vmem:[#allocation2 + $0x8] sm:$0x1] }
 0x1da   : > { %v6187_v18 = vpop.f32.mrf.mxu1  ;;  %v1235_v15 = vpop.f32.mrf.mxu0 }
 0x1db   : > { %v1501_v24 = vshrl.u32 %v4826_v36, 16  ;;  %v1354_v17 = vmax.f32 %v1334_v12, 0.0  ;;  %v1308_v42 = vadd.f32 %v1235_v15, %v995_v52  ;;  %v1504_v61 = vshll.u32 %v4826_v36, 16 }
 0x1dc   : > { %v1055_v26 = vpop.f32.mrf.mxu1  ;;  %v1237_v29 = vpop.f32.mrf.mxu0 }
 0x1dd   : > { %v1503_v31 = vrot.slane %v1501_v24, 7  ;;  %v4827_v37 = vpack.c.bf16 %v1354_v17, %v1354_v17  ;;  %v1335_v46 = vadd.f32 %v6177_v25, %v1308_v42  ;;  %v1006_v29 = vadd.f32 %v6135_v59, %v6105_v35 }
 0x1de   : > { %v6197_v47 = vpop.f32.mrf.mxu1  ;;  %v1238_v38 = vpop.f32.mrf.mxu0  ;;  %v1011_v59 = vadd.f32 %v6139_v3, %v6111_v0 }
 0x1df   : > { %v1506_v33 = vor.u32 %v1504_v61, %v1503_v31  ;;  %v1509_v53 = vshrl.u32 %v4827_v37, 16  ;;  %v1355_v55 = vmax.f32 %v1335_v46, 0.0  ;;  %v1309_v19 = vadd.f32 %v1238_v38, %v998_v20 }
 0x1e0   : > { %v1060_v57 = vpop.f32.mrf.mxu1  ;;  %v1240_v58 = vpop.f32.mrf.mxu0  ;;  %v1512_v63 = vshll.u32 %v4827_v37, 16  ;;  %v1507_v52 = vrot.slane %v1503_v31, 4 }
 0x1e1   : > { %v1703_v50 = vsel %vm6192_vm9, %v1506_v33, %v1702_v49  ;;  %v1511_v62 = vrot.slane %v1509_v53, 7  ;;  %v4828_v10 = vpack.c.bf16 %v1355_v55, %v1355_v55  ;;  %v1336_v28 = vadd.f32 %v6177_v25, %v1309_v19  ;;  %v1709_v33 = vld [vmem:[#allocation2 + $0xc] sm:$0xf] }
 0x1e2   : > { %1704 = vst [vmem:[#allocation2] sm:$0xf] %v1703_v50  ;;  %v6209_v36 = vpop.f32.mrf.mxu1  ;;  %v1243_v12 = vpop.f32.mrf.mxu0 }
 0x1e3   : > { %v1514_v30 = vor.u32 %v1512_v63, %v1511_v62  ;;  %v1516_v7 = vrot.slane %v1511_v62, 4  ;;  %v1310_v15 = vadd.f32 %v1243_v12, %v1003_v9  ;;  %v1518_v24 = vshrl.u32 %v4828_v10, 16 }
 0x1e4   : > { %v1356_v17 = vmax.f32 %v1336_v28, 0.0  ;;  %v1063_v42 = vpop.f32.mrf.mxu1  ;;  %v1245_v26 = vpop.f32.mrf.mxu0  ;;  %v1521_v49 = vshll.u32 %v4828_v10, 16  ;;  %v1713_v10 = vld [vmem:[#allocation2 + $0x14] sm:$0x1] }
 0x1e5   : > { %v1515_v61 = vsel %vm6204_vm11, %v1507_v52, %v1514_v30  ;;  %v1707_v37 = vsel %vm6054_vm5, %v1516_v7, %v1706_v8  ;;  %v1337_v20 = vadd.f32 %v6177_v25, %v1310_v15  ;;  %v1520_v31 = vrot.slane %v1518_v24, 7 }
 0x1e6   : > { %1705 = vst [vmem:[#allocation2 + $0x4] sm:$0xf] %v1515_v61  ;;  %1708 = vst [vmem:[#allocation2 + $0x8] sm:$0x1] %v1707_v37  ;;  %v4829_v46 = vpack.c.bf16 %v1356_v17, %v1356_v17  ;;  %v1246_v38 = vpop.f32.mrf.mxu0  ;;  %v1014_v26 = vadd.f32 %v6143_v6, %v6117_v21  ;;  %v1716_v37 = vld [vmem:[#allocation2 + $0x18] sm:$0xf] }
 0x1e7   : > { %v1357_v53 = vmax.f32 %v1337_v20, 0.0  ;;  %v1311_v55 = vadd.f32 %v1246_v38, %v1006_v29  ;;  %v1523_v19 = vor.u32 %v1521_v49, %v1520_v31  ;;  %v1524_v30 = vrot.slane %v1520_v31, 4 }
 0x1e8   : > { %v1526_v57 = vshrl.u32 %v4829_v46, 16  ;;  %v1248_v35 = vpop.f32.mrf.mxu0  ;;  %v1529_v63 = vshll.u32 %v4829_v46, 16 }
 0x1e9   : > { %v4830_v58 = vpack.c.bf16 %v1357_v53, %v1357_v53  ;;  %v1338_v9 = vadd.f32 %v6177_v25, %v1311_v55  ;;  %v1710_v50 = vsel %vm6192_vm9, %v1523_v19, %v1709_v33  ;;  %v1019_v53 = vadd.f32 %v6147_v11, %v6123_v48  ;;  %v1720_v19 = vld [vmem:[#allocation2 + $0x20] sm:$0x1] }
 0x1ea   : > { %v1528_v62 = vrot.slane %v1526_v57, 7  ;;  %v1251_v8 = vpop.f32.mrf.mxu0  ;;  %1711 = vst [vmem:[#allocation2 + $0xc] sm:$0xf] %v1710_v50  ;;  %v1022_v48 = vadd.f32 %v6151_v16, %v6129_v56  ;;  %v1027_v16 = vadd.f32 %v6155_v60, %v6133_v1 }
 0x1eb   : > { %v1535_v28 = vshrl.u32 %v4830_v58, 16  ;;  %v1358_v12 = vmax.f32 %v1338_v9, 0.0  ;;  %v1312_v52 = vadd.f32 %v1251_v8, %v1011_v59  ;;  %v1538_v0 = vshll.u32 %v4830_v58, 16 }
 0x1ec   : > { %v1531_v7 = vor.u32 %v1529_v63, %v1528_v62  ;;  %v1533_v15 = vrot.slane %v1528_v62, 4  ;;  %v1253_v24 = vpop.f32.mrf.mxu0 }
 0x1ed   : > { %v1537_v17 = vrot.slane %v1535_v28, 7  ;;  %v4831_v3 = vpack.c.bf16 %v1358_v12, %v1358_v12  ;;  %v1339_v42 = vadd.f32 %v6177_v25, %v1312_v52  ;;  %v1723_v24 = vld [vmem:[#allocation2 + $0x24] sm:$0xf] }
 0x1ee   : > { %v1532_v29 = vsel %vm6204_vm11, %v1524_v30, %v1531_v7  ;;  %v1714_v61 = vsel %vm6054_vm5, %v1533_v15, %v1713_v10  ;;  %v1254_v20 = vpop.f32.mrf.mxu0 }
 0x1ef   : > { %1712 = vst [vmem:[#allocation2 + $0x10] sm:$0xf] %v1532_v29  ;;  %1715 = vst [vmem:[#allocation2 + $0x14] sm:$0x1] %v1714_v61  ;;  %v1540_v31 = vor.u32 %v1538_v0, %v1537_v17  ;;  %v1543_v49 = vshrl.u32 %v4831_v3, 16  ;;  %v1359_v46 = vmax.f32 %v1339_v42, 0.0  ;;  %v1313_v38 = vadd.f32 %v1254_v20, %v1014_v26 }
 0x1f0   : > { %v1256_v33 = vpop.f32.mrf.mxu0  ;;  %v1546_v55 = vshll.u32 %v4831_v3, 16  ;;  %v1541_v58 = vrot.slane %v1537_v17, 4 }
 0x1f1   : > { %v1717_v21 = vsel %vm6192_vm9, %v1540_v31, %v1716_v37  ;;  %v1545_v6 = vrot.slane %v1543_v49, 7  ;;  %v4832_v57 = vpack.c.bf16 %v1359_v46, %v1359_v46  ;;  %v1340_v35 = vadd.f32 %v6177_v25, %v1313_v38  ;;  %v1727_v49 = vld [vmem:[#allocation2 + $0x2c] sm:$0x1] }
 0x1f2   : > { %1718 = vst [vmem:[#allocation2 + $0x18] sm:$0xf] %v1717_v21  ;;  %v1259_v59 = vpop.f32.mrf.mxu0 }
 0x1f3   : > { %v1548_v9 = vor.u32 %v1546_v55, %v1545_v6  ;;  %v1550_v50 = vrot.slane %v1545_v6, 4  ;;  %v1314_v62 = vadd.f32 %v1259_v59, %v1019_v53  ;;  %v1552_v63 = vshrl.u32 %v4832_v57, 16 }
 0x1f4   : > { %v1360_v8 = vmax.f32 %v1340_v35, 0.0  ;;  %v1261_v10 = vpop.f32.mrf.mxu0  ;;  %v1555_v30 = vshll.u32 %v4832_v57, 16  ;;  %v1030_v35 = vadd.f32 %v6159_v13, %v6137_v2 }
 0x1f5   : > { %v1549_v11 = vsel %vm6204_vm11, %v1541_v58, %v1548_v9  ;;  %v1721_v28 = vsel %vm6054_vm5, %v1550_v50, %v1720_v19  ;;  %v1341_v12 = vadd.f32 %v6177_v25, %v1314_v62  ;;  %v1554_v52 = vrot.slane %v1552_v63, 7  ;;  %v1730_v9 = vld [vmem:[#allocation2 + $0x30] sm:$0xf] }
 0x1f6   : > { %1719 = vst [vmem:[#allocation2 + $0x1c] sm:$0xf] %v1549_v11  ;;  %1722 = vst [vmem:[#allocation2 + $0x20] sm:$0x1] %v1721_v28  ;;  %v4833_v7 = vpack.c.bf16 %v1360_v8, %v1360_v8  ;;  %v1262_v15 = vpop.f32.mrf.mxu0  ;;  %v1035_v11 = vadd.f32 %v6163_v23, %v6141_v5  ;;  %v1038_v5 = vadd.f32 %v6167_v22, %v6145_v4 }
 0x1f7   : > { %v1361_v17 = vmax.f32 %v1341_v12, 0.0  ;;  %v1315_v0 = vadd.f32 %v1262_v15, %v1022_v48  ;;  %v1557_v3 = vor.u32 %v1555_v30, %v1554_v52  ;;  %v1558_v53 = vrot.slane %v1554_v52, 4  ;;  %v1734_v12 = vld [vmem:[#allocation2 + $0x38] sm:$0x1] }
 0x1f8   : > { %v1560_v42 = vshrl.u32 %v4833_v7, 16  ;;  %v1264_v56 = vpop.f32.mrf.mxu0  ;;  %v1563_v20 = vshll.u32 %v4833_v7, 16  ;;  %v1043_v22 = vadd.f32 %v6171_v41, %v6149_v14 }
 0x1f9   : > { %v4834_v26 = vpack.c.bf16 %v1361_v17, %v1361_v17  ;;  %v1342_v29 = vadd.f32 %v6177_v25, %v1315_v0  ;;  %v1724_v61 = vsel %vm6192_vm9, %v1557_v3, %v1723_v24 }
 0x1fa   : > { %v1562_v37 = vrot.slane %v1560_v42, 7  ;;  %v1267_v31 = vpop.f32.mrf.mxu0  ;;  %1725 = vst [vmem:[#allocation2 + $0x24] sm:$0xf] %v1724_v61 }
 0x1fb   : > { %v1569_v46 = vshrl.u32 %v4834_v26, 16  ;;  %v1362_v38 = vmax.f32 %v1342_v29, 0.0  ;;  %v1316_v33 = vadd.f32 %v1267_v31, %v1027_v16  ;;  %v1572_v1 = vshll.u32 %v4834_v26, 16  ;;  %v1737_v31 = vld [vmem:[#allocation2 + $0x3c] sm:$0xf] }
 0x1fc   : > { %v1565_v21 = vor.u32 %v1563_v20, %v1562_v37  ;;  %v1567_v6 = vrot.slane %v1562_v37, 4  ;;  %v1269_v55 = vpop.f32.mrf.mxu0 }
 0x1fd   : > { %v1571_v19 = vrot.slane %v1569_v46, 7  ;;  %v4835_v60 = vpack.c.bf16 %v1362_v38, %v1362_v38  ;;  %v1343_v57 = vadd.f32 %v6177_v25, %v1316_v33 }
 0x1fe   : > { %v1566_v59 = vsel %vm6204_vm11, %v1558_v53, %v1565_v21  ;;  %v1728_v58 = vsel %vm6054_vm5, %v1567_v6, %v1727_v49  ;;  %v1270_v50 = vpop.f32.mrf.mxu0 }
 0x1ff   : > { %1726 = vst [vmem:[#allocation2 + $0x28] sm:$0xf] %v1566_v59  ;;  %1729 = vst [vmem:[#allocation2 + $0x2c] sm:$0x1] %v1728_v58  ;;  %v1574_v62 = vor.u32 %v1572_v1, %v1571_v19  ;;  %v1577_v63 = vshrl.u32 %v4835_v60, 16  ;;  %v1363_v8 = vmax.f32 %v1343_v57, 0.0  ;;  %v1317_v10 = vadd.f32 %v1270_v50, %v1030_v35 }
 0x200   : > { %v1272_v48 = vpop.f32.mrf.mxu0  ;;  %v1580_v28 = vshll.u32 %v4835_v60, 16  ;;  %v1575_v15 = vrot.slane %v1571_v19, 4  ;;  %v1741_v60 = vld [vmem:[#allocation2 + $0x44] sm:$0x1] }
 0x201   : > { %v1731_v2 = vsel %vm6192_vm9, %v1574_v62, %v1730_v9  ;;  %v1579_v13 = vrot.slane %v1577_v63, 7  ;;  %v4836_v52 = vpack.c.bf16 %v1363_v8, %v1363_v8  ;;  %v1344_v30 = vadd.f32 %v6177_v25, %v1317_v10 }
 0x202   : > { %1732 = vst [vmem:[#allocation2 + $0x30] sm:$0xf] %v1731_v2  ;;  %v1275_v7 = vpop.f32.mrf.mxu0  ;;  %v1046_v10 = vadd.f32 %v6175_v40, %v6153_v44  ;;  %v1744_v2 = vld [vmem:[#allocation2 + $0x48] sm:$0xf] }
 0x203   : > { %v1582_v24 = vor.u32 %v1580_v28, %v1579_v13  ;;  %v1584_v17 = vrot.slane %v1579_v13, 4  ;;  %v1318_v0 = vadd.f32 %v1275_v7, %v1035_v11  ;;  %v1586_v3 = vshrl.u32 %v4836_v52, 16 }
 0x204   : > { %v1364_v42 = vmax.f32 %v1344_v30, 0.0  ;;  %v1277_v56 = vpop.f32.mrf.mxu0  ;;  %v1589_v61 = vshll.u32 %v4836_v52, 16 }
 0x205   : > { %v1583_v23 = vsel %vm6204_vm11, %v1575_v15, %v1582_v24  ;;  %v1735_v16 = vsel %vm6054_vm5, %v1584_v17, %v1734_v12  ;;  %v1345_v26 = vadd.f32 %v6177_v25, %v1318_v0  ;;  %v1588_v29 = vrot.slane %v1586_v3, 7  ;;  %v1748_v17 = vld [vmem:[#allocation2 + $0x50] sm:$0x1] }
 0x206   : > { %1733 = vst [vmem:[#allocation2 + $0x34] sm:$0xf] %v1583_v23  ;;  %1736 = vst [vmem:[#allocation2 + $0x38] sm:$0x1] %v1735_v16  ;;  %v4837_v37 = vpack.c.bf16 %v1364_v42, %v1364_v42  ;;  %v1278_v20 = vpop.f32.mrf.mxu0  ;;  %v1051_v15 = vadd.f32 %v6182_v34, %v6157_v27  ;;  %v1054_v27 = vadd.f32 %v6187_v18, %v6161_v32 }
 0x207   : > { %v1365_v49 = vmax.f32 %v1345_v26, 0.0  ;;  %v1319_v46 = vadd.f32 %v1278_v20, %v1038_v5  ;;  %v1591_v38 = vor.u32 %v1589_v61, %v1588_v29  ;;  %v1592_v58 = vrot.slane %v1588_v29, 4 }
 0x208   : > { %v1594_v33 = vshrl.u32 %v4837_v37, 16  ;;  %v1280_v4 = vpop.f32.mrf.mxu0  ;;  %v1597_v19 = vshll.u32 %v4837_v37, 16  ;;  %v1059_v18 = vadd.f32 %v6197_v47, %v6165_v39 }
 0x209   : > { %v4838_v53 = vpack.c.bf16 %v1365_v49, %v1365_v49  ;;  %v1346_v21 = vadd.f32 %v6177_v25, %v1319_v46  ;;  %v1738_v6 = vsel %vm6192_vm9, %v1591_v38, %v1737_v31 }
 0x20a   : > { %v1596_v55 = vrot.slane %v1594_v33, 7  ;;  %v1283_v1 = vpop.f32.mrf.mxu0  ;;  %1739 = vst [vmem:[#allocation2 + $0x3c] sm:$0xf] %v1738_v6  ;;  %v1751_v33 = vld [vmem:[#allocation2 + $0x54] sm:$0xf] }
 0x20b   : > { %v1603_v57 = vshrl.u32 %v4838_v53, 16  ;;  %v1366_v35 = vmax.f32 %v1346_v21, 0.0  ;;  %v1320_v59 = vadd.f32 %v1283_v1, %v1043_v22  ;;  %v1606_v14 = vshll.u32 %v4838_v53, 16 }
 0x20c   : > { %v1599_v9 = vor.u32 %v1597_v19, %v1596_v55  ;;  %v1601_v50 = vrot.slane %v1596_v55, 4  ;;  %v1285_v62 = vpop.f32.mrf.mxu0 }
 0x20d   : > { %v1605_v63 = vrot.slane %v1603_v57, 7  ;;  %v4839_v41 = vpack.c.bf16 %v1366_v35, %v1366_v35  ;;  %v1347_v8 = vadd.f32 %v6177_v25, %v1320_v59  ;;  %v1755_v35 = vld [vmem:[#allocation2 + $0x5c] sm:$0x1] }
 0x20e   : > { %v1600_v48 = vsel %vm6204_vm11, %v1592_v58, %v1599_v9  ;;  %v1742_v11 = vsel %vm6054_vm5, %v1601_v50, %v1741_v60  ;;  %v1286_v13 = vpop.f32.mrf.mxu0 }
 0x20f   : > { %1740 = vst [vmem:[#allocation2 + $0x40] sm:$0xf] %v1600_v48  ;;  %1743 = vst [vmem:[#allocation2 + $0x44] sm:$0x1] %v1742_v11  ;;  %v1608_v28 = vor.u32 %v1606_v14, %v1605_v63  ;;  %v1611_v12 = vshrl.u32 %v4839_v41, 16  ;;  %v1367_v52 = vmax.f32 %v1347_v8, 0.0  ;;  %v1321_v30 = vadd.f32 %v1286_v13, %v1046_v10 }
 0x210   : > { %v1288_v7 = vpop.f32.mrf.mxu0  ;;  %v1614_v24 = vshll.u32 %v4839_v41, 16  ;;  %v1609_v56 = vrot.slane %v1605_v63, 4  ;;  %v1062_v10 = vadd.f32 %v6209_v36, %v6169_v45  ;;  %v1762_v36 = vld [vmem:[#allocation2 + $0x68] sm:$0x1] }
 0x211   : > { %v1745_v44 = vsel %vm6192_vm9, %v1608_v28, %v1744_v2  ;;  %v1613_v40 = vrot.slane %v1611_v12, 7  ;;  %v4840_v0 = vpack.c.bf16 %v1367_v52, %v1367_v52  ;;  %v1348_v3 = vadd.f32 %v6177_v25, %v1321_v30  ;;  %v1758_v2 = vld [vmem:[#allocation2 + $0x60] sm:$0xf] }
 0x212   : > { %1746 = vst [vmem:[#allocation2 + $0x48] sm:$0xf] %v1745_v44  ;;  %v1291_v42 = vpop.f32.mrf.mxu0 }
 0x213   : > { %v1616_v5 = vor.u32 %v1614_v24, %v1613_v40  ;;  %v1618_v23 = vrot.slane %v1613_v40, 4  ;;  %v1322_v16 = vadd.f32 %v1291_v42, %v1051_v15  ;;  %v1620_v26 = vshrl.u32 %v4840_v0, 16 }
 0x214   : > { %v1368_v29 = vmax.f32 %v1348_v3, 0.0  ;;  %v1293_v61 = vpop.f32.mrf.mxu0  ;;  %v1623_v49 = vshll.u32 %v4840_v0, 16 }
 0x215   : > { %v1617_v34 = vsel %vm6204_vm11, %v1609_v56, %v1616_v5  ;;  %v1749_v37 = vsel %vm6054_vm5, %v1618_v23, %v1748_v17  ;;  %v1349_v20 = vadd.f32 %v6177_v25, %v1322_v16  ;;  %v1622_v31 = vrot.slane %v1620_v26, 7  ;;  %v1765_v61 = vld [vmem:[#allocation2 + $0x6c] sm:$0xf] }
 0x216   : > { %1747 = vst [vmem:[#allocation2 + $0x4c] sm:$0xf] %v1617_v34  ;;  %1750 = vst [vmem:[#allocation2 + $0x50] sm:$0x1] %v1749_v37  ;;  %v4841_v46 = vpack.c.bf16 %v1368_v29, %v1368_v29  ;;  %v1294_v38 = vpop.f32.mrf.mxu0 }
 0x217   : > { %v1369_v4 = vmax.f32 %v1349_v20, 0.0  ;;  %v1323_v22 = vadd.f32 %v1294_v38, %v1054_v27  ;;  %v1625_v53 = vor.u32 %v1623_v49, %v1622_v31  ;;  %v1626_v50 = vrot.slane %v1622_v31, 4  ;;  %v1769_v31 = vld [vmem:[#allocation2 + $0x74] sm:$0x1] }
 0x218   : > { %v1628_v21 = vshrl.u32 %v4841_v46, 16  ;;  %v1296_v32 = vpop.f32.mrf.mxu0  ;;  %v1631_v60 = vshll.u32 %v4841_v46, 16 }
 0x219   : > { %v4842_v6 = vpack.c.bf16 %v1369_v4, %v1369_v4  ;;  %v1350_v55 = vadd.f32 %v6177_v25, %v1323_v22  ;;  %v1752_v19 = vsel %vm6192_vm9, %v1625_v53, %v1751_v33 }
 0x21a   : > { %v1630_v1 = vrot.slane %v1628_v21, 7  ;;  %v1299_v57 = vpop.f32.mrf.mxu0  ;;  %1753 = vst [vmem:[#allocation2 + $0x54] sm:$0xf] %v1752_v19 }
 0x21b   : > { %v1637_v59 = vshrl.u32 %v4842_v6, 16  ;;  %v1370_v58 = vmax.f32 %v1350_v55, 0.0  ;;  %v1324_v9 = vadd.f32 %v1299_v57, %v1059_v18  ;;  %v1640_v39 = vshll.u32 %v4842_v6, 16 }
 0x21c   : > { %v1633_v62 = vor.u32 %v1631_v60, %v1630_v1  ;;  %v1635_v63 = vrot.slane %v1630_v1, 4  ;;  %v1301_v14 = vpop.f32.mrf.mxu0 }
 0x21d   : > { %v1639_v41 = vrot.slane %v1637_v59, 7  ;;  %v4843_v47 = vpack.c.bf16 %v1370_v58, %v1370_v58  ;;  %v1351_v8 = vadd.f32 %v6177_v25, %v1324_v9 }
 0x21e   : > { %v1634_v48 = vsel %vm6204_vm11, %v1626_v50, %v1633_v62  ;;  %v1756_v11 = vsel %vm6054_vm5, %v1635_v63, %v1755_v35  ;;  %v1302_v13 = vpop.f32.mrf.mxu0 }
 0x21f   : > { %1754 = vst [vmem:[#allocation2 + $0x58] sm:$0xf] %v1634_v48  ;;  %1757 = vst [vmem:[#allocation2 + $0x5c] sm:$0x1] %v1756_v11  ;;  %v1642_v28 = vor.u32 %v1640_v39, %v1639_v41  ;;  %v1645_v12 = vshrl.u32 %v4843_v47, 16  ;;  %v1371_v52 = vmax.f32 %v1351_v8, 0.0  ;;  %v1325_v30 = vadd.f32 %v1302_v13, %v1062_v10 }
 0x220   : > { %v1304_v7 = vpop.f32.mrf.mxu0  ;;  %v1648_v45 = vshll.u32 %v4843_v47, 16  ;;  %v1643_v17 = vrot.slane %v1639_v41, 4 }
 0x221   : > { %v1759_v15 = vsel %vm6192_vm9, %v1642_v28, %v1758_v2  ;;  %v1647_v44 = vrot.slane %v1645_v12, 7  ;;  %v4844_v40 = vpack.c.bf16 %v1371_v52, %v1371_v52  ;;  %v1352_v24 = vadd.f32 %v6177_v25, %v1325_v30 }
 0x222   : > { %1760 = vst [vmem:[#allocation2 + $0x60] sm:$0xf] %v1759_v15 }
 0x223   : > { %v1650_v0 = vor.u32 %v1648_v45, %v1647_v44  ;;  %v1652_v3 = vrot.slane %v1647_v44, 4  ;;  %v1654_v42 = vshrl.u32 %v4844_v40, 16  ;;  %v1372_v56 = vmax.f32 %v1352_v24, 0.0 }
 0x224   : > { %v1657_v26 = vshll.u32 %v4844_v40, 16 }
 0x225   : > { %v1651_v5 = vsel %vm6204_vm11, %v1643_v17, %v1650_v0  ;;  %v1763_v23 = vsel %vm6054_vm5, %v1652_v3, %v1762_v36  ;;  %v1656_v16 = vrot.slane %v1654_v42, 7  ;;  %v4845_v29 = vpack.c.bf16 %v1372_v56, %v1372_v56 }
 0x226   : > { %1761 = vst [vmem:[#allocation2 + $0x64] sm:$0xf] %v1651_v5  ;;  %1764 = vst [vmem:[#allocation2 + $0x68] sm:$0x1] %v1763_v23 }
 0x227   : > { %v1659_v27 = vor.u32 %v1657_v26, %v1656_v16  ;;  %v1662_v34 = vshrl.u32 %v4845_v29, 16  ;;  %v1665_v20 = vshll.u32 %v4845_v29, 16  ;;  %v1660_v49 = vrot.slane %v1656_v16, 4 }
 0x229   : > { %v1766_v25 = vsel %vm6192_vm9, %v1659_v27, %v1765_v61  ;;  %v1664_v37 = vrot.slane %v1662_v34, 7 }
 0x22a   : > { %1767 = vst [vmem:[#allocation2 + $0x6c] sm:$0xf] %v1766_v25  ;;  %1775 = sbr.rel (%p4644_p2) target bundleno = 562 (0x232), region = 60 }
 0x22b   : > { %v1667_v46 = vor.u32 %v1665_v20, %v1664_v37  ;;  %v1669_v38 = vrot.slane %v1664_v37, 4 }
 0x22d   : > { %v1668_v33 = vsel %vm6204_vm11, %v1660_v49, %v1667_v46  ;;  %v1770_v4 = vsel %vm6054_vm5, %v1669_v38, %v1769_v31 }
 0x22e   : > { %1768 = vst [vmem:[#allocation2 + $0x70] sm:$0xf] %v1668_v33  ;;  %1771 = vst [vmem:[#allocation2 + $0x74] sm:$0x1] %v1770_v4 }
 0x22f   : > { %v5606_v43 = vmov 0  }
 0x230   : > { %1776 = vst [vmem:[#allocation2] sm:$0xf] %v5606_v43  ;;  %1777 = vst [vmem:[#allocation2 + $0x4] sm:$0xf] %v5606_v43 }
 0x231   : > { %1778 = vst [vmem:[#allocation2 + $0x8] sm:$0x1] %v5606_v43 }
 0x232 PF: > { %s1779_s9 = sadd.s32 8, %s4530_s25 }
 0x233   : > { %p4645_p5 = scmp.lt.s32.totalorder %s1779_s9, 16 }
 0x235   : > { %1783 = sbr.rel (%p4645_p5) target bundleno = 573 (0x23d), region = 64 }
 0x23a   : > { %v5607_v54 = vmov 0  }
 0x23b   : > { %1785 = vst [vmem:[#allocation2 + $0x6c] sm:$0xf] %v5607_v54  ;;  %1786 = vst [vmem:[#allocation2 + $0x70] sm:$0xf] %v5607_v54 }
 0x23c   : > { %1787 = vst [vmem:[#allocation2 + $0x74] sm:$0x1] %v5607_v54 }
 0x23d PF: > { %v5330_v51 = vld [vmem:[#allocation7 + $0x138] sm:$0xff]   ;;  %v5332_v53 = vld [vmem:[#allocation7 + $0x130] sm:$0xff]   ;;  %v5334_v32 = vld [vmem:[#allocation7 + $0x128] sm:$0xff]   ;;  %vm3965_vm12 = vcmask 1041408   ;;  %vm4382_vm13 = vcmask 1041409   ;;  %vm4384_vm14 = vcmask 1042434  }
 0x23e   : > { %v5331_v22 = vld [vmem:[#allocation7 + $0xf8] sm:$0xff]   ;;  %4878 = vmatprep.subr.bf16.mxu1 %v5330_v51  ;;  %v5333_v21 = vld [vmem:[#allocation7 + $0xf0] sm:$0xff]   ;;  %v5335_v18 = vld [vmem:[#allocation7 + $0xe8] sm:$0xff]   ;;  %vm4386_vm15 = vcmask 1043459   ;;  %vm4392_vm2 = vcmask 1046534   ;;  %vm4394_vm3 = vcmask 1047559  }
 0x23f   : > { %4879 = vmatpush3.bf16.msra.mxu1 %v5331_v22  ;;  %v5336_v6 = vld [vmem:[#allocation7 + $0x120] sm:$0xff]   ;;  %v5338_v19 = vld [vmem:[#allocation7 + $0x118] sm:$0xff]   ;;  %v5340_v60 = vld [vmem:[#allocation7 + $0x110] sm:$0xff]  }
 0x240   : > { %4880 = vmatprep.subr.bf16.mxu1 %v5332_v53  ;;  %v5337_v55 = vld [vmem:[#allocation7 + $0xe0] sm:$0xff]   ;;  %v5339_v1 = vld [vmem:[#allocation7 + $0xd8] sm:$0xff]   ;;  %v5341_v35 = vld [vmem:[#allocation7 + $0xd0] sm:$0xff]  }
 0x241   : > { %v5346_v57 = vld [vmem:[#allocation7 + $0x78] sm:$0xff]   ;;  %v2101_v59 = vld [vmem:[#allocation2 + $0xc] sm:$0xf]  ;;  %v5342_v63 = vld [vmem:[#allocation7 + $0x108] sm:$0xff]  }
 0x242   : > { %v6319_v58 = vld [vmem:[#allocation2 + $0x10] sm:$0xf]  ;;  %4958 = vmatprep.subr.bf16.mxu0 %v5346_v57  ;;  %v6322_v50 = vld [vmem:[#allocation2 + $0x14] ss:$0 sps:$4 sm:$0x11]   ;;  %v5343_v47 = vld [vmem:[#allocation7 + $0xc8] sm:$0xff]  }
 0x243   : > { %4881 = vmatpush3.bf16.msra.mxu1 %v5333_v21  ;;  %v4670_v9 = vcombine.low %v2101_v59, %v6319_v58  ;;  %v5349_v62 = vld [vmem:[#allocation7 + $0x38] sm:$0xff]   ;;  %v2213_v39 = vshll.u32 %v6322_v50, 16  ;;  %v5351_v8 = vld [vmem:[#allocation7 + $0x70] sm:$0xff]   ;;  %v5344_v10 = vld [vmem:[#allocation7 + $0x100] sm:$0xff]  }
 0x244   : > { %4882 = vmatprep.subr.bf16.mxu1 %v5334_v32  ;;  %4959 = vmatpush3.bf16.msra.mxu0 %v5349_v62  ;;  %v5352_v2 = vld [vmem:[#allocation7 + $0x30] sm:$0xff]   ;;  %v5353_v13 = vld [vmem:[#allocation7 + $0x68] sm:$0xff]   ;;  %v2103_v28 = vld [vmem:[#allocation2 + $0x18] sm:$0xf] }
 0x245   : > { %v2206_v14 = vshrl.u32 %v4670_v9, 16  ;;  %v2208_v41 = vshll.u32 %v4670_v9, 16  ;;  %v2215_v11 = vrot.slane %v2213_v39, 1  ;;  %4960 = vmatprep.subr.bf16.mxu0 %v5351_v8  ;;  %v6325_v52 = vld [vmem:[#allocation2 + $0x1c] sm:$0xf]  ;;  %v5356_v44 = vld [vmem:[#allocation7 + $0x28] sm:$0xff]  }
 0x246   : > { %v5345_v30 = vld [vmem:[#allocation7 + $0xc0] sm:$0xff]   ;;  %v4671_v7 = vcombine.low %v2103_v28, %v6325_v52  ;;  %v5350_v36 = vld [vmem:[#allocation7 + $0x178] sm:$0xff]   ;;  %v5357_v23 = vld [vmem:[#allocation7 + $0x170] sm:$0xff]  }
 0x247   : > { %4883 = vmatpush3.bf16.msra.mxu1 %v5335_v18  ;;  %v2210_v48 = vrot.slane %v2208_v41, 1  ;;  %v6328_v15 = vld [vmem:[#allocation2 + $0x20] ss:$0 sps:$4 sm:$0x11]   ;;  %v5360_v5 = vld [vmem:[#allocation7 + $0x58] sm:$0xff]   ;;  %v5365_v49 = vld [vmem:[#allocation7 + $0x50] sm:$0xff]  }
 0x248   : > { %4884 = vmatprep.subr.bf16.mxu1 %v5336_v6  ;;  %4961 = vmatpush3.bf16.msra.mxu0 %v5352_v2  ;;  %v2218_v40 = vshrl.u32 %v4671_v7, 16  ;;  %v2220_v24 = vshll.u32 %v4671_v7, 16  ;;  %v2225_v17 = vshll.u32 %v6328_v15, 16  ;;  %v5358_v0 = vld [vmem:[#allocation7 + $0x60] sm:$0xff]   ;;  %v2105_v16 = vld [vmem:[#allocation2 + $0x24] sm:$0xf] }
 0x249   : > { %v2211_v12 = vor.u32 %v2210_v48, %v2206_v14  ;;  %4962 = vmatprep.subr.bf16.mxu0 %v5353_v13  ;;  %v5359_v56 = vld [vmem:[#allocation7 + $0x20] sm:$0xff]   ;;  %v6332_v26 = vld [vmem:[#allocation2 + $0x28] sm:$0xf]  ;;  %v6337_v27 = vld [vmem:[#allocation2 + $0x2c] ss:$0 sps:$4 sm:$0x11]  }
 0x24a   : > { %v2222_v3 = vrot.slane %v2220_v24, 1  ;;  %v2227_v42 = vrot.slane %v2225_v17, 1  ;;  %v6335_v61 = vcombine.low %v2105_v16, %v6332_v26  ;;  %v5363_v34 = vld [vmem:[#allocation7 + $0x18] sm:$0xff]   ;;  %v2237_v31 = vshll.u32 %v6337_v27, 16  ;;  %v5364_v38 = vld [vmem:[#allocation7 + $0x168] sm:$0xff]   ;;  %v5366_v4 = vld [vmem:[#allocation7 + $0x10] sm:$0xff]  }
 0x24b   : > { %4885 = vmatpush3.bf16.msra.mxu1 %v5337_v55  ;;  %v2216_v45 = vsel %vm382_vm0, %v2211_v12, %v2215_v11  ;;  %v5367_v54 = vld [vmem:[#allocation7 + $0x48] sm:$0xff]   ;;  %v2107_v51 = vld [vmem:[#allocation2 + $0x30] sm:$0xf]  ;;  %v6343_v22 = vld [vmem:[#allocation2 + $0x34] sm:$0xf] }
 0x24c   : > { %4886 = vmatprep.subr.bf16.mxu1 %v5338_v19  ;;  %2590 = vmatprep.mubr.bf16.mxu1 %v2216_v45  ;;  %v2223_v29 = vor.u32 %v2222_v3, %v2218_v40  ;;  %v2230_v37 = vshrl.u32 %v6335_v61, 16  ;;  %v2232_v20 = vshll.u32 %v6335_v61, 16  ;;  %v2239_v33 = vrot.slane %v2237_v31, 1  ;;  %v6348_v21 = vld [vmem:[#allocation2 + $0x38] ss:$0 sps:$4 sm:$0x11]  }
 0x24d   : > { %4963 = vmatpush3.bf16.msra.mxu0 %v5356_v44  ;;  %v6346_v53 = vcombine.low %v2107_v51, %v6343_v22  ;;  %v5370_v32 = vld [vmem:[#allocation7 + $0x8] sm:$0xff]   ;;  %v2249_v19 = vshll.u32 %v6348_v21, 16  ;;  %v5373_v59 = vld [vmem:[#allocation7] sm:$0xff]   ;;  %v5378_v39 = vld [vmem:[#allocation7 + $0x158] sm:$0xff]  }
 0x24e   : > { %4964 = vmatprep.subr.bf16.mxu0 %v5358_v0  ;;  %v2228_v25 = vsel %vm382_vm0, %v2223_v29, %v2227_v42  ;;  %v2234_v46 = vrot.slane %v2232_v20, 1  ;;  %v6354_v62 = vld [vmem:[#allocation2 + $0x4] sm:$0xf]  ;;  %v6357_v41 = vld [vmem:[#allocation2 + $0x8] ss:$0 sps:$4 sm:$0x11]  }
 0x24f   : > { %4887 = vmatpush3.bf16.msra.mxu1 %v5339_v1  ;;  %v2242_v6 = vshrl.u32 %v6346_v53, 16  ;;  %v2244_v55 = vshll.u32 %v6346_v53, 16  ;;  %v5371_v1 = vld [vmem:[#allocation7 + $0x160] sm:$0xff]   ;;  %v1900_v11 = vshll.u32 %v6357_v41, 16  ;;  %v1790_v28 = vld [vmem:[#allocation2 + $0xc] sm:$0xf] }
 0x250   : > { %4888 = vmatprep.subr.bf16.mxu1 %v5340_v60  ;;  %v2235_v43 = vor.u32 %v2234_v46, %v2230_v37  ;;  %v5372_v60 = vld [vmem:[#allocation7 + $0x40] sm:$0xff]   ;;  %v6362_v2 = vld [vmem:[#allocation2 + $0x44] ss:$0 sps:$4 sm:$0x11]   ;;  %v6369_v45 = vld [vmem:[#allocation2 + $0x10] sm:$0xf] }
 0x251   : > { %4965 = vmatpush3.bf16.msra.mxu0 %v5359_v56  ;;  %v2246_v57 = vrot.slane %v2244_v55, 1  ;;  %v6359_v8 = vld [vmem:[#allocation2 + $0x40] sm:$0xf]  ;;  %v2261_v44 = vshll.u32 %v6362_v2, 16  ;;  %v4647_v17 = vcombine.low %v1790_v28, %v6369_v45  ;;  %v2111_v0 = vld [vmem:[#allocation2 + $0x48] sm:$0xf] }
 0x252   : > { %4966 = vmatprep.subr.bf16.mxu0 %v5360_v5  ;;  %v2240_v18 = vsel %vm382_vm0, %v2235_v43, %v2239_v33  ;;  %v6375_v56 = vld [vmem:[#allocation2 + $0x14] ss:$0 sps:$4 sm:$0x11]   ;;  %v6377_v5 = vld [vmem:[#allocation2 + $0x4c] sm:$0xf] }
 0x253   : > { %4889 = vmatpush3.bf16.msra.mxu1 %v5341_v35  ;;  %v2251_v35 = vrot.slane %v2249_v19, 1  ;;  %v2263_v42 = vrot.slane %v2261_v44, 1  ;;  %v1905_v16 = vshrl.u32 %v4647_v17, 16  ;;  %v1907_v29 = vshll.u32 %v4647_v17, 16  ;;  %v6388_v43 = vld [vmem:[#allocation2 + $0x1c] sm:$0xf] }
 0x254   : > { %4890 = vmatprep.subr.bf16.mxu1 %v5342_v63  ;;  %v2247_v63 = vor.u32 %v2246_v57, %v2242_v6  ;;  %v1912_v20 = vshll.u32 %v6375_v56, 16 }
 0x255   : > { %4967 = vmatpush3.bf16.msra.mxu0 %v5363_v34  ;;  %v6380_v34 = vcombine.low %v2111_v0, %v6377_v5 }
 0x256   : > { %4968 = vmatprep.subr.bf16.mxu0 %v5365_v49  ;;  %v2252_v12 = vsel %vm382_vm0, %v2247_v63, %v2251_v35  ;;  %v1909_v49 = vrot.slane %v1907_v29, 1 }
 0x257   : > { %4891 = vmatpush3.bf16.msra.mxu1 %v5343_v47  ;;  %v2109_v47 = vld [vmem:[#allocation2 + $0x3c] sm:$0xf]  ;;  %v2268_v46 = vshll.u32 %v6380_v34, 16  ;;  %v2266_v33 = vshrl.u32 %v6380_v34, 16 }
 0x258   : > { %4892 = vmatprep.subr.bf16.mxu1 %v5344_v10  ;;  %v6365_v13 = vcombine.low %v2109_v47, %v6359_v8  ;;  %v1794_v47 = vld [vmem:[#allocation2 + $0x24] sm:$0xf] }
 0x259   : > { %4969 = vmatpush3.bf16.msra.mxu0 %v5366_v4  ;;  %v1792_v4 = vld [vmem:[#allocation2 + $0x18] sm:$0xf]  ;;  %v2270_v55 = vrot.slane %v2268_v46, 1  ;;  %v6434_v46 = vld [vmem:[#allocation2 + $0x34] sm:$0xf] }
 0x25a   : > { %4970 = vmatprep.subr.bf16.mxu0 %v5367_v54  ;;  %v2254_v40 = vshrl.u32 %v6365_v13, 16  ;;  %v2256_v24 = vshll.u32 %v6365_v13, 16  ;;  %v1910_v54 = vor.u32 %v1909_v49, %v1905_v16  ;;  %v6391_v51 = vcombine.low %v1792_v4, %v6388_v43 }
 0x25b   : > { %4893 = vmatpush3.bf16.msra.mxu1 %v5345_v30 }
 0x25c   : > { %5118 = vmatprep.subr.bf16.mxu1 %v5350_v36  ;;  %v1917_v35 = vshrl.u32 %v6391_v51, 16 }
 0x25d   : > { %4971 = vmatpush3.bf16.msra.mxu0 %v5370_v32  ;;  %v6393_v32 = vld [vmem:[#allocation2 + $0x20] ss:$0 sps:$4 sm:$0x11]  }
 0x25e   : > { %2591 = vmatmul.mubr.bf16.vlgmr.msra.gmra.mxu1 %v4670_v9  ;;  %v1788_v9 = vld [vmem:[#allocation2] sm:$0xf]  ;;  %4972 = vmatprep.subr.bf16.mxu0 %v5372_v60  ;;  %v6397_v60 = vld [vmem:[#allocation2 + $0x58] sm:$0xf] }
 0x25f   : > { %5119 = vmatpush3.bf16.msra.mxu1 %v5350_v36  ;;  %2598 = vmatprep.mubr.bf16.mxu1 %v2228_v25  ;;  %v4646_v14 = vcombine.low %v1788_v9, %v6354_v62  ;;  %v5383_v36 = vld [vmem:[#allocation7 + $0x150] sm:$0xff]   ;;  %v5388_v25 = vld [vmem:[#allocation7 + $0x148] sm:$0xff]   ;;  %v1924_v9 = vshll.u32 %v6393_v32, 16 }
 0x260   : > { %5120 = vmatprep.subr.bf16.mxu1 %v5357_v23 }
 0x261   : > { %v1893_v10 = vshrl.u32 %v4646_v14, 16  ;;  %v1895_v48 = vshll.u32 %v4646_v14, 16  ;;  %4973 = vmatpush3.bf16.msra.mxu0 %v5373_v59  ;;  %v1919_v59 = vshll.u32 %v6391_v51, 16  ;;  %v1926_v28 = vrot.slane %v1924_v9, 1 }
 0x263   : > { %5121 = vmatpush3.bf16.msra.mxu1 %v5357_v23  ;;  %v1897_v30 = vrot.slane %v1895_v48, 1  ;;  %v2258_v23 = vrot.slane %v2256_v24, 1  ;;  %v2271_v48 = vor.u32 %v2270_v55, %v2266_v33 }
 0x264   : > { %5122 = vmatprep.subr.bf16.mxu1 %v5364_v38 }
 0x265   : > { %v1898_v3 = vor.u32 %v1897_v30, %v1893_v10  ;;  %v2259_v31 = vor.u32 %v2258_v23, %v2254_v40  ;;  %v6409_v10 = vld [vmem:[#allocation2 + $0x28] sm:$0xf]  ;;  %v2115_v40 = vld [vmem:[#allocation2 + $0x60] sm:$0xf] }
 0x266   : > { %2599 = vmatmul.mubr.bf16.gmra.mxu1 %v4671_v7  ;;  %v1902_v7 = vrot.slane %v1900_v11, 1  ;;  %v6416_v44 = vcombine.low %v1794_v47, %v6409_v10 }
 0x267   : > { %2606 = vmatprep.mubr.bf16.mxu1 %v2240_v18  ;;  %5123 = vmatpush3.bf16.msra.mxu1 %v5364_v38  ;;  %v1914_v38 = vrot.slane %v1912_v20, 1  ;;  %v5393_v18 = vld [vmem:[#allocation7 + $0x140] sm:$0xff]   ;;  %v2264_v6 = vsel %vm382_vm0, %v2259_v31, %v2263_v42  ;;  %v1796_v20 = vld [vmem:[#allocation2 + $0x30] sm:$0xf] }
 0x268   : > { %5124 = vmatprep.subr.bf16.mxu1 %v5371_v1  ;;  %v1903_v37 = vsel %vm382_vm0, %v1898_v3, %v1902_v7  ;;  %v6421_v3 = vld [vmem:[#allocation2 + $0x64] sm:$0xf]  ;;  %v1929_v23 = vshrl.u32 %v6416_v44, 16  ;;  %v1931_v16 = vshll.u32 %v6416_v44, 16  ;;  %v6439_v4 = vcombine.low %v1796_v20, %v6434_v46 }
 0x269   : > { %2928 = vmatprep.mubr.bf16.mxu0 %v1903_v37  ;;  %v1915_v57 = vsel %vm382_vm0, %v1910_v54, %v1914_v38  ;;  %v2334_v38 = vrot.slane %v6322_v50, 1  ;;  %v2125_v54 = vld [vmem:[#allocation2 + $0xc] sm:$0xe] }
 0x26a   : > { %2929 = vmatmul.mubr.bf16.vlgmr.msra.gmra.mxu0 %v4646_v14  ;;  %v6407_v14 = vld [vmem:[#allocation2 + $0x5c] ss:$0 sps:$4 sm:$0x11]   ;;  %v1933_v31 = vrot.slane %v1931_v16, 1 }
 0x26b   : > { %5125 = vmatpush3.bf16.msra.mxu1 %v5371_v1  ;;  %v2113_v1 = vld [vmem:[#allocation2 + $0x54] sm:$0xf]  ;;  %2936 = vmatprep.mubr.bf16.mxu0 %v1915_v57  ;;  %v2285_v0 = vshll.u32 %v6407_v14, 16  ;;  %v4686_v57 = vcombine.low %v2125_v54, %v6319_v58 }
 0x26c   : > { %5126 = vmatprep.subr.bf16.mxu1 %v5378_v39  ;;  %v6405_v63 = vcombine.low %v2113_v1, %v6397_v60  ;;  %v1934_v55 = vor.u32 %v1933_v31, %v1929_v23  ;;  %v6443_v1 = vld [vmem:[#allocation2 + $0x38] ss:$0 sps:$4 sm:$0x11]  }
 0x26d   : > { %v2287_v33 = vrot.slane %v2285_v0, 1  ;;  %v2333_v47 = vrot.slane %v4686_v57, 1 }
 0x26e   : > { %2607 = vmatmul.mubr.bf16.gmra.mxu1 %v6335_v61  ;;  %v6384_v61 = vld [vmem:[#allocation2 + $0x50] ss:$0 sps:$4 sm:$0x11]   ;;  %v2278_v7 = vshrl.u32 %v6405_v63, 16 }
 0x26f   : > { %2614 = vmatprep.mubr.bf16.mxu1 %v2252_v12  ;;  %5127 = vmatpush3.bf16.msra.mxu1 %v5378_v39  ;;  %v2273_v19 = vshll.u32 %v6384_v61, 16  ;;  %v1921_v39 = vrot.slane %v1919_v59, 1  ;;  %v2280_v12 = vshll.u32 %v6405_v63, 16  ;;  %v1943_v59 = vshll.u32 %v6439_v4, 16 }
 0x270   : > { %5128 = vmatprep.subr.bf16.mxu1 %v5383_v36 }
 0x271   : > { %v2275_v11 = vrot.slane %v2273_v19, 1  ;;  %v1922_v30 = vor.u32 %v1921_v39, %v1917_v35  ;;  %v2282_v24 = vrot.slane %v2280_v12, 1  ;;  %v2126_v35 = vld [vmem:[#allocation2 + $0x18] sm:$0xe]  ;;  %v1948_v39 = vshll.u32 %v6443_v1, 16 }
 0x272   : > { %2937 = vmatmul.mubr.bf16.gmra.mxu0 %v4647_v17  ;;  %v6431_v17 = vcombine.low %v2115_v40, %v6421_v3  ;;  %v4687_v9 = vcombine.low %v2126_v35, %v6325_v52  ;;  %v6456_v40 = vld [vmem:[#allocation2 + $0x40] sm:$0xf]  ;;  %v1802_v35 = vld [vmem:[#allocation2 + $0x54] sm:$0xf] }
 0x273   : > { %5129 = vmatpush3.bf16.msra.mxu1 %v5383_v36  ;;  %v6418_v36 = vld [vmem:[#allocation2 + $0x2c] ss:$0 sps:$4 sm:$0x11]   ;;  %v1927_v42 = vsel %vm382_vm0, %v1922_v30, %v1926_v28  ;;  %v2276_v37 = vsel %vm382_vm0, %v2271_v48, %v2275_v11  ;;  %v1945_v48 = vrot.slane %v1943_v59, 1  ;;  %v1798_v28 = vld [vmem:[#allocation2 + $0x3c] sm:$0xf] }
 0x274   : > { %5130 = vmatprep.subr.bf16.mxu1 %v5388_v25  ;;  %v1936_v29 = vshll.u32 %v6418_v36, 16  ;;  %2944 = vmatprep.mubr.bf16.mxu0 %v1927_v42  ;;  %v2292_v19 = vshll.u32 %v6431_v17, 16  ;;  %v2336_v11 = vrot.slane %v4687_v9, 1  ;;  %v2290_v12 = vshrl.u32 %v6431_v17, 16 }
 0x275   : > { %v6464_v42 = vld [vmem:[#allocation2 + $0x44] ss:$0 sps:$4 sm:$0x11]  }
 0x276   : > { %2615 = vmatmul.mubr.bf16.gmra.mxu1 %v6346_v53  ;;  %v6412_v53 = vld [vmem:[#allocation7 + $0xb8] sm:$0xff]   ;;  %v1938_v49 = vrot.slane %v1936_v29, 1  ;;  %v2294_v30 = vrot.slane %v2292_v19, 1 }
 0x277   : > { %2622 = vmatprep.mubr.bf16.mxu1 %v2264_v6  ;;  %5131 = vmatpush3.bf16.msra.mxu1 %v5388_v25  ;;  %v6427_v25 = vld [vmem:[#allocation2 + $0x68] ss:$0 sps:$4 sm:$0x11]   ;;  %v2283_v6 = vor.u32 %v2282_v24, %v2278_v7  ;;  %v2335_v7 = vsel %vm523_vm1, %v2333_v47, %v2334_v38  ;;  %v1950_v24 = vrot.slane %v1948_v39, 1  ;;  %v1960_v38 = vshll.u32 %v6464_v42, 16 }
 0x278   : > { %5132 = vmatprep.subr.bf16.mxu1 %v5393_v18  ;;  %v2297_v50 = vshll.u32 %v6427_v25, 16  ;;  %v2295_v20 = vor.u32 %v2294_v30, %v2290_v12 }
 0x279   : > { %v2288_v58 = vsel %vm382_vm0, %v2283_v6, %v2287_v33  ;;  %v6471_v33 = vld [vmem:[#allocation2 + $0x4c] sm:$0xf]  ;;  %v1962_v19 = vrot.slane %v1960_v38, 1  ;;  %v1814_v38 = vld [vmem:[#allocation2 + $0x18] sm:$0xe] }
 0x27a   : > { %2945 = vmatmul.mubr.bf16.gmra.mxu0 %v6391_v51  ;;  %v6462_v51 = vcombine.low %v1798_v28, %v6456_v40  ;;  %v2299_v16 = vrot.slane %v2297_v50, 1  ;;  %v2021_v28 = vrot.slane %v6357_v41, 1  ;;  %v2129_v41 = vld [vmem:[#allocation2 + $0x3c] sm:$0xe] }
 0x27b   : > { %5133 = vmatpush3.bf16.msra.mxu1 %v5393_v18  ;;  %v2337_v18 = vrot.slane %v6328_v15, 1  ;;  %v1939_v15 = vsel %vm382_vm0, %v1934_v55, %v1938_v49 }
 0x27c   : > { %5150 = vmatprep.subr.bf16.mxu1 %v6412_v53  ;;  %2952 = vmatprep.mubr.bf16.mxu0 %v1939_v15  ;;  %v1955_v23 = vshll.u32 %v6462_v51, 16  ;;  %v1953_v29 = vshrl.u32 %v6462_v51, 16  ;;  %v2300_v6 = vsel %vm382_vm0, %v2295_v20, %v2299_v16 }
 0x27d   : > { %v6459_v0 = vsel %vm523_vm1, %v2336_v11, %v2337_v18  ;;  %v6476_v18 = vld [vmem:[#allocation2 + $0x50] ss:$0 sps:$4 sm:$0x11]   ;;  %v6492_v11 = vld [vmem:[#allocation2 + $0x5c] ss:$0 sps:$4 sm:$0x11]  }
 0x27e   : > { %2623 = vmatmul.mubr.bf16.gmra.mxu1 %v6365_v13  ;;  %v1941_v13 = vshrl.u32 %v6439_v4, 16  ;;  %v1957_v49 = vrot.slane %v1955_v23, 1  ;;  %v1972_v59 = vshll.u32 %v6476_v18, 16 }
 0x27f   : > { %2630 = vmatprep.mubr.bf16.mxu1 %v2276_v37  ;;  %v1800_v37 = vld [vmem:[#allocation2 + $0x48] sm:$0xf] }
 0x280   : > { %v1946_v52 = vor.u32 %v1945_v48, %v1941_v13  ;;  %v6474_v54 = vcombine.low %v1800_v37, %v6471_v33  ;;  %v1958_v55 = vor.u32 %v1957_v49, %v1953_v29  ;;  %v6482_v13 = vld [vmem:[#allocation2 + $0x58] sm:$0xf]  ;;  %v2340_v48 = vrot.slane %v6337_v27, 1  ;;  %v2128_v37 = vld [vmem:[#allocation2 + $0x30] sm:$0xe] }
 0x281   : > { %v5425_v49 = vld [vmem:[#allocation7 + $0x230] sm:$0xff]  }
 0x282   : > { %v1951_v31 = vsel %vm382_vm0, %v1946_v52, %v1950_v24  ;;  %2953 = vmatmul.mubr.bf16.gmra.mxu0 %v6416_v44  ;;  %v1967_v57 = vshll.u32 %v6474_v54, 16  ;;  %v6487_v44 = vcombine.low %v1802_v35, %v6482_v13  ;;  %v1963_v9 = vsel %vm382_vm0, %v1958_v55, %v1962_v19 }
 0x283   : > { %2960 = vmatprep.mubr.bf16.mxu0 %v1951_v31  ;;  %v1965_v15 = vshrl.u32 %v6474_v54, 16  ;;  %v2024_v24 = vrot.slane %v6375_v56, 1  ;;  %v1984_v31 = vshll.u32 %v6492_v11, 16  ;;  %v2030_v19 = vrot.slane %v6418_v36, 1 }
 0x284   : > { %v1969_v39 = vrot.slane %v1967_v57, 1  ;;  %v1979_v12 = vshll.u32 %v6487_v44, 16  ;;  %v1977_v27 = vshrl.u32 %v6487_v44, 16  ;;  %v4689_v57 = vcombine.low %v2128_v37, %v6343_v22 }
 0x285   : > { %v1986_v35 = vrot.slane %v1984_v31, 1  ;;  %v2343_v36 = vrot.slane %v6348_v21, 1  ;;  %v5438_v21 = vld [vmem:[#allocation7 + $0x218] sm:$0xff]   ;;  %v2355_v37 = vrot.slane %v6427_v25, 1  ;;  %v6545_v31 = vld [vmem:[#allocation2 + $0x28] sm:$0xf] }
 0x286   : > { %2631 = vmatmul.mubr.bf16.gmra.mxu1 %v6380_v34  ;;  %v2127_v34 = vld [vmem:[#allocation2 + $0x24] sm:$0xe]  ;;  %v1970_v23 = vor.u32 %v1969_v39, %v1965_v15  ;;  %v1981_v20 = vrot.slane %v1979_v12, 1  ;;  %v2342_v22 = vrot.slane %v4689_v57, 1  ;;  %v2130_v39 = vld [vmem:[#allocation2 + $0x48] sm:$0xe] }
 0x287   : > { %2638 = vmatprep.mubr.bf16.mxu1 %v2288_v58  ;;  %v4688_v50 = vcombine.low %v2127_v34, %v6332_v26  ;;  %v1974_v26 = vrot.slane %v1972_v59, 1  ;;  %v1813_v58 = vld [vmem:[#allocation2 + $0xc] sm:$0xe]  ;;  %v1815_v34 = vld [vmem:[#allocation2 + $0x24] sm:$0xe] }
 0x288   : > { %v4663_v52 = vcombine.low %v1813_v58, %v6369_v45  ;;  %v4665_v55 = vcombine.low %v1815_v34, %v6409_v10  ;;  %v5430_v15 = vld [vmem:[#allocation7 + $0x228] sm:$0xff]   ;;  %v5405_v58 = vld [vmem:[#allocation7 + $0xa0] sm:$0xff]  }
 0x289   : > { %v2339_v47 = vrot.slane %v4688_v50, 1  ;;  %v1975_v56 = vsel %vm382_vm0, %v1970_v23, %v1974_v26  ;;  %v2346_v26 = vrot.slane %v6362_v2, 1 }
 0x28a   : > { %2961 = vmatmul.mubr.bf16.gmra.mxu0 %v6439_v4  ;;  %v2023_v29 = vrot.slane %v4663_v52, 1  ;;  %v5422_v4 = vld [vmem:[#allocation7 + $0x238] sm:$0xff]   ;;  %v2349_v52 = vrot.slane %v6384_v61, 1  ;;  %v5411_v61 = vld [vmem:[#allocation7 + $0x90] sm:$0xff]  }
 0x28b   : > { %2968 = vmatprep.mubr.bf16.mxu0 %v1963_v9  ;;  %5182 = vmatprep.subr.bf16.mxu0 %v5422_v4  ;;  %v2341_v59 = vsel %vm523_vm1, %v2339_v47, %v2340_v48  ;;  %v1982_v9 = vor.u32 %v1981_v20, %v1977_v27  ;;  %v5433_v47 = vld [vmem:[#allocation7 + $0x220] sm:$0xff]   ;;  %v2352_v27 = vrot.slane %v6407_v14, 1 }
 0x28c   : > { %v6507_v45 = vsel %vm523_vm1, %v2023_v29, %v2024_v24  ;;  %5183 = vmatpush3.bf16.msra.mxu0 %v5422_v4  ;;  %v5441_v24 = vld [vmem:[#allocation7 + $0x210] sm:$0xff]   ;;  %v6541_v14 = vld [vmem:[#allocation2 + $0x1c] sm:$0xf] }
 0x28d   : > { %5184 = vmatprep.subr.bf16.mxu0 %v5425_v49 }
 0x28e   : > { %2639 = vmatmul.mubr.bf16.gmra.mxu1 %v6405_v63  ;;  %v1812_v63 = vld [vmem:[#allocation2] sm:$0xe] }
 0x28f   : > { %2646 = vmatprep.mubr.bf16.mxu1 %v2300_v6  ;;  %v4662_v30 = vcombine.low %v1812_v63, %v6354_v62  ;;  %v5399_v6 = vld [vmem:[#allocation7 + $0xb0] sm:$0xff]   ;;  %v1987_v63 = vsel %vm382_vm0, %v1982_v9, %v1986_v35  ;;  %v6558_v9 = vld [vmem:[#allocation2 + $0x38] ss:$0 sps:$4 sm:$0x11]  }
 0x290   : > { %5185 = vmatpush3.bf16.msra.mxu0 %v5425_v49 }
 0x291   : > { %v2020_v16 = vrot.slane %v4662_v30, 1  ;;  %5186 = vmatprep.subr.bf16.mxu0 %v5430_v15 }
 0x292   : > { %2969 = vmatmul.mubr.bf16.gmra.mxu0 %v6462_v51 }
 0x293   : > { %v6504_v62 = vsel %vm523_vm1, %v2020_v16, %v2021_v28  ;;  %2976 = vmatprep.mubr.bf16.mxu0 %v1975_v56  ;;  %v2344_v28 = vsel %vm523_vm1, %v2342_v22, %v2343_v36  ;;  %v5446_v16 = vld [vmem:[#allocation7 + $0x208] sm:$0xff]   ;;  %v5420_v22 = vld [vmem:[#allocation7 + $0x1f8] sm:$0xff]  }
 0x294   : > { %5187 = vmatpush3.bf16.msra.mxu0 %v5430_v15  ;;  %v5416_v56 = vld [vmem:[#allocation7 + $0x88] sm:$0xff]  }
 0x295   : > { %5188 = vmatprep.subr.bf16.mxu0 %v5433_v47  ;;  %v6561_v15 = vld [vmem:[#allocation2 + $0x40] sm:$0xf] }
 0x296   : > { %2647 = vmatmul.mubr.bf16.gmra.mxu1 %v6431_v17  ;;  %v2027_v17 = vrot.slane %v6393_v32, 1  ;;  %v4690_v32 = vcombine.low %v2129_v41, %v6359_v8  ;;  %v5404_v8 = vld [vmem:[#allocation7 + $0xa8] sm:$0xff]   ;;  %v5449_v41 = vld [vmem:[#allocation7 + $0x200] sm:$0xff]  }
 0x297   : > { %5134 = vmatprep.mubr.bf16.mxu1 %v2335_v7  ;;  %v4664_v7 = vcombine.low %v1814_v38, %v6388_v43  ;;  %v2029_v43 = vrot.slane %v4665_v55, 1  ;;  %v3116_v38 = vld [vmem:[#allocation2 + $0x24] sm:$0xe]  ;;  %v5417_v55 = vld [vmem:[#allocation7 + $0x80] sm:$0xff]  }
 0x298   : > { %v2345_v48 = vrot.slane %v4690_v32, 1  ;;  %5189 = vmatpush3.bf16.msra.mxu0 %v5433_v47  ;;  %v3330_v47 = vrot.slane %v6558_v9, 1 }
 0x299   : > { %v2026_v50 = vrot.slane %v4664_v7, 1  ;;  %v6523_v10 = vsel %vm523_vm1, %v2029_v43, %v2030_v19  ;;  %5190 = vmatprep.subr.bf16.mxu0 %v5438_v21  ;;  %v4759_v7 = vcombine.low %v3116_v38, %v6545_v31 }
 0x29a   : > { %2977 = vmatmul.mubr.bf16.gmra.mxu0 %v6474_v54  ;;  %v2347_v12 = vsel %vm523_vm1, %v2345_v48, %v2346_v26  ;;  %v5410_v54 = vld [vmem:[#allocation7 + $0x98] sm:$0xff]   ;;  %v6565_v48 = vld [vmem:[#allocation2 + $0x44] ss:$0 sps:$4 sm:$0x11]  }
 0x29b   : > { %v6519_v51 = vsel %vm523_vm1, %v2026_v50, %v2027_v17  ;;  %2984 = vmatprep.mubr.bf16.mxu0 %v1987_v63  ;;  %v6549_v17 = vld [vmem:[#allocation2 + $0x2c] ss:$0 sps:$4 sm:$0x11]   ;;  %v3326_v19 = vrot.slane %v4759_v7, 1  ;;  %v6555_v50 = vld [vmem:[#allocation2 + $0x34] sm:$0xf] }
 0x29c   : > { %5191 = vmatpush3.bf16.msra.mxu0 %v5438_v21  ;;  %v3327_v57 = vrot.slane %v6549_v17, 1 }
 0x29d   : > { %5192 = vmatprep.subr.bf16.mxu0 %v5441_v24 }
 0x29e   : > { %5135 = vmatmul.mubr.bf16.vlgmr.msra.gmra.mxu1 %v6459_v0  ;;  %v2131_v0 = vld [vmem:[#allocation2 + $0x54] sm:$0xe]  ;;  %v3328_v32 = vsel %vm523_vm1, %v3326_v19, %v3327_v57 }
 0x29f   : > { %5151 = vmatpush3.bf16.msra.mxu1 %v6412_v53  ;;  %5138 = vmatprep.mubr.bf16.mxu1 %v2341_v59  ;;  %v4691_v53 = vcombine.low %v2130_v39, %v6377_v5  ;;  %v4692_v2 = vcombine.low %v2131_v0, %v6397_v60  ;;  %v2132_v5 = vld [vmem:[#allocation2 + $0x60] sm:$0xe]  ;;  %v3117_v59 = vld [vmem:[#allocation2 + $0x30] sm:$0xe] }
 0x2a0   : > { %5152 = vmatprep.subr.bf16.mxu1 %v5399_v6  ;;  %v4693_v60 = vcombine.low %v2132_v5, %v6421_v3  ;;  %5193 = vmatpush3.bf16.msra.mxu0 %v5441_v24  ;;  %v3115_v3 = vld [vmem:[#allocation2 + $0x18] sm:$0xe]  ;;  %v4760_v43 = vcombine.low %v3117_v59, %v6555_v50  ;;  %v1816_v39 = vld [vmem:[#allocation2 + $0x30] sm:$0xe] }
 0x2a1   : > { %v2348_v30 = vrot.slane %v4691_v53, 1  ;;  %v2351_v23 = vrot.slane %v4692_v2, 1  ;;  %5194 = vmatprep.subr.bf16.mxu0 %v5446_v16  ;;  %v4758_v49 = vcombine.low %v3115_v3, %v6541_v14  ;;  %v3333_v53 = vrot.slane %v6565_v48, 1  ;;  %v5423_v2 = vld [vmem:[#allocation7 + $0x1f0] sm:$0xff]  }
 0x2a2   : > { %2985 = vmatmul.mubr.bf16.gmra.mxu0 %v6487_v44  ;;  %v2354_v20 = vrot.slane %v4693_v60, 1  ;;  %v6543_v44 = vld [vmem:[#allocation2 + $0x20] ss:$0 sps:$4 sm:$0x11]   ;;  %v3329_v36 = vrot.slane %v4760_v43, 1  ;;  %v4666_v21 = vcombine.low %v1816_v39, %v6434_v46  ;;  %v5424_v5 = vld [vmem:[#allocation7 + $0x1b0] sm:$0xff]  }
 0x2a3   : > { %5153 = vmatpush3.bf16.msra.mxu1 %v5399_v6  ;;  %v2350_v29 = vsel %vm523_vm1, %v2348_v30, %v2349_v52  ;;  %v2353_v4 = vsel %vm523_vm1, %v2351_v23, %v2352_v27  ;;  %v3324_v25 = vrot.slane %v6543_v44, 1  ;;  %v3323_v34 = vrot.slane %v4758_v49, 1  ;;  %v6576_v52 = vld [vmem:[#allocation2 + $0x58] sm:$0xf]  ;;  %v5428_v23 = vld [vmem:[#allocation7 + $0x1e8] sm:$0xff]  }
 0x2a4   : > { %5154 = vmatprep.subr.bf16.mxu1 %v5404_v8  ;;  %5195 = vmatpush3.bf16.msra.mxu0 %v5446_v16  ;;  %v2356_v6 = vsel %vm523_vm1, %v2354_v20, %v2355_v37  ;;  %v3331_v63 = vsel %vm523_vm1, %v3329_v36, %v3330_v47  ;;  %v2033_v46 = vrot.slane %v6443_v1, 1  ;;  %v3120_v60 = vld [vmem:[#allocation2 + $0x54] sm:$0xe]  ;;  %v2032_v16 = vrot.slane %v4666_v21, 1  ;;  %v1818_v37 = vld [vmem:[#allocation2 + $0x48] sm:$0xe] }
 0x2a5   : > { %5196 = vmatprep.subr.bf16.mxu0 %v5449_v41  ;;  %v3325_v35 = vsel %vm523_vm1, %v3323_v34, %v3324_v25  ;;  %v6588_v3 = vld [vmem:[#allocation2 + $0x68] ss:$0 sps:$4 sm:$0x11]   ;;  %v4668_v25 = vcombine.low %v1818_v37, %v6471_v33  ;;  %v2036_v33 = vrot.slane %v6464_v42, 1  ;;  %v5436_v47 = vld [vmem:[#allocation7 + $0x1d8] sm:$0xff]   ;;  %v3215_v37 = vshll.u32 %v6549_v17, 16 }
 0x2a6   : > { %5139 = vmatmul.mubr.bf16.gmra.mxu1 %v2344_v28  ;;  %5198 = vmatprep.mubr.bf16.mxu0 %v3325_v35  ;;  %v6570_v28 = vld [vmem:[#allocation2 + $0x4c] sm:$0xf]  ;;  %v5429_v49 = vld [vmem:[#allocation7 + $0x1a8] sm:$0xff]   ;;  %v3342_v34 = vrot.slane %v6588_v3, 1  ;;  %v2034_v19 = vsel %vm523_vm1, %v2032_v16, %v2033_v46 }
 0x2a7   : > { %5155 = vmatpush3.bf16.msra.mxu1 %v5404_v8  ;;  %5142 = vmatprep.mubr.bf16.mxu1 %v2347_v12  ;;  %v3118_v8 = vld [vmem:[#allocation2 + $0x3c] sm:$0xe]  ;;  %v3119_v12 = vld [vmem:[#allocation2 + $0x48] sm:$0xe]  ;;  %v3122_v35 = vld [vmem:[#allocation2 + $0x6c] sm:$0xe] }
 0x2a8   : > { %5156 = vmatprep.subr.bf16.mxu1 %v5405_v58  ;;  %5197 = vmatpush3.bf16.msra.mxu0 %v5449_v41  ;;  %v4761_v26 = vcombine.low %v3118_v8, %v6561_v15  ;;  %v4762_v30 = vcombine.low %v3119_v12, %v6570_v28  ;;  %v3091_v41 = vld [vmem:[#allocation2 + $0x18] sm:$0xf]  ;;  %v2038_v8 = vrot.slane %v4668_v25, 1  ;;  %v5439_v12 = vld [vmem:[#allocation7 + $0x1d0] sm:$0xff]  }
 0x2a9   : > { %v6600_v57 = vcombine.low %v3091_v41, %v6541_v14  ;;  %v2039_v14 = vrot.slane %v6476_v18, 1  ;;  %v5447_v41 = vld [vmem:[#allocation7 + $0x1c0] sm:$0xff]  }
 0x2aa   : > { %v3332_v0 = vrot.slane %v4761_v26, 1  ;;  %v3335_v27 = vrot.slane %v4762_v30, 1  ;;  %v1819_v26 = vld [vmem:[#allocation2 + $0x54] sm:$0xe] }
 0x2ab   : > { %5157 = vmatpush3.bf16.msra.mxu1 %v5405_v58  ;;  %5199 = vmatmul.mubr.bf16.vlgmr.msra.gmra.mxu0 %v3328_v32  ;;  %v6573_v58 = vld [vmem:[#allocation2 + $0x50] ss:$0 sps:$4 sm:$0x11]   ;;  %v2040_v21 = vsel %vm523_vm1, %v2038_v8, %v2039_v14  ;;  %v4669_v18 = vcombine.low %v1819_v26, %v6482_v13  ;;  %v5444_v13 = vld [vmem:[#allocation7 + $0x1c8] sm:$0xff]   ;;  %v3239_v8 = vshll.u32 %v6565_v48, 16 }
 0x2ac   : > { %5158 = vmatprep.subr.bf16.mxu1 %v5410_v54  ;;  %5202 = vmatprep.mubr.bf16.mxu0 %v3331_v63  ;;  %v3336_v24 = vrot.slane %v6573_v58, 1  ;;  %v3198_v63 = vshll.u32 %v6600_v57, 16 }
 0x2ad   : > { %v2041_v46 = vrot.slane %v4669_v18, 1 }
 0x2ae   : > { %5143 = vmatmul.mubr.bf16.gmra.mxu1 %v2350_v29  ;;  %v1817_v29 = vld [vmem:[#allocation2 + $0x3c] sm:$0xe]  ;;  %v3200_v30 = vrot.slane %v3198_v63, 1 }
 0x2af   : > { %5159 = vmatpush3.bf16.msra.mxu1 %v5410_v54  ;;  %5146 = vmatprep.mubr.bf16.mxu1 %v2353_v4  ;;  %v3334_v54 = vsel %vm523_vm1, %v3332_v0, %v3333_v53  ;;  %v4763_v4 = vcombine.low %v3120_v60, %v6576_v52  ;;  %v4667_v38 = vcombine.low %v1817_v29, %v6456_v40  ;;  %v6603_v40 = vld [vmem:[#allocation2 + $0x74] ss:$0 sps:$4 sm:$0x11]  }
 0x2b0   : > { %5160 = vmatprep.subr.bf16.mxu1 %v5411_v61  ;;  %v3345_v0 = vrot.slane %v6603_v40, 1 }
 0x2b1   : > { %v3338_v20 = vrot.slane %v4763_v4, 1  ;;  %v2035_v36 = vrot.slane %v4667_v38, 1  ;;  %v3095_v4 = vld [vmem:[#allocation2 + $0x30] sm:$0xf]  ;;  %v3217_v38 = vrot.slane %v3215_v37, 1 }
 0x2b3   : > { %5161 = vmatpush3.bf16.msra.mxu1 %v5411_v61  ;;  %v6583_v61 = vld [vmem:[#allocation2 + $0x5c] ss:$0 sps:$4 sm:$0x11]   ;;  %5203 = vmatmul.mubr.bf16.gmra.mxu0 %v3334_v54  ;;  %v2037_v53 = vsel %vm523_vm1, %v2035_v36, %v2036_v33  ;;  %v3203_v54 = vshll.u32 %v6543_v44, 16  ;;  %v3099_v33 = vld [vmem:[#allocation2 + $0x48] sm:$0xf] }
 0x2b4   : > { %5162 = vmatprep.subr.bf16.mxu1 %v5416_v56  ;;  %v3339_v1 = vrot.slane %v6583_v61, 1  ;;  %v4746_v14 = vcombine.low %v3099_v33, %v6570_v28  ;;  %v3103_v28 = vld [vmem:[#allocation2 + $0x60] sm:$0xf] }
 0x2b5   : > { %v3205_v16 = vrot.slane %v3203_v54, 1 }
 0x2b6   : > { %5147 = vmatmul.mubr.bf16.gmra.mxu1 %v2356_v6  ;;  %v6596_v6 = vld [vmem:[#allocation2 + $0x70] sm:$0xf]  ;;  %v3340_v59 = vsel %vm523_vm1, %v3338_v20, %v3339_v1  ;;  %v3244_v63 = vshrl.u32 %v4746_v14, 16 }
 0x2b7   : > { %5163 = vmatpush3.bf16.msra.mxu1 %v5416_v56  ;;  %5166 = vmatprep.mubr.bf16.mxu1 %v6504_v62  ;;  %v5421_v62 = vld [vmem:[#allocation7 + $0x1b8] sm:$0xff]   ;;  %v6590_v56 = vld [vmem:[#allocation2 + $0x64] sm:$0xf]  ;;  %v4765_v43 = vcombine.low %v3122_v35, %v6596_v6 }
 0x2b8   : > { %5164 = vmatprep.subr.bf16.mxu1 %v5417_v55 }
 0x2b9   : > { %v3344_v42 = vrot.slane %v4765_v43, 1 }
 0x2bb   : > { %5165 = vmatpush3.bf16.msra.mxu1 %v5417_v55  ;;  %v5431_v55 = vld [vmem:[#allocation7 + $0x1e0] sm:$0xff]  }
 0x2bc   : > { %5038 = vmatprep.subr.bf16.mxu1 %v5420_v22  ;;  %v5432_v22 = vld [vmem:[#allocation7 + $0x1a0] sm:$0xff]  }
 0x2be   : > { %5167 = vmatmul.mubr.bf16.vlgmr.msra.gmra.mxu1 %v6507_v45  ;;  %v3337_v45 = vsel %vm523_vm1, %v3335_v27, %v3336_v24  ;;  %v2042_v27 = vrot.slane %v6492_v11, 1  ;;  %v4744_v11 = vcombine.low %v3095_v4, %v6555_v50  ;;  %v3287_v4 = vshll.u32 %v6603_v40, 16 }
 0x2bf   : > { %5039 = vmatpush3.bf16.msra.mxu1 %v5421_v62  ;;  %5170 = vmatprep.mubr.bf16.mxu1 %v6519_v51  ;;  %v3121_v51 = vld [vmem:[#allocation2 + $0x60] sm:$0xe]  ;;  %v5437_v62 = vld [vmem:[#allocation7 + $0x198] sm:$0xff]  }
 0x2c0   : > { %5040 = vmatprep.subr.bf16.mxu1 %v5423_v2  ;;  %5206 = vmatprep.mubr.bf16.mxu0 %v3337_v45  ;;  %v4764_v7 = vcombine.low %v3121_v51, %v6590_v56  ;;  %v3196_v2 = vshrl.u32 %v6600_v57, 16  ;;  %v2043_v44 = vsel %vm523_vm1, %v2041_v46, %v2042_v27  ;;  %v5448_v51 = vld [vmem:[#allocation7 + $0x180] sm:$0xff]   ;;  %v3222_v25 = vshll.u32 %v4744_v11, 16 }
 0x2c1   : > { %5207 = vmatmul.mubr.bf16.gmra.mxu0 %v3340_v59 }
 0x2c2   : > { %v3341_v32 = vrot.slane %v4764_v7, 1  ;;  %v3201_v60 = vor.u32 %v3200_v30, %v3196_v2  ;;  %v3097_v7 = vld [vmem:[#allocation2 + $0x3c] sm:$0xf] }
 0x2c3   : > { %5041 = vmatpush3.bf16.msra.mxu1 %v5424_v5  ;;  %v3346_v5 = vsel %vm523_vm1, %v3344_v42, %v3345_v0  ;;  %v4745_v35 = vcombine.low %v3097_v7, %v6561_v15  ;;  %v3246_v15 = vshll.u32 %v4746_v14, 16 }
 0x2c4   : > { %5042 = vmatprep.subr.bf16.mxu1 %v5428_v23  ;;  %v3343_v39 = vsel %vm523_vm1, %v3341_v32, %v3342_v34  ;;  %v5440_v23 = vld [vmem:[#allocation7 + $0x190] sm:$0xff]   ;;  %v3206_v45 = vsel %vm382_vm0, %v3201_v60, %v3205_v16  ;;  %v3220_v34 = vshrl.u32 %v4744_v11, 16  ;;  %vm4390_vm1 = vcmask 1045509  }
 0x2c5   : > { %5210 = vmatprep.mubr.bf16.mxu0 %v3343_v39  ;;  %v3234_v32 = vshll.u32 %v4745_v35, 16  ;;  %v3232_v43 = vshrl.u32 %v4745_v35, 16  ;;  %v3241_v39 = vrot.slane %v3239_v8, 1 }
 0x2c6   : > { %5171 = vmatmul.mubr.bf16.gmra.mxu1 %v6523_v10  ;;  %v3093_v10 = vld [vmem:[#allocation2 + $0x24] sm:$0xf] }
 0x2c7   : > { %5043 = vmatpush3.bf16.msra.mxu1 %v5429_v49  ;;  %5174 = vmatprep.mubr.bf16.mxu1 %v2034_v19  ;;  %v4743_v24 = vcombine.low %v3093_v10, %v6545_v31  ;;  %v5445_v31 = vld [vmem:[#allocation7 + $0x188] sm:$0xff]   ;;  %v3227_v19 = vshll.u32 %v6558_v9, 16  ;;  %v3236_v36 = vrot.slane %v3234_v32, 1  ;;  %v3248_v10 = vrot.slane %v3246_v15, 1 }
 0x2c8   : > { %5044 = vmatprep.subr.bf16.mxu1 %v5431_v55  ;;  %v3224_v55 = vrot.slane %v3222_v25, 1 }
 0x2c9   : > { %v3210_v29 = vshll.u32 %v4743_v24, 16  ;;  %5211 = vmatmul.mubr.bf16.gmra.mxu0 %v3346_v5  ;;  %v3208_v20 = vshrl.u32 %v4743_v24, 16  ;;  %v3229_v59 = vrot.slane %v3227_v19, 1  ;;  %v3237_v9 = vor.u32 %v3236_v36, %v3232_v43 }
 0x2ca   : > { %v3225_v50 = vor.u32 %v3224_v55, %v3220_v34  ;;  %v3249_v0 = vor.u32 %v3248_v10, %v3244_v63 }
 0x2cb   : > { %5045 = vmatpush3.bf16.msra.mxu1 %v5432_v22  ;;  %v3212_v1 = vrot.slane %v3210_v29, 1  ;;  %v3242_v26 = vsel %vm382_vm0, %v3237_v9, %v3241_v39 }
 0x2cc   : > { %5046 = vmatprep.subr.bf16.mxu1 %v5436_v47  ;;  %v3230_v22 = vsel %vm382_vm0, %v3225_v50, %v3229_v59  ;;  %v3101_v47 = vld [vmem:[#allocation2 + $0x54] sm:$0xf] }
 0x2cd   : > { %v3213_v49 = vor.u32 %v3212_v1, %v3208_v20  ;;  %v4747_v42 = vcombine.low %v3101_v47, %v6576_v52  ;;  %v3105_v52 = vld [vmem:[#allocation2 + $0x6c] sm:$0xf] }
 0x2ce   : > { %5175 = vmatmul.mubr.bf16.gmra.mxu1 %v2037_v53  ;;  %v4749_v27 = vcombine.low %v3105_v52, %v6596_v6 }
 0x2cf   : > { %5047 = vmatpush3.bf16.msra.mxu1 %v5437_v62  ;;  %5178 = vmatprep.mubr.bf16.mxu1 %v2040_v21  ;;  %v3218_v17 = vsel %vm382_vm0, %v3213_v49, %v3217_v38  ;;  %v3258_v53 = vshll.u32 %v4747_v42, 16  ;;  %v3256_v62 = vshrl.u32 %v4747_v42, 16 }
 0x2d0   : > { %5048 = vmatprep.subr.bf16.mxu1 %v5439_v12  ;;  %v3263_v12 = vshll.u32 %v6583_v61, 16  ;;  %v3282_v60 = vshll.u32 %v4749_v27, 16  ;;  %v3280_v16 = vshrl.u32 %v4749_v27, 16 }
 0x2d1   : > { %v3260_v18 = vrot.slane %v3258_v53, 1 }
 0x2d2   : > { %v3265_v30 = vrot.slane %v3263_v12, 1  ;;  %v3284_v29 = vrot.slane %v3282_v60, 1 }
 0x2d3   : > { %5049 = vmatpush3.bf16.msra.mxu1 %v5440_v23  ;;  %v3261_v2 = vor.u32 %v3260_v18, %v3256_v62 }
 0x2d4   : > { %5050 = vmatprep.subr.bf16.mxu1 %v5444_v13 }
 0x2d5   : > { %v3266_v5 = vsel %vm382_vm0, %v3261_v2, %v3265_v30 }
 0x2d6   : > { %5179 = vmatmul.mubr.bf16.gmra.mxu1 %v2043_v44  ;;  %v3289_v44 = vrot.slane %v3287_v4, 1 }
 0x2d7   : > { %5051 = vmatpush3.bf16.msra.mxu1 %v5445_v31  ;;  %3580 = vmatprep.mubr.bf16.mxu1 %v3206_v45 }
 0x2d8   : > { %5052 = vmatprep.subr.bf16.mxu1 %v5447_v41 }
 0x2db   : > { %5053 = vmatpush3.bf16.msra.mxu1 %v5448_v51 }
 0x2de   : > { %3581 = vmatmul.mubr.bf16.vlgmr.msra.gmra.mxu1 %v6600_v57  ;;  %v3251_v57 = vshll.u32 %v6573_v58, 16  ;;  %v4748_v58 = vcombine.low %v3103_v28, %v6590_v56 }
 0x2df   : > { %3588 = vmatprep.mubr.bf16.mxu1 %v3218_v17 }
 0x2e0   : > { %v3253_v48 = vrot.slane %v3251_v57, 1  ;;  %v3270_v54 = vshll.u32 %v4748_v58, 16  ;;  %v3268_v23 = vshrl.u32 %v4748_v58, 16 }
 0x2e2   : > { %v3254_v21 = vsel %vm382_vm0, %v3249_v0, %v3253_v48  ;;  %v3272_v46 = vrot.slane %v3270_v54, 1 }
 0x2e4   : > { %v3273_v13 = vor.u32 %v3272_v46, %v3268_v23 }
 0x2e6   : > { %3589 = vmatmul.mubr.bf16.gmra.mxu1 %v4743_v24  ;;  %v3275_v24 = vshll.u32 %v6588_v3, 16  ;;  %v3285_v3 = vor.u32 %v3284_v29, %v3280_v16 }
 0x2e7   : > { %3596 = vmatprep.mubr.bf16.mxu1 %v3230_v22 }
 0x2e8   : > { %v3277_v61 = vrot.slane %v3275_v24, 1  ;;  %v3290_v31 = vsel %vm382_vm0, %v3285_v3, %v3289_v44 }
 0x2ea   : > { %v3278_v56 = vsel %vm382_vm0, %v3273_v13, %v3277_v61  ;;  %vm4388_vm0 = vcmask 1044484  }
 0x2ee   : > { %3597 = vmatmul.mubr.bf16.gmra.mxu1 %v4744_v11 }
 0x2ef   : > { %3604 = vmatprep.mubr.bf16.mxu1 %v3242_v26 }
 0x2f6   : > { %3605 = vmatmul.mubr.bf16.gmra.mxu1 %v4745_v35 }
 0x2f7   : > { %3612 = vmatprep.mubr.bf16.mxu1 %v3254_v21 }
 0x2fe   : > { %3613 = vmatmul.mubr.bf16.gmra.mxu1 %v4746_v14 }
 0x2ff   : > { %3620 = vmatprep.mubr.bf16.mxu1 %v3266_v5 }
 0x306   : > { %3621 = vmatmul.mubr.bf16.gmra.mxu1 %v4747_v42 }
 0x307   : > { %3628 = vmatprep.mubr.bf16.mxu1 %v3278_v56 }
 0x30e   : > { %3629 = vmatmul.mubr.bf16.gmra.mxu1 %v4748_v58 }
 0x30f   : > { %3636 = vmatprep.mubr.bf16.mxu1 %v3290_v31 }
 0x316   : > { %3637 = vmatmul.mubr.bf16.gmra.mxu1 %v4749_v27 }
 0x31e   : > { %v4894_v6 = vpop.f32.mrf.mxu1 }
 0x320   : > { %v4895_v37 = vpop.f32.mrf.mxu1 }
 0x321   : > { %v6643_v41 = vadd.f32 %v4895_v37, %v4894_v6 }
 0x322   : > { %v4897_v45 = vpop.f32.mrf.mxu1 }
 0x324   : > { %v4898_v20 = vpop.f32.mrf.mxu1 }
 0x325   : > { %v6645_v1 = vadd.f32 %v4898_v20, %v4897_v45 }
 0x326   : > { %v4900_v11 = vpop.f32.mrf.mxu1 }
 0x328   : > { %v4901_v51 = vpop.f32.mrf.mxu1 }
 0x329   : > { %v6647_v40 = vadd.f32 %v4901_v51, %v4900_v11 }
 0x32a   : > { %v4903_v49 = vpop.f32.mrf.mxu1  ;;  %v6653_v19 = vpop.f32.mrf.mxu0 }
 0x32c   : > { %v4904_v38 = vpop.f32.mrf.mxu1  ;;  %v6655_v50 = vpop.f32.mrf.mxu0 }
 0x32d   : > { %v6649_v25 = vadd.f32 %v4904_v38, %v4903_v49 }
 0x32e   : > { %v4906_v7 = vpop.f32.mrf.mxu1  ;;  %v6659_v33 = vpop.f32.mrf.mxu0 }
 0x330   : > { %v4907_v34 = vpop.f32.mrf.mxu1  ;;  %v6661_v22 = vpop.f32.mrf.mxu0 }
 0x331   : > { %v6651_v17 = vadd.f32 %v4907_v34, %v4906_v7 }
 0x332   : > { %v4909_v55 = vpop.f32.mrf.mxu1  ;;  %v6665_v14 = vpop.f32.mrf.mxu0 }
 0x334   : > { %v4910_v35 = vpop.f32.mrf.mxu1  ;;  %v6667_v39 = vpop.f32.mrf.mxu0 }
 0x335   : > { %v6657_v59 = vadd.f32 %v4910_v35, %v4909_v55 }
 0x336   : > { %v4912_v32 = vpop.f32.mrf.mxu1  ;;  %v6671_v57 = vpop.f32.mrf.mxu0 }
 0x338   : > { %v4913_v43 = vpop.f32.mrf.mxu1  ;;  %v6673_v63 = vpop.f32.mrf.mxu0 }
 0x339   : > { %v6663_v36 = vadd.f32 %v4913_v43, %v4912_v32 }
 0x33a   : > { %v4915_v8 = vpop.f32.mrf.mxu1  ;;  %v4986_v0 = vpop.f32.mrf.mxu0 }
 0x33c   : > { %v4916_v9 = vpop.f32.mrf.mxu1  ;;  %v4987_v53 = vpop.f32.mrf.mxu0 }
 0x33d   : > { %v6669_v15 = vadd.f32 %v4916_v9, %v4915_v8  ;;  %v4988_v62 = vadd.f32 %v4987_v53, %v4986_v0 }
 0x33e   : > { %v4918_v47 = vpop.f32.mrf.mxu1  ;;  %v4989_v18 = vpop.f32.mrf.mxu0 }
 0x340   : > { %v4919_v26 = vpop.f32.mrf.mxu1  ;;  %v4990_v58 = vpop.f32.mrf.mxu0 }
 0x341   : > { %v6675_v10 = vadd.f32 %v4919_v26, %v4918_v47  ;;  %v6681_v30 = vadd.f32 %v4990_v58, %v4989_v18 }
 0x342   : > { %v4921_v42 = vpop.f32.mrf.mxu1  ;;  %v4992_v52 = vpop.f32.mrf.mxu0 }
 0x344   : > { %v4922_v48 = vpop.f32.mrf.mxu1  ;;  %v4993_v5 = vpop.f32.mrf.mxu0 }
 0x345   : > { %v6677_v28 = vadd.f32 %v4922_v48, %v4921_v42  ;;  %v4994_v46 = vadd.f32 %v4993_v5, %v4992_v52 }
 0x346   : > { %v4924_v21 = vpop.f32.mrf.mxu1  ;;  %v4995_v13 = vpop.f32.mrf.mxu0 }
 0x348   : > { %v4925_v12 = vpop.f32.mrf.mxu1  ;;  %v4996_v60 = vpop.f32.mrf.mxu0 }
 0x349   : > { %v6679_v2 = vadd.f32 %v4925_v12, %v4924_v21  ;;  %v4997_v16 = vadd.f32 %v4996_v60, %v4995_v13 }
 0x34a   : > { %v4927_v54 = vpop.f32.mrf.mxu1  ;;  %v4998_v4 = vpop.f32.mrf.mxu0 }
 0x34c   : > { %v4928_v24 = vpop.f32.mrf.mxu1  ;;  %v4999_v44 = vpop.f32.mrf.mxu0 }
 0x34d   : > { %v6683_v23 = vadd.f32 %v4928_v24, %v4927_v54  ;;  %v5000_v6 = vadd.f32 %v4999_v44, %v4998_v4 }
 0x34e   : > { %v4930_v27 = vpop.f32.mrf.mxu1  ;;  %v5001_v45 = vpop.f32.mrf.mxu0 }
 0x350   : > { %v4931_v61 = vpop.f32.mrf.mxu1  ;;  %v5002_v11 = vpop.f32.mrf.mxu0 }
 0x351   : > { %v6685_v56 = vadd.f32 %v4931_v61, %v4930_v27  ;;  %v5003_v49 = vadd.f32 %v5002_v11, %v5001_v45 }
 0x352   : > { %v4933_v29 = vpop.f32.mrf.mxu1  ;;  %v5004_v7 = vpop.f32.mrf.mxu0 }
 0x354   : > { %v4934_v3 = vpop.f32.mrf.mxu1  ;;  %v5005_v55 = vpop.f32.mrf.mxu0 }
 0x355   : > { %v6687_v31 = vadd.f32 %v4934_v3, %v4933_v29  ;;  %v5006_v32 = vadd.f32 %v5005_v55, %v5004_v7 }
 0x356   : > { %v4936_v37 = vpop.f32.mrf.mxu1  ;;  %v5007_v8 = vpop.f32.mrf.mxu0 }
 0x358   : > { %v4937_v20 = vpop.f32.mrf.mxu1  ;;  %v5008_v26 = vpop.f32.mrf.mxu0 }
 0x359   : > { %v4938_v51 = vadd.f32 %v4937_v20, %v4936_v37  ;;  %v5009_v0 = vadd.f32 %v5008_v26, %v5007_v8 }
 0x35a   : > { %v4939_v38 = vpop.f32.mrf.mxu1  ;;  %v5010_v53 = vpop.f32.mrf.mxu0 }
 0x35c   : > { %v4940_v34 = vpop.f32.mrf.mxu1  ;;  %v5011_v12 = vpop.f32.mrf.mxu0 }
 0x35d   : > { %v4941_v35 = vadd.f32 %v4940_v34, %v4939_v38  ;;  %v5012_v54 = vadd.f32 %v5011_v12, %v5010_v53 }
 0x35e   : > { %v5136_v43 = vpop.f32.mrf.mxu1 }
 0x35f   : > { %v6690_v9 = vadd.f32 %v5136_v43, %v6647_v40  ;;  %v5013_v40 = vpop.f32.mrf.mxu0 }
 0x360   : > { %v2689_v47 = vpop.f32.mrf.mxu1 }
 0x361   : > { %v6693_v42 = vadd.f32 %v6643_v41, %v2689_v47  ;;  %v5014_v27 = vpop.f32.mrf.mxu0 }
 0x362   : > { %v5137_v48 = vpop.f32.mrf.mxu1  ;;  %v5015_v13 = vadd.f32 %v5014_v27, %v5013_v40 }
 0x363   : > { %v6696_v21 = vadd.f32 %v5137_v48, %v6649_v25  ;;  %v5016_v29 = vpop.f32.mrf.mxu0 }
 0x364   : > { %v2692_v18 = vpop.f32.mrf.mxu1 }
 0x365   : > { %v6699_v58 = vadd.f32 %v6645_v1, %v2692_v18  ;;  %v5017_v44 = vpop.f32.mrf.mxu0 }
 0x366   : > { %v5140_v52 = vpop.f32.mrf.mxu1  ;;  %v5018_v37 = vadd.f32 %v5017_v44, %v5016_v29 }
 0x367   : > { %v2714_v24 = vadd.f32 %v5140_v52, %v6663_v36  ;;  %v5019_v11 = vpop.f32.mrf.mxu0 }
 0x368   : > { %v2705_v5 = vpop.f32.mrf.mxu1 }
 0x369   : > { %v2706_v41 = vadd.f32 %v6651_v17, %v2705_v5  ;;  %v2955_v61 = vadd.f32 %v4994_v46, %v2714_v24  ;;  %v5020_v7 = vpop.f32.mrf.mxu0 }
 0x36a   : > { %v5141_v60 = vpop.f32.mrf.mxu1  ;;  %v5021_v34 = vadd.f32 %v5020_v7, %v5019_v11 }
 0x36b   : > { %v2717_v25 = vadd.f32 %v5141_v60, %v6669_v15  ;;  %v2947_v4 = vadd.f32 %v4988_v62, %v2706_v41 }
 0x36c   : > { %v2708_v3 = vpop.f32.mrf.mxu1 }
 0x36d   : > { %v2709_v1 = vadd.f32 %v6657_v59, %v2708_v3  ;;  %v2958_v45 = vadd.f32 %v4997_v16, %v2717_v25 }
 0x36e   : > { %v5144_v20 = vpop.f32.mrf.mxu1 }
 0x36f   : > { %v2730_v36 = vadd.f32 %v5144_v20, %v6679_v2  ;;  %v2950_v38 = vadd.f32 %v6681_v30, %v2709_v1 }
 0x370   : > { %v2721_v17 = vpop.f32.mrf.mxu1 }
 0x371   : > { %v2722_v46 = vadd.f32 %v6675_v10, %v2721_v17  ;;  %v2971_v55 = vadd.f32 %v5006_v32, %v2730_v36  ;;  %v5200_v36 = vpop.f32.mrf.mxu0 }
 0x372   : > { %v5145_v15 = vpop.f32.mrf.mxu1 }
 0x373   : > { %v2733_v62 = vadd.f32 %v5145_v15, %v6683_v23  ;;  %v2963_v43 = vadd.f32 %v5000_v6, %v2722_v46  ;;  %v3679_v46 = vpop.f32.mrf.mxu0  ;;  %v4976_v15 = vadd.f32 %v6655_v50, %v6653_v19  ;;  %v4985_v19 = vadd.f32 %v6673_v63, %v6671_v57 }
 0x374   : > { %v2724_v8 = vpop.f32.mrf.mxu1 }
 0x375   : > { %v2725_v59 = vadd.f32 %v6677_v28, %v2724_v8  ;;  %v2974_v16 = vadd.f32 %v5009_v0, %v2733_v62  ;;  %v2942_v57 = vadd.f32 %v4985_v19, %v6696_v21 }
 0x376   : > { %v5148_v47 = vpop.f32.mrf.mxu1 }
 0x377   : > { %v2746_v26 = vadd.f32 %v5148_v47, %v4938_v51  ;;  %v2966_v48 = vadd.f32 %v5003_v49, %v2725_v59  ;;  %v4982_v59 = vadd.f32 %v6667_v39, %v6665_v14 }
 0x378   : > { %v2737_v2 = vpop.f32.mrf.mxu1 }
 0x379   : > { %v2738_v30 = vadd.f32 %v6685_v56, %v2737_v2  ;;  %v2987_v53 = vadd.f32 %v5018_v37, %v2746_v26  ;;  %v2939_v50 = vadd.f32 %v4982_v59, %v6690_v9 }
 0x37a   : > { %v5149_v18 = vpop.f32.mrf.mxu1 }
 0x37b   : > { %v2749_v12 = vadd.f32 %v5149_v18, %v4941_v35  ;;  %v2979_v10 = vadd.f32 %v5012_v54, %v2738_v30  ;;  %v3801_v30 = vlaneseq }
 0x37c   : > { %v2740_v52 = vpop.f32.mrf.mxu1 }
 0x37d   : > { %v2741_v32 = vadd.f32 %v6687_v31, %v2740_v52  ;;  %v2990_v40 = vadd.f32 %v5021_v34, %v2749_v12 }
 0x37e   : > { %v5168_v23 = vpop.f32.mrf.mxu1 }
 0x37f   : > { %v2982_v6 = vadd.f32 %v5015_v13, %v2741_v32  ;;  %v3802_v32 = vshrl.u32 %v3801_v30, 7 }
 0x380   : > { %v3027_v24 = vpop.f32.mrf.mxu1 }
 0x382   : > { %v6712_v5 = vpop.f32.mrf.mxu1 }
 0x384   : > { %v3030_v28 = vpop.f32.mrf.mxu1 }
 0x386   : > { %v5172_v0 = vpop.f32.mrf.mxu1 }
 0x387   : > { %v6714_v51 = vadd.f32 %v5172_v0, %v2955_v61  ;;  %v3036_v0 = vadd.f32 %v5168_v23, %v2939_v50 }
 0x388   : > { %v3043_v49 = vpop.f32.mrf.mxu1 }
 0x389   : > { %v6716_v27 = vadd.f32 %v3043_v49, %v2947_v4 }
 0x38a   : > { %v5173_v56 = vpop.f32.mrf.mxu1 }
 0x38b   : > { %v6718_v41 = vadd.f32 %v5173_v56, %v2958_v45 }
 0x38c   : > { %v3046_v35 = vpop.f32.mrf.mxu1 }
 0x38d   : > { %v6720_v54 = vadd.f32 %v3046_v35, %v2950_v38  ;;  %v6751_v35 = vld [vmem:[#allocation8] ss:$0 sm:$0xff] }
 0x38e   : > { %v5176_v31 = vpop.f32.mrf.mxu1 }
 0x38f   : > { %v6722_v60 = vadd.f32 %v5176_v31, %v2971_v55 }
 0x390   : > { %v3059_v13 = vpop.f32.mrf.mxu1 }
 0x391   : > { %v6724_v29 = vadd.f32 %v3059_v13, %v2963_v43  ;;  %v5201_v43 = vpop.f32.mrf.mxu0 }
 0x392   : > { %v5177_v25 = vpop.f32.mrf.mxu1 }
 0x393   : > { %v6726_v3 = vadd.f32 %v5177_v25, %v2974_v16  ;;  %v4979_v16 = vadd.f32 %v6661_v22, %v6659_v33  ;;  %v3682_v12 = vpop.f32.mrf.mxu0 }
 0x394   : > { %v3062_v61 = vpop.f32.mrf.mxu1 }
 0x395   : > { %v6728_v44 = vadd.f32 %v3062_v61, %v2966_v48  ;;  %v5608_v48 = vmov 1983009808   ;;  %v2934_v39 = vadd.f32 %v4979_v16, %v6699_v58  ;;  %v3039_v61 = vadd.f32 %v6712_v5, %v2942_v57 }
 0x396   : > { %v5180_v4 = vpop.f32.mrf.mxu1  ;;  %v3799_v2 = vunpack.c.l.s4 %v5608_v48 }
 0x397   : > { %v6730_v1 = vadd.f32 %v5180_v4, %v2987_v53  ;;  %v2931_v53 = vadd.f32 %v4976_v15, %v6693_v42  ;;  %v3031_v56 = vadd.f32 %v3030_v28, %v2934_v39 }
 0x398   : > { %v3075_v37 = vpop.f32.mrf.mxu1  ;;  %v3800_v22 = vunpack.c.0.s8 %v3799_v2 }
 0x399   : > { %v6732_v45 = vadd.f32 %v3075_v37, %v2979_v10  ;;  %v3028_v52 = vadd.f32 %v3027_v24, %v2931_v53 }
 0x39a   : > { %v5181_v20 = vpop.f32.mrf.mxu1  ;;  %v6754_v13 = vsub.s32 %v3800_v22, %v3802_v32 }
 0x39b   : > { %v6734_v11 = vadd.f32 %v5181_v20, %v2990_v40 }
 0x39c   : > { %v3078_v38 = vpop.f32.mrf.mxu1 }
 0x39d   : > { %v6736_v17 = vadd.f32 %v3078_v38, %v2982_v6  ;;  %v6749_v6 = vpop.f32.mrf.mxu0 }
 0x39e   : > { %v5054_v7 = vpop.f32.mrf.mxu1 }
 0x39f   : > { %v3695_v25 = vpop.f32.mrf.mxu0 }
 0x3a0   : > { %v5055_v34 = vpop.f32.mrf.mxu1 }
 0x3a1   : > { %v5056_v62 = vadd.f32 %v5055_v34, %v5054_v7 }
 0x3a2   : > { %v5057_v55 = vpop.f32.mrf.mxu1 }
 0x3a3   : > { %v3680_v18 = vadd.f32 %v5056_v62, %v3679_v46  ;;  %v6760_v46 = vpop.f32.mrf.mxu0 }
 0x3a4   : > { %v5058_v8 = vpop.f32.mrf.mxu1 }
 0x3a5   : > { %v5059_v47 = vadd.f32 %v5058_v8, %v5057_v55  ;;  %v3742_v42 = vadd.f32 %v3680_v18, %v3028_v52  ;;  %v3698_v30 = vpop.f32.mrf.mxu0 }
 0x3a6   : > { %v5060_v26 = vpop.f32.mrf.mxu1 }
 0x3a7   : > { %v3683_v33 = vadd.f32 %v5059_v47, %v3682_v12  ;;  %v3765_v4 = vadd.f32 %v6751_v35, %v3742_v42 }
 0x3a8   : > { %v5061_v10 = vpop.f32.mrf.mxu1 }
 0x3a9   : > { %v5062_v14 = vadd.f32 %v5061_v10, %v5060_v26  ;;  %v3743_v24 = vadd.f32 %v3683_v33, %v3031_v56 }
 0x3aa   : > { %v5063_v40 = vpop.f32.mrf.mxu1 }
 0x3ab   : > { %v3688_v49 = vadd.f32 %v5200_v36, %v5062_v14  ;;  %v3766_v21 = vadd.f32 %v6751_v35, %v3743_v24 }
 0x3ac   : > { %v5064_v31 = vpop.f32.mrf.mxu1 }
 0x3ad   : > { %v3744_v63 = vadd.f32 %v3688_v49, %v3036_v0  ;;  %v5065_v9 = vadd.f32 %v5064_v31, %v5063_v40 }
 0x3ae   : > { %v5066_v58 = vpop.f32.mrf.mxu1 }
 0x3af   : > { %v3767_v23 = vadd.f32 %v6751_v35, %v3744_v63  ;;  %v3691_v37 = vadd.f32 %v5201_v43, %v5065_v9 }
 0x3b0   : > { %v5067_v28 = vpop.f32.mrf.mxu1 }
 0x3b1   : > { %v3781_v20 = vmax.f32 %v3765_v4, %v3767_v23  ;;  %v3745_v36 = vadd.f32 %v3691_v37, %v3039_v61  ;;  %v5068_v38 = vadd.f32 %v5067_v28, %v5066_v58 }
 0x3b2   : > { %v5069_v7 = vpop.f32.mrf.mxu1 }
 0x3b3   : > { %v3797_v34 = vcombine.high %v3781_v20, %v3781_v20  ;;  %v3804_v55 = vrot.slane %v3781_v20, %v6754_v13  ;;  %v3768_v5 = vadd.f32 %v6751_v35, %v3745_v36  ;;  %v3696_v15 = vadd.f32 %v5068_v38, %v3695_v25 }
 0x3b4   : > { %v5070_v62 = vpop.f32.mrf.mxu1 }
 0x3b5   : > { %v3811_v8 = vrot.slane %v3797_v34, %v6754_v13  ;;  %v3812_v43 = vcombine.high %v3804_v55, %v3804_v55  ;;  %v3966_v59 = vsel %vm3965_vm12, %v3804_v55, -inf  ;;  %v3782_v16 = vmax.f32 %v3766_v21, %v3768_v5 }
 0x3b6   : > { %v3967_v47 = vrot.slane %v3966_v59, 4  ;;  %v3746_v26 = vadd.f32 %v3696_v15, %v6716_v27  ;;  %v5071_v48 = vadd.f32 %v5070_v62, %v5069_v7  ;;  %v6767_v2 = vpop.f32.mrf.mxu1 }
 0x3b7   : > { %v3813_v53 = vcombine.high %v3811_v8, %v3811_v8  ;;  %v3973_v18 = vsel %vm3965_vm12, %v3812_v43, -inf  ;;  %v3980_v12 = vsel %vm3965_vm12, %v3811_v8, -inf  ;;  %v3814_v10 = vcombine.high %v3782_v16, %v3782_v16 }
 0x3b8   : > { %v3968_v19 = vmax.f32 %v3966_v59, %v3967_v47  ;;  %v3974_v50 = vrot.slane %v3973_v18, 4  ;;  %v3981_v52 = vrot.slane %v3980_v12, 4  ;;  %v3821_v14 = vrot.slane %v3782_v16, %v6754_v13  ;;  %v6772_v39 = vpop.f32.mrf.mxu1 }
 0x3b9   : > { %v3987_v33 = vsel %vm3965_vm12, %v3813_v53, -inf  ;;  %v3828_v27 = vrot.slane %v3814_v10, %v6754_v13  ;;  %v6777_v22 = vadd.f32 %v6751_v35, %v3746_v26  ;;  %v6779_v32 = vadd.f32 %v5071_v48, %v3698_v30  ;;  %v6793_v26 = vpop.f32.mrf.mxu0 }
 0x3ba   : > { %v3969_v40 = vrot.slane %v3968_v19, 2  ;;  %v3975_v0 = vmax.f32 %v3973_v18, %v3974_v50  ;;  %v3982_v42 = vmax.f32 %v3980_v12, %v3981_v52  ;;  %v3988_v49 = vrot.slane %v3987_v33, 4  ;;  %v6781_v56 = vpop.f32.mrf.mxu1 }
 0x3bb   : > { %v3829_v31 = vcombine.high %v3821_v14, %v3821_v14  ;;  %v3830_v57 = vcombine.high %v3828_v27, %v3828_v27  ;;  %v3994_v63 = vsel %vm3965_vm12, %v3821_v14, -inf  ;;  %v4008_v9 = vsel %vm3965_vm12, %v3828_v27, -inf }
 0x3bc   : > { %v3970_v24 = vmax.f32 %v3968_v19, %v3969_v40  ;;  %v3976_v58 = vrot.slane %v3975_v0, 2  ;;  %v3983_v25 = vrot.slane %v3982_v42, 2  ;;  %v3989_v61 = vmax.f32 %v3987_v33, %v3988_v49  ;;  %v6785_v4 = vpop.f32.mrf.mxu1 }
 0x3bd   : > { %v3995_v23 = vrot.slane %v3994_v63, 4  ;;  %v4001_v37 = vsel %vm3965_vm12, %v3829_v31, -inf  ;;  %v4009_v28 = vrot.slane %v4008_v9, 4  ;;  %v4015_v20 = vsel %vm3965_vm12, %v3830_v57, -inf  ;;  %v3711_v57 = vpop.f32.mrf.mxu0 }
 0x3be   : > { %v3971_v36 = vrot.slane %v3970_v24, 1  ;;  %v3977_v38 = vmax.f32 %v3975_v0, %v3976_v58  ;;  %v3984_v21 = vmax.f32 %v3982_v42, %v3983_v25  ;;  %v3990_v7 = vrot.slane %v3989_v61, 2  ;;  %v6789_v34 = vpop.f32.mrf.mxu1 }
 0x3bf   : > { %v3996_v55 = vmax.f32 %v3994_v63, %v3995_v23  ;;  %v4002_v5 = vrot.slane %v4001_v37, 4  ;;  %v4010_v15 = vmax.f32 %v4008_v9, %v4009_v28  ;;  %v4016_v62 = vrot.slane %v4015_v20, 4 }
 0x3c0   : > { %v3972_v8 = vmax.f32 %v3970_v24, %v3971_v36  ;;  %v3978_v43 = vrot.slane %v3977_v38, 1  ;;  %v3985_v59 = vrot.slane %v3984_v21, 1  ;;  %v3991_v16 = vmax.f32 %v3989_v61, %v3990_v7  ;;  %v6791_v47 = vpop.f32.mrf.mxu1 }
 0x3c1   : > { %v3997_v48 = vrot.slane %v3996_v55, 2  ;;  %v4003_v30 = vmax.f32 %v4001_v37, %v4002_v5  ;;  %v4011_v53 = vrot.slane %v4010_v15, 2  ;;  %v4017_v18 = vmax.f32 %v4015_v20, %v4016_v62 }
 0x3c2   : > { %v3979_v12 = vmax.f32 %v3977_v38, %v3978_v43  ;;  %v3986_v10 = vmax.f32 %v3984_v21, %v3985_v59  ;;  %v3992_v19 = vrot.slane %v3991_v16, 1  ;;  %v4190_v50 = vmax.f32 %v3972_v8, 0.0  ;;  %v5081_v52 = vpop.f32.mrf.mxu1  ;;  %v5209_v8 = vpop.f32.mrf.mxu0 }
 0x3c3   : > { %v3998_v14 = vmax.f32 %v3996_v55, %v3997_v48  ;;  %v4004_v33 = vrot.slane %v4003_v30, 2  ;;  %v4012_v27 = vmax.f32 %v4010_v15, %v4011_v53  ;;  %v4018_v40 = vrot.slane %v4017_v18, 2 }
 0x3c4   : > { %v3993_v0 = vmax.f32 %v3991_v16, %v3992_v19  ;;  %v4191_v42 = vmax.f32 %v3979_v12, 0.0  ;;  %v4192_v49 = vmax.f32 %v3986_v10, 0.0  ;;  %v4846_v31 = vpack.c.bf16 %v4190_v50, %v4190_v50  ;;  %v5082_v63 = vpop.f32.mrf.mxu1 }
 0x3c5   : > { %v3999_v9 = vrot.slane %v3998_v14, 1  ;;  %v4005_v24 = vmax.f32 %v4003_v30, %v4004_v33  ;;  %v4013_v58 = vrot.slane %v4012_v27, 1  ;;  %v4019_v25 = vmax.f32 %v4017_v18, %v4018_v40 }
 0x3c6   : > { %v4193_v61 = vmax.f32 %v3993_v0, 0.0  ;;  %v4847_v23 = vpack.c.bf16 %v4191_v42, %v4191_v42  ;;  %v4848_v37 = vpack.c.bf16 %v4192_v49, %v4192_v49  ;;  %v4350_v28 = vunpack.c.l.b16 %v4846_v31  ;;  %v5084_v20 = vpop.f32.mrf.mxu1  ;;  %v3714_v42 = vpop.f32.mrf.mxu0 }
 0x3c7   : > { %v4000_v36 = vmax.f32 %v3998_v14, %v3999_v9  ;;  %v4006_v38 = vrot.slane %v4005_v24, 1  ;;  %v4014_v21 = vmax.f32 %v4012_v27, %v4013_v58  ;;  %v4020_v7 = vrot.slane %v4019_v25, 1 }
 0x3c8   : > { %v4849_v55 = vpack.c.bf16 %v4193_v61, %v4193_v61  ;;  %v4351_v5 = vunpack.c.l.b16 %v4847_v23  ;;  %v4352_v15 = vunpack.c.l.b16 %v4848_v37  ;;  %v3747_v62 = vadd.f32 %v6779_v32, %v6720_v54  ;;  %v5085_v43 = vpop.f32.mrf.mxu1  ;;  %v6810_v37 = vpop.f32.mrf.mxu0 }
 0x3c9   : > { %v4007_v59 = vmax.f32 %v4005_v24, %v4006_v38  ;;  %v4021_v16 = vmax.f32 %v4019_v25, %v4020_v7  ;;  %v4194_v48 = vmax.f32 %v4000_v36, 0.0  ;;  %v4196_v30 = vmax.f32 %v4014_v21, 0.0 }
 0x3ca   : > { %v4353_v53 = vunpack.c.l.b16 %v4849_v55  ;;  %v4383_v18 = vsel %vm4382_vm13, %v4351_v5, %v4350_v28  ;;  %v3770_v12 = vadd.f32 %v6751_v35, %v3747_v62  ;;  %v5074_v10 = vadd.f32 %v6772_v39, %v6767_v2  ;;  %v5087_v19 = vpop.f32.mrf.mxu1 }
 0x3cb   : > { %v4385_v50 = vsel %vm4384_vm14, %v4352_v15, %v4383_v18  ;;  %v4195_v14 = vmax.f32 %v4007_v59, 0.0  ;;  %v4197_v33 = vmax.f32 %v4021_v16, 0.0  ;;  %v4850_v54 = vpack.c.bf16 %v4194_v48, %v4194_v48  ;;  %v3727_v15 = vpop.f32.mrf.mxu0 }
 0x3cc   : > { %v4852_v32 = vpack.c.bf16 %v4196_v30, %v4196_v30  ;;  %v4387_v27 = vsel %vm4386_vm15, %v4353_v53, %v4385_v50  ;;  %v3704_v40 = vadd.f32 %v6749_v6, %v5074_v10  ;;  %v5077_v0 = vadd.f32 %v6785_v4, %v6781_v56  ;;  %v5088_v49 = vpop.f32.mrf.mxu1 }
 0x3cd   : > { %v4851_v31 = vpack.c.bf16 %v4195_v14, %v4195_v14  ;;  %v4853_v9 = vpack.c.bf16 %v4197_v33, %v4197_v33  ;;  %v4354_v24 = vunpack.c.l.b16 %v4850_v54  ;;  %v5080_v2 = vadd.f32 %v6791_v47, %v6789_v34 }
 0x3ce   : > { %v4356_v39 = vunpack.c.l.b16 %v4852_v32  ;;  %v3748_v58 = vadd.f32 %v3704_v40, %v6714_v51  ;;  %v3707_v25 = vadd.f32 %v6760_v46, %v5077_v0  ;;  %v5083_v61 = vadd.f32 %v5082_v63, %v5081_v52  ;;  %v5090_v23 = vpop.f32.mrf.mxu1 }
 0x3cf   : > { %v4355_v6 = vunpack.c.l.b16 %v4851_v31  ;;  %v4357_v28 = vunpack.c.l.b16 %v4853_v9  ;;  %v4389_v56 = vsel %vm4388_vm0, %v4354_v24, %v4387_v27  ;;  %v3712_v4 = vadd.f32 %v5080_v2, %v3711_v57 }
 0x3d0   : > { %v3771_v36 = vadd.f32 %v6751_v35, %v3748_v58  ;;  %v3749_v38 = vadd.f32 %v3707_v25, %v6718_v41  ;;  %v3715_v21 = vadd.f32 %v5083_v61, %v3714_v42  ;;  %v5086_v34 = vadd.f32 %v5085_v43, %v5084_v20  ;;  %v5091_v47 = vpop.f32.mrf.mxu1 }
 0x3d1   : > { %v4391_v51 = vsel %vm4390_vm1, %v4355_v6, %v4389_v56  ;;  %v3750_v46 = vadd.f32 %v3712_v4, %v6724_v29  ;;  %v5089_v52 = vadd.f32 %v5088_v49, %v5087_v19  ;;  %v5092_v63 = vadd.f32 %v5091_v47, %v5090_v23 }
 0x3d2   : > { %v4393_v7 = vsel %vm4392_vm2, %v4356_v39, %v4391_v51  ;;  %v3783_v55 = vmax.f32 %v6777_v22, %v3771_v36  ;;  %v3772_v57 = vadd.f32 %v6751_v35, %v3749_v38  ;;  %v3751_v5 = vadd.f32 %v3715_v21, %v6728_v44 }
 0x3d3   : > { %v4395_v41 = vsel %vm4394_vm3, %v4357_v28, %v4393_v7  ;;  %v6823_v20 = vadd.f32 %v6751_v35, %v3750_v46  ;;  %v3720_v62 = vadd.f32 %v6793_v26, %v5086_v34  ;;  %v3723_v29 = vadd.f32 %v5209_v8, %v5089_v52 }
 0x3d4   : > { %v4417_v43 = vpack.c.b16 %v4395_v41, %v4395_v41  ;;  %v3831_v59 = vcombine.high %v3783_v55, %v3783_v55  ;;  %v3838_v16 = vrot.slane %v3783_v55, %v6754_v13  ;;  %v3784_v48 = vmax.f32 %v3770_v12, %v3772_v57 }
 0x3d5   : > { %v6828_v22 = vadd.f32 %v6751_v35, %v3751_v5  ;;  %v3752_v30 = vadd.f32 %v3720_v62, %v6722_v60  ;;  %v3753_v44 = vadd.f32 %v3723_v29, %v6726_v3  ;;  %v6832_v53 = vadd.f32 %v5092_v63, %v3727_v15 }
 0x3d6   : > { %4425 = vst [vmem:[%s5740_s7] sm:$0xf] %v4417_v43  ;;  %v3845_v18 = vrot.slane %v3831_v59, %v6754_v13  ;;  %v3846_v10 = vcombine.high %v3838_v16, %v3838_v16  ;;  %v4022_v26 = vsel %vm3965_vm12, %v3838_v16, -inf  ;;  %v3848_v8 = vcombine.high %v3784_v48, %v3784_v48 }
 0x3d7   : > { %v4023_v19 = vrot.slane %v4022_v26, 4  ;;  %v3855_v50 = vrot.slane %v3784_v48, %v6754_v13  ;;  %v6839_v12 = vadd.f32 %v6751_v35, %v3752_v30  ;;  %v6842_v14 = vadd.f32 %v6751_v35, %v3753_v44 }
 0x3d8   : > { %v3847_v60 = vcombine.high %v3845_v18, %v3845_v18  ;;  %v4029_v3 = vsel %vm3965_vm12, %v3846_v10, -inf  ;;  %v4036_v33 = vsel %vm3965_vm12, %v3845_v18, -inf  ;;  %v3862_v54 = vrot.slane %v3848_v8, %v6754_v13 }
 0x3d9   : > { %v4024_v32 = vmax.f32 %v4022_v26, %v4023_v19  ;;  %v4030_v27 = vrot.slane %v4029_v3, 4  ;;  %v4037_v40 = vrot.slane %v4036_v33, 4  ;;  %v3863_v0 = vcombine.high %v3855_v50, %v3855_v50 }
 0x3da   : > { %v4043_v42 = vsel %vm3965_vm12, %v3847_v60, -inf  ;;  %v3864_v49 = vcombine.high %v3862_v54, %v3862_v54  ;;  %v4050_v31 = vsel %vm3965_vm12, %v3855_v50, -inf  ;;  %v4064_v9 = vsel %vm3965_vm12, %v3862_v54, -inf }
 0x3db   : > { %v4025_v24 = vrot.slane %v4024_v32, 2  ;;  %v4031_v2 = vmax.f32 %v4029_v3, %v4030_v27  ;;  %v4038_v39 = vmax.f32 %v4036_v33, %v4037_v40  ;;  %v4044_v58 = vrot.slane %v4043_v42, 4 }
 0x3dc   : > { %v4051_v25 = vrot.slane %v4050_v31, 4  ;;  %v4057_v61 = vsel %vm3965_vm12, %v3863_v0, -inf  ;;  %v4065_v23 = vrot.slane %v4064_v9, 4  ;;  %v4071_v6 = vsel %vm3965_vm12, %v3864_v49, -inf }
 0x3dd   : > { %v4026_v28 = vmax.f32 %v4024_v32, %v4025_v24  ;;  %v4032_v56 = vrot.slane %v4031_v2, 2  ;;  %v4039_v4 = vrot.slane %v4038_v39, 2  ;;  %v4045_v36 = vmax.f32 %v4043_v42, %v4044_v58 }
 0x3de   : > { %v4052_v38 = vmax.f32 %v4050_v31, %v4051_v25  ;;  %v4058_v21 = vrot.slane %v4057_v61, 4  ;;  %v4066_v34 = vmax.f32 %v4064_v9, %v4065_v23  ;;  %v4072_v47 = vrot.slane %v4071_v6, 4 }
 0x3df   : > { %v4027_v51 = vrot.slane %v4026_v28, 1  ;;  %v4033_v46 = vmax.f32 %v4031_v2, %v4032_v56  ;;  %v4040_v52 = vmax.f32 %v4038_v39, %v4039_v4  ;;  %v4046_v63 = vrot.slane %v4045_v36, 2 }
 0x3e0   : > { %v4053_v7 = vrot.slane %v4052_v38, 2  ;;  %v4059_v55 = vmax.f32 %v4057_v61, %v4058_v21  ;;  %v4067_v57 = vrot.slane %v4066_v34, 2  ;;  %v4073_v5 = vmax.f32 %v4071_v6, %v4072_v47 }
 0x3e1   : > { %v4028_v15 = vmax.f32 %v4026_v28, %v4027_v51  ;;  %v4034_v41 = vrot.slane %v4033_v46, 1  ;;  %v4041_v62 = vrot.slane %v4040_v52, 1  ;;  %v4047_v29 = vmax.f32 %v4045_v36, %v4046_v63 }
 0x3e2   : > { %v4054_v43 = vmax.f32 %v4052_v38, %v4053_v7  ;;  %v4060_v59 = vrot.slane %v4059_v55, 2  ;;  %v4068_v16 = vmax.f32 %v4066_v34, %v4067_v57  ;;  %v4074_v48 = vrot.slane %v4073_v5, 2 }
 0x3e3   : > { %v4035_v30 = vmax.f32 %v4033_v46, %v4034_v41  ;;  %v4042_v44 = vmax.f32 %v4040_v52, %v4041_v62  ;;  %v4048_v18 = vrot.slane %v4047_v29, 1  ;;  %v4198_v10 = vmax.f32 %v4028_v15, 0.0  ;;  %v6861_v62 = vpop.f32.mrf.mxu1 }
 0x3e4   : > { %v4055_v26 = vrot.slane %v4054_v43, 1  ;;  %v4061_v8 = vmax.f32 %v4059_v55, %v4060_v59  ;;  %v4069_v19 = vrot.slane %v4068_v16, 1  ;;  %v4075_v50 = vmax.f32 %v4073_v5, %v4074_v48 }
 0x3e5   : > { %v4049_v60 = vmax.f32 %v4047_v29, %v4048_v18  ;;  %v4199_v3 = vmax.f32 %v4035_v30, 0.0  ;;  %v4200_v33 = vmax.f32 %v4042_v44, 0.0  ;;  %v4854_v54 = vpack.c.bf16 %v4198_v10, %v4198_v10 }
 0x3e6   : > { %v4056_v32 = vmax.f32 %v4054_v43, %v4055_v26  ;;  %v4062_v27 = vrot.slane %v4061_v8, 1  ;;  %v4070_v40 = vmax.f32 %v4068_v16, %v4069_v19  ;;  %v4076_v0 = vrot.slane %v4075_v50, 1 }
 0x3e7   : > { %v4201_v42 = vmax.f32 %v4049_v60, 0.0  ;;  %v4855_v49 = vpack.c.bf16 %v4199_v3, %v4199_v3  ;;  %v4856_v31 = vpack.c.bf16 %v4200_v33, %v4200_v33  ;;  %v4358_v9 = vunpack.c.l.b16 %v4854_v54  ;;  %v6871_v33 = vpop.f32.mrf.mxu1 }
 0x3e8   : > { %v4063_v24 = vmax.f32 %v4061_v8, %v4062_v27  ;;  %v4077_v2 = vmax.f32 %v4075_v50, %v4076_v0  ;;  %v4202_v39 = vmax.f32 %v4056_v32, 0.0  ;;  %v4204_v58 = vmax.f32 %v4070_v40, 0.0 }
 0x3e9   : > { %v4857_v25 = vpack.c.bf16 %v4201_v42, %v4201_v42  ;;  %v4359_v61 = vunpack.c.l.b16 %v4855_v49  ;;  %v4360_v23 = vunpack.c.l.b16 %v4856_v31  ;;  %v3785_v6 = vmax.f32 %v6823_v20, %v6839_v12 }
 0x3ea   : > { %v4203_v28 = vmax.f32 %v4063_v24, 0.0  ;;  %v4205_v56 = vmax.f32 %v4077_v2, 0.0  ;;  %v4858_v4 = vpack.c.bf16 %v4202_v39, %v4202_v39  ;;  %v4860_v36 = vpack.c.bf16 %v4204_v58, %v4204_v58 }
 0x3eb   : > { %v4361_v38 = vunpack.c.l.b16 %v4857_v25  ;;  %v4396_v21 = vsel %vm4382_vm13, %v4359_v61, %v4358_v9  ;;  %v3865_v34 = vcombine.high %v3785_v6, %v3785_v6  ;;  %v3872_v47 = vrot.slane %v3785_v6, %v6754_v13  ;;  %v5096_v61 = vpop.f32.mrf.mxu1 }
 0x3ec   : > { %v4397_v51 = vsel %vm4384_vm14, %v4360_v23, %v4396_v21  ;;  %v4859_v46 = vpack.c.bf16 %v4203_v28, %v4203_v28  ;;  %v4861_v52 = vpack.c.bf16 %v4205_v56, %v4205_v56  ;;  %v4362_v63 = vunpack.c.l.b16 %v4858_v4 }
 0x3ed   : > { %v4364_v7 = vunpack.c.l.b16 %v4860_v36  ;;  %v4398_v55 = vsel %vm4386_vm15, %v4361_v38, %v4397_v51  ;;  %v3879_v20 = vrot.slane %v3865_v34, %v6754_v13  ;;  %v3880_v12 = vcombine.high %v3872_v47, %v3872_v47 }
 0x3ee   : > { %v4363_v57 = vunpack.c.l.b16 %v4859_v46  ;;  %v4365_v5 = vunpack.c.l.b16 %v4861_v52  ;;  %v4399_v15 = vsel %vm4388_vm0, %v4362_v63, %v4398_v55  ;;  %v4078_v41 = vsel %vm3965_vm12, %v3872_v47, -inf }
 0x3ef   : > { %v3881_v29 = vcombine.high %v3879_v20, %v3879_v20  ;;  %v4079_v43 = vrot.slane %v4078_v41, 4  ;;  %v4085_v59 = vsel %vm3965_vm12, %v3880_v12, -inf  ;;  %v4092_v16 = vsel %vm3965_vm12, %v3879_v20, -inf }
 0x3f0   : > { %v4400_v48 = vsel %vm4390_vm1, %v4363_v57, %v4399_v15  ;;  %v4086_v30 = vrot.slane %v4085_v59, 4  ;;  %v4093_v44 = vrot.slane %v4092_v16, 4  ;;  %v3786_v18 = vmax.f32 %v6828_v22, %v6842_v14 }
 0x3f1   : > { %v4401_v10 = vsel %vm4392_vm2, %v4364_v7, %v4400_v48  ;;  %v4080_v26 = vmax.f32 %v4078_v41, %v4079_v43  ;;  %v4099_v8 = vsel %vm3965_vm12, %v3881_v29, -inf  ;;  %v6876_v42 = vadd.f32 %v6832_v53, %v6732_v45  ;;  %v5097_v7 = vpop.f32.mrf.mxu1 }
 0x3f2   : > { %v4402_v19 = vsel %vm4394_vm3, %v4365_v5, %v4401_v10  ;;  %v4087_v50 = vmax.f32 %v4085_v59, %v4086_v30  ;;  %v4094_v60 = vmax.f32 %v4092_v16, %v4093_v44  ;;  %v4100_v3 = vrot.slane %v4099_v8, 4  ;;  %v5213_v30 = vpop.f32.mrf.mxu0 }
 0x3f3   : > { %v4418_v54 = vpack.c.b16 %v4402_v19, %v4402_v19  ;;  %v4081_v32 = vrot.slane %v4080_v26, 2  ;;  %v3882_v27 = vcombine.high %v3786_v18, %v3786_v18  ;;  %v3889_v40 = vrot.slane %v3786_v18, %v6754_v13 }
 0x3f4   : > { %v4088_v0 = vrot.slane %v4087_v50, 2  ;;  %v4095_v22 = vrot.slane %v4094_v60, 2  ;;  %v4101_v14 = vmax.f32 %v4099_v8, %v4100_v3  ;;  %v5099_v8 = vpop.f32.mrf.mxu1 }
 0x3f5   : > { %4426 = vst [vmem:[%s5740_s7 + $0x4] sm:$0xf] %v4418_v54  ;;  %v4082_v49 = vmax.f32 %v4080_v26, %v4081_v32  ;;  %v3896_v31 = vrot.slane %v3882_v27, %v6754_v13  ;;  %v3897_v9 = vcombine.high %v3889_v40, %v3889_v40  ;;  %v4106_v24 = vsel %vm3965_vm12, %v3889_v40, -inf }
 0x3f6   : > { %v4089_v2 = vmax.f32 %v4087_v50, %v4088_v0  ;;  %v4096_v39 = vmax.f32 %v4094_v60, %v4095_v22  ;;  %v4102_v58 = vrot.slane %v4101_v14, 2  ;;  %v4107_v25 = vrot.slane %v4106_v24, 4 }
 0x3f7   : > { %v4083_v23 = vrot.slane %v4082_v49, 1  ;;  %v3898_v6 = vcombine.high %v3896_v31, %v3896_v31  ;;  %v4113_v28 = vsel %vm3965_vm12, %v3897_v9, -inf  ;;  %v4120_v56 = vsel %vm3965_vm12, %v3896_v31, -inf  ;;  %v3730_v31 = vpop.f32.mrf.mxu0 }
 0x3f8   : > { %v4090_v45 = vrot.slane %v4089_v2, 1  ;;  %v4097_v53 = vrot.slane %v4096_v39, 1  ;;  %v4103_v4 = vmax.f32 %v4101_v14, %v4102_v58  ;;  %v4108_v36 = vmax.f32 %v4106_v24, %v4107_v25  ;;  %v5100_v58 = vpop.f32.mrf.mxu1 }
 0x3f9   : > { %v4084_v38 = vmax.f32 %v4082_v49, %v4083_v23  ;;  %v4114_v21 = vrot.slane %v4113_v28, 4  ;;  %v4121_v34 = vrot.slane %v4120_v56, 4  ;;  %v4127_v47 = vsel %vm3965_vm12, %v3898_v6, -inf }
 0x3fa   : > { %v4091_v51 = vmax.f32 %v4089_v2, %v4090_v45  ;;  %v4098_v46 = vmax.f32 %v4096_v39, %v4097_v53  ;;  %v4104_v52 = vrot.slane %v4103_v4, 1  ;;  %v4109_v63 = vrot.slane %v4108_v36, 2 }
 0x3fb   : > { %v4206_v55 = vmax.f32 %v4084_v38, 0.0  ;;  %v4115_v20 = vmax.f32 %v4113_v28, %v4114_v21  ;;  %v4122_v12 = vmax.f32 %v4120_v56, %v4121_v34  ;;  %v4128_v57 = vrot.slane %v4127_v47, 4 }
 0x3fc   : > { %v4105_v5 = vmax.f32 %v4103_v4, %v4104_v52  ;;  %v4207_v15 = vmax.f32 %v4091_v51, 0.0  ;;  %v4208_v41 = vmax.f32 %v4098_v46, 0.0  ;;  %v4110_v29 = vmax.f32 %v4108_v36, %v4109_v63 }
 0x3fd   : > { %v4862_v43 = vpack.c.bf16 %v4206_v55, %v4206_v55  ;;  %v4116_v59 = vrot.slane %v4115_v20, 2  ;;  %v4123_v16 = vrot.slane %v4122_v12, 2  ;;  %v4129_v48 = vmax.f32 %v4127_v47, %v4128_v57 }
 0x3fe   : > { %v4209_v44 = vmax.f32 %v4105_v5, 0.0  ;;  %v4863_v18 = vpack.c.bf16 %v4207_v15, %v4207_v15  ;;  %v4864_v10 = vpack.c.bf16 %v4208_v41, %v4208_v41  ;;  %v4111_v26 = vrot.slane %v4110_v29, 1 }
 0x3ff   : > { %v4366_v19 = vunpack.c.l.b16 %v4862_v43  ;;  %v4117_v50 = vmax.f32 %v4115_v20, %v4116_v59  ;;  %v4124_v60 = vmax.f32 %v4122_v12, %v4123_v16  ;;  %v4130_v3 = vrot.slane %v4129_v48, 2 }
 0x400   : > { %v4865_v54 = vpack.c.bf16 %v4209_v44, %v4209_v44  ;;  %v4367_v32 = vunpack.c.l.b16 %v4863_v18  ;;  %v4368_v27 = vunpack.c.l.b16 %v4864_v10  ;;  %v4112_v40 = vmax.f32 %v4110_v29, %v4111_v26 }
 0x401   : > { %v4118_v0 = vrot.slane %v4117_v50, 1  ;;  %v4125_v22 = vrot.slane %v4124_v60, 1  ;;  %v4131_v14 = vmax.f32 %v4129_v48, %v4130_v3  ;;  %v5095_v49 = vadd.f32 %v6871_v33, %v6861_v62 }
 0x402   : > { %v4369_v9 = vunpack.c.l.b16 %v4865_v54  ;;  %v4403_v24 = vsel %vm4382_vm13, %v4367_v32, %v4366_v19  ;;  %v4210_v2 = vmax.f32 %v4112_v40, 0.0  ;;  %v5098_v39 = vadd.f32 %v5097_v7, %v5096_v61 }
 0x403   : > { %v4404_v25 = vsel %vm4384_vm14, %v4368_v27, %v4403_v24  ;;  %v4119_v23 = vmax.f32 %v4117_v50, %v4118_v0  ;;  %v4126_v6 = vmax.f32 %v4124_v60, %v4125_v22  ;;  %v4132_v28 = vrot.slane %v4131_v14, 1 }
 0x404   : > { %v4866_v56 = vpack.c.bf16 %v4210_v2, %v4210_v2  ;;  %v4405_v45 = vsel %vm4386_vm15, %v4369_v9, %v4404_v25  ;;  %v3731_v53 = vadd.f32 %v5095_v49, %v3730_v31  ;;  %v3736_v4 = vadd.f32 %v6810_v37, %v5098_v39 }
 0x405   : > { %v4133_v36 = vmax.f32 %v4131_v14, %v4132_v28  ;;  %v4211_v62 = vmax.f32 %v4119_v23, 0.0  ;;  %v4212_v33 = vmax.f32 %v4126_v6, 0.0  ;;  %v5101_v38 = vadd.f32 %v5100_v58, %v5099_v8 }
 0x406   : > { %v4370_v21 = vunpack.c.l.b16 %v4866_v56  ;;  %v3755_v34 = vadd.f32 %v3731_v53, %v6736_v17  ;;  %v3756_v61 = vadd.f32 %v3736_v4, %v6730_v1  ;;  %v3777_v7 = vadd.f32 %v6751_v35, %v6876_v42 }
 0x407   : > { %v4213_v47 = vmax.f32 %v4133_v36, 0.0  ;;  %v4867_v51 = vpack.c.bf16 %v4211_v62, %v4211_v62  ;;  %v4868_v46 = vpack.c.bf16 %v4212_v33, %v4212_v33  ;;  %v3739_v52 = vadd.f32 %v5213_v30, %v5101_v38 }
 0x408   : > { %v4406_v63 = vsel %vm4388_vm0, %v4370_v21, %v4405_v45  ;;  %v3779_v37 = vadd.f32 %v6751_v35, %v3756_v61  ;;  %v3778_v15 = vadd.f32 %v6751_v35, %v3755_v34 }
 0x409   : > { %v4869_v55 = vpack.c.bf16 %v4213_v47, %v4213_v47  ;;  %v4371_v20 = vunpack.c.l.b16 %v4867_v51  ;;  %v4372_v12 = vunpack.c.l.b16 %v4868_v46  ;;  %v3757_v57 = vadd.f32 %v3739_v52, %v6734_v11 }
 0x40a   : > { %v3787_v5 = vmax.f32 %v3777_v7, %v3779_v37 }
 0x40b   : > { %v4373_v17 = vunpack.c.l.b16 %v4869_v55  ;;  %v4407_v1 = vsel %vm4390_vm1, %v4371_v20, %v4406_v63  ;;  %v3780_v41 = vadd.f32 %v6751_v35, %v3757_v57 }
 0x40c   : > { %v4408_v29 = vsel %vm4392_vm2, %v4372_v12, %v4407_v1  ;;  %v3899_v43 = vcombine.high %v3787_v5, %v3787_v5  ;;  %v3906_v42 = vrot.slane %v3787_v5, %v6754_v13 }
 0x40d   : > { %v4409_v59 = vsel %vm4394_vm3, %v4373_v17, %v4408_v29  ;;  %v3788_v16 = vmax.f32 %v3778_v15, %v3780_v41 }
 0x40e   : > { %v4419_v48 = vpack.c.b16 %v4409_v59, %v4409_v59  ;;  %v3913_v11 = vrot.slane %v3899_v43, %v6754_v13  ;;  %v3914_v30 = vcombine.high %v3906_v42, %v3906_v42  ;;  %v4134_v44 = vsel %vm3965_vm12, %v3906_v42, -inf }
 0x40f   : > { %v4135_v18 = vrot.slane %v4134_v44, 4  ;;  %v3916_v10 = vcombine.high %v3788_v16, %v3788_v16  ;;  %v3923_v26 = vrot.slane %v3788_v16, %v6754_v13 }
 0x410   : > { %4427 = vst [vmem:[%s5740_s7 + $0x8] sm:$0xf] %v4419_v48  ;;  %v3915_v35 = vcombine.high %v3913_v11, %v3913_v11  ;;  %v4141_v8 = vsel %vm3965_vm12, %v3914_v30, -inf  ;;  %v4148_v19 = vsel %vm3965_vm12, %v3913_v11, -inf }
 0x411   : > { %v4136_v50 = vmax.f32 %v4134_v44, %v4135_v18  ;;  %v4142_v60 = vrot.slane %v4141_v8, 4  ;;  %v4149_v3 = vrot.slane %v4148_v19, 4  ;;  %v3930_v54 = vrot.slane %v3916_v10, %v6754_v13 }
 0x412   : > { %v4155_v32 = vsel %vm3965_vm12, %v3915_v35, -inf  ;;  %v3931_v27 = vcombine.high %v3923_v26, %v3923_v26  ;;  %v4162_v40 = vsel %vm3965_vm12, %v3923_v26, -inf }
 0x413   : > { %v4137_v0 = vrot.slane %v4136_v50, 2  ;;  %v4143_v22 = vmax.f32 %v4141_v8, %v4142_v60  ;;  %v4150_v14 = vmax.f32 %v4148_v19, %v4149_v3  ;;  %v4156_v49 = vrot.slane %v4155_v32, 4 }
 0x414   : > { %v3932_v31 = vcombine.high %v3930_v54, %v3930_v54  ;;  %v4163_v9 = vrot.slane %v4162_v40, 4  ;;  %v4169_v24 = vsel %vm3965_vm12, %v3931_v27, -inf  ;;  %v4176_v2 = vsel %vm3965_vm12, %v3930_v54, -inf }
 0x415   : > { %v4138_v39 = vmax.f32 %v4136_v50, %v4137_v0  ;;  %v4144_v58 = vrot.slane %v4143_v22, 2  ;;  %v4151_v25 = vrot.slane %v4150_v14, 2  ;;  %v4157_v23 = vmax.f32 %v4155_v32, %v4156_v49 }
 0x416   : > { %v4164_v13 = vmax.f32 %v4162_v40, %v4163_v9  ;;  %v4170_v6 = vrot.slane %v4169_v24, 4  ;;  %v4177_v28 = vrot.slane %v4176_v2, 4  ;;  %v4183_v56 = vsel %vm3965_vm12, %v3932_v31, -inf }
 0x417   : > { %v4139_v45 = vrot.slane %v4138_v39, 1  ;;  %v4145_v53 = vmax.f32 %v4143_v22, %v4144_v58  ;;  %v4152_v4 = vmax.f32 %v4150_v14, %v4151_v25  ;;  %v4158_v36 = vrot.slane %v4157_v23, 2 }
 0x418   : > { %v4165_v62 = vrot.slane %v4164_v13, 2  ;;  %v4171_v33 = vmax.f32 %v4169_v24, %v4170_v6  ;;  %v4178_v38 = vmax.f32 %v4176_v2, %v4177_v28  ;;  %v4184_v21 = vrot.slane %v4183_v56, 4 }
 0x419   : > { %v4140_v34 = vmax.f32 %v4138_v39, %v4139_v45  ;;  %v4146_v61 = vrot.slane %v4145_v53, 1  ;;  %v4153_v47 = vrot.slane %v4152_v4, 1  ;;  %v4159_v51 = vmax.f32 %v4157_v23, %v4158_v36 }
 0x41a   : > { %v4166_v46 = vmax.f32 %v4164_v13, %v4165_v62  ;;  %v4172_v52 = vrot.slane %v4171_v33, 2  ;;  %v4179_v63 = vrot.slane %v4178_v38, 2  ;;  %v4185_v7 = vmax.f32 %v4183_v56, %v4184_v21 }
 0x41b   : > { %v4147_v37 = vmax.f32 %v4145_v53, %v4146_v61  ;;  %v4154_v55 = vmax.f32 %v4152_v4, %v4153_v47  ;;  %v4160_v20 = vrot.slane %v4159_v51, 1  ;;  %v4214_v12 = vmax.f32 %v4140_v34, 0.0 }
 0x41c   : > { %v4167_v57 = vrot.slane %v4166_v46, 1  ;;  %v4173_v5 = vmax.f32 %v4171_v33, %v4172_v52  ;;  %v4180_v17 = vmax.f32 %v4178_v38, %v4179_v63  ;;  %v4186_v1 = vrot.slane %v4185_v7, 2 }
 0x41d   : > { %v4161_v15 = vmax.f32 %v4159_v51, %v4160_v20  ;;  %v4215_v41 = vmax.f32 %v4147_v37, 0.0  ;;  %v4216_v29 = vmax.f32 %v4154_v55, 0.0  ;;  %v4870_v43 = vpack.c.bf16 %v4214_v12, %v4214_v12 }
 0x41e   : > { %v4168_v42 = vmax.f32 %v4166_v46, %v4167_v57  ;;  %v4174_v59 = vrot.slane %v4173_v5, 1  ;;  %v4181_v16 = vrot.slane %v4180_v17, 1  ;;  %v4187_v48 = vmax.f32 %v4185_v7, %v4186_v1 }
 0x41f   : > { %v4217_v11 = vmax.f32 %v4161_v15, 0.0  ;;  %v4871_v30 = vpack.c.bf16 %v4215_v41, %v4215_v41  ;;  %v4872_v44 = vpack.c.bf16 %v4216_v29, %v4216_v29  ;;  %v4374_v19 = vunpack.c.l.b16 %v4870_v43 }
 0x420   : > { %v4175_v18 = vmax.f32 %v4173_v5, %v4174_v59  ;;  %v4182_v10 = vmax.f32 %v4180_v17, %v4181_v16  ;;  %v4188_v26 = vrot.slane %v4187_v48, 1  ;;  %v4218_v35 = vmax.f32 %v4168_v42, 0.0 }
 0x421   : > { %v4873_v8 = vpack.c.bf16 %v4217_v11, %v4217_v11  ;;  %v4375_v50 = vunpack.c.l.b16 %v4871_v30  ;;  %v4376_v60 = vunpack.c.l.b16 %v4872_v44 }
 0x422   : > { %v4189_v3 = vmax.f32 %v4187_v48, %v4188_v26  ;;  %v4219_v54 = vmax.f32 %v4175_v18, 0.0  ;;  %v4220_v32 = vmax.f32 %v4182_v10, 0.0  ;;  %v4874_v27 = vpack.c.bf16 %v4218_v35, %v4218_v35 }
 0x423   : > { %v4377_v40 = vunpack.c.l.b16 %v4873_v8  ;;  %v4410_v0 = vsel %vm4382_vm13, %v4375_v50, %v4374_v19 }
 0x424   : > { %v4411_v22 = vsel %vm4384_vm14, %v4376_v60, %v4410_v0  ;;  %v4221_v14 = vmax.f32 %v4189_v3, 0.0  ;;  %v4875_v49 = vpack.c.bf16 %v4219_v54, %v4219_v54  ;;  %v4876_v31 = vpack.c.bf16 %v4220_v32, %v4220_v32 }
 0x425   : > { %v4378_v9 = vunpack.c.l.b16 %v4874_v27  ;;  %v4412_v24 = vsel %vm4386_vm15, %v4377_v40, %v4411_v22 }
 0x426   : > { %v4877_v2 = vpack.c.bf16 %v4221_v14, %v4221_v14  ;;  %v4379_v39 = vunpack.c.l.b16 %v4875_v49  ;;  %v4380_v58 = vunpack.c.l.b16 %v4876_v31 }
 0x427   : > { %v4413_v25 = vsel %vm4388_vm0, %v4378_v9, %v4412_v24 }
 0x428   : > { %v4381_v23 = vunpack.c.l.b16 %v4877_v2  ;;  %v4414_v13 = vsel %vm4390_vm1, %v4379_v39, %v4413_v25 }
 0x429   : > { %v4415_v6 = vsel %vm4392_vm2, %v4380_v58, %v4414_v13 }
 0x42a   : > { %v4416_v28 = vsel %vm4394_vm3, %v4381_v23, %v4415_v6 }
 0x42b   : > { %v4420_v56 = vpack.c.b16 %v4416_v28, %v4416_v28 }
 0x42d   : > { %4428 = vst [vmem:[%s5740_s7 + $0xc] sm:$0xf] %v4420_v56 }
 0x42e PF: > { %s18_s18 = sadd.s32 1, %s5596_s18  }
 0x42f   : > { %p15_p6 = scmp.ge.s32.totalorder %s18_s18, 4  }
 0x431   :  { %17 = sbr.rel (!%p15_p6) target bundleno = 3 (0x3), region = 100 }
 0x436   :  { %4451 = vsyncpa [#allocation4], 1 }
 0x437   :  { %4453 = vsyncpa [#allocation4 + $0x1], 1 }
 0x438   :  { %4454 = vsyncpa [#allocation6], 1 }
 0x439   :  { %4455 = vsyncpa [#allocation9], 1 }

// kernel: musiclass_forward.3
= control target key start
LH: loop header
LB: loop body
LE: loop exit
PB: predicated region body
PF: predicated region fallthrough
CT: control target
= control target key end

     0   :  { %10 = vsyncpa [#allocation4], 0  ;;  %s8427_s0 = inlined_call_operand.vmem [shape: f32[36,34], index: 0, kind: input, shape index: {}]   ;;  %s8428_s1 = inlined_call_operand.hbm [shape: bf16[16,32], index: 1, kind: input, shape index: {}]   ;;  %s8429_s2 = inlined_call_operand.hbm [shape: f32[1,32], index: 2, kind: input, shape index: {}]   ;;  %s8430_s3 = inlined_call_operand.vmem [shape: bf16[3,96,64], index: 3, kind: input, shape index: {}]   ;;  %s8431_s4 = inlined_call_operand.hbm [shape: f32[1,64], index: 4, kind: input, shape index: {}]   ;;  %s8432_s5 = inlined_call_operand.vmem [shape: bf16[16,16,64], index: 5, kind: output, shape index: {}]  }
   0x1   :  { %11 = vsyncpa [#allocation6], 0  ;;  %s6560_s18 = smov 0  }
   0x2 LB: > { %s6520_s19 = smov [#allocation5]   ;;  %s6566_s21 = sadd.s32 4294967295, %s6518_s18   ;;  %s6518_s18 = sphi %s6560_s18, %s17_s18  }
   0x3   : > { %s182_s20 = sshll.u32 %s6520_s19, 4  ;;  %p5554_p0 = scmp.ge.s32.totalorder %s6518_s18, 1  ;;  %s183_s20 = int_to_ptr.vmem [resolvable:$true] %s182_s20 }
   0x4   : > { %p153_p1 = scmp.lt.s32.totalorder %s6518_s18, 5  ;;  %p8433_p2 = scmp.eq.s32.totalorder %s6566_s21, 0 }
   0x5   : > { %s6521_s23 = smov [#allocation3]   ;;  %s6522_s26 = smov [#allocation7]  }
   0x6   : > { %p6571_p3 = pnand %p5554_p0, %p153_p1  ;;  %s168_s24 = sshll.u32 %s6521_s23, 4  ;;  %s169_s24 = int_to_ptr.vmem [resolvable:$true] %s168_s24 }
   0x7   : > { %s196_s27 = sshll.u32 %s6522_s26, 4  ;;  %s6437_s28 = scalar_lea.vmem %s183_s20, 16  ;;  %s6583_s27 = int_to_ptr.vmem [resolvable:$true] %s196_s27 }
   0x8   : > { %s8435_s22 = scalar_select %p6571_p3, 1, 0 }
   0x9   : > { %p6261_p4 = pneg %p6571_p3  ;;  %p6438_p7 = scmp.ne.s32.totalorder %s183_s20, %s6437_s28 }
   0xa   : > { %s6444_s29 = scalar_lea.vmem %s183_s20, 32  ;;  %p6445_p10 = scmp.lt.s32.totalorder %s183_s20, %s183_s20 }
   0xb   : > { %p6579_p5 = pnand %p8433_p2, %p6261_p4  ;;  %p6446_p11 = scmp.lt.s32.totalorder %s6444_s29, %s6437_s28 }
   0xd   : > { %p6428_p6 = pneg %p6579_p5  ;;  %p6447_p12 = por %p6446_p11, %p6445_p10 }
   0xf   : > { %p6440_p8 = pnand %p6438_p7, %p6428_p6 }
  0x11   : > { %p6441_p9 = pneg %p6440_p8 }
  0x13   : > { %p6448_p13 = pnand %p6447_p12, %p6441_p9 }
  0x15   : > { %6451 = shalt.err (!%p6448_p13)
}
  0x16   : > { %6267 = dma.hbm_to_vmem [thread:$0]  (!%p6579_p5), %s8429_s2, 16, %s183_s20, [#allocation6]  }
  0x17   : > { %s6463_s7 = scalar_lea.vmem %s169_s24, 128  ;;  %p6471_p7 = scmp.lt.s32.totalorder %s169_s24, %s169_s24 }
  0x18   : > { %p6464_p0 = scmp.ne.s32.totalorder %s169_s24, %s6463_s7  ;;  %p6472_p8 = scmp.lt.s32.totalorder %s6463_s7, %s6463_s7 }
  0x1a   : > { %p6466_p1 = pnand %p6464_p0, %p6428_p6  ;;  %p6473_p2 = por %p6472_p8, %p6471_p7 }
  0x1c   : > { %p6467_p4 = pneg %p6466_p1 }
  0x1e   : > { %p6474_p3 = pnand %p6473_p2, %p6467_p4 }
  0x20   : > { %6477 = shalt.err (!%p6474_p3)
}
  0x21   : > { %s6523_s8 = smov 64   ;;  %s6524_s9 = smov 4  }
  0x22   : > { %6264 = dma.hbm_to_vmem [thread:$0]  (!%p6579_p5), %s8428_s1, 128, %s169_s24, [#allocation4], %s6523_s8, %s6523_s8, %s6524_s9  }
  0x23   : > { %s6489_s12 = scalar_lea.vmem %s6583_s27, 16  ;;  %s6496_s13 = scalar_lea.vmem %s6583_s27, 32 }
  0x24   : > { %p6490_p9 = scmp.ne.s32.totalorder %s6583_s27, %s6489_s12  ;;  %p6497_p3 = scmp.lt.s32.totalorder %s6583_s27, %s6583_s27 }
  0x25   : > { %p6498_p11 = scmp.lt.s32.totalorder %s6496_s13, %s6489_s12 }
  0x26   : > { %p6492_p10 = pnand %p6490_p9, %p6428_p6 }
  0x27   : > { %p6499_p12 = por %p6498_p11, %p6497_p3 }
  0x28   : > { %p6493_p2 = pneg %p6492_p10 }
  0x2a   : > { %p6500_p13 = pnand %p6499_p12, %p6493_p2 }
  0x2c   : > { %6503 = shalt.err (!%p6500_p13)
}
  0x2d   : > { %6270 = dma.hbm_to_vmem [thread:$0]  (!%p6579_p5), %s8431_s4, 16, %s6583_s27, [#allocation6]  }
  0x2e   : > { %p8437_p0 = scmp.ne.s32.totalorder %s8435_s22, 0 }
  0x30   : > { %209 = sbr.rel (%p8437_p0) target bundleno = 1210 (0x4ba), region = 40 }
  0x35   : > { %p8438_p6 = scmp.eq.s32.totalorder %s6566_s21, 0 }
  0x37   : > { %6509 = dma.done.wait (%p8438_p6), [#allocation4], 128   ;;  %p8439_p1 = pmov %p8438_p6 }
  0x39   : > { %6511 = vsyncadd (%p8439_p1), [#allocation4], 4294967168  ;;  %p8440_p4 = pmov %p8439_p1 }
  0x3a   : > { %p8441_p7 = pmov %p8439_p1 }
  0x3b   : > { %6513 = dma.done.wait (%p8440_p4), [#allocation6], 32  }
  0x3c   : > { %6515 = vsyncadd (%p8441_p7), [#allocation6], 4294967264  ;;  %v257_v0 = vlaneseq  ;;  %s6628_s16 = sshll.u32 %s6566_s21, 3  ;;  %s5562_s22 = sshll.u32 %s6566_s21, 2  ;;  %v6295_v22 = vld [vmem:[#allocation3] sm:$0xff]   ;;  %vm584_vm0 = vcmask 7168  }
  0x3d   : > { %s250_s20 = scalar_lea.vmem %s8427_s0, %s6628_s16  ;;  %p242_p5 = scmp.lt.s32.totalorder %s5562_s22, 15  ;;  %6075 = vmatprep.subr.bf16.mxu0 %v6295_v22  ;;  %vm645_vm1 = vcmask 15360   ;;  %vm686_vm2 = vcmask 23552   ;;  %vm709_vm3 = vcmask 31744   ;;  %vm732_vm4 = vcmask 39936  }
  0x3e   : > { %v6634_v1 = vshrl.u32 %v257_v0, 7  ;;  %v251_v2 = vld [vmem:[%s250_s20] sm:$0xff]  ;;  %v252_v3 = vld [vmem:[%s250_s20 + $0x8] sm:$0xf]  ;;  %6076 = vmatpush3.bf16.msra.mxu0 %v6295_v22  ;;  %vm755_vm5 = vcmask 48128   ;;  %vm778_vm6 = vcmask 56320  }
  0x3f   : > { %v253_v4 = vpack.c.bf16 %v252_v3, %v251_v2  ;;  %s8457_s22 = smov (!%p242_p5, %s5562_s22), 15  ;;  %vm801_vm7 = vcmask 64512   ;;  %vm824_vm8 = vcmask 72704   ;;  %vm861_vm9 = vcmask 130048   ;;  %p5628_p8 = scmp.ne.s32.totalorder %s6628_s16, 0 }
  0x40   : > { %v259_v5 = vsub.s32 0, %v6634_v1  ;;  %v328_v6 = vsub.s32 3, %v6634_v1  ;;  %v350_v7 = vsub.s32 4, %v6634_v1  ;;  %v532_v8 = vsub.s32 5, %v6634_v1  ;;  %s5883_s23 = sshll.u32 %s8457_s22, 3 }
  0x41   : > { %v255_v9 = vpack.i.b16 %v253_v4, %v253_v4  ;;  %v268_v10 = vshrl.u32 %v253_v4, 16  ;;  %v284_v20 = vsub.s32 1, %v6634_v1  ;;  %s6653_s26 = scalar_lea.vmem %s8432_s5, %s5883_s23  ;;  %v306_v24 = vsub.s32 2, %v6634_v1 }
  0x42   : > { %vm1135_vm10 = vcmask 253952   ;;  %vm1136_vm11 = vsmask.f32 256  ;;  %vm1168_vm12 = vsmask.f32 7938  ;;  %vm1722_vm15 = vcmask 257024  }
  0x43   : > { %v260_v11 = vrot.slane %v255_v9, %v259_v5  ;;  %v269_v12 = vpack.i.b16 %v268_v10, %v268_v10  ;;  %v329_v13 = vrot.slane %v255_v9, %v328_v6  ;;  %v6640_v14 = vrot.slane %v255_v9, %v350_v7  ;;  %vm6850_vm13 = vmand %vm1135_vm10, %vm1136_vm11 }
  0x44   : > { %v6642_v15 = vrot.slane %v255_v9, %v532_v8  ;;  %v285_v21 = vrot.slane %v255_v9, %v284_v20  ;;  %v307_v25 = vrot.slane %v255_v9, %v306_v24  ;;  %vm6857_vm14 = vmand %vm1135_vm10, %vm1168_vm12 }
  0x45   : > { %266 = vbcast.lane.c.b16.xlu1 %v260_v11, 272  ;;  %262 = vbcast.lane.c.b16.xlu0 %v260_v11, 256  ;;  %v340_v16 = vrot.slane %v269_v12, %v328_v6  ;;  %v6644_v17 = vrot.slane %v269_v12, %v350_v7  ;;  %v6646_v18 = vrot.slane %v269_v12, %v532_v8 }
  0x46   : > { %v274_v19 = vrot.slane %v269_v12, %v259_v5  ;;  %v296_v23 = vrot.slane %v269_v12, %v284_v20  ;;  %v318_v26 = vrot.slane %v269_v12, %v306_v24 }
  0x49   : > { %376 = vbcast.lane.c.b16.xlu1 %v260_v11, 273  ;;  %372 = vbcast.lane.c.b16.xlu0 %v260_v11, 257 }
  0x4d   : > { %276 = vbcast.lane.c.b16.xlu1 %v274_v19, 256  ;;  %452 = vbcast.lane.c.b16.xlu0 %v260_v11, 258 }
  0x51   : > { %280 = vbcast.lane.c.b16.xlu1 %v274_v19, 272  ;;  %456 = vbcast.lane.c.b16.xlu0 %v260_v11, 274 }
  0x55   : > { %384 = vbcast.lane.c.b16.xlu1 %v274_v19, 273  ;;  %380 = vbcast.lane.c.b16.xlu0 %v274_v19, 257 }
  0x59   : > { %287 = vbcast.lane.c.b16.xlu1 %v285_v21, 256  ;;  %460 = vbcast.lane.c.b16.xlu0 %v274_v19, 258 }
  0x5d   : > { %291 = vbcast.lane.c.b16.xlu1 %v285_v21, 272  ;;  %464 = vbcast.lane.c.b16.xlu0 %v274_v19, 274 }
  0x61   : > { %392 = vbcast.lane.c.b16.xlu1 %v285_v21, 273  ;;  %388 = vbcast.lane.c.b16.xlu0 %v285_v21, 257 }
  0x65   : > { %472 = vbcast.lane.c.b16.xlu1 %v285_v21, 274  ;;  %468 = vbcast.lane.c.b16.xlu0 %v285_v21, 258 }
  0x69   : > { %302 = vbcast.lane.c.b16.xlu1 %v296_v23, 272  ;;  %298 = vbcast.lane.c.b16.xlu0 %v296_v23, 256 }
  0x6d   : > { %400 = vbcast.lane.c.b16.xlu1 %v296_v23, 273  ;;  %396 = vbcast.lane.c.b16.xlu0 %v296_v23, 257 }
  0x71   : > { %480 = vbcast.lane.c.b16.xlu1 %v296_v23, 274  ;;  %476 = vbcast.lane.c.b16.xlu0 %v296_v23, 258 }
  0x75   : > { %313 = vbcast.lane.c.b16.xlu1 %v307_v25, 272  ;;  %309 = vbcast.lane.c.b16.xlu0 %v307_v25, 256 }
  0x79   : > { %408 = vbcast.lane.c.b16.xlu1 %v307_v25, 273  ;;  %404 = vbcast.lane.c.b16.xlu0 %v307_v25, 257 }
  0x7d   : > { %488 = vbcast.lane.c.b16.xlu1 %v307_v25, 274  ;;  %484 = vbcast.lane.c.b16.xlu0 %v307_v25, 258 }
  0x81   : > { %324 = vbcast.lane.c.b16.xlu1 %v318_v26, 272  ;;  %320 = vbcast.lane.c.b16.xlu0 %v318_v26, 256 }
  0x85   : > { %416 = vbcast.lane.c.b16.xlu1 %v318_v26, 273  ;;  %412 = vbcast.lane.c.b16.xlu0 %v318_v26, 257 }
  0x89   : > { %496 = vbcast.lane.c.b16.xlu1 %v318_v26, 274  ;;  %492 = vbcast.lane.c.b16.xlu0 %v318_v26, 258 }
  0x8d   : > { %335 = vbcast.lane.c.b16.xlu1 %v329_v13, 272  ;;  %331 = vbcast.lane.c.b16.xlu0 %v329_v13, 256 }
  0x91   : > { %424 = vbcast.lane.c.b16.xlu1 %v329_v13, 273  ;;  %420 = vbcast.lane.c.b16.xlu0 %v329_v13, 257 }
  0x95   : > { %504 = vbcast.lane.c.b16.xlu1 %v329_v13, 274  ;;  %500 = vbcast.lane.c.b16.xlu0 %v329_v13, 258 }
  0x99   : > { %346 = vbcast.lane.c.b16.xlu1 %v340_v16, 272  ;;  %342 = vbcast.lane.c.b16.xlu0 %v340_v16, 256 }
  0x9d   : > { %432 = vbcast.lane.c.b16.xlu1 %v340_v16, 273  ;;  %428 = vbcast.lane.c.b16.xlu0 %v340_v16, 257 }
  0xa1   : > { %512 = vbcast.lane.c.b16.xlu1 %v340_v16, 274  ;;  %508 = vbcast.lane.c.b16.xlu0 %v340_v16, 258 }
  0xa5   : > { %357 = vbcast.lane.c.b16.xlu1 %v6640_v14, 272  ;;  %353 = vbcast.lane.c.b16.xlu0 %v6640_v14, 256 }
  0xa9   : > { %440 = vbcast.lane.c.b16.xlu1 %v6640_v14, 273  ;;  %436 = vbcast.lane.c.b16.xlu0 %v6640_v14, 257 }
  0xad   : > { %520 = vbcast.lane.c.b16.xlu1 %v6640_v14, 274  ;;  %516 = vbcast.lane.c.b16.xlu0 %v6640_v14, 258 }
  0xb1   : > { %368 = vbcast.lane.c.b16.xlu1 %v6644_v17, 272  ;;  %364 = vbcast.lane.c.b16.xlu0 %v6644_v17, 256 }
  0xb5   : > { %448 = vbcast.lane.c.b16.xlu1 %v6644_v17, 273  ;;  %444 = vbcast.lane.c.b16.xlu0 %v6644_v17, 257 }
  0xb7   : > { %v267_v27 = vpop.permute.xlu1 %266  ;;  %v263_v28 = vpop.permute.xlu0 %262 }
  0xb9   : > { %528 = vbcast.lane.c.b16.xlu1 %v6644_v17, 274  ;;  %524 = vbcast.lane.c.b16.xlu0 %v6644_v17, 258 }
  0xbb   : > { %v377_v29 = vpop.permute.xlu1 %376  ;;  %v373_v30 = vpop.permute.xlu0 %372 }
  0xbc   : > { %v590_v39 = vsel %vm584_vm0, %v267_v27, %v377_v29  ;;  %v587_v40 = vsel %vm584_vm0, %v263_v28, %v373_v30 }
  0xbd   : > { %539 = vbcast.lane.c.b16.xlu1 %v6642_v15, 272  ;;  %535 = vbcast.lane.c.b16.xlu0 %v6642_v15, 256 }
  0xbf   : > { %v277_v31 = vpop.permute.xlu1 %276  ;;  %v453_v32 = vpop.permute.xlu0 %452 }
  0xc0   : > { %v647_v42 = vsel %vm645_vm1, %v587_v40, %v453_v32 }
  0xc1   : > { %547 = vbcast.lane.c.b16.xlu1 %v6642_v15, 273  ;;  %543 = vbcast.lane.c.b16.xlu0 %v6642_v15, 257  ;;  %v687_v47 = vsel %vm686_vm2, %v647_v42, %v277_v31 }
  0xc3   : > { %v281_v33 = vpop.permute.xlu1 %280  ;;  %v457_v34 = vpop.permute.xlu0 %456 }
  0xc4   : > { %v649_v41 = vsel %vm645_vm1, %v590_v39, %v457_v34 }
  0xc5   : > { %555 = vbcast.lane.c.b16.xlu1 %v6642_v15, 274  ;;  %551 = vbcast.lane.c.b16.xlu0 %v6642_v15, 258  ;;  %v688_v45 = vsel %vm686_vm2, %v649_v41, %v281_v33 }
  0xc7   : > { %v385_v35 = vpop.permute.xlu1 %384  ;;  %v381_v36 = vpop.permute.xlu0 %380 }
  0xc8   : > { %v711_v46 = vsel %vm709_vm3, %v688_v45, %v385_v35  ;;  %v710_v48 = vsel %vm709_vm3, %v687_v47, %v381_v36  ;;  %v596_v63 = vsel %vm584_vm0, %v281_v33, %v385_v35  ;;  %v593_v3 = vsel %vm584_vm0, %v277_v31, %v381_v36 }
  0xc9   : > { %566 = vbcast.lane.c.b16.xlu1 %v6646_v18, 272  ;;  %562 = vbcast.lane.c.b16.xlu0 %v6646_v18, 256 }
  0xcb   : > { %v6676_v37 = vpop.permute.xlu1 %287  ;;  %v461_v38 = vpop.permute.xlu0 %460 }
  0xcc   : > { %v733_v52 = vsel %vm732_vm4, %v710_v48, %v461_v38  ;;  %v651_v5 = vsel %vm645_vm1, %v593_v3, %v461_v38 }
  0xcd   : > { %574 = vbcast.lane.c.b16.xlu1 %v6646_v18, 273  ;;  %570 = vbcast.lane.c.b16.xlu0 %v6646_v18, 257  ;;  %v756_v54 = vsel %vm755_vm5, %v733_v52, %v6676_v37  ;;  %v689_v9 = vsel %vm686_vm2, %v651_v5, %v6676_v37 }
  0xcf   : > { %v292_v43 = vpop.permute.xlu1 %291  ;;  %v465_v44 = vpop.permute.xlu0 %464 }
  0xd0   : > { %v734_v49 = vsel %vm732_vm4, %v711_v46, %v465_v44  ;;  %v653_v4 = vsel %vm645_vm1, %v596_v63, %v465_v44 }
  0xd1   : > { %582 = vbcast.lane.c.b16.xlu1 %v6646_v18, 274  ;;  %578 = vbcast.lane.c.b16.xlu0 %v6646_v18, 258  ;;  %v757_v53 = vsel %vm755_vm5, %v734_v49, %v292_v43  ;;  %v690_v6 = vsel %vm686_vm2, %v653_v4, %v292_v43 }
  0xd3   : > { %v393_v50 = vpop.permute.xlu1 %392  ;;  %v389_v51 = vpop.permute.xlu0 %388 }
  0xd4   : > { %v780_v55 = vsel %vm778_vm6, %v757_v53, %v393_v50  ;;  %v779_v58 = vsel %vm778_vm6, %v756_v54, %v389_v51  ;;  %v713_v10 = vsel %vm709_vm3, %v690_v6, %v393_v50  ;;  %v712_v11 = vsel %vm709_vm3, %v689_v9, %v389_v51 }
  0xd5   : > { %v602_v26 = vsel %vm584_vm0, %v292_v43, %v393_v50  ;;  %v599_v27 = vsel %vm584_vm0, %v6676_v37, %v389_v51 }
  0xd7   : > { %v473_v56 = vpop.permute.xlu1 %472  ;;  %v469_v57 = vpop.permute.xlu0 %468 }
  0xd8   : > { %v803_v59 = vsel %vm801_vm7, %v780_v55, %v473_v56  ;;  %v802_v60 = vsel %vm801_vm7, %v779_v58, %v469_v57  ;;  %v736_v12 = vsel %vm732_vm4, %v713_v10, %v473_v56  ;;  %v735_v13 = vsel %vm732_vm4, %v712_v11, %v469_v57 }
  0xd9   : > { %v827_v61 = vsel %vm824_vm8, %v803_v59, 0  ;;  %v826_v62 = vsel %vm824_vm8, %v802_v60, 0  ;;  %v657_v28 = vsel %vm645_vm1, %v602_v26, %v473_v56  ;;  %v655_v29 = vsel %vm645_vm1, %v599_v27, %v469_v57 }
  0xda   : > { %6077 = vmatprep.mubr.msk.bf16.mxu0 %vm861_vm9, %v826_v62 }
  0xdb   : > { %v303_v0 = vpop.permute.xlu1 %302  ;;  %v299_v2 = vpop.permute.xlu0 %298  ;;  %6078 = vmatmul.mubr.msk.bf16.vlgmr.msra.gmra.mxu0 %vm861_vm9, %v827_v61 }
  0xdc   : > { %v759_v14 = vsel %vm755_vm5, %v736_v12, %v303_v0  ;;  %v758_v15 = vsel %vm755_vm5, %v735_v13, %v299_v2  ;;  %v692_v30 = vsel %vm686_vm2, %v657_v28, %v303_v0  ;;  %v691_v33 = vsel %vm686_vm2, %v655_v29, %v299_v2 }
  0xdf   : > { %v401_v7 = vpop.permute.xlu1 %400  ;;  %v397_v8 = vpop.permute.xlu0 %396 }
  0xe0   : > { %v782_v16 = vsel %vm778_vm6, %v759_v14, %v401_v7  ;;  %v781_v19 = vsel %vm778_vm6, %v758_v15, %v397_v8  ;;  %v715_v34 = vsel %vm709_vm3, %v692_v30, %v401_v7  ;;  %v714_v35 = vsel %vm709_vm3, %v691_v33, %v397_v8 }
  0xe1   : > { %v608_v50 = vsel %vm584_vm0, %v303_v0, %v401_v7  ;;  %v605_v51 = vsel %vm584_vm0, %v299_v2, %v397_v8 }
  0xe3   : > { %v481_v17 = vpop.permute.xlu1 %480  ;;  %v477_v18 = vpop.permute.xlu0 %476 }
  0xe4   : > { %v805_v20 = vsel %vm801_vm7, %v782_v16, %v481_v17  ;;  %v804_v21 = vsel %vm801_vm7, %v781_v19, %v477_v18  ;;  %v738_v36 = vsel %vm732_vm4, %v715_v34, %v481_v17  ;;  %v737_v38 = vsel %vm732_vm4, %v714_v35, %v477_v18 }
  0xe5   : > { %v829_v22 = vsel %vm824_vm8, %v805_v20, 0  ;;  %v828_v23 = vsel %vm824_vm8, %v804_v21, 0  ;;  %v661_v52 = vsel %vm645_vm1, %v608_v50, %v481_v17  ;;  %v659_v53 = vsel %vm645_vm1, %v605_v51, %v477_v18 }
  0xe6   : > { %6081 = vmatprep.mubr.msk.bf16.mxu0 %vm861_vm9, %v828_v23 }
  0xe7   : > { %v314_v24 = vpop.permute.xlu1 %313  ;;  %v310_v25 = vpop.permute.xlu0 %309  ;;  %6082 = vmatmul.mubr.msk.bf16.gmra.mxu0 %vm861_vm9, %v829_v22 }
  0xe8   : > { %v761_v37 = vsel %vm755_vm5, %v738_v36, %v314_v24  ;;  %v760_v39 = vsel %vm755_vm5, %v737_v38, %v310_v25  ;;  %v694_v54 = vsel %vm686_vm2, %v661_v52, %v314_v24  ;;  %v693_v57 = vsel %vm686_vm2, %v659_v53, %v310_v25 }
  0xeb   : > { %v409_v31 = vpop.permute.xlu1 %408  ;;  %v405_v32 = vpop.permute.xlu0 %404 }
  0xec   : > { %v784_v40 = vsel %vm778_vm6, %v761_v37, %v409_v31  ;;  %v783_v43 = vsel %vm778_vm6, %v760_v39, %v405_v32  ;;  %v717_v58 = vsel %vm709_vm3, %v694_v54, %v409_v31  ;;  %v716_v59 = vsel %vm709_vm3, %v693_v57, %v405_v32 }
  0xed   : > { %v614_v11 = vsel %vm584_vm0, %v314_v24, %v409_v31  ;;  %v611_v12 = vsel %vm584_vm0, %v310_v25, %v405_v32 }
  0xef   : > { %v489_v41 = vpop.permute.xlu1 %488  ;;  %v485_v42 = vpop.permute.xlu0 %484 }
  0xf0   : > { %v807_v44 = vsel %vm801_vm7, %v784_v40, %v489_v41  ;;  %v806_v45 = vsel %vm801_vm7, %v783_v43, %v485_v42  ;;  %v740_v60 = vsel %vm732_vm4, %v717_v58, %v489_v41  ;;  %v739_v61 = vsel %vm732_vm4, %v716_v59, %v485_v42 }
  0xf1   : > { %v831_v46 = vsel %vm824_vm8, %v807_v44, 0  ;;  %v830_v47 = vsel %vm824_vm8, %v806_v45, 0  ;;  %v665_v13 = vsel %vm645_vm1, %v614_v11, %v489_v41  ;;  %v663_v14 = vsel %vm645_vm1, %v611_v12, %v485_v42 }
  0xf2   : > { %6085 = vmatprep.mubr.msk.bf16.mxu0 %vm861_vm9, %v830_v47 }
  0xf3   : > { %v325_v48 = vpop.permute.xlu1 %324  ;;  %v321_v49 = vpop.permute.xlu0 %320  ;;  %6086 = vmatmul.mubr.msk.bf16.gmra.mxu0 %vm861_vm9, %v831_v46 }
  0xf4   : > { %v763_v62 = vsel %vm755_vm5, %v740_v60, %v325_v48  ;;  %v762_v63 = vsel %vm755_vm5, %v739_v61, %v321_v49  ;;  %v696_v15 = vsel %vm686_vm2, %v665_v13, %v325_v48  ;;  %v695_v18 = vsel %vm686_vm2, %v663_v14, %v321_v49 }
  0xf7   : > { %v417_v55 = vpop.permute.xlu1 %416  ;;  %v413_v56 = vpop.permute.xlu0 %412 }
  0xf8   : > { %v786_v0 = vsel %vm778_vm6, %v763_v62, %v417_v55  ;;  %v785_v4 = vsel %vm778_vm6, %v762_v63, %v413_v56  ;;  %v719_v19 = vsel %vm709_vm3, %v696_v15, %v417_v55  ;;  %v718_v20 = vsel %vm709_vm3, %v695_v18, %v413_v56 }
  0xf9   : > { %v620_v35 = vsel %vm584_vm0, %v325_v48, %v417_v55  ;;  %v617_v36 = vsel %vm584_vm0, %v321_v49, %v413_v56 }
  0xfb   : > { %v497_v2 = vpop.permute.xlu1 %496  ;;  %v493_v3 = vpop.permute.xlu0 %492 }
  0xfc   : > { %v809_v5 = vsel %vm801_vm7, %v786_v0, %v497_v2  ;;  %v808_v6 = vsel %vm801_vm7, %v785_v4, %v493_v3  ;;  %v742_v21 = vsel %vm732_vm4, %v719_v19, %v497_v2  ;;  %v741_v22 = vsel %vm732_vm4, %v718_v20, %v493_v3 }
  0xfd   : > { %v833_v7 = vsel %vm824_vm8, %v809_v5, 0  ;;  %v832_v8 = vsel %vm824_vm8, %v808_v6, 0  ;;  %v669_v38 = vsel %vm645_vm1, %v620_v35, %v497_v2  ;;  %v667_v37 = vsel %vm645_vm1, %v617_v36, %v493_v3 }
  0xfe   : > { %6089 = vmatprep.mubr.msk.bf16.mxu0 %vm861_vm9, %v832_v8 }
  0xff   : > { %v336_v9 = vpop.permute.xlu1 %335  ;;  %v332_v10 = vpop.permute.xlu0 %331  ;;  %6090 = vmatmul.mubr.msk.bf16.gmra.mxu0 %vm861_vm9, %v833_v7 }
 0x100   : > { %v765_v23 = vsel %vm755_vm5, %v742_v21, %v336_v9  ;;  %v764_v24 = vsel %vm755_vm5, %v741_v22, %v332_v10  ;;  %v698_v39 = vsel %vm686_vm2, %v669_v38, %v336_v9  ;;  %v697_v42 = vsel %vm686_vm2, %v667_v37, %v332_v10  ;;  %v1170_v22 = vld [vmem:[#allocation2 + $0x10] sm:$0x1] }
 0x103   : > { %v425_v16 = vpop.permute.xlu1 %424  ;;  %v421_v17 = vpop.permute.xlu0 %420 }
 0x104   : > { %v788_v25 = vsel %vm778_vm6, %v765_v23, %v425_v16  ;;  %v787_v28 = vsel %vm778_vm6, %v764_v24, %v421_v17  ;;  %v721_v43 = vsel %vm709_vm3, %v698_v39, %v425_v16  ;;  %v720_v44 = vsel %vm709_vm3, %v697_v42, %v421_v17 }
 0x105   : > { %v626_v59 = vsel %vm584_vm0, %v336_v9, %v425_v16  ;;  %v623_v60 = vsel %vm584_vm0, %v332_v10, %v421_v17  ;;  %v1138_v17 = vld [vmem:[#allocation2] sm:$0x1] }
 0x107   : > { %v505_v26 = vpop.permute.xlu1 %504  ;;  %v501_v27 = vpop.permute.xlu0 %500 }
 0x108   : > { %v811_v29 = vsel %vm801_vm7, %v788_v25, %v505_v26  ;;  %v810_v30 = vsel %vm801_vm7, %v787_v28, %v501_v27  ;;  %v744_v45 = vsel %vm732_vm4, %v721_v43, %v505_v26  ;;  %v743_v46 = vsel %vm732_vm4, %v720_v44, %v501_v27 }
 0x109   : > { %v835_v31 = vsel %vm824_vm8, %v811_v29, 0  ;;  %v834_v32 = vsel %vm824_vm8, %v810_v30, 0  ;;  %v673_v61 = vsel %vm645_vm1, %v626_v59, %v505_v26  ;;  %v671_v62 = vsel %vm645_vm1, %v623_v60, %v501_v27 }
 0x10a   : > { %6093 = vmatprep.mubr.msk.bf16.mxu0 %vm861_vm9, %v834_v32  ;;  %v1139_v25 = vsel %vm6850_vm13, 0, %v1138_v17  ;;  %v1171_v26 = vsel %vm6857_vm14, 0, %v1170_v22  ;;  %v1176_v17 = vld [vmem:[#allocation2 + $0x38] sm:$0x1] }
 0x10b   : > { %v6784_v33 = vpop.permute.xlu1 %346  ;;  %v6786_v34 = vpop.permute.xlu0 %342  ;;  %6094 = vmatmul.mubr.msk.bf16.gmra.mxu0 %vm861_vm9, %v835_v31  ;;  %1140 = vst [vmem:[#allocation2] sm:$0x1] %v1139_v25  ;;  %1172 = vst [vmem:[#allocation2 + $0x10] sm:$0x1] %v1171_v26 }
 0x10c   : > { %v767_v47 = vsel %vm755_vm5, %v744_v45, %v6784_v33  ;;  %v766_v48 = vsel %vm755_vm5, %v743_v46, %v6786_v34  ;;  %v700_v63 = vsel %vm686_vm2, %v673_v61, %v6784_v33  ;;  %v699_v3 = vsel %vm686_vm2, %v671_v62, %v6786_v34 }
 0x10f   : > { %v433_v40 = vpop.permute.xlu1 %432  ;;  %v429_v41 = vpop.permute.xlu0 %428 }
 0x110   : > { %v790_v49 = vsel %vm778_vm6, %v767_v47, %v433_v40  ;;  %v789_v52 = vsel %vm778_vm6, %v766_v48, %v429_v41  ;;  %v723_v4 = vsel %vm709_vm3, %v700_v63, %v433_v40  ;;  %v722_v5 = vsel %vm709_vm3, %v699_v3, %v429_v41  ;;  %v1141_v48 = vld [vmem:[#allocation2 + $0x14] sm:$0x1] }
 0x111   : > { %v632_v24 = vsel %vm584_vm0, %v6784_v33, %v433_v40  ;;  %v629_v27 = vsel %vm584_vm0, %v6786_v34, %v429_v41 }
 0x113   : > { %v513_v50 = vpop.permute.xlu1 %512  ;;  %v509_v51 = vpop.permute.xlu0 %508 }
 0x114   : > { %v813_v53 = vsel %vm801_vm7, %v790_v49, %v513_v50  ;;  %v812_v54 = vsel %vm801_vm7, %v789_v52, %v509_v51  ;;  %v746_v6 = vsel %vm732_vm4, %v723_v4, %v513_v50  ;;  %v745_v7 = vsel %vm732_vm4, %v722_v5, %v509_v51  ;;  %v1173_v52 = vld [vmem:[#allocation2 + $0x24] sm:$0x1] }
 0x115   : > { %v837_v55 = vsel %vm824_vm8, %v813_v53, 0  ;;  %v836_v56 = vsel %vm824_vm8, %v812_v54, 0  ;;  %v677_v28 = vsel %vm645_vm1, %v632_v24, %v513_v50  ;;  %v675_v29 = vsel %vm645_vm1, %v629_v27, %v509_v51 }
 0x116   : > { %6097 = vmatprep.mubr.msk.bf16.mxu0 %vm861_vm9, %v836_v56  ;;  %v1142_v51 = vsel %vm6850_vm13, 0, %v1141_v48  ;;  %v1177_v24 = vsel %vm6857_vm14, 0, %v1176_v17 }
 0x117   : > { %v6810_v57 = vpop.permute.xlu1 %357  ;;  %v6812_v58 = vpop.permute.xlu0 %353  ;;  %6098 = vmatmul.mubr.msk.bf16.gmra.mxu0 %vm861_vm9, %v837_v55  ;;  %1143 = vst [vmem:[#allocation2 + $0x14] sm:$0x1] %v1142_v51  ;;  %v1174_v55 = vsel %vm6857_vm14, 0, %v1173_v52  ;;  %1178 = vst [vmem:[#allocation2 + $0x38] sm:$0x1] %v1177_v24 }
 0x118   : > { %v769_v8 = vsel %vm755_vm5, %v746_v6, %v6810_v57  ;;  %v768_v9 = vsel %vm755_vm5, %v745_v7, %v6812_v58  ;;  %v702_v30 = vsel %vm686_vm2, %v677_v28, %v6810_v57  ;;  %v701_v33 = vsel %vm686_vm2, %v675_v29, %v6812_v58  ;;  %1175 = vst [vmem:[#allocation2 + $0x24] sm:$0x1] %v1174_v55  ;;  %v1153_v51 = vld [vmem:[#allocation2 + $0x64] sm:$0x1]  ;;  %v1156_v55 = vld [vmem:[#allocation2 + $0x78] sm:$0x1] }
 0x119   : > { %v1154_v52 = vsel %vm6850_vm13, 0, %v1153_v51 }
 0x11a   : > { %1155 = vst [vmem:[#allocation2 + $0x64] sm:$0x1] %v1154_v52 }
 0x11b   : > { %v6821_v0 = vpop.permute.xlu1 %440  ;;  %v6823_v2 = vpop.permute.xlu0 %436 }
 0x11c   : > { %v792_v10 = vsel %vm778_vm6, %v769_v8, %v6821_v0  ;;  %v791_v13 = vsel %vm778_vm6, %v768_v9, %v6823_v2  ;;  %v725_v35 = vsel %vm709_vm3, %v702_v30, %v6821_v0  ;;  %v724_v34 = vsel %vm709_vm3, %v701_v33, %v6823_v2 }
 0x11d   : > { %v638_v53 = vsel %vm584_vm0, %v6810_v57, %v6821_v0  ;;  %v635_v54 = vsel %vm584_vm0, %v6812_v58, %v6823_v2 }
 0x11f   : > { %v521_v11 = vpop.permute.xlu1 %520  ;;  %v517_v12 = vpop.permute.xlu0 %516 }
 0x120   : > { %v815_v14 = vsel %vm801_vm7, %v792_v10, %v521_v11  ;;  %v814_v15 = vsel %vm801_vm7, %v791_v13, %v517_v12  ;;  %v748_v36 = vsel %vm732_vm4, %v725_v35, %v521_v11  ;;  %v747_v38 = vsel %vm732_vm4, %v724_v34, %v517_v12  ;;  %v1144_v13 = vld [vmem:[#allocation2 + $0x28] sm:$0x1] }
 0x121   : > { %v839_v16 = vsel %vm824_vm8, %v815_v14, 0  ;;  %v838_v18 = vsel %vm824_vm8, %v814_v15, 0  ;;  %v681_v56 = vsel %vm645_vm1, %v638_v53, %v521_v11  ;;  %v679_v59 = vsel %vm645_vm1, %v635_v54, %v517_v12  ;;  %v1185_v53 = vld [vmem:[#allocation2 + $0x74] sm:$0x1] }
 0x122   : > { %6101 = vmatprep.mubr.msk.bf16.mxu0 %vm861_vm9, %v838_v18  ;;  %v1186_v54 = vsel %vm6857_vm14, 0, %v1185_v53 }
 0x123   : > { %v6844_v19 = vpop.permute.xlu1 %368  ;;  %v6846_v20 = vpop.permute.xlu0 %364  ;;  %6102 = vmatmul.mubr.msk.bf16.gmra.mxu0 %vm861_vm9, %v839_v16  ;;  %v1145_v16 = vsel %vm6850_vm13, 0, %v1144_v13  ;;  %1187 = vst [vmem:[#allocation2 + $0x74] sm:$0x1] %v1186_v54 }
 0x124   : > { %v771_v37 = vsel %vm755_vm5, %v748_v36, %v6844_v19  ;;  %v770_v39 = vsel %vm755_vm5, %v747_v38, %v6846_v20  ;;  %v704_v60 = vsel %vm686_vm2, %v681_v56, %v6844_v19  ;;  %v703_v61 = vsel %vm686_vm2, %v679_v59, %v6846_v20  ;;  %1146 = vst [vmem:[#allocation2 + $0x28] sm:$0x1] %v1145_v16  ;;  %v1188_v59 = vld [vmem:[#allocation2 + $0x88] sm:$0x1] }
 0x125   : > { %v1157_v56 = vsel %vm6850_vm13, 0, %v1156_v55 }
 0x126   : > { %1158 = vst [vmem:[#allocation2 + $0x78] sm:$0x1] %v1157_v56 }
 0x127   : > { %v449_v31 = vpop.permute.xlu1 %448  ;;  %v445_v32 = vpop.permute.xlu0 %444 }
 0x128   : > { %v794_v40 = vsel %vm778_vm6, %v771_v37, %v449_v31  ;;  %v793_v43 = vsel %vm778_vm6, %v770_v39, %v445_v32  ;;  %v727_v63 = vsel %vm709_vm3, %v704_v60, %v449_v31  ;;  %v726_v58 = vsel %vm709_vm3, %v703_v61, %v445_v32  ;;  %v1159_v61 = vld [vmem:[#allocation2 + $0x8c] sm:$0x1] }
 0x129   : > { %v644_v18 = vsel %vm584_vm0, %v6844_v19, %v449_v31  ;;  %v641_v22 = vsel %vm584_vm0, %v6846_v20, %v445_v32  ;;  %v1189_v60 = vsel %vm6857_vm14, 0, %v1188_v59  ;;  %vm1320_vm0 = vsmask.f32 4368 }
 0x12a   : > { %1190 = vst [vmem:[#allocation2 + $0x88] sm:$0x1] %v1189_v60 }
 0x12b   : > { %v529_v41 = vpop.permute.xlu1 %528  ;;  %v525_v42 = vpop.permute.xlu0 %524 }
 0x12c   : > { %v817_v44 = vsel %vm801_vm7, %v794_v40, %v529_v41  ;;  %v816_v45 = vsel %vm801_vm7, %v793_v43, %v525_v42  ;;  %v750_v0 = vsel %vm732_vm4, %v727_v63, %v529_v41  ;;  %v749_v2 = vsel %vm732_vm4, %v726_v58, %v525_v42  ;;  %v1147_v43 = vld [vmem:[#allocation2 + $0x3c] sm:$0x1]  ;;  %v1162_v58 = vld [vmem:[#allocation2 + $0xa0] sm:$0x1] }
 0x12d   : > { %v841_v46 = vsel %vm824_vm8, %v817_v44, 0  ;;  %v840_v47 = vsel %vm824_vm8, %v816_v45, 0  ;;  %v685_v25 = vsel %vm645_vm1, %v644_v18, %v529_v41  ;;  %v683_v26 = vsel %vm645_vm1, %v641_v22, %v525_v42  ;;  %v1179_v45 = vld [vmem:[#allocation2 + $0x4c] sm:$0x1]  ;;  %vm6985_vm1 = vmand %vm1722_vm15, %vm1168_vm12 }
 0x12e   : > { %6105 = vmatprep.mubr.msk.bf16.mxu0 %vm861_vm9, %v840_v47  ;;  %v1148_v44 = vsel %vm6850_vm13, 0, %v1147_v43  ;;  %v1150_v47 = vld [vmem:[#allocation2 + $0x50] sm:$0x1] }
 0x12f   : > { %v540_v49 = vpop.permute.xlu1 %539  ;;  %v536_v50 = vpop.permute.xlu0 %535  ;;  %6106 = vmatmul.mubr.msk.bf16.gmra.mxu0 %vm861_vm9, %v841_v46  ;;  %1149 = vst [vmem:[#allocation2 + $0x3c] sm:$0x1] %v1148_v44  ;;  %v1180_v46 = vsel %vm6857_vm14, 0, %v1179_v45  ;;  %v1151_v48 = vsel %vm6850_vm13, 0, %v1150_v47 }
 0x130   : > { %v773_v3 = vsel %vm755_vm5, %v750_v0, %v540_v49  ;;  %v772_v4 = vsel %vm755_vm5, %v749_v2, %v536_v50  ;;  %v708_v27 = vsel %vm686_vm2, %v685_v25, %v540_v49  ;;  %v706_v28 = vsel %vm686_vm2, %v683_v26, %v536_v50  ;;  %1181 = vst [vmem:[#allocation2 + $0x4c] sm:$0x1] %v1180_v46  ;;  %v1182_v49 = vld [vmem:[#allocation2 + $0x60] sm:$0x1]  ;;  %v1194_v2 = vld [vmem:[#allocation2 + $0xb0] sm:$0x1]  ;;  %vm6991_vm2 = vmor %vm1136_vm11, %vm1320_vm0 }
 0x131   : > { %1152 = vst [vmem:[#allocation2 + $0x50] sm:$0x1] %v1151_v48  ;;  %v1183_v50 = vsel %vm6857_vm14, 0, %v1182_v49  ;;  %v1163_v0 = vsel %vm6850_vm13, 0, %v1162_v58 }
 0x132   : > { %1184 = vst [vmem:[#allocation2 + $0x60] sm:$0x1] %v1183_v50  ;;  %1164 = vst [vmem:[#allocation2 + $0xa0] sm:$0x1] %v1163_v0 }
 0x133   : > { %v548_v62 = vpop.permute.xlu1 %547  ;;  %v544_v57 = vpop.permute.xlu0 %543 }
 0x134   : > { %v796_v5 = vsel %vm778_vm6, %v773_v3, %v548_v62  ;;  %v795_v6 = vsel %vm778_vm6, %v772_v4, %v544_v57  ;;  %v731_v33 = vsel %vm709_vm3, %v708_v27, %v548_v62  ;;  %v729_v19 = vsel %vm709_vm3, %v706_v28, %v544_v57  ;;  %v1191_v57 = vld [vmem:[#allocation2 + $0x9c] sm:$0x1]  ;;  %v1165_v4 = vld [vmem:[#allocation2 + $0xb4] sm:$0x1] }
 0x135   : > { %v1160_v62 = vsel %vm6850_vm13, 0, %v1159_v61  ;;  %v1192_v63 = vsel %vm6857_vm14, 0, %v1191_v57  ;;  %v1195_v3 = vsel %vm6857_vm14, 0, %v1194_v2 }
 0x136   : > { %1161 = vst [vmem:[#allocation2 + $0x8c] sm:$0x1] %v1160_v62  ;;  %1193 = vst [vmem:[#allocation2 + $0x9c] sm:$0x1] %v1192_v63 }
 0x137   : > { %v556_v7 = vpop.permute.xlu1 %555  ;;  %v552_v8 = vpop.permute.xlu0 %551  ;;  %1196 = vst [vmem:[#allocation2 + $0xb0] sm:$0x1] %v1195_v3 }
 0x138   : > { %v819_v9 = vsel %vm801_vm7, %v796_v5, %v556_v7  ;;  %v818_v10 = vsel %vm801_vm7, %v795_v6, %v552_v8  ;;  %v754_v20 = vsel %vm732_vm4, %v731_v33, %v556_v7  ;;  %v752_v31 = vsel %vm732_vm4, %v729_v19, %v552_v8  ;;  %v1197_v6 = vld [vmem:[#allocation2 + $0xc4] sm:$0x1]  ;;  %v6977_v8 = vld [vmem:[#allocation5] ss:$0 sm:$0xff] }
 0x139   : > { %v843_v11 = vsel %vm824_vm8, %v819_v9, 0  ;;  %v842_v12 = vsel %vm824_vm8, %v818_v10, 0  ;;  %v1166_v5 = vsel %vm6850_vm13, 0, %v1165_v4  ;;  %v1198_v7 = vsel %vm6857_vm14, 0, %v1197_v6 }
 0x13a   : > { %6109 = vmatprep.mubr.msk.bf16.mxu0 %vm861_vm9, %v842_v12  ;;  %1167 = vst [vmem:[#allocation2 + $0xb4] sm:$0x1] %v1166_v5  ;;  %1199 = vst [vmem:[#allocation2 + $0xc4] sm:$0x1] %v1198_v7 }
 0x13b   : > { %v567_v14 = vpop.permute.xlu1 %566  ;;  %6110 = vmatmul.mubr.msk.bf16.gmra.mxu0 %vm861_vm9, %v843_v11  ;;  %v563_v15 = vpop.permute.xlu0 %562 }
 0x13c   : > { %v777_v32 = vsel %vm755_vm5, %v754_v20, %v567_v14  ;;  %v775_v35 = vsel %vm755_vm5, %v752_v31, %v563_v15  ;;  %v1724_v31 = vld [vmem:[#allocation2] sm:$0xf] }
 0x13f   : > { %v575_v29 = vpop.permute.xlu1 %574  ;;  %v571_v30 = vpop.permute.xlu0 %570 }
 0x140   : > { %v800_v34 = vsel %vm778_vm6, %v777_v32, %v575_v29  ;;  %v798_v36 = vsel %vm778_vm6, %v775_v35, %v571_v30 }
 0x143   : > { %v583_v38 = vpop.permute.xlu1 %582  ;;  %v579_v37 = vpop.permute.xlu0 %578 }
 0x144   : > { %v823_v39 = vsel %vm801_vm7, %v800_v34, %v583_v38  ;;  %v821_v40 = vsel %vm801_vm7, %v798_v36, %v579_v37 }
 0x145   : > { %v845_v41 = vsel %vm824_vm8, %v823_v39, 0  ;;  %v844_v42 = vsel %vm824_vm8, %v821_v40, 0 }
 0x146   : > { %6113 = vmatprep.mubr.msk.bf16.mxu0 %vm861_vm9, %v844_v42  ;;  %v1731_v42 = vld [vmem:[#allocation2 + $0x10] sm:$0x1] }
 0x147   : > { %6114 = vmatmul.mubr.msk.bf16.gmra.mxu0 %vm861_vm9, %v845_v41 }
 0x19b   : > { %v6079_v9 = vpop.f32.mrf.mxu0 }
 0x19c   : > { %v945_v10 = vadd.f32 %v6079_v9, %v6977_v8 }
 0x19d   : > { %v936_v11 = vpop.f32.mrf.mxu0 }
 0x19e   : > { %v1097_v12 = vmax.f32 %v945_v10, 0.0  ;;  %v937_v13 = vadd.f32 %v6977_v8, %v936_v11 }
 0x19f   : > { %v6080_v14 = vpop.f32.mrf.mxu0 }
 0x1a0   : > { %v5886_v15 = vpack.c.bf16 %v1097_v12, %v1097_v12  ;;  %v1095_v16 = vmax.f32 %v937_v13, 0.0  ;;  %v948_v17 = vadd.f32 %v6080_v14, %v6977_v8 }
 0x1a1   : > { %v939_v18 = vpop.f32.mrf.mxu0 }
 0x1a2   : > { %v1340_v22 = vshrl.u32 %v5886_v15, 16  ;;  %v5884_v24 = vpack.c.bf16 %v1095_v16, %v1095_v16  ;;  %v1098_v23 = vmax.f32 %v948_v17, 0.0  ;;  %v940_v25 = vadd.f32 %v6977_v8, %v939_v18  ;;  %v1734_v16 = vld [vmem:[#allocation2 + $0x14] sm:$0xf] }
 0x1a3   : > { %v1343_v39 = vshll.u32 %v5886_v15, 16 }
 0x1a4   : > { %v1323_v26 = vshrl.u32 %v5884_v24, 16  ;;  %v5887_v27 = vpack.c.bf16 %v1098_v23, %v1098_v23  ;;  %v1342_v28 = vrot.slane %v1340_v22, 7  ;;  %v1096_v29 = vmax.f32 %v940_v25, 0.0 }
 0x1a5   : > { %v1326_v33 = vshll.u32 %v5884_v24, 16 }
 0x1a6   : > { %v1325_v30 = vrot.slane %v1323_v26, 7  ;;  %v1349_v19 = vshrl.u32 %v5887_v27, 16  ;;  %v5885_v32 = vpack.c.bf16 %v1096_v29, %v1096_v29  ;;  %v1352_v38 = vshll.u32 %v5887_v27, 16  ;;  %v1740_v26 = vld [vmem:[#allocation2 + $0x24] sm:$0x1] }
 0x1a7   : > { %v6083_v35 = vpop.f32.mrf.mxu0  ;;  %v1347_v40 = vrot.slane %v1342_v28, 4  ;;  %v1345_v49 = vor.u32 %v1343_v39, %v1342_v28 }
 0x1a8   : > { %v1328_v34 = vor.u32 %v1326_v33, %v1325_v30  ;;  %v1351_v36 = vrot.slane %v1349_v19, 7  ;;  %v961_v37 = vadd.f32 %v6083_v35, %v6977_v8  ;;  %v1331_v43 = vshrl.u32 %v5885_v32, 16 }
 0x1a9   : > { %v952_v44 = vpop.f32.mrf.mxu0  ;;  %v1334_v51 = vshll.u32 %v5885_v32, 16  ;;  %v1329_v60 = vrot.slane %v1325_v30, 4 }
 0x1aa   : > { %v1725_v45 = vsel %vm6985_vm1, %v1328_v34, %v1724_v31  ;;  %v1354_v46 = vor.u32 %v1352_v38, %v1351_v36  ;;  %v1356_v47 = vrot.slane %v1351_v36, 4  ;;  %v1101_v48 = vmax.f32 %v961_v37, 0.0 }
 0x1ab   : > { %1726 = vst [vmem:[#allocation2] sm:$0xf] %v1725_v45  ;;  %v1333_v50 = vrot.slane %v1331_v43, 7  ;;  %v953_v52 = vadd.f32 %v6977_v8, %v952_v44  ;;  %v6084_v53 = vpop.f32.mrf.mxu0 }
 0x1ac   : > { %v1355_v54 = vsel %vm6991_vm2, %v1347_v40, %v1354_v46  ;;  %v1732_v55 = vsel %vm6850_vm13, %v1356_v47, %v1731_v42  ;;  %v5890_v56 = vpack.c.bf16 %v1101_v48, %v1101_v48  ;;  %v964_v59 = vadd.f32 %v6084_v53, %v6977_v8 }
 0x1ad   : > { %1730 = vst.msk [vmem:[#allocation2 + $0xc] sm:$0xf] %vm1722_vm15, %v1355_v54  ;;  %1733 = vst [vmem:[#allocation2 + $0x10] sm:$0x1] %v1732_v55  ;;  %v1336_v61 = vor.u32 %v1334_v51, %v1333_v50  ;;  %v1338_v62 = vrot.slane %v1333_v50, 4  ;;  %v1099_v57 = vmax.f32 %v953_v52, 0.0  ;;  %v955_v63 = vpop.f32.mrf.mxu0 }
 0x1ae   : > { %v1375_v58 = vshrl.u32 %v5890_v56, 16  ;;  %v1102_v0 = vmax.f32 %v964_v59, 0.0  ;;  %v956_v2 = vadd.f32 %v6977_v8, %v955_v63  ;;  %v1378_v24 = vshll.u32 %v5890_v56, 16 }
 0x1af   : > { %v1337_v3 = vsel %vm6991_vm2, %v1329_v60, %v1336_v61  ;;  %v1346_v4 = vsel %vm6991_vm2, %v1338_v62, %v1345_v49  ;;  %v5888_v5 = vpack.c.bf16 %v1099_v57, %v1099_v57  ;;  %v1743_v57 = vld [vmem:[#allocation2 + $0x28] sm:$0xf] }
 0x1b0   : > { %1728 = vst.msk [vmem:[#allocation2 + $0x4] sm:$0xf] %vm1722_vm15, %v1337_v3  ;;  %1729 = vst.msk [vmem:[#allocation2 + $0x8] sm:$0xf] %vm1722_vm15, %v1346_v4  ;;  %v5891_v6 = vpack.c.bf16 %v1102_v0, %v1102_v0  ;;  %v1100_v7 = vmax.f32 %v956_v2, 0.0  ;;  %v1377_v9 = vrot.slane %v1375_v58, 7 }
 0x1b1   : > { %v1358_v10 = vshrl.u32 %v5888_v5, 16  ;;  %v1361_v13 = vshll.u32 %v5888_v5, 16 }
 0x1b2   : > { %v1384_v11 = vshrl.u32 %v5891_v6, 16  ;;  %v5889_v14 = vpack.c.bf16 %v1100_v7, %v1100_v7  ;;  %v1387_v18 = vshll.u32 %v5891_v6, 16  ;;  %v1382_v23 = vrot.slane %v1377_v9, 4 }
 0x1b3   : > { %v1360_v12 = vrot.slane %v1358_v10, 7  ;;  %v6087_v15 = vpop.f32.mrf.mxu0  ;;  %v1380_v31 = vor.u32 %v1378_v24, %v1377_v9 }
 0x1b4   : > { %v1386_v17 = vrot.slane %v1384_v11, 7  ;;  %v977_v22 = vadd.f32 %v6087_v15, %v6977_v8  ;;  %v1366_v27 = vshrl.u32 %v5889_v14, 16  ;;  %v1369_v34 = vshll.u32 %v5889_v14, 16  ;;  %v1749_v11 = vld [vmem:[#allocation2 + $0x38] sm:$0x1] }
 0x1b5   : > { %v1363_v25 = vor.u32 %v1361_v13, %v1360_v12  ;;  %v968_v28 = vpop.f32.mrf.mxu0  ;;  %v1364_v42 = vrot.slane %v1360_v12, 4 }
 0x1b6   : > { %v1389_v29 = vor.u32 %v1387_v18, %v1386_v17  ;;  %v1391_v30 = vrot.slane %v1386_v17, 4  ;;  %v1105_v33 = vmax.f32 %v977_v22, 0.0  ;;  %v969_v19 = vadd.f32 %v6977_v8, %v968_v28 }
 0x1b7   : > { %v1735_v32 = vsel %vm6985_vm1, %v1363_v25, %v1734_v16  ;;  %v1368_v35 = vrot.slane %v1366_v27, 7  ;;  %v6088_v36 = vpop.f32.mrf.mxu0 }
 0x1b8   : > { %1736 = vst [vmem:[#allocation2 + $0x14] sm:$0xf] %v1735_v32  ;;  %v1390_v38 = vsel %vm6991_vm2, %v1382_v23, %v1389_v29  ;;  %v1741_v37 = vsel %vm6850_vm13, %v1391_v30, %v1740_v26  ;;  %v5894_v39 = vpack.c.bf16 %v1105_v33, %v1105_v33  ;;  %v1103_v40 = vmax.f32 %v969_v19, 0.0 }
 0x1b9   : > { %1739 = vst.msk [vmem:[#allocation2 + $0x20] sm:$0xf] %vm1722_vm15, %v1390_v38  ;;  %1742 = vst [vmem:[#allocation2 + $0x24] sm:$0x1] %v1741_v37  ;;  %v1371_v43 = vor.u32 %v1369_v34, %v1368_v35  ;;  %v1373_v44 = vrot.slane %v1368_v35, 4  ;;  %v980_v45 = vadd.f32 %v6088_v36, %v6977_v8  ;;  %v971_v46 = vpop.f32.mrf.mxu0 }
 0x1ba   : > { %v1410_v47 = vshrl.u32 %v5894_v39, 16  ;;  %v5892_v48 = vpack.c.bf16 %v1103_v40, %v1103_v40  ;;  %v972_v49 = vadd.f32 %v6977_v8, %v971_v46  ;;  %v1413_v59 = vshll.u32 %v5894_v39, 16 }
 0x1bb   : > { %v1372_v50 = vsel %vm6991_vm2, %v1364_v42, %v1371_v43  ;;  %v1381_v51 = vsel %vm6991_vm2, %v1373_v44, %v1380_v31  ;;  %v1106_v52 = vmax.f32 %v980_v45, 0.0  ;;  %v1752_v44 = vld [vmem:[#allocation2 + $0x3c] sm:$0xf] }
 0x1bc   : > { %1737 = vst.msk [vmem:[#allocation2 + $0x18] sm:$0xf] %vm1722_vm15, %v1372_v50  ;;  %1738 = vst.msk [vmem:[#allocation2 + $0x1c] sm:$0xf] %vm1722_vm15, %v1381_v51  ;;  %v1412_v53 = vrot.slane %v1410_v47, 7  ;;  %v1393_v54 = vshrl.u32 %v5892_v48, 16 }
 0x1bd   : > { %v1104_v55 = vmax.f32 %v972_v49, 0.0  ;;  %v5895_v56 = vpack.c.bf16 %v1106_v52, %v1106_v52  ;;  %v1396_v61 = vshll.u32 %v5892_v48, 16 }
 0x1be   : > { %v1395_v60 = vrot.slane %v1393_v54, 7  ;;  %v1415_v0 = vor.u32 %v1413_v59, %v1412_v53  ;;  %v1417_v4 = vrot.slane %v1412_v53, 4  ;;  %v1758_v53 = vld [vmem:[#allocation2 + $0x4c] sm:$0x1] }
 0x1bf   : > { %v5893_v62 = vpack.c.bf16 %v1104_v55, %v1104_v55  ;;  %v1419_v63 = vshrl.u32 %v5895_v56, 16  ;;  %v6091_v58 = vpop.f32.mrf.mxu0  ;;  %v1422_v6 = vshll.u32 %v5895_v56, 16 }
 0x1c0   : > { %v1398_v2 = vor.u32 %v1396_v61, %v1395_v60  ;;  %v993_v7 = vadd.f32 %v6091_v58, %v6977_v8  ;;  %v1399_v15 = vrot.slane %v1395_v60, 4 }
 0x1c1   : > { %v1401_v3 = vshrl.u32 %v5893_v62, 16  ;;  %v1421_v5 = vrot.slane %v1419_v63, 7  ;;  %v984_v9 = vpop.f32.mrf.mxu0  ;;  %v1404_v13 = vshll.u32 %v5893_v62, 16 }
 0x1c2   : > { %v1744_v10 = vsel %vm6985_vm1, %v1398_v2, %v1743_v57  ;;  %v985_v14 = vadd.f32 %v6977_v8, %v984_v9  ;;  %v1109_v18 = vmax.f32 %v993_v7, 0.0 }
 0x1c3   : > { %v1403_v12 = vrot.slane %v1401_v3, 7  ;;  %1745 = vst [vmem:[#allocation2 + $0x28] sm:$0xf] %v1744_v10  ;;  %v1424_v16 = vor.u32 %v1422_v6, %v1421_v5  ;;  %v1426_v17 = vrot.slane %v1421_v5, 4  ;;  %v6092_v22 = vpop.f32.mrf.mxu0 }
 0x1c4   : > { %v1107_v25 = vmax.f32 %v985_v14, 0.0  ;;  %v996_v26 = vadd.f32 %v6092_v22, %v6977_v8  ;;  %v5898_v29 = vpack.c.bf16 %v1109_v18, %v1109_v18 }
 0x1c5   : > { %v1406_v24 = vor.u32 %v1404_v13, %v1403_v12  ;;  %v1408_v23 = vrot.slane %v1403_v12, 4  ;;  %v1425_v27 = vsel %vm6991_vm2, %v1417_v4, %v1424_v16  ;;  %v1750_v28 = vsel %vm6850_vm13, %v1426_v17, %v1749_v11  ;;  %v987_v30 = vpop.f32.mrf.mxu0 }
 0x1c6   : > { %1748 = vst.msk [vmem:[#allocation2 + $0x34] sm:$0xf] %vm1722_vm15, %v1425_v27  ;;  %1751 = vst [vmem:[#allocation2 + $0x38] sm:$0x1] %v1750_v28  ;;  %v5896_v31 = vpack.c.bf16 %v1107_v25, %v1107_v25  ;;  %v1110_v32 = vmax.f32 %v996_v26, 0.0  ;;  %v1445_v35 = vshrl.u32 %v5898_v29, 16  ;;  %v988_v34 = vadd.f32 %v6977_v8, %v987_v30 }
 0x1c7   : > { %v1407_v33 = vsel %vm6991_vm2, %v1399_v15, %v1406_v24  ;;  %v1416_v19 = vsel %vm6991_vm2, %v1408_v23, %v1415_v0  ;;  %v1448_v51 = vshll.u32 %v5898_v29, 16  ;;  %v1761_v30 = vld [vmem:[#allocation2 + $0x50] sm:$0xf] }
 0x1c8   : > { %1746 = vst.msk [vmem:[#allocation2 + $0x2c] sm:$0xf] %vm1722_vm15, %v1407_v33  ;;  %1747 = vst.msk [vmem:[#allocation2 + $0x30] sm:$0xf] %vm1722_vm15, %v1416_v19  ;;  %v1428_v36 = vshrl.u32 %v5896_v31, 16  ;;  %v5899_v38 = vpack.c.bf16 %v1110_v32, %v1110_v32  ;;  %v1447_v37 = vrot.slane %v1445_v35, 7 }
 0x1c9   : > { %v1108_v39 = vmax.f32 %v988_v34, 0.0  ;;  %v1431_v42 = vshll.u32 %v5896_v31, 16 }
 0x1ca   : > { %v1430_v40 = vrot.slane %v1428_v36, 7  ;;  %v1454_v43 = vshrl.u32 %v5899_v38, 16  ;;  %v1457_v49 = vshll.u32 %v5899_v38, 16  ;;  %v1452_v52 = vrot.slane %v1447_v37, 4  ;;  %v1767_v36 = vld [vmem:[#allocation2 + $0x60] sm:$0x1] }
 0x1cb   : > { %v5897_v45 = vpack.c.bf16 %v1108_v39, %v1108_v39  ;;  %v6095_v46 = vpop.f32.mrf.mxu0  ;;  %v1450_v62 = vor.u32 %v1448_v51, %v1447_v37 }
 0x1cc   : > { %v1433_v47 = vor.u32 %v1431_v42, %v1430_v40  ;;  %v1456_v48 = vrot.slane %v1454_v43, 7  ;;  %v1009_v50 = vadd.f32 %v6095_v46, %v6977_v8  ;;  %v1434_v6 = vrot.slane %v1430_v40, 4 }
 0x1cd   : > { %v1436_v54 = vshrl.u32 %v5897_v45, 16  ;;  %v1000_v55 = vpop.f32.mrf.mxu0  ;;  %v1439_v63 = vshll.u32 %v5897_v45, 16 }
 0x1ce   : > { %v1753_v56 = vsel %vm6985_vm1, %v1433_v47, %v1752_v44  ;;  %v1459_v59 = vor.u32 %v1457_v49, %v1456_v48  ;;  %v1461_v60 = vrot.slane %v1456_v48, 4  ;;  %v1113_v61 = vmax.f32 %v1009_v50, 0.0 }
 0x1cf   : > { %1754 = vst [vmem:[#allocation2 + $0x3c] sm:$0xf] %v1753_v56  ;;  %v1438_v57 = vrot.slane %v1436_v54, 7  ;;  %v1001_v58 = vadd.f32 %v6977_v8, %v1000_v55  ;;  %v6096_v0 = vpop.f32.mrf.mxu0 }
 0x1d0   : > { %v1460_v2 = vsel %vm6991_vm2, %v1452_v52, %v1459_v59  ;;  %v1759_v3 = vsel %vm6850_vm13, %v1461_v60, %v1758_v53  ;;  %v5902_v4 = vpack.c.bf16 %v1113_v61, %v1113_v61  ;;  %v1012_v5 = vadd.f32 %v6096_v0, %v6977_v8 }
 0x1d1   : > { %1757 = vst.msk [vmem:[#allocation2 + $0x48] sm:$0xf] %vm1722_vm15, %v1460_v2  ;;  %1760 = vst [vmem:[#allocation2 + $0x4c] sm:$0x1] %v1759_v3  ;;  %v1441_v7 = vor.u32 %v1439_v63, %v1438_v57  ;;  %v1443_v9 = vrot.slane %v1438_v57, 4  ;;  %v1111_v10 = vmax.f32 %v1001_v58, 0.0  ;;  %v1003_v11 = vpop.f32.mrf.mxu0 }
 0x1d2   : > { %v1480_v12 = vshrl.u32 %v5902_v4, 16  ;;  %v1114_v13 = vmax.f32 %v1012_v5, 0.0  ;;  %v1004_v14 = vadd.f32 %v6977_v8, %v1003_v11  ;;  %v1483_v32 = vshll.u32 %v5902_v4, 16 }
 0x1d3   : > { %v1442_v15 = vsel %vm6991_vm2, %v1434_v6, %v1441_v7  ;;  %v1451_v16 = vsel %vm6991_vm2, %v1443_v9, %v1450_v62  ;;  %v5900_v17 = vpack.c.bf16 %v1111_v10, %v1111_v10  ;;  %v1770_v10 = vld [vmem:[#allocation2 + $0x64] sm:$0xf] }
 0x1d4   : > { %1755 = vst.msk [vmem:[#allocation2 + $0x40] sm:$0xf] %vm1722_vm15, %v1442_v15  ;;  %1756 = vst.msk [vmem:[#allocation2 + $0x44] sm:$0xf] %vm1722_vm15, %v1451_v16  ;;  %v5903_v18 = vpack.c.bf16 %v1114_v13, %v1114_v13  ;;  %v1112_v22 = vmax.f32 %v1004_v14, 0.0  ;;  %v1482_v24 = vrot.slane %v1480_v12, 7 }
 0x1d5   : > { %v1463_v23 = vshrl.u32 %v5900_v17, 16  ;;  %v1466_v27 = vshll.u32 %v5900_v17, 16 }
 0x1d6   : > { %v1489_v25 = vshrl.u32 %v5903_v18, 16  ;;  %v5901_v28 = vpack.c.bf16 %v1112_v22, %v1112_v22  ;;  %v1492_v19 = vshll.u32 %v5903_v18, 16  ;;  %v1487_v35 = vrot.slane %v1482_v24, 4 }
 0x1d7   : > { %v1465_v26 = vrot.slane %v1463_v23, 7  ;;  %v6099_v29 = vpop.f32.mrf.mxu0  ;;  %v1485_v44 = vor.u32 %v1483_v32, %v1482_v24 }
 0x1d8   : > { %v1491_v33 = vrot.slane %v1489_v25, 7  ;;  %v1025_v31 = vadd.f32 %v6099_v29, %v6977_v8  ;;  %v1471_v38 = vshrl.u32 %v5901_v28, 16  ;;  %v1474_v47 = vshll.u32 %v5901_v28, 16  ;;  %v1776_v25 = vld [vmem:[#allocation2 + $0x74] sm:$0x1] }
 0x1d9   : > { %v1468_v34 = vor.u32 %v1466_v27, %v1465_v26  ;;  %v1016_v37 = vpop.f32.mrf.mxu0  ;;  %v1469_v53 = vrot.slane %v1465_v26, 4 }
 0x1da   : > { %v1494_v39 = vor.u32 %v1492_v19, %v1491_v33  ;;  %v1496_v40 = vrot.slane %v1491_v33, 4  ;;  %v1117_v42 = vmax.f32 %v1025_v31, 0.0  ;;  %v1017_v43 = vadd.f32 %v6977_v8, %v1016_v37 }
 0x1db   : > { %v1762_v45 = vsel %vm6985_vm1, %v1468_v34, %v1761_v30  ;;  %v1473_v46 = vrot.slane %v1471_v38, 7  ;;  %v6100_v48 = vpop.f32.mrf.mxu0 }
 0x1dc   : > { %1763 = vst [vmem:[#allocation2 + $0x50] sm:$0xf] %v1762_v45  ;;  %v1495_v49 = vsel %vm6991_vm2, %v1487_v35, %v1494_v39  ;;  %v1768_v50 = vsel %vm6850_vm13, %v1496_v40, %v1767_v36  ;;  %v5906_v51 = vpack.c.bf16 %v1117_v42, %v1117_v42  ;;  %v1115_v52 = vmax.f32 %v1017_v43, 0.0 }
 0x1dd   : > { %1766 = vst.msk [vmem:[#allocation2 + $0x5c] sm:$0xf] %vm1722_vm15, %v1495_v49  ;;  %1769 = vst [vmem:[#allocation2 + $0x60] sm:$0x1] %v1768_v50  ;;  %v1476_v54 = vor.u32 %v1474_v47, %v1473_v46  ;;  %v1478_v55 = vrot.slane %v1473_v46, 4  ;;  %v1028_v56 = vadd.f32 %v6100_v48, %v6977_v8  ;;  %v1019_v59 = vpop.f32.mrf.mxu0 }
 0x1de   : > { %v1515_v60 = vshrl.u32 %v5906_v51, 16  ;;  %v5904_v61 = vpack.c.bf16 %v1115_v52, %v1115_v52  ;;  %v1020_v62 = vadd.f32 %v6977_v8, %v1019_v59  ;;  %v1518_v5 = vshll.u32 %v5906_v51, 16 }
 0x1df   : > { %v1477_v57 = vsel %vm6991_vm2, %v1469_v53, %v1476_v54  ;;  %v1486_v63 = vsel %vm6991_vm2, %v1478_v55, %v1485_v44  ;;  %v1118_v58 = vmax.f32 %v1028_v56, 0.0  ;;  %v1779_v55 = vld [vmem:[#allocation2 + $0x78] sm:$0xf] }
 0x1e0   : > { %1764 = vst.msk [vmem:[#allocation2 + $0x54] sm:$0xf] %vm1722_vm15, %v1477_v57  ;;  %1765 = vst.msk [vmem:[#allocation2 + $0x58] sm:$0xf] %vm1722_vm15, %v1486_v63  ;;  %v1517_v0 = vrot.slane %v1515_v60, 7  ;;  %v1498_v2 = vshrl.u32 %v5904_v61, 16 }
 0x1e1   : > { %v1116_v3 = vmax.f32 %v1020_v62, 0.0  ;;  %v5907_v4 = vpack.c.bf16 %v1118_v58, %v1118_v58  ;;  %v1501_v7 = vshll.u32 %v5904_v61, 16 }
 0x1e2   : > { %v1500_v6 = vrot.slane %v1498_v2, 7  ;;  %v1520_v13 = vor.u32 %v1518_v5, %v1517_v0  ;;  %v1522_v16 = vrot.slane %v1517_v0, 4  ;;  %v1785_v0 = vld [vmem:[#allocation2 + $0x88] sm:$0x1] }
 0x1e3   : > { %v5905_v9 = vpack.c.bf16 %v1116_v3, %v1116_v3  ;;  %v1524_v11 = vshrl.u32 %v5907_v4, 16  ;;  %v6103_v12 = vpop.f32.mrf.mxu0  ;;  %v1527_v18 = vshll.u32 %v5907_v4, 16 }
 0x1e4   : > { %v1503_v14 = vor.u32 %v1501_v7, %v1500_v6  ;;  %v1041_v22 = vadd.f32 %v6103_v12, %v6977_v8  ;;  %v1504_v29 = vrot.slane %v1500_v6, 4 }
 0x1e5   : > { %v1506_v15 = vshrl.u32 %v5905_v9, 16  ;;  %v1526_v17 = vrot.slane %v1524_v11, 7  ;;  %v1032_v24 = vpop.f32.mrf.mxu0  ;;  %v1509_v27 = vshll.u32 %v5905_v9, 16 }
 0x1e6   : > { %v1771_v23 = vsel %vm6985_vm1, %v1503_v14, %v1770_v10  ;;  %v1033_v28 = vadd.f32 %v6977_v8, %v1032_v24  ;;  %v1121_v19 = vmax.f32 %v1041_v22, 0.0 }
 0x1e7   : > { %v1508_v26 = vrot.slane %v1506_v15, 7  ;;  %1772 = vst [vmem:[#allocation2 + $0x64] sm:$0xf] %v1771_v23  ;;  %v1529_v30 = vor.u32 %v1527_v18, %v1526_v17  ;;  %v1531_v33 = vrot.slane %v1526_v17, 4  ;;  %v6104_v31 = vpop.f32.mrf.mxu0 }
 0x1e8   : > { %v1119_v34 = vmax.f32 %v1033_v28, 0.0  ;;  %v1044_v36 = vadd.f32 %v6104_v31, %v6977_v8  ;;  %v5910_v39 = vpack.c.bf16 %v1121_v19, %v1121_v19 }
 0x1e9   : > { %v1511_v32 = vor.u32 %v1509_v27, %v1508_v26  ;;  %v1513_v35 = vrot.slane %v1508_v26, 4  ;;  %v1530_v38 = vsel %vm6991_vm2, %v1522_v16, %v1529_v30  ;;  %v1777_v37 = vsel %vm6850_vm13, %v1531_v33, %v1776_v25  ;;  %v1035_v40 = vpop.f32.mrf.mxu0 }
 0x1ea   : > { %1775 = vst.msk [vmem:[#allocation2 + $0x70] sm:$0xf] %vm1722_vm15, %v1530_v38  ;;  %1778 = vst [vmem:[#allocation2 + $0x74] sm:$0x1] %v1777_v37  ;;  %v5908_v44 = vpack.c.bf16 %v1119_v34, %v1119_v34  ;;  %v1122_v45 = vmax.f32 %v1044_v36, 0.0  ;;  %v1550_v46 = vshrl.u32 %v5910_v39, 16  ;;  %v1036_v47 = vadd.f32 %v6977_v8, %v1035_v40 }
 0x1eb   : > { %v1512_v42 = vsel %vm6991_vm2, %v1504_v29, %v1511_v32  ;;  %v1521_v43 = vsel %vm6991_vm2, %v1513_v35, %v1520_v13  ;;  %v1553_v63 = vshll.u32 %v5910_v39, 16 }
 0x1ec   : > { %1773 = vst.msk [vmem:[#allocation2 + $0x68] sm:$0xf] %vm1722_vm15, %v1512_v42  ;;  %1774 = vst.msk [vmem:[#allocation2 + $0x6c] sm:$0xf] %vm1722_vm15, %v1521_v43  ;;  %v1533_v48 = vshrl.u32 %v5908_v44, 16  ;;  %v5911_v49 = vpack.c.bf16 %v1122_v45, %v1122_v45  ;;  %v1552_v50 = vrot.slane %v1550_v46, 7 }
 0x1ed   : > { %v1120_v51 = vmax.f32 %v1036_v47, 0.0  ;;  %v1536_v53 = vshll.u32 %v5908_v44, 16  ;;  %v1788_v44 = vld [vmem:[#allocation2 + $0x8c] sm:$0xf] }
 0x1ee   : > { %v1535_v52 = vrot.slane %v1533_v48, 7  ;;  %v1559_v54 = vshrl.u32 %v5911_v49, 16  ;;  %v1562_v62 = vshll.u32 %v5911_v49, 16  ;;  %v1557_v58 = vrot.slane %v1552_v50, 4 }
 0x1ef   : > { %v5909_v56 = vpack.c.bf16 %v1120_v51, %v1120_v51  ;;  %v6107_v59 = vpop.f32.mrf.mxu0  ;;  %v1555_v9 = vor.u32 %v1553_v63, %v1552_v50  ;;  %v1794_v51 = vld [vmem:[#allocation2 + $0x9c] sm:$0x1] }
 0x1f0   : > { %v1538_v60 = vor.u32 %v1536_v53, %v1535_v52  ;;  %v1561_v61 = vrot.slane %v1559_v54, 7  ;;  %v1057_v57 = vadd.f32 %v6107_v59, %v6977_v8  ;;  %v1539_v18 = vrot.slane %v1535_v52, 4 }
 0x1f1   : > { %v1541_v2 = vshrl.u32 %v5909_v56, 16  ;;  %v1048_v3 = vpop.f32.mrf.mxu0  ;;  %v1544_v11 = vshll.u32 %v5909_v56, 16 }
 0x1f2   : > { %v1780_v4 = vsel %vm6985_vm1, %v1538_v60, %v1779_v55  ;;  %v1564_v5 = vor.u32 %v1562_v62, %v1561_v61  ;;  %v1566_v6 = vrot.slane %v1561_v61, 4  ;;  %v1125_v7 = vmax.f32 %v1057_v57, 0.0 }
 0x1f3   : > { %1781 = vst [vmem:[#allocation2 + $0x78] sm:$0xf] %v1780_v4  ;;  %v1543_v10 = vrot.slane %v1541_v2, 7  ;;  %v1049_v12 = vadd.f32 %v6977_v8, %v1048_v3  ;;  %v6108_v13 = vpop.f32.mrf.mxu0 }
 0x1f4   : > { %v1565_v14 = vsel %vm6991_vm2, %v1557_v58, %v1564_v5  ;;  %v1786_v15 = vsel %vm6850_vm13, %v1566_v6, %v1785_v0  ;;  %v5914_v16 = vpack.c.bf16 %v1125_v7, %v1125_v7  ;;  %v1060_v17 = vadd.f32 %v6108_v13, %v6977_v8 }
 0x1f5   : > { %1784 = vst.msk [vmem:[#allocation2 + $0x84] sm:$0xf] %vm1722_vm15, %v1565_v14  ;;  %1787 = vst [vmem:[#allocation2 + $0x88] sm:$0x1] %v1786_v15  ;;  %v1546_v22 = vor.u32 %v1544_v11, %v1543_v10  ;;  %v1548_v24 = vrot.slane %v1543_v10, 4  ;;  %v1123_v23 = vmax.f32 %v1049_v12, 0.0  ;;  %v1051_v25 = vpop.f32.mrf.mxu0 }
 0x1f6   : > { %v1585_v26 = vshrl.u32 %v5914_v16, 16  ;;  %v1126_v27 = vmax.f32 %v1060_v17, 0.0  ;;  %v1052_v28 = vadd.f32 %v6977_v8, %v1051_v25  ;;  %v1588_v34 = vshll.u32 %v5914_v16, 16  ;;  %v1797_v25 = vld [vmem:[#allocation2 + $0xa0] sm:$0xf] }
 0x1f7   : > { %v1547_v29 = vsel %vm6991_vm2, %v1539_v18, %v1546_v22  ;;  %v1556_v30 = vsel %vm6991_vm2, %v1548_v24, %v1555_v9  ;;  %v5912_v33 = vpack.c.bf16 %v1123_v23, %v1123_v23 }
 0x1f8   : > { %1782 = vst.msk [vmem:[#allocation2 + $0x7c] sm:$0xf] %vm1722_vm15, %v1547_v29  ;;  %1783 = vst.msk [vmem:[#allocation2 + $0x80] sm:$0xf] %vm1722_vm15, %v1556_v30  ;;  %v1587_v19 = vrot.slane %v1585_v26, 7  ;;  %v5915_v31 = vpack.c.bf16 %v1126_v27, %v1126_v27  ;;  %v1124_v32 = vmax.f32 %v1052_v28, 0.0 }
 0x1f9   : > { %v1568_v35 = vshrl.u32 %v5912_v33, 16  ;;  %v1571_v39 = vshll.u32 %v5912_v33, 16 }
 0x1fa   : > { %v1594_v36 = vshrl.u32 %v5915_v31, 16  ;;  %v5913_v40 = vpack.c.bf16 %v1124_v32, %v1124_v32  ;;  %v1590_v43 = vor.u32 %v1588_v34, %v1587_v19  ;;  %v1597_v46 = vshll.u32 %v5915_v31, 16  ;;  %v1803_v31 = vld [vmem:[#allocation2 + $0xb0] sm:$0x1] }
 0x1fb   : > { %v6111_v38 = vpop.f32.mrf.mxu0  ;;  %v1570_v37 = vrot.slane %v1568_v35, 7  ;;  %v1592_v48 = vrot.slane %v1587_v19, 4 }
 0x1fc   : > { %v1073_v42 = vadd.f32 %v6111_v38, %v6977_v8  ;;  %v1596_v45 = vrot.slane %v1594_v36, 7  ;;  %v1576_v52 = vshrl.u32 %v5913_v40, 16  ;;  %v1579_v62 = vshll.u32 %v5913_v40, 16 }
 0x1fd   : > { %v1064_v47 = vpop.f32.mrf.mxu0  ;;  %v1573_v49 = vor.u32 %v1571_v39, %v1570_v37  ;;  %v1574_v50 = vrot.slane %v1570_v37, 4 }
 0x1fe   : > { %v1599_v53 = vor.u32 %v1597_v46, %v1596_v45  ;;  %v1601_v54 = vrot.slane %v1596_v45, 4  ;;  %v1129_v55 = vmax.f32 %v1073_v42, 0.0  ;;  %v1065_v56 = vadd.f32 %v6977_v8, %v1064_v47 }
 0x1ff   : > { %v6112_v59 = vpop.f32.mrf.mxu0  ;;  %v1789_v60 = vsel %vm6985_vm1, %v1573_v49, %v1788_v44  ;;  %v1578_v61 = vrot.slane %v1576_v52, 7 }
 0x200   : > { %v1076_v57 = vadd.f32 %v6112_v59, %v6977_v8  ;;  %1790 = vst [vmem:[#allocation2 + $0x8c] sm:$0xf] %v1789_v60  ;;  %v1600_v63 = vsel %vm6991_vm2, %v1592_v48, %v1599_v53  ;;  %v1795_v58 = vsel %vm6850_vm13, %v1601_v54, %v1794_v51  ;;  %v5918_v0 = vpack.c.bf16 %v1129_v55, %v1129_v55 }
 0x201   : > { %v1127_v2 = vmax.f32 %v1065_v56, 0.0  ;;  %v1067_v3 = vpop.f32.mrf.mxu0  ;;  %1793 = vst.msk [vmem:[#allocation2 + $0x98] sm:$0xf] %vm1722_vm15, %v1600_v63  ;;  %1796 = vst [vmem:[#allocation2 + $0x9c] sm:$0x1] %v1795_v58  ;;  %v1581_v4 = vor.u32 %v1579_v62, %v1578_v61  ;;  %v1583_v5 = vrot.slane %v1578_v61, 4 }
 0x202   : > { %v1130_v6 = vmax.f32 %v1076_v57, 0.0  ;;  %v1068_v7 = vadd.f32 %v6977_v8, %v1067_v3  ;;  %v1620_v9 = vshrl.u32 %v5918_v0, 16  ;;  %v1623_v30 = vshll.u32 %v5918_v0, 16 }
 0x203   : > { %v5916_v10 = vpack.c.bf16 %v1127_v2, %v1127_v2  ;;  %v1582_v11 = vsel %vm6991_vm2, %v1574_v50, %v1581_v4  ;;  %v1591_v12 = vsel %vm6991_vm2, %v1583_v5, %v1590_v43  ;;  %v1806_v4 = vld [vmem:[#allocation2 + $0xb4] sm:$0xf] }
 0x204   : > { %v5919_v13 = vpack.c.bf16 %v1130_v6, %v1130_v6  ;;  %v1128_v14 = vmax.f32 %v1068_v7, 0.0  ;;  %1791 = vst.msk [vmem:[#allocation2 + $0x90] sm:$0xf] %vm1722_vm15, %v1582_v11  ;;  %1792 = vst.msk [vmem:[#allocation2 + $0x94] sm:$0xf] %vm1722_vm15, %v1591_v12  ;;  %v1622_v15 = vrot.slane %v1620_v9, 7 }
 0x205   : > { %v1603_v16 = vshrl.u32 %v5916_v10, 16  ;;  %v1606_v24 = vshll.u32 %v5916_v10, 16  ;;  %v1812_v10 = vld [vmem:[#allocation2 + $0xc4] sm:$0x1] }
 0x206   : > { %v1629_v17 = vshrl.u32 %v5919_v13, 16  ;;  %v5917_v18 = vpack.c.bf16 %v1128_v14, %v1128_v14  ;;  %v1632_v27 = vshll.u32 %v5919_v13, 16  ;;  %v1627_v33 = vrot.slane %v1622_v15, 4 }
 0x207   : > { %v1605_v22 = vrot.slane %v1603_v16, 7  ;;  %v6115_v23 = vpop.f32.mrf.mxu0  ;;  %v1625_v39 = vor.u32 %v1623_v30, %v1622_v15 }
 0x208   : > { %v1631_v26 = vrot.slane %v1629_v17, 7  ;;  %v1611_v28 = vshrl.u32 %v5917_v18, 16  ;;  %v1089_v29 = vadd.f32 %v6115_v23, %v6977_v8  ;;  %v1614_v32 = vshll.u32 %v5917_v18, 16 }
 0x209   : > { %v1608_v19 = vor.u32 %v1606_v24, %v1605_v22  ;;  %v1080_v35 = vpop.f32.mrf.mxu0  ;;  %v1609_v40 = vrot.slane %v1605_v22, 4 }
 0x20a   : > { %v1634_v34 = vor.u32 %v1632_v27, %v1631_v26  ;;  %v1636_v36 = vrot.slane %v1631_v26, 4  ;;  %v1613_v38 = vrot.slane %v1611_v28, 7  ;;  %v1133_v37 = vmax.f32 %v1089_v29, 0.0 }
 0x20b   : > { %v1798_v42 = vsel %vm6985_vm1, %v1608_v19, %v1797_v25  ;;  %v1081_v43 = vadd.f32 %v6977_v8, %v1080_v35  ;;  %v6116_v44 = vpop.f32.mrf.mxu0 }
 0x20c   : > { %1799 = vst [vmem:[#allocation2 + $0xa0] sm:$0xf] %v1798_v42  ;;  %v1635_v45 = vsel %vm6991_vm2, %v1627_v33, %v1634_v34  ;;  %v1804_v46 = vsel %vm6850_vm13, %v1636_v36, %v1803_v31  ;;  %v1616_v47 = vor.u32 %v1614_v32, %v1613_v38  ;;  %v1618_v48 = vrot.slane %v1613_v38, 4 }
 0x20d   : > { %1802 = vst.msk [vmem:[#allocation2 + $0xac] sm:$0xf] %vm1722_vm15, %v1635_v45  ;;  %1805 = vst [vmem:[#allocation2 + $0xb0] sm:$0x1] %v1804_v46  ;;  %v5922_v49 = vpack.c.bf16 %v1133_v37, %v1133_v37  ;;  %v1131_v50 = vmax.f32 %v1081_v43, 0.0  ;;  %v1092_v51 = vadd.f32 %v6116_v44, %v6977_v8  ;;  %v1083_v52 = vpop.f32.mrf.mxu0 }
 0x20e   : > { %v1617_v53 = vsel %vm6991_vm2, %v1609_v40, %v1616_v47  ;;  %v1626_v54 = vsel %vm6991_vm2, %v1618_v48, %v1625_v39  ;;  %v1084_v55 = vadd.f32 %v6977_v8, %v1083_v52 }
 0x20f   : > { %1800 = vst.msk [vmem:[#allocation2 + $0xa4] sm:$0xf] %vm1722_vm15, %v1617_v53  ;;  %1801 = vst.msk [vmem:[#allocation2 + $0xa8] sm:$0xf] %vm1722_vm15, %v1626_v54  ;;  %v1655_v56 = vshrl.u32 %v5922_v49, 16  ;;  %v5920_v59 = vpack.c.bf16 %v1131_v50, %v1131_v50  ;;  %v1134_v60 = vmax.f32 %v1092_v51, 0.0 }
 0x210   : > { %v1132_v61 = vmax.f32 %v1084_v55, 0.0  ;;  %v1658_v9 = vshll.u32 %v5922_v49, 16 }
 0x211   : > { %v1638_v62 = vshrl.u32 %v5920_v59, 16  ;;  %v5923_v57 = vpack.c.bf16 %v1134_v60, %v1134_v60  ;;  %v1657_v58 = vrot.slane %v1655_v56, 7  ;;  %v1641_v2 = vshll.u32 %v5920_v59, 16 }
 0x212   : > { %v5921_v63 = vpack.c.bf16 %v1132_v61, %v1132_v61 }
 0x213   : > { %v1640_v0 = vrot.slane %v1638_v62, 7  ;;  %v1664_v3 = vshrl.u32 %v5923_v57, 16  ;;  %v1667_v8 = vshll.u32 %v5923_v57, 16  ;;  %v1662_v13 = vrot.slane %v1657_v58, 4 }
 0x214   : > { %v1646_v5 = vshrl.u32 %v5921_v63, 16  ;;  %v1649_v12 = vshll.u32 %v5921_v63, 16  ;;  %v1660_v17 = vor.u32 %v1658_v9, %v1657_v58 }
 0x215   : > { %v1643_v6 = vor.u32 %v1641_v2, %v1640_v0  ;;  %v1666_v7 = vrot.slane %v1664_v3, 7  ;;  %v1644_v18 = vrot.slane %v1640_v0, 4 }
 0x216   : > { %v1648_v11 = vrot.slane %v1646_v5, 7 }
 0x217   : > { %v1807_v14 = vsel %vm6985_vm1, %v1643_v6, %v1806_v4  ;;  %v1669_v15 = vor.u32 %v1667_v8, %v1666_v7  ;;  %v1671_v16 = vrot.slane %v1666_v7, 4  ;;  %1818 = sbr.rel (%p5628_p8) target bundleno = 544 (0x220), region = 56 }
 0x218   : > { %1808 = vst [vmem:[#allocation2 + $0xb4] sm:$0xf] %v1807_v14  ;;  %v1651_v22 = vor.u32 %v1649_v12, %v1648_v11  ;;  %v1653_v24 = vrot.slane %v1648_v11, 4 }
 0x219   : > { %v1670_v23 = vsel %vm6991_vm2, %v1662_v13, %v1669_v15  ;;  %v1813_v25 = vsel %vm6850_vm13, %v1671_v16, %v1812_v10 }
 0x21a   : > { %1811 = vst.msk [vmem:[#allocation2 + $0xc0] sm:$0xf] %vm1722_vm15, %v1670_v23  ;;  %1814 = vst [vmem:[#allocation2 + $0xc4] sm:$0x1] %v1813_v25  ;;  %v1652_v20 = vsel %vm6991_vm2, %v1644_v18, %v1651_v22  ;;  %v1661_v26 = vsel %vm6991_vm2, %v1653_v24, %v1660_v17 }
 0x21b   : > { %1809 = vst.msk [vmem:[#allocation2 + $0xb8] sm:$0xf] %vm1722_vm15, %v1652_v20  ;;  %1810 = vst.msk [vmem:[#allocation2 + $0xbc] sm:$0xf] %vm1722_vm15, %v1661_v26 }
 0x21c   : > { %v6525_v27 = vmov 0  }
 0x21d   : > { %1819 = vst.msk [vmem:[#allocation2] sm:$0xf] %vm1722_vm15, %v6525_v27  ;;  %1820 = vst.msk [vmem:[#allocation2 + $0x4] sm:$0xf] %vm1722_vm15, %v6525_v27 }
 0x21e   : > { %1821 = vst.msk [vmem:[#allocation2 + $0x8] sm:$0xf] %vm1722_vm15, %v6525_v27  ;;  %1822 = vst.msk [vmem:[#allocation2 + $0xc] sm:$0xf] %vm1722_vm15, %v6525_v27 }
 0x21f   : > { %1824 = vst.msk [vmem:[#allocation2 + $0x10] sm:$0x1] %vm1135_vm10, %v6525_v27 }
 0x220 PF: > { %s1825_s21 = sadd.s32 8, %s6628_s16 }
 0x221   : > { %p5629_p9 = scmp.lt.s32.totalorder %s1825_s21, 32 }
 0x223   : > { %1829 = sbr.rel (%p5629_p9) target bundleno = 556 (0x22c), region = 60 }
 0x228   : > { %v6526_v21 = vmov 0  }
 0x229   : > { %1831 = vst.msk [vmem:[#allocation2 + $0xb4] sm:$0xf] %vm1722_vm15, %v6526_v21  ;;  %1832 = vst.msk [vmem:[#allocation2 + $0xb8] sm:$0xf] %vm1722_vm15, %v6526_v21 }
 0x22a   : > { %1833 = vst.msk [vmem:[#allocation2 + $0xbc] sm:$0xf] %vm1722_vm15, %v6526_v21  ;;  %1834 = vst.msk [vmem:[#allocation2 + $0xc0] sm:$0xf] %vm1722_vm15, %v6526_v21 }
 0x22b   : > { %1836 = vst.msk [vmem:[#allocation2 + $0xc4] sm:$0x1] %vm1135_vm10, %v6526_v21 }
 0x22c PF: > { %vm2206_vm3 = vcmask 1046528   ;;  %v2358_v41 = vld [vmem:[#allocation2 + $0x14] sm:$0xf]  ;;  %v2359_v28 = vld [vmem:[#allocation2 + $0x18] sm:$0xf]  ;;  %v6297_v33 = vld [vmem:[#allocation2 + $0x1c] sm:$0xff]  }
 0x22d   : > { %v2398_v29 = vld [vmem:[#allocation2 + $0x14] sm:$0xe]  ;;  %v7172_v30 = vcombine.low %v2358_v41, %v2359_v28  ;;  %vm1989_vm4 = vsmask.f32 7424  ;;  %v2727_v38 = vrot.slane %v6297_v33, 1  ;;  %v2518_v37 = vshll.u32 %v6297_v33, 16 }
 0x22e   : > { %v5686_v19 = vcombine.low %v2398_v29, %v2359_v28  ;;  %v6299_v35 = vld [vmem:[#allocation2 + $0x24] ss:$0 sps:$4 sm:$0x11]   ;;  %v7176_v34 = vld [vmem:[#allocation2 + $0x30] sm:$0xff]   ;;  %v2522_v39 = vshrl.u32 %v6297_v33, 16  ;;  %s6527_s27 = smov 64  }
 0x22f   : > { %v2511_v31 = vshrl.u32 %v7172_v30, 16  ;;  %v2513_v32 = vshll.u32 %v7172_v30, 16  ;;  %v2729_v42 = vrot.slane %v6299_v35, 1  ;;  %v2526_v43 = vshll.u32 %v6299_v35, 16  ;;  %v2362_v52 = vld [vmem:[#allocation2 + $0x28] sm:$0xf] }
 0x230   : > { %v2726_v36 = vrot.slane %v5686_v19, 1  ;;  %v2538_v44 = vshll.u32 %v7176_v34, 16  ;;  %v2520_v46 = vrot.slane %v2518_v37, 1  ;;  %v6301_v47 = vld [vmem:[#allocation2 + $0x38] ss:$0 sps:$4 sm:$0x11]  }
 0x231   : > { %v2515_v40 = vrot.slane %v2513_v32, 1  ;;  %v2730_v49 = vsel %vm2206_vm3, %v2727_v38, %v2729_v42  ;;  %v2528_v50 = vrot.slane %v2526_v43, 1  ;;  %v2363_v53 = vld [vmem:[#allocation2 + $0x2c] sm:$0xf]  ;;  %v2542_v55 = vshrl.u32 %v7176_v34, 16  ;;  %s6528_s28 = smov 32  }
 0x232   : > { %v2728_v45 = vsel %vm2206_vm3, %v2726_v36, %v2727_v38  ;;  %v2540_v51 = vrot.slane %v2538_v44, 1  ;;  %v2524_v54 = vor.u32 %v2522_v39, %v2520_v46  ;;  %v2546_v56 = vshll.u32 %v6301_v47, 16  ;;  %v2399_v60 = vld [vmem:[#allocation2 + $0x28] sm:$0xe]  ;;  %v2366_v7 = vld [vmem:[#allocation2 + $0x3c] sm:$0xf] }
 0x233   : > { %2766 = vrot.lane.b32.xlu1 %v2728_v45, %s6527_s27  ;;  %v2516_v48 = vor.u32 %v2515_v40, %v2511_v31  ;;  %v7183_v59 = vcombine.low %v2362_v52, %v2363_v53  ;;  %v2732_v62 = vrot.slane %v7176_v34, 1  ;;  %v2734_v58 = vrot.slane %v6301_v47, 1  ;;  %v7188_v2 = vld [vmem:[#allocation2 + $0x44] sm:$0xff]   ;;  %v6305_v3 = vld [vmem:[#allocation2 + $0x4c] ss:$0 sps:$4 sm:$0x11]  }
 0x234   : > { %v2544_v57 = vor.u32 %v2542_v55, %v2540_v51  ;;  %v2548_v63 = vrot.slane %v2546_v56, 1  ;;  %v5687_v0 = vcombine.low %v2399_v60, %v2363_v53  ;;  %v2529_v4 = vsel %vm1989_vm4, %v2524_v54, %v2528_v50  ;;  %v2367_v8 = vld [vmem:[#allocation2 + $0x40] sm:$0xf]  ;;  %v7197_v13 = vld [vmem:[#allocation2 + $0x58] sm:$0xff]   ;;  %v2370_v41 = vld [vmem:[#allocation2 + $0x50] sm:$0xf] }
 0x235   : > { %v2521_v61 = vsel %vm1989_vm4, %v2516_v48, %v2520_v46  ;;  %v2531_v5 = vshrl.u32 %v7183_v59, 16  ;;  %v2533_v6 = vshll.u32 %v7183_v59, 16  ;;  %v2558_v10 = vshll.u32 %v7188_v2, 16  ;;  %v2400_v18 = vld [vmem:[#allocation2 + $0x3c] sm:$0xe]  ;;  %v7220_v43 = vld [vmem:[#allocation2 + $0x6c] sm:$0xff]  }
 0x236   : > { %2670 = vrot.lane.b32.xlu0 %v2521_v61, %s6528_s28  ;;  %v2549_v9 = vsel %vm1989_vm4, %v2544_v57, %v2548_v63  ;;  %v2562_v11 = vshrl.u32 %v7188_v2, 16  ;;  %v2566_v12 = vshll.u32 %v6305_v3, 16  ;;  %v7199_v15 = vcombine.low %v2366_v7, %v2367_v8  ;;  %v7205_v25 = vld [vmem:[#allocation2 + $0x60] ss:$0 sps:$4 sm:$0x11]  }
 0x237   : > { %2768 = vrot.lane.b32.xlu1 %v2730_v49, %s6527_s27  ;;  %v2535_v14 = vrot.slane %v2533_v6, 1  ;;  %v2731_v16 = vrot.slane %v5687_v0, 1  ;;  %v2560_v17 = vrot.slane %v2558_v10, 1  ;;  %v2735_v20 = vsel %vm2206_vm3, %v2732_v62, %v2734_v58  ;;  %v2371_v28 = vld [vmem:[#allocation2 + $0x54] sm:$0xf]  ;;  %v7233_v57 = vld [vmem:[#allocation2 + $0x80] sm:$0xff]  }
 0x238   : > { %v2551_v24 = vshrl.u32 %v7199_v15, 16  ;;  %v2553_v23 = vshll.u32 %v7199_v15, 16  ;;  %v2568_v27 = vrot.slane %v2566_v12, 1  ;;  %v2578_v21 = vshll.u32 %v7197_v13, 16  ;;  %v2374_v44 = vld [vmem:[#allocation2 + $0x64] sm:$0xf] }
 0x239   : > { %v2536_v22 = vor.u32 %v2535_v14, %v2531_v5  ;;  %v2564_v26 = vor.u32 %v2562_v11, %v2560_v17  ;;  %v2733_v19 = vsel %vm2206_vm3, %v2731_v16, %v2732_v62  ;;  %v5688_v31 = vcombine.low %v2400_v18, %v2367_v8  ;;  %v2375_v45 = vld [vmem:[#allocation2 + $0x68] sm:$0xf]  ;;  %v2401_v47 = vld [vmem:[#allocation2 + $0x50] sm:$0xe]  ;;  %v2378_v6 = vld [vmem:[#allocation2 + $0x78] sm:$0xf] }
 0x23a   : > { %2672 = vrot.lane.b32.xlu0 %v2529_v4, %s6528_s28  ;;  %v2555_v33 = vrot.slane %v2553_v23, 1  ;;  %v7212_v32 = vcombine.low %v2370_v41, %v2371_v28  ;;  %v2737_v34 = vrot.slane %v7188_v2, 1  ;;  %v2739_v36 = vrot.slane %v6305_v3, 1  ;;  %v6313_v55 = vld [vmem:[#allocation2 + $0x74] ss:$0 sps:$4 sm:$0x11]  }
 0x23b   : > { %2676 = vrot.lane.b32.xlu1 %v2549_v9, %s6528_s28  ;;  %v2541_v29 = vsel %vm1989_vm4, %v2536_v22, %v2540_v51  ;;  %v2582_v38 = vshrl.u32 %v7197_v13, 16  ;;  %v2569_v37 = vsel %vm1989_vm4, %v2564_v26, %v2568_v27  ;;  %v2580_v39 = vrot.slane %v2578_v21, 1  ;;  %v7240_v7 = vld [vmem:[#allocation2 + $0x7c] sm:$0xf] }
 0x23c   : > { %v2556_v35 = vor.u32 %v2555_v33, %v2551_v24  ;;  %v2586_v40 = vshll.u32 %v7205_v25, 16  ;;  %v2573_v42 = vshll.u32 %v7212_v32, 16  ;;  %v2736_v46 = vrot.slane %v5688_v31, 1  ;;  %v7244_v10 = vld [vmem:[#allocation2 + $0x88] ss:$0 sps:$4 sm:$0x11]  }
 0x23d   : > { %v2571_v49 = vshrl.u32 %v7212_v32, 16  ;;  %v7226_v51 = vcombine.low %v2374_v44, %v2375_v45  ;;  %v2740_v52 = vsel %vm2206_vm3, %v2737_v34, %v2739_v36  ;;  %v2584_v53 = vor.u32 %v2582_v38, %v2580_v39  ;;  %v7263_v31 = vld [vmem:[#allocation2 + $0x90] sm:$0xf]  ;;  %v2403_v36 = vld [vmem:[#allocation2 + $0x78] sm:$0xe] }
 0x23e   : > { %2674 = vrot.lane.b32.xlu0 %v2541_v29, %s6528_s28  ;;  %v2561_v48 = vsel %vm1989_vm4, %v2556_v35, %v2560_v17  ;;  %v2575_v50 = vrot.slane %v2573_v42, 1  ;;  %v2588_v54 = vrot.slane %v2586_v40, 1  ;;  %v2598_v56 = vshll.u32 %v7220_v43, 16  ;;  %v7260_v29 = vld [vmem:[#allocation2 + $0x94] sm:$0xff]  }
 0x23f   : > { %2772 = vrot.lane.b32.xlu1 %v2735_v20, %s6527_s27  ;;  %v2742_v60 = vrot.slane %v7197_v13, 1  ;;  %v2744_v61 = vrot.slane %v7205_v25, 1  ;;  %v5689_v62 = vcombine.low %v2401_v47, %v2371_v28  ;;  %v2738_v63 = vsel %vm2206_vm3, %v2736_v46, %v2737_v34  ;;  %v2402_v13 = vld [vmem:[#allocation2 + $0x64] sm:$0xe]  ;;  %v6347_v35 = vld [vmem:[%s8430_s3 + $0x58] sm:$0xff]   ;;  %v6349_v47 = vld [vmem:[%s8430_s3 + $0x50] sm:$0xff]  }
 0x240   : > { %v2576_v58 = vor.u32 %v2575_v50, %v2571_v49  ;;  %v2602_v0 = vshrl.u32 %v7220_v43, 16  ;;  %v2593_v2 = vshll.u32 %v7226_v51, 16  ;;  %v2589_v3 = vsel %vm1989_vm4, %v2584_v53, %v2588_v54  ;;  %v7272_v40 = vld [vmem:[#allocation2 + $0x9c] ss:$0 sps:$4 sm:$0x11]   ;;  %6117 = vmatprep.subr.bf16.mxu1 %v6347_v35 }
 0x241   : > { %v2600_v4 = vrot.slane %v2598_v56, 1  ;;  %v2606_v5 = vshll.u32 %v6313_v55, 16  ;;  %v2741_v8 = vrot.slane %v5689_v62, 1  ;;  %v2591_v9 = vshrl.u32 %v7226_v51, 16  ;;  %6118 = vmatpush3.bf16.msra.mxu1 %v6347_v35 }
 0x242   : > { %2770 = vrot.lane.b32.xlu0 %v2733_v19, %s6527_s27  ;;  %v2581_v11 = vsel %vm1989_vm4, %v2576_v58, %v2580_v39  ;;  %v2595_v12 = vrot.slane %v2593_v2, 1  ;;  %v2618_v14 = vshll.u32 %v7233_v57, 16  ;;  %v7250_v16 = vcombine.low %v2378_v6, %v7240_v7  ;;  %v2382_v19 = vld [vmem:[#allocation2 + $0x8c] sm:$0xf]  ;;  %6119 = vmatprep.subr.bf16.mxu1 %v6349_v47  ;;  %v6355_v2 = vld [vmem:[%s8430_s3 + $0x40] sm:$0xff]  }
 0x243   : > { %2680 = vrot.lane.b32.xlu1 %v2569_v37, %s6528_s28  ;;  %v2745_v17 = vsel %vm2206_vm3, %v2742_v60, %v2744_v61  ;;  %v2604_v18 = vor.u32 %v2602_v0, %v2600_v4  ;;  %v2608_v22 = vrot.slane %v2606_v5, 1  ;;  %v2747_v24 = vrot.slane %v7220_v43, 1  ;;  %v6353_v58 = vld [vmem:[%s8430_s3 + $0x48] sm:$0xff]   ;;  %v7299_v0 = vld [vmem:[#allocation2 + $0xb0] ss:$0 sps:$4 sm:$0x11]  }
 0x244   : > { %v2743_v23 = vsel %vm2206_vm3, %v2741_v8, %v2742_v60  ;;  %v2749_v25 = vrot.slane %v6313_v55, 1  ;;  %v5690_v20 = vcombine.low %v2402_v13, %v2375_v45  ;;  %v2622_v26 = vshrl.u32 %v7233_v57, 16  ;;  %v7291_v60 = vld [vmem:[#allocation2 + $0xa8] sm:$0xff]  }
 0x245   : > { %v2596_v27 = vor.u32 %v2595_v12, %v2591_v9  ;;  %v2620_v21 = vrot.slane %v2618_v14, 1  ;;  %v2626_v41 = vshll.u32 %v7244_v10, 16  ;;  %v2613_v28 = vshll.u32 %v7250_v16, 16  ;;  %6120 = vmatpush3.bf16.msra.mxu1 %v6349_v47  ;;  %v7348_v47 = vld [vmem:[#allocation2 + $0x30] sm:$0xff]  }
 0x246   : > { %2678 = vrot.lane.b32.xlu0 %v2561_v48, %s6528_s28  ;;  %v2609_v33 = vsel %vm1989_vm4, %v2604_v18, %v2608_v22  ;;  %v2746_v34 = vrot.slane %v5690_v20, 1  ;;  %v2611_v37 = vshrl.u32 %v7250_v16, 16  ;;  %v7275_v42 = vcombine.low %v2382_v19, %v7263_v31  ;;  %6121 = vmatprep.subr.bf16.mxu1 %v6353_v58  ;;  %v6359_v18 = vld [vmem:[%s8430_s3 + $0x38] sm:$0xff]   ;;  %v7324_v20 = vld [vmem:[#allocation2 + $0x8] sm:$0xff]  }
 0x247   : > { %2776 = vrot.lane.b32.xlu1 %v2740_v52, %s6527_s27  ;;  %v2601_v38 = vsel %vm1989_vm4, %v2596_v27, %v2600_v4  ;;  %v2615_v39 = vrot.slane %v2613_v28, 1  ;;  %v2750_v43 = vsel %vm2206_vm3, %v2747_v24, %v2749_v25  ;;  %v2624_v44 = vor.u32 %v2622_v26, %v2620_v21  ;;  %v7328_v28 = vld [vmem:[#allocation2 + $0x4] sm:$0xf] }
 0x248   : > { %v2628_v45 = vrot.slane %v2626_v41, 1  ;;  %v2638_v46 = vshll.u32 %v7260_v29, 16  ;;  %v2748_v48 = vsel %vm2206_vm3, %v2746_v34, %v2747_v24  ;;  %v2752_v49 = vrot.slane %v7233_v57, 1  ;;  %v2386_v57 = vld [vmem:[#allocation2 + $0xa0] sm:$0xf] }
 0x249   : > { %v2754_v50 = vrot.slane %v7244_v10, 1  ;;  %v5691_v52 = vcombine.low %v2403_v36, %v7240_v7  ;;  %v2616_v53 = vor.u32 %v2615_v39, %v2611_v37  ;;  %v2642_v54 = vshrl.u32 %v7260_v29, 16  ;;  %v2404_v7 = vld [vmem:[#allocation2 + $0x8c] sm:$0xe]  ;;  %6122 = vmatpush3.bf16.msra.mxu1 %v6353_v58  ;;  %v1837_v41 = vld [vmem:[#allocation2] sm:$0xf] }
 0x24a   : > { %2774 = vrot.lane.b32.xlu0 %v2738_v63, %s6527_s27  ;;  %v2646_v55 = vshll.u32 %v7272_v40, 16  ;;  %v2633_v56 = vshll.u32 %v7275_v42, 16  ;;  %v2629_v61 = vsel %vm1989_vm4, %v2624_v44, %v2628_v45  ;;  %v2640_v62 = vrot.slane %v2638_v46, 1  ;;  %v7294_v63 = vld [vmem:[#allocation2 + $0xa4] sm:$0xf]  ;;  %6123 = vmatprep.subr.bf16.mxu1 %v6355_v2 }
 0x24b   : > { %2684 = vrot.lane.b32.xlu1 %v2589_v3, %s6528_s28  ;;  %v2751_v3 = vrot.slane %v5691_v52, 1  ;;  %v2621_v4 = vsel %vm1989_vm4, %v2616_v53, %v2620_v21  ;;  %v2631_v5 = vshrl.u32 %v7275_v42, 16  ;;  %v7309_v8 = vcombine.low %v2386_v57, %v7294_v63  ;;  %v2405_v36 = vld [vmem:[#allocation2 + $0xa0] sm:$0xe] }
 0x24c   : > { %v2635_v6 = vrot.slane %v2633_v56, 1  ;;  %v2755_v9 = vsel %vm2206_vm3, %v2752_v49, %v2754_v50  ;;  %v2644_v10 = vor.u32 %v2642_v54, %v2640_v62  ;;  %v2658_v12 = vshll.u32 %v7291_v60, 16  ;;  %v3335_v56 = vld [vmem:[#allocation2 + $0x28] sm:$0xf] }
 0x24d   : > { %v2753_v13 = vsel %vm2206_vm3, %v2751_v3, %v2752_v49  ;;  %v5692_v14 = vcombine.low %v2404_v7, %v7263_v31  ;;  %v2757_v24 = vrot.slane %v7260_v29, 1  ;;  %v2653_v25 = vshll.u32 %v7309_v8, 16  ;;  %6124 = vmatpush3.bf16.msra.mxu1 %v6355_v2  ;;  %v6361_v29 = vld [vmem:[%s8430_s3 + $0x30] sm:$0xff]  }
 0x24e   : > { %2682 = vrot.lane.b32.xlu0 %v2581_v11, %s6528_s28  ;;  %v2648_v11 = vrot.slane %v2646_v55, 1  ;;  %v2636_v22 = vor.u32 %v2635_v6, %v2631_v5  ;;  %v2660_v27 = vrot.slane %v2658_v12, 1  ;;  %v2662_v21 = vshrl.u32 %v7291_v60, 16  ;;  %6125 = vmatprep.subr.bf16.mxu1 %v6359_v18 }
 0x24f   : > { %2780 = vrot.lane.b32.xlu1 %v2745_v17, %s6527_s27  ;;  %v2666_v17 = vshll.u32 %v7299_v0, 16  ;;  %v2651_v35 = vshrl.u32 %v7309_v8, 16  ;;  %v2655_v34 = vrot.slane %v2653_v25, 1  ;;  %v2762_v44 = vrot.slane %v7291_v60, 1  ;;  %v7356_v60 = vld [vmem:[#allocation2 + $0x2c] sm:$0xf] }
 0x250   : > { %v2649_v26 = vsel %vm1989_vm4, %v2644_v10, %v2648_v11  ;;  %v2641_v31 = vsel %vm1989_vm4, %v2636_v22, %v2640_v62  ;;  %v2664_v39 = vor.u32 %v2662_v21, %v2660_v27  ;;  %v2764_v45 = vrot.slane %v7299_v0, 1  ;;  %v7358_v62 = vld [vmem:[#allocation2 + $0x38] ss:$0 sps:$4 sm:$0x11]  }
 0x251   : > { %v2668_v19 = vrot.slane %v2666_v17, 1  ;;  %6126 = vmatpush3.bf16.msra.mxu1 %v6359_v18  ;;  %v5693_v46 = vcombine.low %v2405_v36, %v7294_v63  ;;  %v2656_v49 = vor.u32 %v2655_v34, %v2651_v35  ;;  %v2002_v50 = vshrl.u32 %v7324_v20, 16 }
 0x252   : > { %2778 = vrot.lane.b32.xlu0 %v2743_v23, %s6527_s27  ;;  %v2759_v23 = vrot.slane %v7272_v40, 1  ;;  %v7341_v40 = vld [vmem:[#allocation2 + $0x10] ss:$0 sps:$4 sm:$0x11]   ;;  %6127 = vmatprep.subr.bf16.mxu1 %v6361_v29  ;;  %v3495_v2 = vshll.u32 %v7348_v47, 16  ;;  %v7366_v3 = vcombine.low %v3335_v56, %v7356_v60  ;;  %v2765_v5 = vsel %vm2206_vm3, %v2762_v44, %v2764_v45 }
 0x253   : > { %2688 = vrot.lane.b32.xlu1 %v2609_v33, %s6528_s28  ;;  %v2756_v33 = vrot.slane %v5692_v14, 1  ;;  %v2669_v53 = vsel %vm1989_vm4, %v2664_v39, %v2668_v19  ;;  %v2006_v55 = vshll.u32 %v7341_v40, 16  ;;  %v2761_v57 = vrot.slane %v5693_v46, 1  ;;  %v7409_v46 = vld [vmem:[#allocation2 + $0x44] sm:$0xff]   ;;  %v1878_v56 = vld [vmem:[#allocation2 + $0x14] sm:$0xe] }
 0x254   : > { %v2760_v37 = vsel %vm2206_vm3, %v2757_v24, %v2759_v23  ;;  %v2661_v58 = vsel %vm1989_vm4, %v2656_v49, %v2660_v27  ;;  %v2208_v10 = vrot.slane %v7324_v20, 1  ;;  %v2210_v12 = vrot.slane %v7341_v40, 1  ;;  %v7384_v23 = vld [vmem:[#allocation2 + $0x1c] sm:$0xff]  }
 0x255   : > { %6128 = vmatpush3.bf16.msra.mxu1 %v6361_v29  ;;  %v2008_v7 = vrot.slane %v2006_v55, 1  ;;  %v2763_v11 = vsel %vm2206_vm3, %v2761_v57, %v2762_v44  ;;  %v3499_v14 = vshrl.u32 %v7348_v47, 16  ;;  %v3497_v18 = vrot.slane %v3495_v2, 1  ;;  %v7420_v55 = vld [vmem:[#allocation2 + $0x40] sm:$0xf] }
 0x256   : > { %2686 = vrot.lane.b32.xlu0 %v2601_v38, %s6528_s28  ;;  %v7338_v38 = vcombine.low %v1837_v41, %v7328_v28  ;;  %v3503_v22 = vshll.u32 %v7358_v62, 16  ;;  %v3488_v21 = vshrl.u32 %v7366_v3, 16  ;;  %v7391_v41 = vld [vmem:[#allocation2 + $0x24] ss:$0 sps:$4 sm:$0x11]   ;;  %v2018_v19 = vshll.u32 %v7384_v23, 16 }
 0x257   : > { %2784 = vrot.lane.b32.xlu1 %v2750_v43, %s6527_s27  ;;  %v1998_v43 = vshll.u32 %v7324_v20, 16  ;;  %v1841_v20 = vld [vmem:[#allocation2 + $0x14] sm:$0xf]  ;;  %v2211_v35 = vsel %vm2206_vm3, %v2208_v10, %v2210_v12  ;;  %v3501_v34 = vor.u32 %v3499_v14, %v3497_v18  ;;  %v3704_v39 = vrot.slane %v7348_v47, 1 }
 0x258   : > { %v1993_v52 = vshll.u32 %v7338_v38, 16  ;;  %v1991_v63 = vshrl.u32 %v7338_v38, 16  ;;  %v3505_v36 = vrot.slane %v3503_v22, 1  ;;  %v3706_v40 = vrot.slane %v7358_v62, 1  ;;  %v7442_v12 = vld [vmem:[#allocation2 + $0x30] sm:$0xff]  }
 0x259   : > { %v2000_v54 = vrot.slane %v1998_v43, 1  ;;  %v2022_v44 = vshrl.u32 %v7384_v23, 16  ;;  %v2026_v45 = vshll.u32 %v7391_v41, 16  ;;  %v7425_v62 = vld [vmem:[#allocation2 + $0x4c] ss:$0 sps:$4 sm:$0x11]  }
 0x25a   : > { %2782 = vrot.lane.b32.xlu0 %v2748_v48, %s6527_s27  ;;  %v2758_v48 = vsel %vm2206_vm3, %v2756_v33, %v2757_v24  ;;  %v1995_v0 = vrot.slane %v1993_v52, 1  ;;  %v3490_v24 = vshll.u32 %v7366_v3, 16  ;;  %v3375_v33 = vld [vmem:[#allocation2 + $0x28] sm:$0xe]  ;;  %v3707_v2 = vsel %vm2206_vm3, %v3704_v39, %v3706_v40 }
 0x25b   : > { %2692 = vrot.lane.b32.xlu1 %v2629_v61, %s6528_s28  ;;  %v1877_v61 = vld [vmem:[#allocation2] sm:$0xe]  ;;  %v2004_v6 = vor.u32 %v2002_v50, %v2000_v54  ;;  %v5774_v43 = vcombine.low %v3375_v33, %v7356_v60  ;;  %v2020_v50 = vrot.slane %v2018_v19, 1  ;;  %v1845_v22 = vld [vmem:[#allocation2 + $0x28] sm:$0xf]  ;;  %v3709_v40 = vrot.slane %v7409_v46, 1 }
 0x25c   : > { %v1996_v17 = vor.u32 %v1995_v0, %v1991_v63  ;;  %v3492_v29 = vrot.slane %v3490_v24, 1  ;;  %v6394_v0 = vld [vmem:[%s8430_s3 + $0x10] sm:$0xff]   ;;  %v3376_v33 = vld [vmem:[#allocation2 + $0x3c] sm:$0xe]  ;;  %vm2279_vm5 = vcmask 261120   ;;  %vm2312_vm6 = vcmask 523264  }
 0x25d   : > { %v2009_v25 = vsel %vm1989_vm4, %v2004_v6, %v2008_v7  ;;  %v3703_v60 = vrot.slane %v5774_v43, 1  ;;  %v3515_v6 = vshll.u32 %v7409_v46, 16  ;;  %v2213_v7 = vrot.slane %v7384_v23, 1 }
 0x25e   : > { %2690 = vrot.lane.b32.xlu0 %v2621_v4, %s6528_s28  ;;  %v6385_v4 = vld [vmem:[%s8430_s3 + $0x28] sm:$0xff]   ;;  %v3493_v49 = vor.u32 %v3492_v29, %v3488_v21  ;;  %v6402_v21 = vld [vmem:[%s8430_s3] sm:$0xff]   ;;  %v5775_v43 = vcombine.low %v3376_v33, %v7420_v55  ;;  %vm2911_vm7 = vcmask 785408   ;;  %vm4552_vm8 = vcmask 517120  }
 0x25f   : > { %2788 = vrot.lane.b32.xlu1 %v2755_v9, %s6527_s27  ;;  %v6387_v9 = vld [vmem:[%s8430_s3 + $0x20] sm:$0xff]   ;;  %6161 = vmatprep.subr.bf16.mxu0 %v6385_v4  ;;  %v3517_v23 = vrot.slane %v3515_v6, 1  ;;  %vm5385_vm9 = vcmask 1041409   ;;  %vm5387_vm10 = vcmask 1042434   ;;  %vm5389_vm11 = vcmask 1043459  }
 0x260   : > { %6162 = vmatpush3.bf16.msra.mxu0 %v6385_v4  ;;  %v3498_v57 = vsel %vm1989_vm4, %v3493_v49, %v3497_v18  ;;  %v2024_v4 = vor.u32 %v2022_v44, %v2020_v50  ;;  %vm5391_vm12 = vcmask 1044484   ;;  %vm5393_vm13 = vcmask 1045509  }
 0x261   : > { %6163 = vmatprep.subr.bf16.mxu0 %v6387_v9  ;;  %vm5395_vm14 = vcmask 1046534   ;;  %vm5397_vm15 = vcmask 1047559   ;;  %vm5464_vm0 = vcmask 519168  }
 0x262   : > { %2786 = vrot.lane.b32.xlu0 %v2753_v13, %s6527_s27  ;;  %v5654_v13 = vcombine.low %v1877_v61, %v7328_v28  ;;  %v2001_v28 = vsel %vm1989_vm4, %v1996_v17, %v2000_v54  ;;  %v3339_v54 = vld [vmem:[#allocation2 + $0x3c] sm:$0xf]  ;;  %v3519_v17 = vshrl.u32 %v7409_v46, 16  ;;  %v3344_v46 = vld [vmem:[#allocation2 + $0x54] sm:$0xf] }
 0x263   : > { %2696 = vrot.lane.b32.xlu1 %v2649_v26, %s6528_s28  ;;  %v7387_v26 = vld [vmem:[#allocation2 + $0x18] sm:$0xf] }
 0x264   : > { %v2207_v27 = vrot.slane %v5654_v13, 1  ;;  %6164 = vmatpush3.bf16.msra.mxu0 %v6387_v9  ;;  %v2215_v9 = vrot.slane %v7391_v41, 1  ;;  %v3705_v13 = vsel %vm2206_vm3, %v3703_v60, %v3704_v39 }
 0x266   : > { %2694 = vrot.lane.b32.xlu0 %v2641_v31, %s6528_s28  ;;  %v7397_v31 = vcombine.low %v1841_v20, %v7387_v26  ;;  %v2209_v47 = vsel %vm2206_vm3, %v2207_v27, %v2208_v10  ;;  %v5655_v10 = vcombine.low %v1878_v56, %v7387_v26  ;;  %v6399_v20 = vld [vmem:[%s8430_s3 + $0x8] sm:$0xff]   ;;  %v3343_v56 = vld [vmem:[#allocation2 + $0x50] sm:$0xf] }
 0x267   : > { %2792 = vrot.lane.b32.xlu1 %v2760_v37, %s6527_s27  ;;  %v6391_v37 = vld [vmem:[%s8430_s3 + $0x18] sm:$0xff]  }
 0x268   : > { %6165 = vmatprep.subr.bf16.mxu0 %v6391_v37  ;;  %v2013_v52 = vshll.u32 %v7397_v31, 16  ;;  %v2011_v61 = vshrl.u32 %v7397_v31, 16  ;;  %v2212_v26 = vrot.slane %v5655_v10, 1 }
 0x269   : > { %6166 = vmatpush3.bf16.msra.mxu0 %v6391_v37  ;;  %v2038_v37 = vshll.u32 %v7442_v12, 16 }
 0x26a   : > { %2790 = vrot.lane.b32.xlu0 %v2758_v48, %s6527_s27  ;;  %v7414_v48 = vld [vmem:[%s8430_s3 + $0x88] sm:$0xff]   ;;  %v2015_v63 = vrot.slane %v2013_v52, 1  ;;  %6167 = vmatprep.subr.bf16.mxu0 %v6394_v0  ;;  %v2214_v39 = vsel %vm2206_vm3, %v2212_v26, %v2213_v7 }
 0x26b   : > { %2700 = vrot.lane.b32.xlu1 %v2669_v53, %s6528_s28  ;;  %v3506_v53 = vsel %vm1989_vm4, %v3501_v34, %v3505_v36  ;;  %6205 = vmatprep.subr.bf16.mxu1 %v7414_v48  ;;  %v3521_v34 = vor.u32 %v3519_v17, %v3517_v23  ;;  %v6345_v36 = vld [vmem:[#allocation2 + $0x38] ss:$0 sps:$4 sm:$0x11]   ;;  %v7495_v26 = vld [vmem:[#allocation2 + $0x4c] ss:$0 sps:$4 sm:$0x11]  }
 0x26c   : > { %v2016_v14 = vor.u32 %v2015_v63, %v2011_v61  ;;  %v7481_v63 = vcombine.low %v3343_v56, %v3344_v46 }
 0x26d   : > { %6168 = vmatpush3.bf16.msra.mxu0 %v6394_v0 }
 0x26e   : > { %2698 = vrot.lane.b32.xlu0 %v2661_v58, %s6528_s28  ;;  %v7430_v58 = vcombine.low %v3339_v54, %v7420_v55  ;;  %6169 = vmatprep.subr.bf16.mxu0 %v6399_v20  ;;  %v2021_v41 = vsel %vm1989_vm4, %v2016_v14, %v2020_v50  ;;  %v7474_v50 = vld [vmem:[#allocation2 + $0x58] sm:$0xff]   ;;  %v2046_v54 = vshll.u32 %v6345_v36, 16  ;;  %v3708_v55 = vrot.slane %v5775_v43, 1  ;;  %v7508_v43 = vld [vmem:[#allocation2 + $0x6c] sm:$0xff]  }
 0x26f   : > { %2796 = vrot.lane.b32.xlu1 %v2765_v5, %s6527_s27  ;;  %v2028_v5 = vrot.slane %v2026_v45, 1  ;;  %v3711_v45 = vrot.slane %v7425_v62, 1  ;;  %v3535_v6 = vshll.u32 %v7474_v50, 16  ;;  %v3539_v17 = vshrl.u32 %v7474_v50, 16 }
 0x270   : > { %v3510_v18 = vshll.u32 %v7430_v58, 16 }
 0x271   : > { %v2029_v24 = vsel %vm1989_vm4, %v2024_v4, %v2028_v5  ;;  %6170 = vmatpush3.bf16.msra.mxu0 %v6399_v20  ;;  %v3712_v0 = vsel %vm2206_vm3, %v3709_v40, %v3711_v45  ;;  %v2048_v4 = vrot.slane %v2046_v54, 1  ;;  %v6351_v5 = vld [vmem:[#allocation2 + $0x60] ss:$0 sps:$4 sm:$0x11]   ;;  %v1849_v20 = vld [vmem:[#allocation2 + $0x3c] sm:$0xf] }
 0x272   : > { %2794 = vrot.lane.b32.xlu0 %v2763_v11, %s6527_s27  ;;  %v3523_v11 = vshll.u32 %v7425_v62, 16  ;;  %v3512_v29 = vrot.slane %v3510_v18, 1  ;;  %6171 = vmatprep.subr.bf16.mxu0 %v6402_v21  ;;  %v3530_v18 = vshll.u32 %v7481_v63, 16 }
 0x273   : > { %2152 = vrot.lane.b32.xlu1 %v2009_v25, %s6528_s28  ;;  %v7449_v25 = vld [vmem:[#allocation2 + $0x2c] sm:$0xf] }
 0x274   : > { %v3525_v27 = vrot.slane %v3523_v11, 1  ;;  %v7462_v19 = vcombine.low %v1845_v22, %v7449_v25  ;;  %v7488_v11 = vld [vmem:[#allocation2 + $0x44] sm:$0xff]  }
 0x275   : > { %6172 = vmatpush3.bf16.msra.mxu0 %v6402_v21 }
 0x276   : > { %2150 = vrot.lane.b32.xlu0 %v2001_v28, %s6528_s28  ;;  %v3508_v28 = vshrl.u32 %v7430_v58, 16  ;;  %v2033_v49 = vshll.u32 %v7462_v19, 16  ;;  %v3526_v52 = vsel %vm1989_vm4, %v3521_v34, %v3525_v27  ;;  %v2031_v61 = vshrl.u32 %v7462_v19, 16  ;;  %v3377_v27 = vld [vmem:[#allocation2 + $0x50] sm:$0xe] }
 0x277   : > { %2249 = vrot.lane.b32.xlu1 %v2211_v35, %s6527_s27  ;;  %v2216_v35 = vsel %vm2206_vm3, %v2213_v7, %v2215_v9  ;;  %v2218_v7 = vrot.slane %v7442_v12, 1  ;;  %v2220_v9 = vrot.slane %v6345_v36, 1  ;;  %v2058_v36 = vshll.u32 %v7488_v11, 16 }
 0x278   : > { %v3513_v44 = vor.u32 %v3512_v29, %v3508_v28  ;;  %v2035_v62 = vrot.slane %v2033_v49, 1  ;;  %v3532_v28 = vrot.slane %v3530_v18, 1 }
 0x279   : > { %v2221_v33 = vsel %vm2206_vm3, %v2218_v7, %v2220_v9  ;;  %v2060_v56 = vrot.slane %v2058_v36, 1  ;;  %v2225_v9 = vrot.slane %v7495_v26, 1 }
 0x27a   : > { %2247 = vrot.lane.b32.xlu0 %v2209_v47, %s6527_s27  ;;  %v2042_v47 = vshrl.u32 %v7442_v12, 16  ;;  %v3518_v60 = vsel %vm1989_vm4, %v3513_v44, %v3517_v23  ;;  %v2036_v14 = vor.u32 %v2035_v62, %v2031_v61  ;;  %v3543_v23 = vshll.u32 %v6351_v5, 16  ;;  %v1850_v12 = vld [vmem:[#allocation2 + $0x40] sm:$0xf] }
 0x27b   : > { %3649 = vrot.lane.b32.xlu1 %v3506_v53, %s6528_s28  ;;  %v2040_v53 = vrot.slane %v2038_v37, 1  ;;  %v7501_v29 = vcombine.low %v1849_v20, %v1850_v12  ;;  %v5776_v37 = vcombine.low %v3377_v27, %v3344_v46  ;;  %v2062_v46 = vshrl.u32 %v7488_v11, 16  ;;  %v7518_v61 = vld [vmem:[#allocation2 + $0x74] ss:$0 sps:$4 sm:$0x11]  }
 0x27c   : > { %v3545_v34 = vrot.slane %v3543_v23, 1  ;;  %v3555_v62 = vshll.u32 %v7508_v43, 16 }
 0x27d   : > { %v2041_v21 = vsel %vm1989_vm4, %v2036_v14, %v2040_v53  ;;  %v2053_v49 = vshll.u32 %v7501_v29, 16  ;;  %v3559_v14 = vshrl.u32 %v7508_v43, 16 }
 0x27e   : > { %3647 = vrot.lane.b32.xlu0 %v3498_v57, %s6528_s28  ;;  %v1879_v57 = vld [vmem:[#allocation2 + $0x28] sm:$0xe] }
 0x27f   : > { %3745 = vrot.lane.b32.xlu1 %v3707_v2, %s6527_s27  ;;  %v2044_v2 = vor.u32 %v2042_v47, %v2040_v53  ;;  %v5656_v10 = vcombine.low %v1879_v57, %v7449_v25  ;;  %v3716_v47 = vrot.slane %v6351_v5, 1  ;;  %v7513_v53 = vld [vmem:[#allocation2 + $0x68] sm:$0xf] }
 0x281   : > { %v2049_v22 = vsel %vm1989_vm4, %v2044_v2, %v2048_v4  ;;  %v2217_v25 = vrot.slane %v5656_v10, 1  ;;  %v2051_v2 = vshrl.u32 %v7501_v29, 16  ;;  %v2055_v4 = vrot.slane %v2053_v49, 1 }
 0x282   : > { %3743 = vrot.lane.b32.xlu0 %v3705_v13, %s6527_s27  ;;  %v3710_v13 = vsel %vm2206_vm3, %v3708_v55, %v3709_v40  ;;  %v3714_v40 = vrot.slane %v7474_v50, 1  ;;  %v1880_v55 = vld [vmem:[#allocation2 + $0x3c] sm:$0xe]  ;;  %v3713_v50 = vrot.slane %v5776_v37, 1 }
 0x283   : > { %2156 = vrot.lane.b32.xlu1 %v2029_v24, %s6528_s28  ;;  %v3537_v24 = vrot.slane %v3535_v6, 1  ;;  %v2219_v44 = vsel %vm2206_vm3, %v2217_v25, %v2218_v7  ;;  %v2064_v6 = vor.u32 %v2062_v46, %v2060_v56  ;;  %v2223_v7 = vrot.slane %v7488_v11, 1  ;;  %v1853_v11 = vld [vmem:[#allocation2 + $0x50] sm:$0xf] }
 0x284   : > { %v3717_v5 = vsel %vm2206_vm3, %v3714_v40, %v3716_v47  ;;  %v5657_v10 = vcombine.low %v1880_v55, %v1850_v12  ;;  %v2056_v23 = vor.u32 %v2055_v4, %v2051_v2  ;;  %v7539_v12 = vld [vmem:[#allocation2 + $0x54] sm:$0xf]  ;;  %v7541_v25 = vld [vmem:[#allocation2 + $0x60] ss:$0 sps:$4 sm:$0x11]  }
 0x285   : > { %v2086_v49 = vshll.u32 %v7541_v25, 16 }
 0x286   : > { %2154 = vrot.lane.b32.xlu0 %v2021_v41, %s6528_s28  ;;  %v3528_v41 = vshrl.u32 %v7481_v63, 16  ;;  %v2222_v27 = vrot.slane %v5657_v10, 1 }
 0x287   : > { %2253 = vrot.lane.b32.xlu1 %v2216_v35, %s6527_s27  ;;  %v3541_v35 = vor.u32 %v3539_v17, %v3537_v24  ;;  %v3563_v17 = vshll.u32 %v7518_v61, 16 }
 0x288   : > { %v3533_v45 = vor.u32 %v3532_v28, %v3528_v41 }
 0x289   : > { %v3546_v54 = vsel %vm1989_vm4, %v3541_v35, %v3545_v34  ;;  %v7549_v35 = vcombine.low %v1853_v11, %v7539_v12  ;;  %v2226_v34 = vsel %vm2206_vm3, %v2223_v7, %v2225_v9  ;;  %v3565_v37 = vrot.slane %v3563_v17, 1  ;;  %v1881_v9 = vld [vmem:[#allocation2 + $0x50] sm:$0xe]  ;;  %v6410_v11 = vld [vmem:[#allocation2 + $0x1c] sm:$0xff]  }
 0x28a   : > { %2251 = vrot.lane.b32.xlu0 %v2214_v39, %s6527_s27  ;;  %v2066_v39 = vshll.u32 %v7495_v26, 16  ;;  %v3378_v26 = vld [vmem:[#allocation2 + $0x64] sm:$0xe] }
 0x28b   : > { %3653 = vrot.lane.b32.xlu1 %v3526_v52, %s6528_s28  ;;  %v3347_v52 = vld [vmem:[#allocation2 + $0x64] sm:$0xf]  ;;  %v2073_v55 = vshll.u32 %v7549_v35, 16 }
 0x28c   : > { %v7522_v57 = vcombine.low %v3347_v52, %v7513_v53  ;;  %v7558_v52 = vld [vmem:[#allocation2 + $0x80] sm:$0xff]  }
 0x28e   : > { %3651 = vrot.lane.b32.xlu0 %v3518_v60, %s6528_s28  ;;  %v2068_v60 = vrot.slane %v2066_v39, 1  ;;  %v3550_v18 = vshll.u32 %v7522_v57, 16 }
 0x28f   : > { %3749 = vrot.lane.b32.xlu1 %v3712_v0, %s6527_s27  ;;  %v3538_v0 = vsel %vm1989_vm4, %v3533_v45, %v3537_v24  ;;  %v3715_v24 = vsel %vm2206_vm3, %v3713_v50, %v3714_v40  ;;  %v3719_v40 = vrot.slane %v7508_v43, 1  ;;  %v5777_v45 = vcombine.low %v3378_v26, %v7513_v53  ;;  %v3351_v50 = vld [vmem:[#allocation2 + $0x78] sm:$0xf]  ;;  %v6395_v26 = vld [vmem:[%s8430_s3 + $0x80] sm:$0xff]  }
 0x290   : > { %v2069_v20 = vsel %vm1989_vm4, %v2064_v6, %v2068_v60  ;;  %v3552_v41 = vrot.slane %v3550_v18, 1  ;;  %v2071_v6 = vshrl.u32 %v7549_v35, 16  ;;  %v2088_v18 = vrot.slane %v2086_v49, 1  ;;  %v7599_v49 = vld [vmem:[#allocation2 + $0x68] sm:$0xf] }
 0x291   : > { %v3718_v4 = vrot.slane %v5777_v45, 1 }
 0x292   : > { %3747 = vrot.lane.b32.xlu0 %v3710_v13, %s6527_s27  ;;  %v3557_v13 = vrot.slane %v3555_v62, 1  ;;  %v7564_v62 = vld [vmem:[#allocation2 + $0x7c] sm:$0xf] }
 0x293   : > { %2160 = vrot.lane.b32.xlu1 %v2049_v22, %s6528_s28  ;;  %v7534_v22 = vld [vmem:[#allocation2 + $0x58] sm:$0xff]   ;;  %v7575_v10 = vcombine.low %v3351_v50, %v7564_v62 }
 0x294   : > { %v2078_v28 = vshll.u32 %v7534_v22, 16  ;;  %v3561_v36 = vor.u32 %v3559_v14, %v3557_v13  ;;  %v2082_v47 = vshrl.u32 %v7534_v22, 16 }
 0x295   : > { %v3568_v50 = vshrl.u32 %v7575_v10, 16 }
 0x296   : > { %2158 = vrot.lane.b32.xlu0 %v2041_v21, %s6528_s28  ;;  %v3548_v21 = vshrl.u32 %v7522_v57, 16  ;;  %v2080_v46 = vrot.slane %v2078_v28, 1  ;;  %v5658_v28 = vcombine.low %v1881_v9, %v7539_v12  ;;  %v1857_v12 = vld [vmem:[#allocation2 + $0x64] sm:$0xf] }
 0x297   : > { %2257 = vrot.lane.b32.xlu1 %v2221_v33, %s6527_s27  ;;  %v2061_v33 = vsel %vm1989_vm4, %v2056_v23, %v2060_v56  ;;  %v3575_v23 = vshll.u32 %v7558_v52, 16  ;;  %v7616_v9 = vld [vmem:[#allocation2 + $0x74] ss:$0 sps:$4 sm:$0x11]  }
 0x298   : > { %v3553_v56 = vor.u32 %v3552_v41, %v3548_v21  ;;  %v2084_v17 = vor.u32 %v2082_v47, %v2080_v46  ;;  %v2228_v21 = vrot.slane %v7534_v22, 1  ;;  %v2230_v41 = vrot.slane %v7541_v25, 1 }
 0x299   : > { %v3577_v47 = vrot.slane %v3575_v23, 1 }
 0x29a   : > { %2255 = vrot.lane.b32.xlu0 %v2219_v44, %s6527_s27  ;;  %v3721_v44 = vrot.slane %v7518_v61, 1  ;;  %v3566_v61 = vsel %vm1989_vm4, %v3561_v36, %v3565_v37  ;;  %v3579_v36 = vshrl.u32 %v7558_v52, 16  ;;  %v3570_v37 = vshll.u32 %v7575_v10, 16 }
 0x29b   : > { %3657 = vrot.lane.b32.xlu1 %v3546_v54, %s6528_s28  ;;  %v2224_v54 = vsel %vm2206_vm3, %v2222_v27, %v2223_v7  ;;  %v2075_v7 = vrot.slane %v2073_v55, 1  ;;  %v2089_v45 = vsel %vm1989_vm4, %v2084_v17, %v2088_v18  ;;  %v2227_v55 = vrot.slane %v5658_v28, 1 }
 0x29c   : > { %v3722_v14 = vsel %vm2206_vm3, %v3719_v40, %v3721_v44 }
 0x29e   : > { %3655 = vrot.lane.b32.xlu0 %v3538_v0, %s6528_s28 }
 0x29f   : > { %3753 = vrot.lane.b32.xlu1 %v3717_v5, %s6527_s27  ;;  %v3558_v5 = vsel %vm1989_vm4, %v3553_v56, %v3557_v13  ;;  %v2231_v56 = vsel %vm2206_vm3, %v2228_v21, %v2230_v41  ;;  %v7634_v41 = vld [vmem:[#allocation2 + $0x94] sm:$0xff]  }
 0x2a2   : > { %3751 = vrot.lane.b32.xlu0 %v3715_v24, %s6527_s27  ;;  %v7578_v24 = vld [vmem:[#allocation2 + $0x88] ss:$0 sps:$4 sm:$0x11]  }
 0x2a3   : > { %2164 = vrot.lane.b32.xlu1 %v2069_v20, %s6528_s28  ;;  %v3583_v25 = vshll.u32 %v7578_v24, 16  ;;  %v3726_v23 = vrot.slane %v7578_v24, 1  ;;  %v2106_v24 = vshll.u32 %v7616_v9, 16 }
 0x2a5   : > { %v2767_v39 = vpop.permute.xlu1 %2766 }
 0x2a6   : > { %2162 = vrot.lane.b32.xlu0 %v2061_v33, %s6528_s28  ;;  %v3720_v33 = vsel %vm2206_vm3, %v3718_v4, %v3719_v40  ;;  %v6400_v40 = vld [vmem:[%s8430_s3 + $0x78] sm:$0xff]  }
 0x2a7   : > { %2261 = vrot.lane.b32.xlu1 %v2226_v34, %s6527_s27  ;;  %v2076_v34 = vor.u32 %v2075_v7, %v2071_v6  ;;  %v3581_v6 = vor.u32 %v3579_v36, %v3577_v47  ;;  %v3585_v7 = vrot.slane %v3583_v25, 1  ;;  %v7638_v36 = vld [vmem:[#allocation2 + $0x90] sm:$0xf] }
 0x2a8   : > { %v2671_v60 = vpop.permute.xlu0 %2670 }
 0x2a9   : > { %v2799_v53 = vsel %vm2279_vm5, %v7172_v30, %v2671_v60  ;;  %v2769_v0 = vpop.permute.xlu1 %2768  ;;  %v6411_v60 = vld [vmem:[#allocation2 + $0x30] sm:$0xff]  }
 0x2aa   : > { %2259 = vrot.lane.b32.xlu0 %v2224_v54, %s6527_s27  ;;  %v2831_v2 = vsel %vm2312_vm6, %v2799_v53, %v2767_v39  ;;  %v7595_v39 = vld [vmem:[#allocation2 + $0x6c] sm:$0xff]   ;;  %v3572_v53 = vrot.slane %v3570_v37, 1 }
 0x2ab   : > { %6129 = vmatprep.mubr.msk.bf16.mxu1 %vm2911_vm7, %v2831_v2  ;;  %3661 = vrot.lane.b32.xlu1 %v3566_v61, %s6528_s28  ;;  %v7612_v2 = vcombine.low %v1857_v12, %v7599_v49  ;;  %v6412_v12 = vld [vmem:[#allocation2 + $0x44] sm:$0xff]  }
 0x2ac   : > { %v2673_v30 = vpop.permute.xlu0 %2672 }
 0x2ad   : > { %v2801_v20 = vsel %vm2279_vm5, %v6410_v11, %v2673_v30  ;;  %v2677_v13 = vpop.permute.xlu1 %2676  ;;  %v2098_v30 = vshll.u32 %v7595_v39, 16  ;;  %v2091_v25 = vshrl.u32 %v7612_v2, 16 }
 0x2ae   : > { %3659 = vrot.lane.b32.xlu0 %v3558_v5, %s6528_s28  ;;  %v2833_v27 = vsel %vm2312_vm6, %v2801_v20, %v2769_v0  ;;  %v2805_v61 = vsel %vm2279_vm5, %v6411_v60, %v2677_v13  ;;  %v3379_v0 = vld [vmem:[#allocation2 + $0x78] sm:$0xe]  ;;  %v2229_v20 = vsel %vm2206_vm3, %v2227_v55, %v2228_v21  ;;  %v3573_v13 = vor.u32 %v3572_v53, %v3568_v50  ;;  %v6407_v21 = vld [vmem:[%s8430_s3 + $0x68] sm:$0xff]   ;;  %v1882_v55 = vld [vmem:[#allocation2 + $0x64] sm:$0xe] }
 0x2af   : > { %6130 = vmatmul.mubr.msk.bf16.vlgmr.msra.gmra.mxu1 %vm2911_vm7, %v2833_v27  ;;  %3757 = vrot.lane.b32.xlu1 %v3722_v14, %s6527_s27  ;;  %v5778_v11 = vcombine.low %v3379_v0, %v7564_v62  ;;  %v2093_v27 = vshll.u32 %v7612_v2, 16  ;;  %v3355_v62 = vld [vmem:[#allocation2 + $0x8c] sm:$0xf]  ;;  %v2108_v53 = vrot.slane %v2106_v24, 1 }
 0x2b0   : > { %v2675_v44 = vpop.permute.xlu0 %2674  ;;  %6206 = vmatpush3.bf16.msra.mxu1 %v7414_v48  ;;  %v2081_v48 = vsel %vm1989_vm4, %v2076_v34, %v2080_v46  ;;  %v6403_v46 = vld [vmem:[%s8430_s3 + $0x70] sm:$0xff]   ;;  %v2100_v34 = vrot.slane %v2098_v30, 1  ;;  %v7650_v50 = vcombine.low %v3355_v62, %v7638_v36  ;;  %v7654_v0 = vld [vmem:[#allocation2 + $0x9c] ss:$0 sps:$4 sm:$0x11]   ;;  %v2235_v30 = vrot.slane %v7616_v9, 1 }
 0x2b1   : > { %v2773_v54 = vpop.permute.xlu1 %2772  ;;  %6207 = vmatprep.subr.bf16.mxu1 %v6395_v26  ;;  %v2803_v4 = vsel %vm2279_vm5, %v7183_v59, %v2675_v44  ;;  %v3724_v59 = vrot.slane %v7558_v52, 1  ;;  %v3603_v9 = vshll.u32 %v7654_v0, 16  ;;  %v6413_v62 = vld [vmem:[#allocation2 + $0x58] sm:$0xff]  }
 0x2b2   : > { %3755 = vrot.lane.b32.xlu0 %v3720_v33, %s6527_s27  ;;  %v2837_v18 = vsel %vm2312_vm6, %v2805_v61, %v2773_v54  ;;  %v3586_v33 = vsel %vm1989_vm4, %v3581_v6, %v3585_v7  ;;  %v3588_v24 = vshrl.u32 %v7650_v50, 16 }
 0x2b3   : > { %2168 = vrot.lane.b32.xlu1 %v2089_v45, %s6528_s28  ;;  %v3727_v44 = vsel %vm2206_vm3, %v3724_v59, %v3726_v23  ;;  %v3723_v45 = vrot.slane %v5778_v11, 1  ;;  %v3590_v23 = vshll.u32 %v7650_v50, 16  ;;  %v7672_v11 = vld [vmem:[#allocation2 + $0x80] sm:$0xff]  }
 0x2b4   : > { %v2771_v5 = vpop.permute.xlu0 %2770  ;;  %6208 = vmatpush3.bf16.msra.mxu1 %v6395_v26  ;;  %v2102_v26 = vshrl.u32 %v7595_v39, 16 }
 0x2b5   : > { %v2835_v14 = vsel %vm2312_vm6, %v2803_v4, %v2771_v5  ;;  %v2681_v17 = vpop.permute.xlu1 %2680  ;;  %6209 = vmatprep.subr.bf16.mxu1 %v6400_v40  ;;  %v3595_v4 = vshll.u32 %v7634_v41, 16 }
 0x2b6   : > { %6133 = vmatprep.mubr.msk.bf16.mxu1 %vm2911_vm7, %v2835_v14  ;;  %2166 = vrot.lane.b32.xlu0 %v2081_v48, %s6528_s28  ;;  %v2809_v54 = vsel %vm2279_vm5, %v6412_v12, %v2681_v17  ;;  %v2104_v48 = vor.u32 %v2102_v26, %v2100_v34  ;;  %v5659_v14 = vcombine.low %v1882_v55, %v7599_v49  ;;  %v1861_v49 = vld [vmem:[#allocation2 + $0x78] sm:$0xf]  ;;  %v7689_v55 = vld [vmem:[#allocation2 + $0x88] ss:$0 sps:$4 sm:$0x11]  }
 0x2b7   : > { %6134 = vmatmul.mubr.msk.bf16.gmra.mxu1 %vm2911_vm7, %v2837_v18  ;;  %2265 = vrot.lane.b32.xlu1 %v2231_v56, %s6527_s27  ;;  %v2095_v56 = vrot.slane %v2093_v27, 1  ;;  %v3725_v17 = vsel %vm2206_vm3, %v3723_v45, %v3724_v59  ;;  %v3599_v18 = vshrl.u32 %v7634_v41, 16  ;;  %v3597_v26 = vrot.slane %v3595_v4, 1  ;;  %v7676_v27 = vld [vmem:[#allocation2 + $0x7c] sm:$0xf] }
 0x2b8   : > { %v2679_v28 = vpop.permute.xlu0 %2678  ;;  %6210 = vmatpush3.bf16.msra.mxu1 %v6400_v40  ;;  %v3578_v40 = vsel %vm1989_vm4, %v3573_v13, %v3577_v47  ;;  %v6409_v47 = vld [vmem:[%s8430_s3 + $0x60] sm:$0xff]   ;;  %v2109_v13 = vsel %vm1989_vm4, %v2104_v48, %v2108_v53  ;;  %v3592_v45 = vrot.slane %v3590_v23, 1  ;;  %v3729_v53 = vrot.slane %v7634_v41, 1 }
 0x2b9   : > { %v2777_v37 = vpop.permute.xlu1 %2776  ;;  %6211 = vmatprep.subr.bf16.mxu1 %v6403_v46  ;;  %v2807_v60 = vsel %vm2279_vm5, %v7199_v15, %v2679_v28  ;;  %v2233_v15 = vrot.slane %v7595_v39, 1 }
 0x2ba   : > { %2263 = vrot.lane.b32.xlu0 %v2229_v20, %s6527_s27  ;;  %v2841_v7 = vsel %vm2312_vm6, %v2809_v54, %v2777_v37 }
 0x2bb   : > { %3665 = vrot.lane.b32.xlu1 %v3586_v33, %s6528_s28  ;;  %v2236_v59 = vsel %vm2206_vm3, %v2233_v15, %v2235_v30  ;;  %v2232_v33 = vrot.slane %v5659_v14, 1  ;;  %v7703_v30 = vld [vmem:[#allocation2 + $0xa4] sm:$0xf] }
 0x2bc   : > { %v2775_v61 = vpop.permute.xlu0 %2774  ;;  %6212 = vmatpush3.bf16.msra.mxu1 %v6403_v46  ;;  %v2096_v46 = vor.u32 %v2095_v56, %v2091_v25  ;;  %v3380_v25 = vld [vmem:[#allocation2 + $0x8c] sm:$0xe]  ;;  %v3605_v56 = vrot.slane %v3603_v9, 1 }
 0x2bd   : > { %v2839_v5 = vsel %vm2312_vm6, %v2807_v60, %v2775_v61  ;;  %v2685_v6 = vpop.permute.xlu1 %2684  ;;  %6213 = vmatprep.subr.bf16.mxu1 %v6407_v21  ;;  %v2118_v60 = vshll.u32 %v7672_v11, 16  ;;  %v5779_v4 = vcombine.low %v3380_v25, %v7638_v36  ;;  %v2126_v36 = vshll.u32 %v7689_v55, 16  ;;  %v6414_v9 = vld [vmem:[#allocation2 + $0x6c] sm:$0xff]  }
 0x2be   : > { %6137 = vmatprep.mubr.msk.bf16.mxu1 %vm2911_vm7, %v2839_v5  ;;  %3663 = vrot.lane.b32.xlu0 %v3578_v40, %s6528_s28  ;;  %v2813_v37 = vsel %vm2279_vm5, %v6413_v62, %v2685_v6  ;;  %v3601_v40 = vor.u32 %v3599_v18, %v3597_v26  ;;  %v2234_v5 = vsel %vm2206_vm3, %v2232_v33, %v2233_v15  ;;  %v7708_v18 = vld [vmem:[#allocation2 + $0xa8] sm:$0xff]   ;;  %v7721_v25 = vld [vmem:[#allocation2 + $0xb0] ss:$0 sps:$4 sm:$0x11]  }
 0x2bf   : > { %6138 = vmatmul.mubr.msk.bf16.gmra.mxu1 %vm2911_vm7, %v2841_v7  ;;  %3761 = vrot.lane.b32.xlu1 %v3727_v44, %s6527_s27  ;;  %v2101_v44 = vsel %vm1989_vm4, %v2096_v46, %v2100_v34  ;;  %v3593_v6 = vor.u32 %v3592_v45, %v3588_v24  ;;  %v3359_v7 = vld [vmem:[#allocation2 + $0xa0] sm:$0xf]  ;;  %v2120_v46 = vrot.slane %v2118_v60, 1  ;;  %v1883_v24 = vld [vmem:[#allocation2 + $0x78] sm:$0xe]  ;;  %v2128_v45 = vrot.slane %v2126_v36, 1 }
 0x2c0   : > { %v2683_v20 = vpop.permute.xlu0 %2682  ;;  %6214 = vmatpush3.bf16.msra.mxu1 %v6407_v21  ;;  %v7685_v21 = vcombine.low %v1861_v49, %v7676_v27  ;;  %v6415_v36 = vld [vmem:[#allocation2 + $0x80] sm:$0xff]  }
 0x2c1   : > { %v2781_v28 = vpop.permute.xlu1 %2780  ;;  %6215 = vmatprep.subr.bf16.mxu1 %v6409_v47  ;;  %v2811_v12 = vsel %vm2279_vm5, %v7212_v32, %v2683_v20  ;;  %v3731_v32 = vrot.slane %v7654_v0, 1  ;;  %v2122_v0 = vshrl.u32 %v7672_v11, 16  ;;  %v3728_v20 = vrot.slane %v5779_v4, 1  ;;  %v7736_v4 = vld [vmem:[#allocation2 + $0x94] sm:$0xff]  }
 0x2c2   : > { %3759 = vrot.lane.b32.xlu0 %v3725_v17, %s6527_s27  ;;  %v2845_v34 = vsel %vm2312_vm6, %v2813_v37, %v2781_v28  ;;  %v3606_v17 = vsel %vm1989_vm4, %v3601_v40, %v3605_v56  ;;  %v3598_v28 = vsel %vm1989_vm4, %v3593_v6, %v3597_v26  ;;  %v2238_v26 = vrot.slane %v7672_v11, 1 }
 0x2c3   : > { %2172 = vrot.lane.b32.xlu1 %v2109_v13, %s6528_s28  ;;  %v3732_v15 = vsel %vm2206_vm3, %v3729_v53, %v3731_v32  ;;  %v7713_v13 = vcombine.low %v3359_v7, %v7703_v30  ;;  %v3619_v32 = vshrl.u32 %v7708_v18, 16  ;;  %v1865_v7 = vld [vmem:[#allocation2 + $0x8c] sm:$0xf] }
 0x2c4   : > { %v2779_v54 = vpop.permute.xlu0 %2778  ;;  %6216 = vmatpush3.bf16.msra.mxu1 %v6409_v47  ;;  %v2113_v47 = vshll.u32 %v7685_v21, 16 }
 0x2c5   : > { %v2843_v61 = vsel %vm2312_vm6, %v2811_v12, %v2779_v54  ;;  %v2689_v48 = vpop.permute.xlu1 %2688  ;;  %v3615_v12 = vshll.u32 %v7708_v18, 16  ;;  %v3610_v60 = vshll.u32 %v7713_v13, 16 }
 0x2c6   : > { %6141 = vmatprep.mubr.msk.bf16.mxu1 %vm2911_vm7, %v2843_v61  ;;  %2170 = vrot.lane.b32.xlu0 %v2101_v44, %s6528_s28  ;;  %v2817_v49 = vsel %vm2279_vm5, %v6414_v9, %v2689_v48  ;;  %v2115_v33 = vrot.slane %v2113_v47, 1  ;;  %v2124_v44 = vor.u32 %v2122_v0, %v2120_v46  ;;  %v3730_v61 = vsel %vm2206_vm3, %v3728_v20, %v3729_v53  ;;  %v3381_v9 = vld [vmem:[#allocation2 + $0xa0] sm:$0xe] }
 0x2c7   : > { %6142 = vmatmul.mubr.msk.bf16.gmra.mxu1 %vm2911_vm7, %v2845_v34  ;;  %2269 = vrot.lane.b32.xlu1 %v2236_v59, %s6527_s27  ;;  %v2111_v59 = vshrl.u32 %v7685_v21, 16  ;;  %v5660_v34 = vcombine.low %v1883_v24, %v7676_v27  ;;  %v3617_v47 = vrot.slane %v3615_v12, 1  ;;  %v3608_v27 = vshrl.u32 %v7713_v13, 16 }
 0x2c8   : > { %v2687_v14 = vpop.permute.xlu0 %2686  ;;  %v2129_v6 = vsel %vm1989_vm4, %v2124_v44, %v2128_v45  ;;  %v3612_v0 = vrot.slane %v3610_v60, 1 }
 0x2c9   : > { %v2785_v23 = vpop.permute.xlu1 %2784  ;;  %v2815_v62 = vsel %vm2279_vm5, %v7226_v51, %v2687_v14  ;;  %v2240_v51 = vrot.slane %v7689_v55, 1  ;;  %v2116_v48 = vor.u32 %v2115_v33, %v2111_v59  ;;  %v3623_v55 = vshll.u32 %v7721_v25, 16  ;;  %v7740_v14 = vld [vmem:[#allocation2 + $0x90] sm:$0xf] }
 0x2ca   : > { %2267 = vrot.lane.b32.xlu0 %v2234_v5, %s6527_s27  ;;  %v2849_v56 = vsel %vm2312_vm6, %v2817_v49, %v2785_v23  ;;  %v2237_v20 = vrot.slane %v5660_v34, 1  ;;  %v7749_v49 = vcombine.low %v1865_v7, %v7740_v14  ;;  %v3621_v33 = vor.u32 %v3619_v32, %v3617_v47 }
 0x2cb   : > { %3669 = vrot.lane.b32.xlu1 %v3606_v17, %s6528_s28  ;;  %v2241_v53 = vsel %vm2206_vm3, %v2238_v26, %v2240_v51  ;;  %v3625_v24 = vrot.slane %v3623_v55, 1  ;;  %v2142_v51 = vshrl.u32 %v7736_v4, 16 }
 0x2cc   : > { %v2783_v37 = vpop.permute.xlu0 %2782  ;;  %v2133_v60 = vshll.u32 %v7749_v49, 16 }
 0x2cd   : > { %v2847_v54 = vsel %vm2312_vm6, %v2815_v62, %v2783_v37  ;;  %v2693_v40 = vpop.permute.xlu1 %2692  ;;  %v7753_v62 = vld [vmem:[#allocation2 + $0x9c] ss:$0 sps:$4 sm:$0x11]   ;;  %v2138_v37 = vshll.u32 %v7736_v4, 16  ;;  %v3626_v34 = vsel %vm1989_vm4, %v3621_v33, %v3625_v24 }
 0x2ce   : > { %6145 = vmatprep.mubr.msk.bf16.mxu1 %vm2911_vm7, %v2847_v54  ;;  %3667 = vrot.lane.b32.xlu0 %v3598_v28, %s6528_s28  ;;  %v2821_v23 = vsel %vm2279_vm5, %v6415_v36, %v2693_v40  ;;  %v3613_v54 = vor.u32 %v3612_v0, %v3608_v27  ;;  %v5780_v40 = vcombine.low %v3381_v9, %v7703_v30  ;;  %v7772_v30 = vld [vmem:[#allocation2 + $0xb8] sm:$0xf]  ;;  %v2131_v27 = vshrl.u32 %v7749_v49, 16  ;;  %v1884_v36 = vld [vmem:[#allocation2 + $0x8c] sm:$0xe] }
 0x2cf   : > { %6146 = vmatmul.mubr.msk.bf16.gmra.mxu1 %vm2911_vm7, %v2849_v56  ;;  %3765 = vrot.lane.b32.xlu1 %v3732_v15, %s6527_s27  ;;  %v2121_v15 = vsel %vm1989_vm4, %v2116_v48, %v2120_v46  ;;  %v3734_v46 = vrot.slane %v7708_v18, 1  ;;  %v2239_v56 = vsel %vm2206_vm3, %v2237_v20, %v2238_v26  ;;  %v2140_v32 = vrot.slane %v2138_v37, 1 }
 0x2d0   : > { %v2691_v5 = vpop.permute.xlu0 %2690  ;;  %v3618_v26 = vsel %vm1989_vm4, %v3613_v54, %v3617_v47  ;;  %v3733_v7 = vrot.slane %v5780_v40, 1  ;;  %v2135_v0 = vrot.slane %v2133_v60, 1  ;;  %v2245_v54 = vrot.slane %v7753_v62, 1 }
 0x2d1   : > { %v2789_v17 = vpop.permute.xlu1 %2788  ;;  %v2819_v28 = vsel %vm2279_vm5, %v7250_v16, %v2691_v5  ;;  %v3736_v16 = vrot.slane %v7721_v25, 1  ;;  %v2146_v25 = vshll.u32 %v7753_v62, 16  ;;  %v3363_v5 = vld [vmem:[#allocation2 + $0xb4] sm:$0xf]  ;;  %v2144_v47 = vor.u32 %v2142_v51, %v2140_v32 }
 0x2d2   : > { %3763 = vrot.lane.b32.xlu0 %v3730_v61, %s6527_s27  ;;  %v2853_v12 = vsel %vm2312_vm6, %v2821_v23, %v2789_v17  ;;  %v7768_v61 = vld [vmem:[#allocation2 + $0xbc] sm:$0xff]   ;;  %v6416_v17 = vld [vmem:[#allocation2 + $0x94] sm:$0xff]   ;;  %v7781_v23 = vcombine.low %v3363_v5, %v7772_v30 }
 0x2d3   : > { %2176 = vrot.lane.b32.xlu1 %v2129_v6, %s6528_s28  ;;  %v3737_v55 = vsel %vm2206_vm3, %v3734_v46, %v3736_v16  ;;  %v2148_v9 = vrot.slane %v2146_v25, 1  ;;  %v3639_v60 = vshrl.u32 %v7768_v61, 16 }
 0x2d4   : > { %v2787_v59 = vpop.permute.xlu0 %2786  ;;  %v3630_v16 = vshll.u32 %v7781_v23, 16  ;;  %v3628_v5 = vshrl.u32 %v7781_v23, 16 }
 0x2d5   : > { %v2851_v44 = vsel %vm2312_vm6, %v2819_v28, %v2787_v59  ;;  %v2697_v45 = vpop.permute.xlu1 %2696  ;;  %v6405_v28 = vld [vmem:[#allocation2 + $0xc4] ss:$0 sps:$4 sm:$0x11]   ;;  %v3635_v59 = vshll.u32 %v7768_v61, 16 }
 0x2d6   : > { %6149 = vmatprep.mubr.msk.bf16.mxu1 %vm2911_vm7, %v2851_v44  ;;  %2174 = vrot.lane.b32.xlu0 %v2121_v15, %s6528_s28  ;;  %v3735_v44 = vsel %vm2206_vm3, %v3733_v7, %v3734_v46  ;;  %v3643_v46 = vshll.u32 %v6405_v28, 16 }
 0x2d7   : > { %6150 = vmatmul.mubr.msk.bf16.gmra.mxu1 %vm2911_vm7, %v2853_v12  ;;  %2273 = vrot.lane.b32.xlu1 %v2241_v53, %s6527_s27  ;;  %v2825_v53 = vsel %vm2279_vm5, %v6416_v17, %v2697_v45  ;;  %v5661_v45 = vcombine.low %v1884_v36, %v7740_v14  ;;  %v2243_v12 = vrot.slane %v7736_v4, 1  ;;  %v3637_v51 = vrot.slane %v3635_v59, 1 }
 0x2d8   : > { %v2695_v48 = vpop.permute.xlu0 %2694  ;;  %v3739_v59 = vrot.slane %v7768_v61, 1 }
 0x2d9   : > { %v2793_v6 = vpop.permute.xlu1 %2792  ;;  %v2823_v15 = vsel %vm2279_vm5, %v7275_v42, %v2695_v48  ;;  %v2136_v42 = vor.u32 %v2135_v0, %v2131_v27  ;;  %v2242_v14 = vrot.slane %v5661_v45, 1  ;;  %v2246_v7 = vsel %vm2206_vm3, %v2243_v12, %v2245_v54  ;;  %v3382_v27 = vld [vmem:[#allocation2 + $0xb4] sm:$0xe] }
 0x2da   : > { %2271 = vrot.lane.b32.xlu0 %v2239_v56, %s6527_s27  ;;  %v2857_v37 = vsel %vm2312_vm6, %v2825_v53, %v2793_v6  ;;  %v2149_v56 = vsel %vm1989_vm4, %v2144_v47, %v2148_v9  ;;  %v3632_v6 = vrot.slane %v3630_v16, 1  ;;  %v3641_v17 = vor.u32 %v3639_v60, %v3637_v51  ;;  %v6419_v60 = vld [vmem:[#allocation2 + $0x30] sm:$0xff]  }
 0x2db   : > { %3673 = vrot.lane.b32.xlu1 %v3626_v34, %s6528_s28  ;;  %v6417_v34 = vld [vmem:[#allocation2 + $0xa8] sm:$0xff]   ;;  %v2141_v62 = vsel %vm1989_vm4, %v2136_v42, %v2140_v32  ;;  %v3645_v53 = vrot.slane %v3643_v46, 1 }
 0x2dc   : > { %v2791_v20 = vpop.permute.xlu0 %2790  ;;  %v3633_v32 = vor.u32 %v3632_v6, %v3628_v5 }
 0x2dd   : > { %v2855_v33 = vsel %vm2312_vm6, %v2823_v15, %v2791_v20  ;;  %v2701_v24 = vpop.permute.xlu1 %2700  ;;  %v5781_v20 = vcombine.low %v3382_v27, %v7772_v30  ;;  %v3646_v9 = vsel %vm1989_vm4, %v3641_v17, %v3645_v53 }
 0x2de   : > { %6153 = vmatprep.mubr.msk.bf16.mxu1 %vm2911_vm7, %v2855_v33  ;;  %3671 = vrot.lane.b32.xlu0 %v3618_v26, %s6528_s28  ;;  %v2829_v25 = vsel %vm2279_vm5, %v6417_v34, %v2701_v24  ;;  %v3741_v33 = vrot.slane %v6405_v28, 1  ;;  %v3638_v45 = vsel %vm1989_vm4, %v3633_v32, %v3637_v51 }
 0x2df   : > { %6154 = vmatmul.mubr.msk.bf16.gmra.mxu1 %vm2911_vm7, %v2857_v37  ;;  %3769 = vrot.lane.b32.xlu1 %v3737_v55, %s6527_s27  ;;  %v6418_v37 = vld [vmem:[#allocation2 + $0x8] sm:$0xff]   ;;  %v3738_v42 = vrot.slane %v5781_v20, 1 }
 0x2e0   : > { %v2699_v40 = vpop.permute.xlu0 %2698  ;;  %v3742_v54 = vsel %vm2206_vm3, %v3739_v59, %v3741_v33 }
 0x2e1   : > { %v2797_v48 = vpop.permute.xlu1 %2796  ;;  %v2827_v26 = vsel %vm2279_vm5, %v7309_v8, %v2699_v40  ;;  %v2244_v8 = vsel %vm2206_vm3, %v2242_v14, %v2243_v12 }
 0x2e2   : > { %3767 = vrot.lane.b32.xlu0 %v3735_v44, %s6527_s27  ;;  %v2861_v15 = vsel %vm2312_vm6, %v2829_v25, %v2797_v48 }
 0x2e3   : > { %2180 = vrot.lane.b32.xlu1 %v2149_v56, %s6528_s28  ;;  %v3740_v56 = vsel %vm2206_vm3, %v3738_v42, %v3739_v59 }
 0x2e4   : > { %v2795_v55 = vpop.permute.xlu0 %2794 }
 0x2e5   : > { %v2859_v0 = vsel %vm2312_vm6, %v2827_v26, %v2795_v55  ;;  %v2153_v36 = vpop.permute.xlu1 %2152  ;;  %v6420_v26 = vld [vmem:[#allocation2 + $0x1c] sm:$0xff]  }
 0x2e6   : > { %6157 = vmatprep.mubr.msk.bf16.mxu1 %vm2911_vm7, %v2859_v0  ;;  %2178 = vrot.lane.b32.xlu0 %v2141_v62, %s6528_s28  ;;  %v2283_v44 = vsel %vm2279_vm5, %v6418_v37, %v2153_v36 }
 0x2e7   : > { %6158 = vmatmul.mubr.msk.bf16.gmra.mxu1 %vm2911_vm7, %v2861_v15  ;;  %2277 = vrot.lane.b32.xlu1 %v2246_v7, %s6527_s27  ;;  %v6421_v15 = vld [vmem:[#allocation2 + $0x44] sm:$0xff]  }
 0x2e8   : > { %v2151_v47 = vpop.permute.xlu0 %2150 }
 0x2e9   : > { %v2250_v24 = vpop.permute.xlu1 %2249  ;;  %v2281_v30 = vsel %vm2279_vm5, %v7338_v38, %v2151_v47 }
 0x2ea   : > { %2275 = vrot.lane.b32.xlu0 %v2244_v8, %s6527_s27  ;;  %v2316_v40 = vsel %vm2312_vm6, %v2283_v44, %v2250_v24  ;;  %v6422_v24 = vld [vmem:[#allocation2 + $0x30] sm:$0xff]  }
 0x2eb   : > { %3677 = vrot.lane.b32.xlu1 %v3646_v9, %s6528_s28 }
 0x2ec   : > { %v2248_v12 = vpop.permute.xlu0 %2247 }
 0x2ed   : > { %v3650_v16 = vpop.permute.xlu1 %3649  ;;  %v2314_v28 = vsel %vm2312_vm6, %v2281_v30, %v2248_v12 }
 0x2ee   : > { %3675 = vrot.lane.b32.xlu0 %v3638_v45, %s6528_s28  ;;  %6173 = vmatprep.mubr.msk.bf16.mxu0 %vm2911_vm7, %v2314_v28  ;;  %v3778_v46 = vsel %vm2279_vm5, %v6419_v60, %v3650_v16  ;;  %v6423_v16 = vld [vmem:[#allocation2 + $0x58] sm:$0xff]  }
 0x2ef   : > { %6174 = vmatmul.mubr.msk.bf16.vlgmr.msra.gmra.mxu0 %vm2911_vm7, %v2316_v40  ;;  %3773 = vrot.lane.b32.xlu1 %v3742_v54, %s6527_s27 }
 0x2f0   : > { %v3648_v51 = vpop.permute.xlu0 %3647 }
 0x2f1   : > { %v3746_v38 = vpop.permute.xlu1 %3745  ;;  %v3776_v48 = vsel %vm2279_vm5, %v7366_v3, %v3648_v51 }
 0x2f2   : > { %3771 = vrot.lane.b32.xlu0 %v3740_v56, %s6527_s27  ;;  %v3810_v62 = vsel %vm2312_vm6, %v3778_v46, %v3746_v38 }
 0x2f4   : > { %v3744_v14 = vpop.permute.xlu0 %3743 }
 0x2f5   : > { %v3808_v34 = vsel %vm2312_vm6, %v3776_v48, %v3744_v14  ;;  %v2157_v25 = vpop.permute.xlu1 %2156  ;;  %v6424_v48 = vld [vmem:[#allocation2 + $0x44] sm:$0xff]  }
 0x2f6   : > { %6217 = vmatprep.mubr.msk.bf16.mxu1 %vm2911_vm7, %v3808_v34  ;;  %v2287_v55 = vsel %vm2279_vm5, %v6420_v26, %v2157_v25 }
 0x2f7   : > { %6218 = vmatmul.mubr.msk.bf16.vlgmr.msra.gmra.mxu1 %vm2911_vm7, %v3810_v62 }
 0x2f8   : > { %v2155_v5 = vpop.permute.xlu0 %2154 }
 0x2f9   : > { %v2254_v6 = vpop.permute.xlu1 %2253  ;;  %v2285_v7 = vsel %vm2279_vm5, %v7397_v31, %v2155_v5 }
 0x2fa   : > { %v2320_v27 = vsel %vm2312_vm6, %v2287_v55, %v2254_v6 }
 0x2fc   : > { %v2252_v17 = vpop.permute.xlu0 %2251 }
 0x2fd   : > { %v2318_v3 = vsel %vm2312_vm6, %v2285_v7, %v2252_v17  ;;  %v3654_v53 = vpop.permute.xlu1 %3653 }
 0x2fe   : > { %6177 = vmatprep.mubr.msk.bf16.mxu0 %vm2911_vm7, %v2318_v3  ;;  %v3782_v8 = vsel %vm2279_vm5, %v6421_v15, %v3654_v53 }
 0x2ff   : > { %6178 = vmatmul.mubr.msk.bf16.gmra.mxu0 %vm2911_vm7, %v2320_v27 }
 0x300   : > { %v3652_v0 = vpop.permute.xlu0 %3651 }
 0x301   : > { %v3750_v36 = vpop.permute.xlu1 %3749  ;;  %v3780_v32 = vsel %vm2279_vm5, %v7430_v58, %v3652_v0 }
 0x302   : > { %v3814_v9 = vsel %vm2312_vm6, %v3782_v8, %v3750_v36 }
 0x304   : > { %v3748_v20 = vpop.permute.xlu0 %3747 }
 0x305   : > { %v3812_v31 = vsel %vm2312_vm6, %v3780_v32, %v3748_v20  ;;  %v2161_v47 = vpop.permute.xlu1 %2160 }
 0x306   : > { %6221 = vmatprep.mubr.msk.bf16.mxu1 %vm2911_vm7, %v3812_v31  ;;  %v2291_v37 = vsel %vm2279_vm5, %v6422_v24, %v2161_v47 }
 0x307   : > { %6222 = vmatmul.mubr.msk.bf16.gmra.mxu1 %vm2911_vm7, %v3814_v9 }
 0x308   : > { %v2159_v59 = vpop.permute.xlu0 %2158 }
 0x309   : > { %v2258_v33 = vpop.permute.xlu1 %2257  ;;  %v2289_v44 = vsel %vm2279_vm5, %v7462_v19, %v2159_v59 }
 0x30a   : > { %v2324_v30 = vsel %vm2312_vm6, %v2291_v37, %v2258_v33 }
 0x30c   : > { %v2256_v45 = vpop.permute.xlu0 %2255 }
 0x30d   : > { %v2322_v58 = vsel %vm2312_vm6, %v2289_v44, %v2256_v45  ;;  %v3658_v42 = vpop.permute.xlu1 %3657 }
 0x30e   : > { %6181 = vmatprep.mubr.msk.bf16.mxu0 %vm2911_vm7, %v2322_v58  ;;  %v3786_v28 = vsel %vm2279_vm5, %v6423_v16, %v3658_v42 }
 0x30f   : > { %6182 = vmatmul.mubr.msk.bf16.gmra.mxu0 %vm2911_vm7, %v2324_v30 }
 0x310   : > { %v3656_v12 = vpop.permute.xlu0 %3655 }
 0x311   : > { %v3754_v54 = vpop.permute.xlu1 %3753  ;;  %v3784_v40 = vsel %vm2279_vm5, %v7481_v63, %v3656_v12 }
 0x312   : > { %v3818_v38 = vsel %vm2312_vm6, %v3786_v28, %v3754_v54 }
 0x314   : > { %v3752_v56 = vpop.permute.xlu0 %3751 }
 0x315   : > { %v3816_v19 = vsel %vm2312_vm6, %v3784_v40, %v3752_v56  ;;  %v2165_v51 = vpop.permute.xlu1 %2164 }
 0x316   : > { %6225 = vmatprep.mubr.msk.bf16.mxu1 %vm2911_vm7, %v3816_v19  ;;  %v2295_v14 = vsel %vm2279_vm5, %v6424_v48, %v2165_v51 }
 0x317   : > { %6226 = vmatmul.mubr.msk.bf16.gmra.mxu1 %vm2911_vm7, %v3818_v38 }
 0x318   : > { %v2163_v60 = vpop.permute.xlu0 %2162 }
 0x319   : > { %v2262_v46 = vpop.permute.xlu1 %2261  ;;  %v2293_v34 = vsel %vm2279_vm5, %v7501_v29, %v2163_v60 }
 0x31a   : > { %v2328_v5 = vsel %vm2312_vm6, %v2295_v14, %v2262_v46 }
 0x31c   : > { %v2260_v25 = vpop.permute.xlu0 %2259 }
 0x31d   : > { %v2326_v63 = vsel %vm2312_vm6, %v2293_v34, %v2260_v25  ;;  %v3662_v62 = vpop.permute.xlu1 %3661 }
 0x31e   : > { %6185 = vmatprep.mubr.msk.bf16.mxu0 %vm2911_vm7, %v2326_v63  ;;  %v3790_v55 = vsel %vm2279_vm5, %v7508_v43, %v3662_v62 }
 0x31f   : > { %6186 = vmatmul.mubr.msk.bf16.gmra.mxu0 %vm2911_vm7, %v2328_v5 }
 0x320   : > { %v3660_v6 = vpop.permute.xlu0 %3659 }
 0x321   : > { %v3758_v26 = vpop.permute.xlu1 %3757  ;;  %v3788_v7 = vsel %vm2279_vm5, %v7522_v57, %v3660_v6 }
 0x322   : > { %v3822_v53 = vsel %vm2312_vm6, %v3790_v55, %v3758_v26 }
 0x324   : > { %v3756_v17 = vpop.permute.xlu0 %3755 }
 0x325   : > { %v3820_v29 = vsel %vm2312_vm6, %v3788_v7, %v3756_v17  ;;  %v2169_v3 = vpop.permute.xlu1 %2168 }
 0x326   : > { %6229 = vmatprep.mubr.msk.bf16.mxu1 %vm2911_vm7, %v3820_v29  ;;  %v2299_v36 = vsel %vm2279_vm5, %v7534_v22, %v2169_v3 }
 0x327   : > { %6230 = vmatmul.mubr.msk.bf16.gmra.mxu1 %vm2911_vm7, %v3822_v53 }
 0x328   : > { %v2167_v27 = vpop.permute.xlu0 %2166 }
 0x329   : > { %v2266_v0 = vpop.permute.xlu1 %2265  ;;  %v2297_v43 = vsel %vm2279_vm5, %v7549_v35, %v2167_v27 }
 0x32a   : > { %v2332_v32 = vsel %vm2312_vm6, %v2299_v36, %v2266_v0 }
 0x32c   : > { %v2264_v15 = vpop.permute.xlu0 %2263 }
 0x32d   : > { %v2330_v57 = vsel %vm2312_vm6, %v2297_v43, %v2264_v15  ;;  %v3666_v8 = vpop.permute.xlu1 %3665 }
 0x32e   : > { %6189 = vmatprep.mubr.msk.bf16.mxu0 %vm2911_vm7, %v2330_v57  ;;  %v3794_v47 = vsel %vm2279_vm5, %v7558_v52, %v3666_v8 }
 0x32f   : > { %6190 = vmatmul.mubr.msk.bf16.gmra.mxu0 %vm2911_vm7, %v2332_v32 }
 0x330   : > { %v3664_v20 = vpop.permute.xlu0 %3663 }
 0x331   : > { %v3762_v31 = vpop.permute.xlu1 %3761  ;;  %v3792_v22 = vsel %vm2279_vm5, %v7575_v10, %v3664_v20 }
 0x332   : > { %v3826_v33 = vsel %vm2312_vm6, %v3794_v47, %v3762_v31 }
 0x334   : > { %v3760_v9 = vpop.permute.xlu0 %3759 }
 0x335   : > { %v3824_v35 = vsel %vm2312_vm6, %v3792_v22, %v3760_v9  ;;  %v2173_v59 = vpop.permute.xlu1 %2172 }
 0x336   : > { %6233 = vmatprep.mubr.msk.bf16.mxu1 %vm2911_vm7, %v3824_v35  ;;  %v2303_v44 = vsel %vm2279_vm5, %v7595_v39, %v2173_v59 }
 0x337   : > { %6234 = vmatmul.mubr.msk.bf16.gmra.mxu1 %vm2911_vm7, %v3826_v33 }
 0x338   : > { %v2171_v24 = vpop.permute.xlu0 %2170 }
 0x339   : > { %v2270_v37 = vpop.permute.xlu1 %2269  ;;  %v2301_v52 = vsel %vm2279_vm5, %v7612_v2, %v2171_v24 }
 0x33a   : > { %v2336_v42 = vsel %vm2312_vm6, %v2303_v44, %v2270_v37 }
 0x33c   : > { %v2268_v45 = vpop.permute.xlu0 %2267 }
 0x33d   : > { %v2334_v10 = vsel %vm2312_vm6, %v2301_v52, %v2268_v45  ;;  %v3670_v58 = vpop.permute.xlu1 %3669 }
 0x33e   : > { %6193 = vmatprep.mubr.msk.bf16.mxu0 %vm2911_vm7, %v2334_v10  ;;  %v3798_v54 = vsel %vm2279_vm5, %v7634_v41, %v3670_v58 }
 0x33f   : > { %6194 = vmatmul.mubr.msk.bf16.gmra.mxu0 %vm2911_vm7, %v2336_v42 }
 0x340   : > { %v3668_v30 = vpop.permute.xlu0 %3667 }
 0x341   : > { %v3766_v12 = vpop.permute.xlu1 %3765  ;;  %v3796_v39 = vsel %vm2279_vm5, %v7650_v50, %v3668_v30 }
 0x342   : > { %v3830_v40 = vsel %vm2312_vm6, %v3798_v54, %v3766_v12 }
 0x344   : > { %v3764_v16 = vpop.permute.xlu0 %3763 }
 0x345   : > { %v3828_v2 = vsel %vm2312_vm6, %v3796_v39, %v3764_v16  ;;  %v2177_v28 = vpop.permute.xlu1 %2176 }
 0x346   : > { %6237 = vmatprep.mubr.msk.bf16.mxu1 %vm2911_vm7, %v3828_v2  ;;  %v2307_v51 = vsel %vm2279_vm5, %v7672_v11, %v2177_v28 }
 0x347   : > { %6238 = vmatmul.mubr.msk.bf16.gmra.mxu1 %vm2911_vm7, %v3830_v40 }
 0x348   : > { %v2175_v56 = vpop.permute.xlu0 %2174 }
 0x349   : > { %v2274_v19 = vpop.permute.xlu1 %2273  ;;  %v2305_v41 = vsel %vm2279_vm5, %v7685_v21, %v2175_v56 }
 0x34a   : > { %v2340_v46 = vsel %vm2312_vm6, %v2307_v51, %v2274_v19 }
 0x34c   : > { %v2272_v38 = vpop.permute.xlu0 %2271 }
 0x34d   : > { %v2338_v50 = vsel %vm2312_vm6, %v2305_v41, %v2272_v38  ;;  %v3674_v60 = vpop.permute.xlu1 %3673 }
 0x34e   : > { %6197 = vmatprep.mubr.msk.bf16.mxu0 %vm2911_vm7, %v2338_v50  ;;  %v3802_v34 = vsel %vm2279_vm5, %v7708_v18, %v3674_v60 }
 0x34f   : > { %6198 = vmatmul.mubr.msk.bf16.gmra.mxu0 %vm2911_vm7, %v2340_v46 }
 0x350   : > { %v3672_v48 = vpop.permute.xlu0 %3671 }
 0x351   : > { %v3770_v14 = vpop.permute.xlu1 %3769  ;;  %v3800_v11 = vsel %vm2279_vm5, %v7713_v13, %v3672_v48 }
 0x352   : > { %v3834_v62 = vsel %vm2312_vm6, %v3802_v34, %v3770_v14 }
 0x354   : > { %v3768_v25 = vpop.permute.xlu0 %3767 }
 0x355   : > { %v3832_v21 = vsel %vm2312_vm6, %v3800_v11, %v3768_v25  ;;  %v2181_v63 = vpop.permute.xlu1 %2180  ;;  %v6529_v11 = vmov 1983009808  }
 0x356   : > { %6241 = vmatprep.mubr.msk.bf16.mxu1 %vm2911_vm7, %v3832_v21  ;;  %v2311_v26 = vsel %vm2279_vm5, %v7736_v4, %v2181_v63  ;;  %v4218_v25 = vunpack.c.l.s4 %v6529_v11  ;;  %v7996_v63 = vld [vmem:[#allocation7] ss:$0 sm:$0xff] }
 0x357   : > { %6242 = vmatmul.mubr.msk.bf16.gmra.mxu1 %vm2911_vm7, %v3834_v62 }
 0x358   : > { %v2179_v5 = vpop.permute.xlu0 %2178 }
 0x359   : > { %v2278_v6 = vpop.permute.xlu1 %2277  ;;  %v2309_v18 = vsel %vm2279_vm5, %v7749_v49, %v2179_v5 }
 0x35a   : > { %v2344_v17 = vsel %vm2312_vm6, %v2311_v26, %v2278_v6 }
 0x35c   : > { %v2276_v55 = vpop.permute.xlu0 %2275 }
 0x35d   : > { %v2342_v13 = vsel %vm2312_vm6, %v2309_v18, %v2276_v55  ;;  %v3678_v7 = vpop.permute.xlu1 %3677 }
 0x35e   : > { %6201 = vmatprep.mubr.msk.bf16.mxu0 %vm2911_vm7, %v2342_v13  ;;  %v3806_v3 = vsel %vm2279_vm5, %v7768_v61, %v3678_v7 }
 0x35f   : > { %6202 = vmatmul.mubr.msk.bf16.gmra.mxu0 %vm2911_vm7, %v2344_v17 }
 0x360   : > { %v3676_v29 = vpop.permute.xlu0 %3675 }
 0x361   : > { %v3774_v53 = vpop.permute.xlu1 %3773  ;;  %v3804_v4 = vsel %vm2279_vm5, %v7781_v23, %v3676_v29 }
 0x362   : > { %v3838_v0 = vsel %vm2312_vm6, %v3806_v3, %v3774_v53  ;;  %v4219_v3 = vunpack.c.0.s8 %v4218_v25 }
 0x364   : > { %v3772_v27 = vpop.permute.xlu0 %3771 }
 0x365   : > { %v3836_v49 = vsel %vm2312_vm6, %v3804_v4, %v3772_v27 }
 0x366   : > { %6245 = vmatprep.mubr.msk.bf16.mxu1 %vm2911_vm7, %v3836_v49 }
 0x367   : > { %6246 = vmatmul.mubr.msk.bf16.gmra.mxu1 %vm2911_vm7, %v3838_v0 }
 0x36f   : > { %v6131_v36 = vpop.f32.mrf.mxu1 }
 0x371   : > { %v2978_v43 = vpop.f32.mrf.mxu1 }
 0x373   : > { %v6132_v15 = vpop.f32.mrf.mxu1 }
 0x375   : > { %v2981_v57 = vpop.f32.mrf.mxu1 }
 0x377   : > { %v6135_v8 = vpop.f32.mrf.mxu1 }
 0x379   : > { %v2994_v32 = vpop.f32.mrf.mxu1 }
 0x37b   : > { %v6136_v61 = vpop.f32.mrf.mxu1 }
 0x37d   : > { %v7946_v20 = vpop.f32.mrf.mxu1 }
 0x37f   : > { %v7948_v31 = vpop.f32.mrf.mxu1 }
 0x381   : > { %v7950_v23 = vpop.f32.mrf.mxu1 }
 0x383   : > { %v7952_v47 = vpop.f32.mrf.mxu1 }
 0x385   : > { %v7954_v22 = vpop.f32.mrf.mxu1 }
 0x387   : > { %v7956_v9 = vpop.f32.mrf.mxu1 }
 0x389   : > { %v7958_v35 = vpop.f32.mrf.mxu1 }
 0x38b   : > { %v7960_v59 = vpop.f32.mrf.mxu1 }
 0x38d   : > { %v7962_v33 = vpop.f32.mrf.mxu1 }
 0x38f   : > { %v7964_v24 = vpop.f32.mrf.mxu1 }
 0x391   : > { %v7966_v37 = vpop.f32.mrf.mxu1 }
 0x393   : > { %v7968_v44 = vpop.f32.mrf.mxu1 }
 0x395   : > { %v7970_v52 = vpop.f32.mrf.mxu1 }
 0x397   : > { %v7972_v45 = vpop.f32.mrf.mxu1 }
 0x399   : > { %v7974_v10 = vpop.f32.mrf.mxu1 }
 0x39b   : > { %v7976_v58 = vpop.f32.mrf.mxu1 }
 0x39d   : > { %v7978_v42 = vpop.f32.mrf.mxu1 }
 0x39f   : > { %v7980_v30 = vpop.f32.mrf.mxu1 }
 0x3a1   : > { %v7982_v12 = vpop.f32.mrf.mxu1 }
 0x3a3   : > { %v7984_v54 = vpop.f32.mrf.mxu1 }
 0x3a5   : > { %v7986_v39 = vpop.f32.mrf.mxu1 }
 0x3a7   : > { %v7988_v16 = vpop.f32.mrf.mxu1 }
 0x3a9   : > { %v7990_v2 = vpop.f32.mrf.mxu1 }
 0x3aa   : > { %8450 = vst [vmem:[#allocation10_spill] sm:$0xff] %v7990_v2 }
 0x3ab   : > { %v7992_v40 = vpop.f32.mrf.mxu1 }
 0x3ac   : > { %8451 = vst [vmem:[#allocation11_spill] sm:$0xff] %v7992_v40 }
 0x3ad   : > { %v7994_v19 = vpop.f32.mrf.mxu1 }
 0x3ae   : > { %8452 = vst [vmem:[#allocation12_spill] sm:$0xff] %v7994_v19 }
 0x3af   : > { %v6175_v28 = vpop.f32.mrf.mxu0 }
 0x3b0   : > { %v3216_v48 = vadd.f32 %v6175_v28, %v6131_v36 }
 0x3b1   : > { %v3207_v56 = vpop.f32.mrf.mxu0 }
 0x3b2   : > { %v3208_v21 = vadd.f32 %v3207_v56, %v2978_v43  ;;  %v8005_v56 = vsub.s32 %v4219_v3, %v6634_v1 }
 0x3b3   : > { %v6176_v41 = vpop.f32.mrf.mxu0 }
 0x3b4   : > { %v3219_v5 = vadd.f32 %v6176_v41, %v6132_v15 }
 0x3b5   : > { %v3210_v50 = vpop.f32.mrf.mxu0 }
 0x3b6   : > { %v3211_v6 = vadd.f32 %v3210_v50, %v2981_v57 }
 0x3b7   : > { %v6219_v51 = vpop.f32.mrf.mxu1 }
 0x3b8   : > { %v4083_v34 = vadd.f32 %v6219_v51, %v3216_v48 }
 0x3b9   : > { %v3954_v38 = vpop.f32.mrf.mxu1 }
 0x3ba   : > { %v4081_v18 = vadd.f32 %v3954_v38, %v3208_v21  ;;  %v4122_v13 = vadd.f32 %v7996_v63, %v4083_v34 }
 0x3bb   : > { %v6220_v46 = vpop.f32.mrf.mxu1 }
 0x3bc   : > { %v4084_v7 = vadd.f32 %v6220_v46, %v3219_v5  ;;  %v4120_v0 = vadd.f32 %v7996_v63, %v4081_v18  ;;  %v4158_v57 = vsel %vm2312_vm6, %v4122_v13, -inf }
 0x3bd   : > { %v3957_v62 = vpop.f32.mrf.mxu1 }
 0x3be   : > { %v4082_v17 = vadd.f32 %v3957_v62, %v3211_v6  ;;  %v4152_v46 = vsel %vm2312_vm6, %v4120_v0, -inf }
 0x3bf   : > { %v6179_v60 = vpop.f32.mrf.mxu0 }
 0x3c0   : > { %v3232_v55 = vadd.f32 %v6179_v60, %v6135_v8  ;;  %v4123_v8 = vadd.f32 %v7996_v63, %v4084_v7  ;;  %v4121_v28 = vadd.f32 %v7996_v63, %v4082_v17 }
 0x3c1   : > { %v3223_v14 = vpop.f32.mrf.mxu0 }
 0x3c2   : > { %v3224_v53 = vadd.f32 %v3223_v14, %v2994_v32  ;;  %v8016_v21 = vsel %vm2312_vm6, %v4121_v28, -inf }
 0x3c3   : > { %v6180_v26 = vpop.f32.mrf.mxu0 }
 0x3c4   : > { %v3235_v36 = vadd.f32 %v6180_v26, %v6136_v61 }
 0x3c5   : > { %v3226_v27 = vpop.f32.mrf.mxu0 }
 0x3c6   : > { %v3227_v32 = vadd.f32 %v3226_v27, %v7946_v20  ;;  %v4161_v20 = vsel %vm2312_vm6, %v4123_v8, -inf }
 0x3c7   : > { %v6223_v29 = vpop.f32.mrf.mxu1 }
 0x3c8   : > { %v4087_v4 = vadd.f32 %v6223_v29, %v3232_v55 }
 0x3c9   : > { %v3970_v49 = vpop.f32.mrf.mxu1 }
 0x3ca   : > { %v4126_v43 = vadd.f32 %v7996_v63, %v4087_v4  ;;  %v4085_v15 = vadd.f32 %v3970_v49, %v3224_v53 }
 0x3cb   : > { %v6224_v51 = vpop.f32.mrf.mxu1 }
 0x3cc   : > { %v4159_v41 = vsel %vm2312_vm6, %v4126_v43, -inf  ;;  %v4124_v38 = vadd.f32 %v7996_v63, %v4085_v15  ;;  %v4088_v61 = vadd.f32 %v6224_v51, %v3235_v36 }
 0x3cd   : > { %v4160_v50 = vmax.f32 %v4158_v57, %v4159_v41  ;;  %v3973_v60 = vpop.f32.mrf.mxu1 }
 0x3ce   : > { %v4153_v48 = vsel %vm2312_vm6, %v4124_v38, -inf  ;;  %v4127_v14 = vadd.f32 %v7996_v63, %v4088_v61  ;;  %v4086_v34 = vadd.f32 %v3973_v60, %v3227_v32 }
 0x3cf   : > { %v4250_v1 = vcombine.high %v4160_v50, %v4160_v50  ;;  %v4257_v11 = vrot.slane %v4160_v50, %v8005_v56  ;;  %v4154_v25 = vmax.f32 %v4152_v46, %v4153_v48 }
 0x3d0   : > { %v4162_v62 = vsel %vm2312_vm6, %v4127_v14, -inf  ;;  %v8025_v17 = vadd.f32 %v7996_v63, %v4086_v34 }
 0x3d1   : > { %v4264_v5 = vrot.slane %v4250_v1, %v8005_v56  ;;  %v4265_v6 = vcombine.high %v4257_v11, %v4257_v11  ;;  %v4609_v26 = vsel %vm4552_vm8, %v4257_v11, -inf  ;;  %v4216_v18 = vcombine.high %v4154_v25, %v4154_v25 }
 0x3d2   : > { %v4610_v55 = vrot.slane %v4609_v26, 4  ;;  %v4223_v13 = vrot.slane %v4154_v25, %v8005_v56  ;;  %v8022_v7 = vmax.f32 %v4161_v20, %v4162_v62 }
 0x3d3   : > { %v4266_v29 = vcombine.high %v4264_v5, %v4264_v5  ;;  %v4616_v3 = vsel %vm4552_vm8, %v4265_v6, -inf  ;;  %v4623_v53 = vsel %vm4552_vm8, %v4264_v5, -inf  ;;  %v4230_v4 = vrot.slane %v4216_v18, %v8005_v56 }
 0x3d4   : > { %v4611_v27 = vmax.f32 %v4609_v26, %v4610_v55  ;;  %v4617_v49 = vrot.slane %v4616_v3, 4  ;;  %v4624_v0 = vrot.slane %v4623_v53, 4  ;;  %v4231_v36 = vcombine.high %v4223_v13, %v4223_v13 }
 0x3d5   : > { %v4630_v43 = vsel %vm4552_vm8, %v4266_v29, -inf  ;;  %v4232_v15 = vcombine.high %v4230_v4, %v4230_v4  ;;  %v4553_v57 = vsel %vm4552_vm8, %v4223_v13, -inf  ;;  %v4567_v8 = vsel %vm4552_vm8, %v4230_v4, -inf }
 0x3d6   : > { %v4612_v28 = vrot.slane %v4611_v27, 2  ;;  %v4618_v51 = vmax.f32 %v4616_v3, %v4617_v49  ;;  %v4625_v32 = vmax.f32 %v4623_v53, %v4624_v0  ;;  %v4631_v41 = vrot.slane %v4630_v43, 4 }
 0x3d7   : > { %v4554_v38 = vrot.slane %v4553_v57, 4  ;;  %v4560_v61 = vsel %vm4552_vm8, %v4231_v36, -inf  ;;  %v4568_v50 = vrot.slane %v4567_v8, 4  ;;  %v4574_v60 = vsel %vm4552_vm8, %v4232_v15, -inf }
 0x3d8   : > { %v4613_v46 = vmax.f32 %v4611_v27, %v4612_v28  ;;  %v4619_v48 = vrot.slane %v4618_v51, 2  ;;  %v4626_v14 = vrot.slane %v4625_v32, 2  ;;  %v4632_v34 = vmax.f32 %v4630_v43, %v4631_v41 }
 0x3d9   : > { %v4555_v1 = vmax.f32 %v4553_v57, %v4554_v38  ;;  %v4561_v11 = vrot.slane %v4560_v61, 4  ;;  %v4569_v25 = vmax.f32 %v4567_v8, %v4568_v50  ;;  %v4575_v20 = vrot.slane %v4574_v60, 4 }
 0x3da   : > { %v4614_v62 = vrot.slane %v4613_v46, 1  ;;  %v4620_v5 = vmax.f32 %v4618_v51, %v4619_v48  ;;  %v4627_v6 = vmax.f32 %v4625_v32, %v4626_v14  ;;  %v4633_v26 = vrot.slane %v4632_v34, 2  ;;  %v6183_v48 = vpop.f32.mrf.mxu0 }
 0x3db   : > { %v4556_v18 = vrot.slane %v4555_v1, 2  ;;  %v4562_v55 = vmax.f32 %v4560_v61, %v4561_v11  ;;  %v4570_v13 = vrot.slane %v4569_v25, 2  ;;  %v4576_v29 = vmax.f32 %v4574_v60, %v4575_v20 }
 0x3dc   : > { %v4615_v3 = vmax.f32 %v4613_v46, %v4614_v62  ;;  %v4621_v53 = vrot.slane %v4620_v5, 1  ;;  %v4628_v4 = vrot.slane %v4627_v6, 1  ;;  %v4634_v27 = vmax.f32 %v4632_v34, %v4633_v26 }
 0x3dd   : > { %v4557_v49 = vmax.f32 %v4555_v1, %v4556_v18  ;;  %v4563_v0 = vrot.slane %v4562_v55, 2  ;;  %v4571_v36 = vmax.f32 %v4569_v25, %v4570_v13  ;;  %v4577_v43 = vrot.slane %v4576_v29, 2 }
 0x3de   : > { %v4622_v15 = vmax.f32 %v4620_v5, %v4621_v53  ;;  %v4629_v57 = vmax.f32 %v4627_v6, %v4628_v4  ;;  %v4635_v8 = vrot.slane %v4634_v27, 1  ;;  %v5009_v28 = vmax.f32 %v4615_v3, 0.0  ;;  %v3239_v4 = vpop.f32.mrf.mxu0 }
 0x3df   : > { %v4558_v51 = vrot.slane %v4557_v49, 1  ;;  %v4564_v32 = vmax.f32 %v4562_v55, %v4563_v0  ;;  %v4572_v41 = vrot.slane %v4571_v36, 1  ;;  %v4578_v38 = vmax.f32 %v4576_v29, %v4577_v43 }
 0x3e0   : > { %v4636_v61 = vmax.f32 %v4634_v27, %v4635_v8  ;;  %v5010_v50 = vmax.f32 %v4622_v15, 0.0  ;;  %v5011_v60 = vmax.f32 %v4629_v57, 0.0  ;;  %v5932_v46 = vpack.c.bf16 %v5009_v28, %v5009_v28  ;;  %v8043_v28 = vpop.f32.mrf.mxu1 }
 0x3e1   : > { %v4559_v14 = vmax.f32 %v4557_v49, %v4558_v51  ;;  %v4565_v34 = vrot.slane %v4564_v32, 1  ;;  %v4573_v11 = vmax.f32 %v4571_v36, %v4572_v41  ;;  %v4579_v1 = vrot.slane %v4578_v38, 1 }
 0x3e2   : > { %v5012_v20 = vmax.f32 %v4636_v61, 0.0  ;;  %v5933_v25 = vpack.c.bf16 %v5010_v50, %v5010_v50  ;;  %v5934_v62 = vpack.c.bf16 %v5011_v60, %v5011_v60  ;;  %v5329_v5 = vunpack.c.l.b16 %v5932_v46 }
 0x3e3   : > { %v4566_v6 = vmax.f32 %v4564_v32, %v4565_v34  ;;  %v4580_v26 = vmax.f32 %v4578_v38, %v4579_v1  ;;  %v5001_v18 = vmax.f32 %v4559_v14, 0.0  ;;  %v5003_v55 = vmax.f32 %v4573_v11, 0.0  ;;  %v8047_v14 = vpop.f32.mrf.mxu0 }
 0x3e4   : > { %v5935_v13 = vpack.c.bf16 %v5012_v20, %v5012_v20  ;;  %v5330_v29 = vunpack.c.l.b16 %v5933_v25  ;;  %v5331_v3 = vunpack.c.l.b16 %v5934_v62  ;;  %v4267_v53 = vcombine.high %v8022_v7, %v8022_v7 }
 0x3e5   : > { %v5002_v27 = vmax.f32 %v4566_v6, 0.0  ;;  %v5004_v49 = vmax.f32 %v4580_v26, 0.0  ;;  %v5924_v0 = vpack.c.bf16 %v5001_v18, %v5001_v18  ;;  %v5926_v36 = vpack.c.bf16 %v5003_v55, %v5003_v55 }
 0x3e6   : > { %v5399_v43 = vsel %vm5385_vm9, %v5330_v29, %v5329_v5  ;;  %v4274_v15 = vrot.slane %v8022_v7, %v8005_v56  ;;  %v4281_v57 = vrot.slane %v4267_v53, %v8005_v56  ;;  %v4156_v8 = vsel %vm2312_vm6, %v8025_v17, -inf  ;;  %v8052_v5 = vpop.f32.mrf.mxu1 }
 0x3e7   : > { %v5332_v51 = vunpack.c.l.b16 %v5935_v13  ;;  %v5400_v32 = vsel %vm5387_vm10, %v5331_v3, %v5399_v43  ;;  %v5925_v41 = vpack.c.bf16 %v5002_v27, %v5002_v27  ;;  %v5927_v38 = vpack.c.bf16 %v5004_v49, %v5004_v49  ;;  %v8060_v27 = vpop.f32.mrf.mxu0 }
 0x3e8   : > { %v5323_v61 = vunpack.c.l.b16 %v5926_v36  ;;  %v4282_v50 = vcombine.high %v4274_v15, %v4274_v15  ;;  %v4283_v60 = vcombine.high %v4281_v57, %v4281_v57  ;;  %v4637_v46 = vsel %vm4552_vm8, %v4274_v15, -inf }
 0x3e9   : > { %v5321_v7 = vunpack.c.l.b16 %v5924_v0  ;;  %v5322_v34 = vunpack.c.l.b16 %v5925_v41  ;;  %v4638_v11 = vrot.slane %v4637_v46, 4  ;;  %v4651_v1 = vsel %vm4552_vm8, %v4281_v57, -inf }
 0x3ea   : > { %v5324_v17 = vunpack.c.l.b16 %v5927_v38  ;;  %v4644_v20 = vsel %vm4552_vm8, %v4282_v50, -inf  ;;  %v4652_v25 = vrot.slane %v4651_v1, 4  ;;  %v4658_v62 = vsel %vm4552_vm8, %v4283_v60, -inf }
 0x3eb   : > { %v5386_v6 = vsel %vm5385_vm9, %v5322_v34, %v5321_v7  ;;  %v4639_v26 = vmax.f32 %v4637_v46, %v4638_v11  ;;  %v4645_v18 = vrot.slane %v4644_v20, 4  ;;  %v4659_v55 = vrot.slane %v4658_v62, 4 }
 0x3ec   : > { %v5388_v13 = vsel %vm5387_vm10, %v5323_v61, %v5386_v6  ;;  %v4653_v29 = vmax.f32 %v4651_v1, %v4652_v25  ;;  %v4157_v3 = vmax.f32 %v8016_v21, %v4156_v8  ;;  %v8058_v53 = vadd.f32 %v6183_v48, %v7948_v31  ;;  %v8069_v61 = vpop.f32.mrf.mxu1  ;;  %v8071_v21 = vpop.f32.mrf.mxu0 }
 0x3ed   : > { %v4640_v49 = vrot.slane %v4639_v26, 2  ;;  %v4646_v0 = vmax.f32 %v4644_v20, %v4645_v18  ;;  %v4660_v36 = vmax.f32 %v4658_v62, %v4659_v55  ;;  %v8063_v43 = vsel %vm5389_vm11, %v5332_v51, %v5400_v32 }
 0x3ee   : > { %v4654_v15 = vrot.slane %v4653_v29, 2  ;;  %v4233_v57 = vcombine.high %v4157_v3, %v4157_v3  ;;  %v4240_v41 = vrot.slane %v4157_v3, %v8005_v56  ;;  %v8067_v38 = vadd.f32 %v3239_v4, %v7950_v23  ;;  %v8082_v62 = vpop.f32.mrf.mxu0 }
 0x3ef   : > { %v4641_v31 = vmax.f32 %v4639_v26, %v4640_v49  ;;  %v4647_v48 = vrot.slane %v4646_v0, 2  ;;  %v4661_v8 = vrot.slane %v4660_v36, 2  ;;  %v8074_v50 = vsel %vm5389_vm11, %v5324_v17, %v5388_v13  ;;  %v8080_v17 = vpop.f32.mrf.mxu1 }
 0x3f0   : > { %v4655_v60 = vmax.f32 %v4653_v29, %v4654_v15  ;;  %v4247_v51 = vrot.slane %v4233_v57, %v8005_v56  ;;  %v4248_v32 = vcombine.high %v4240_v41, %v4240_v41  ;;  %v4581_v46 = vsel %vm4552_vm8, %v4240_v41, -inf }
 0x3f1   : > { %v4642_v7 = vrot.slane %v4641_v31, 1  ;;  %v4648_v23 = vmax.f32 %v4646_v0, %v4647_v48  ;;  %v4662_v4 = vmax.f32 %v4660_v36, %v4661_v8  ;;  %v4582_v34 = vrot.slane %v4581_v46, 4  ;;  %v8085_v0 = vpop.f32.mrf.mxu1 }
 0x3f2   : > { %v4656_v11 = vrot.slane %v4655_v60, 1  ;;  %v4249_v1 = vcombine.high %v4247_v51, %v4247_v51  ;;  %v4588_v20 = vsel %vm4552_vm8, %v4248_v32, -inf  ;;  %v4595_v25 = vsel %vm4552_vm8, %v4247_v51, -inf  ;;  %v8087_v32 = vpop.f32.mrf.mxu0 }
 0x3f3   : > { %v4643_v6 = vmax.f32 %v4641_v31, %v4642_v7  ;;  %v4649_v26 = vrot.slane %v4648_v23, 1  ;;  %v4663_v18 = vrot.slane %v4662_v4, 1  ;;  %v4583_v55 = vmax.f32 %v4581_v46, %v4582_v34  ;;  %v4002_v2 = vpop.f32.mrf.mxu1 }
 0x3f4   : > { %v4657_v13 = vmax.f32 %v4655_v60, %v4656_v11  ;;  %v4589_v29 = vrot.slane %v4588_v20, 4  ;;  %v4596_v3 = vrot.slane %v4595_v25, 4  ;;  %v4602_v49 = vsel %vm4552_vm8, %v4249_v1, -inf }
 0x3f5   : > { %v4650_v36 = vmax.f32 %v4648_v23, %v4649_v26  ;;  %v4664_v15 = vmax.f32 %v4662_v4, %v4663_v18  ;;  %v5013_v57 = vmax.f32 %v4643_v6, 0.0  ;;  %v4584_v41 = vrot.slane %v4583_v55, 2 }
 0x3f6   : > { %v5015_v48 = vmax.f32 %v4657_v13, 0.0  ;;  %v4590_v8 = vmax.f32 %v4588_v20, %v4589_v29  ;;  %v4597_v51 = vmax.f32 %v4595_v25, %v4596_v3  ;;  %v4603_v31 = vrot.slane %v4602_v49, 4  ;;  %v3258_v29 = vpop.f32.mrf.mxu0 }
 0x3f7   : > { %v5014_v7 = vmax.f32 %v4650_v36, 0.0  ;;  %v5016_v46 = vmax.f32 %v4664_v15, 0.0  ;;  %v5936_v60 = vpack.c.bf16 %v5013_v57, %v5013_v57  ;;  %v4585_v34 = vmax.f32 %v4583_v55, %v4584_v41 }
 0x3f8   : > { %v5938_v11 = vpack.c.bf16 %v5015_v48, %v5015_v48  ;;  %v4591_v19 = vrot.slane %v4590_v8, 2  ;;  %v4598_v1 = vrot.slane %v4597_v51, 2  ;;  %v4604_v40 = vmax.f32 %v4602_v49, %v4603_v31  ;;  %v6232_v31 = vpop.f32.mrf.mxu1 }
 0x3f9   : > { %v5937_v23 = vpack.c.bf16 %v5014_v7, %v5014_v7  ;;  %v5939_v4 = vpack.c.bf16 %v5016_v46, %v5016_v46  ;;  %v5333_v6 = vunpack.c.l.b16 %v5936_v60  ;;  %v4586_v26 = vrot.slane %v4585_v34, 1  ;;  %v6191_v7 = vpop.f32.mrf.mxu0 }
 0x3fa   : > { %v5335_v18 = vunpack.c.l.b16 %v5938_v11  ;;  %v4592_v20 = vmax.f32 %v4590_v8, %v4591_v19  ;;  %v4599_v25 = vmax.f32 %v4597_v51, %v4598_v1  ;;  %v4605_v13 = vrot.slane %v4604_v40, 2 }
 0x3fb   : > { %v5334_v3 = vunpack.c.l.b16 %v5937_v23  ;;  %v5336_v36 = vunpack.c.l.b16 %v5939_v4  ;;  %v5402_v15 = vsel %vm5391_vm12, %v5333_v6, %v8063_v43  ;;  %v4587_v55 = vmax.f32 %v4585_v34, %v4586_v26  ;;  %v4005_v6 = vpop.f32.mrf.mxu1 }
 0x3fc   : > { %v4593_v57 = vrot.slane %v4592_v20, 1  ;;  %v4600_v41 = vrot.slane %v4599_v25, 1  ;;  %v4606_v48 = vmax.f32 %v4604_v40, %v4605_v13  ;;  %v3251_v49 = vadd.f32 %v8047_v14, %v7952_v47 }
 0x3fd   : > { %v5403_v46 = vsel %vm5393_vm13, %v5334_v3, %v5402_v15  ;;  %v5005_v19 = vmax.f32 %v4587_v55, 0.0  ;;  %v4091_v8 = vadd.f32 %v8043_v28, %v8058_v53  ;;  %v4089_v51 = vadd.f32 %v8052_v5, %v8067_v38  ;;  %v3271_v5 = vpop.f32.mrf.mxu0 }
 0x3fe   : > { %v5404_v43 = vsel %vm5395_vm14, %v5335_v18, %v5403_v46  ;;  %v4594_v60 = vmax.f32 %v4592_v20, %v4593_v57  ;;  %v4601_v34 = vmax.f32 %v4599_v25, %v4600_v41  ;;  %v4607_v40 = vrot.slane %v4606_v48, 1 }
 0x3ff   : > { %v5405_v11 = vsel %vm5397_vm15, %v5336_v36, %v5404_v43  ;;  %v5928_v47 = vpack.c.bf16 %v5005_v19, %v5005_v19  ;;  %v3243_v14 = vadd.f32 %v8060_v27, %v7954_v22  ;;  %v4092_v1 = vadd.f32 %v8069_v61, %v3251_v49  ;;  %v6235_v27 = vpop.f32.mrf.mxu1  ;;  %v6192_v49 = vpop.f32.mrf.mxu0 }
 0x400   : > { %v5449_v23 = vpack.c.b16 %v5405_v11, %v5405_v11  ;;  %v4608_v4 = vmax.f32 %v4606_v48, %v4607_v40  ;;  %v5006_v28 = vmax.f32 %v4594_v60, 0.0  ;;  %v5007_v53 = vmax.f32 %v4601_v34, 0.0 }
 0x401   : > { %v5325_v38 = vunpack.c.l.b16 %v5928_v47  ;;  %v4130_v26 = vadd.f32 %v7996_v63, %v4091_v8  ;;  %v4128_v18 = vadd.f32 %v7996_v63, %v4089_v51  ;;  %v4090_v22 = vadd.f32 %v8080_v17, %v3243_v14  ;;  %v3274_v40 = vpop.f32.mrf.mxu0 }
 0x402   : > { %5466 = vst.msk [vmem:[%s6653_s26 + $0x4] sm:$0xf] %vm5464_vm0, %v5449_v23  ;;  %v5008_v20 = vmax.f32 %v4608_v4, 0.0  ;;  %v5929_v25 = vpack.c.bf16 %v5006_v28, %v5006_v28  ;;  %v5930_v13 = vpack.c.bf16 %v5007_v53, %v5007_v53  ;;  %v4131_v3 = vadd.f32 %v7996_v63, %v4092_v1 }
 0x403   : > { %v5392_v61 = vsel %vm5391_vm12, %v5325_v38, %v8074_v50  ;;  %v3264_v36 = vadd.f32 %v8071_v21, %v7956_v9  ;;  %v3256_v15 = vadd.f32 %v8082_v62, %v7958_v35  ;;  %v4129_v48 = vadd.f32 %v7996_v63, %v4090_v22  ;;  %v4018_v62 = vpop.f32.mrf.mxu1 }
 0x404   : > { %v5931_v55 = vpack.c.bf16 %v5008_v20, %v5008_v20  ;;  %v5326_v57 = vunpack.c.l.b16 %v5929_v25  ;;  %v5327_v41 = vunpack.c.l.b16 %v5930_v13  ;;  %v4170_v17 = vsel %vm2312_vm6, %v4130_v26, -inf }
 0x405   : > { %v3267_v46 = vadd.f32 %v8087_v32, %v7960_v59  ;;  %v4095_v50 = vadd.f32 %v8085_v0, %v3264_v36  ;;  %v4093_v19 = vadd.f32 %v4002_v2, %v3256_v15  ;;  %v4164_v21 = vsel %vm2312_vm6, %v4128_v18, -inf  ;;  %v6236_v4 = vpop.f32.mrf.mxu1 }
 0x406   : > { %v5328_v8 = vunpack.c.l.b16 %v5931_v55  ;;  %v5394_v9 = vsel %vm5393_vm13, %v5326_v57, %v5392_v61  ;;  %v3259_v35 = vadd.f32 %v3258_v29, %v7962_v33  ;;  %v4173_v2 = vsel %vm2312_vm6, %v4131_v3, -inf }
 0x407   : > { %v5396_v51 = vsel %vm5395_vm14, %v5327_v41, %v5394_v9  ;;  %v4134_v43 = vadd.f32 %v7996_v63, %v4095_v50  ;;  %v4132_v60 = vadd.f32 %v7996_v63, %v4093_v19  ;;  %v4096_v34 = vadd.f32 %v6232_v31, %v3267_v46 }
 0x408   : > { %v5398_v59 = vsel %vm5397_vm15, %v5328_v8, %v5396_v51  ;;  %v8129_v0 = vsel %vm2312_vm6, %v4129_v48, -inf  ;;  %v4094_v32 = vadd.f32 %v4005_v6, %v3259_v35  ;;  %v3280_v31 = vadd.f32 %v6191_v7, %v7964_v24 }
 0x409   : > { %v5448_v11 = vpack.c.b16 %v5398_v59, %v5398_v59  ;;  %v4171_v33 = vsel %vm2312_vm6, %v4134_v43, -inf  ;;  %v4165_v29 = vsel %vm2312_vm6, %v4132_v60, -inf  ;;  %v4135_v47 = vadd.f32 %v7996_v63, %v4096_v34 }
 0x40a   : > { %v4172_v14 = vmax.f32 %v4170_v17, %v4171_v33  ;;  %v4166_v1 = vmax.f32 %v4164_v21, %v4165_v29  ;;  %v3272_v23 = vadd.f32 %v3271_v5, %v7966_v37  ;;  %v4133_v53 = vadd.f32 %v7996_v63, %v4094_v32 }
 0x40b   : > { %5465 = vst.msk [vmem:[%s6653_s26] sm:$0xf] %vm5464_vm0, %v5448_v11  ;;  %v4174_v28 = vsel %vm2312_vm6, %v4135_v47, -inf  ;;  %v3283_v6 = vadd.f32 %v6192_v49, %v7968_v44  ;;  %v8142_v38 = vadd.f32 %v3274_v40, %v7970_v52  ;;  %v8148_v37 = vadd.f32 %v6235_v27, %v3280_v31 }
 0x40c   : > { %v4318_v26 = vcombine.high %v4172_v14, %v4172_v14  ;;  %v4325_v18 = vrot.slane %v4172_v14, %v8005_v56  ;;  %v4284_v20 = vcombine.high %v4166_v1, %v4166_v1  ;;  %v4291_v24 = vrot.slane %v4166_v1, %v8005_v56 }
 0x40d   : > { %v8146_v7 = vmax.f32 %v4173_v2, %v4174_v28  ;;  %v8150_v5 = vadd.f32 %v4018_v62, %v3272_v23  ;;  %v8152_v25 = vadd.f32 %v6236_v4, %v3283_v6  ;;  %v8159_v15 = vsel %vm2312_vm6, %v4133_v53, -inf }
 0x40e   : > { %v4332_v13 = vrot.slane %v4318_v26, %v8005_v56  ;;  %v4333_v44 = vcombine.high %v4325_v18, %v4325_v18  ;;  %v4721_v52 = vsel %vm4552_vm8, %v4325_v18, -inf  ;;  %v4298_v22 = vrot.slane %v4284_v20, %v8005_v56 }
 0x40f   : > { %v4722_v61 = vrot.slane %v4721_v52, 4  ;;  %v4299_v3 = vcombine.high %v4291_v24, %v4291_v24  ;;  %v4665_v36 = vsel %vm4552_vm8, %v4291_v24, -inf }
 0x410   : > { %v4334_v27 = vcombine.high %v4332_v13, %v4332_v13  ;;  %v4728_v55 = vsel %vm4552_vm8, %v4333_v44, -inf  ;;  %v4735_v57 = vsel %vm4552_vm8, %v4332_v13, -inf  ;;  %v4300_v41 = vcombine.high %v4298_v22, %v4298_v22 }
 0x411   : > { %v4723_v48 = vmax.f32 %v4721_v52, %v4722_v61  ;;  %v4729_v49 = vrot.slane %v4728_v55, 4  ;;  %v4736_v17 = vrot.slane %v4735_v57, 4  ;;  %v4666_v46 = vrot.slane %v4665_v36, 4 }
 0x412   : > { %v4742_v50 = vsel %vm4552_vm8, %v4334_v27, -inf  ;;  %v4672_v19 = vsel %vm4552_vm8, %v4299_v3, -inf  ;;  %v4679_v8 = vsel %vm4552_vm8, %v4298_v22, -inf  ;;  %v4686_v9 = vsel %vm4552_vm8, %v4300_v41, -inf }
 0x413   : > { %v4724_v21 = vrot.slane %v4723_v48, 2  ;;  %v4730_v35 = vmax.f32 %v4728_v55, %v4729_v49  ;;  %v4737_v62 = vmax.f32 %v4735_v57, %v4736_v17  ;;  %v4743_v51 = vrot.slane %v4742_v50, 4 }
 0x414   : > { %v4667_v43 = vmax.f32 %v4665_v36, %v4666_v46  ;;  %v4673_v60 = vrot.slane %v4672_v19, 4  ;;  %v4680_v34 = vrot.slane %v4679_v8, 4  ;;  %v4687_v59 = vrot.slane %v4686_v9, 4 }
 0x415   : > { %v4725_v2 = vmax.f32 %v4723_v48, %v4724_v21  ;;  %v4731_v32 = vrot.slane %v4730_v35, 2  ;;  %v4738_v40 = vrot.slane %v4737_v62, 2  ;;  %v4744_v11 = vmax.f32 %v4742_v50, %v4743_v51 }
 0x416   : > { %v4668_v33 = vrot.slane %v4667_v43, 2  ;;  %v4674_v29 = vmax.f32 %v4672_v19, %v4673_v60  ;;  %v4681_v47 = vmax.f32 %v4679_v8, %v4680_v34  ;;  %v4688_v14 = vmax.f32 %v4686_v9, %v4687_v59 }
 0x417   : > { %v4726_v1 = vrot.slane %v4725_v2, 1  ;;  %v4732_v31 = vmax.f32 %v4730_v35, %v4731_v32  ;;  %v4739_v23 = vmax.f32 %v4737_v62, %v4738_v40  ;;  %v4745_v4 = vrot.slane %v4744_v11, 2 }
 0x418   : > { %v4669_v28 = vmax.f32 %v4667_v43, %v4668_v33  ;;  %v4675_v53 = vrot.slane %v4674_v29, 2  ;;  %v4682_v6 = vrot.slane %v4681_v47, 2  ;;  %v4689_v26 = vrot.slane %v4688_v14, 2 }
 0x419   : > { %v4727_v18 = vmax.f32 %v4725_v2, %v4726_v1  ;;  %v4733_v20 = vrot.slane %v4732_v31, 1  ;;  %v4740_v24 = vrot.slane %v4739_v23, 1  ;;  %v4746_v13 = vmax.f32 %v4744_v11, %v4745_v4 }
 0x41a   : > { %v4670_v44 = vrot.slane %v4669_v28, 1  ;;  %v4676_v52 = vmax.f32 %v4674_v29, %v4675_v53  ;;  %v4683_v22 = vmax.f32 %v4681_v47, %v4682_v6  ;;  %v4690_v61 = vmax.f32 %v4688_v14, %v4689_v26 }
 0x41b   : > { %v4734_v3 = vmax.f32 %v4732_v31, %v4733_v20  ;;  %v4741_v36 = vmax.f32 %v4739_v23, %v4740_v24  ;;  %v4747_v27 = vrot.slane %v4746_v13, 1  ;;  %v5025_v55 = vmax.f32 %v4727_v18, 0.0 }
 0x41c   : > { %v4671_v57 = vmax.f32 %v4669_v28, %v4670_v44  ;;  %v4677_v41 = vrot.slane %v4676_v52, 1  ;;  %v4684_v48 = vrot.slane %v4683_v22, 1  ;;  %v4691_v49 = vrot.slane %v4690_v61, 1 }
 0x41d   : > { %v4748_v17 = vmax.f32 %v4746_v13, %v4747_v27  ;;  %v5026_v46 = vmax.f32 %v4734_v3, 0.0  ;;  %v5027_v50 = vmax.f32 %v4741_v36, 0.0  ;;  %v5948_v19 = vpack.c.bf16 %v5025_v55, %v5025_v55 }
 0x41e   : > { %v4678_v8 = vmax.f32 %v4676_v52, %v4677_v41  ;;  %v4685_v9 = vmax.f32 %v4683_v22, %v4684_v48  ;;  %v4692_v21 = vmax.f32 %v4690_v61, %v4691_v49  ;;  %v5017_v35 = vmax.f32 %v4671_v57, 0.0 }
 0x41f   : > { %v5028_v62 = vmax.f32 %v4748_v17, 0.0  ;;  %v5949_v51 = vpack.c.bf16 %v5026_v46, %v5026_v46  ;;  %v5950_v43 = vpack.c.bf16 %v5027_v50, %v5027_v50  ;;  %v4335_v60 = vcombine.high %v8146_v7, %v8146_v7 }
 0x420   : > { %v5018_v34 = vmax.f32 %v4678_v8, 0.0  ;;  %v5019_v59 = vmax.f32 %v4685_v9, 0.0  ;;  %v5020_v2 = vmax.f32 %v4692_v21, 0.0  ;;  %v5940_v32 = vpack.c.bf16 %v5017_v35, %v5017_v35 }
 0x421   : > { %v5346_v40 = vunpack.c.l.b16 %v5949_v51  ;;  %v4342_v11 = vrot.slane %v8146_v7, %v8005_v56  ;;  %v8173_v33 = vadd.f32 %v7996_v63, %v8148_v37  ;;  %v8177_v29 = vadd.f32 %v7996_v63, %v8150_v5 }
 0x422   : > { %v5951_v47 = vpack.c.bf16 %v5028_v62, %v5028_v62  ;;  %v5345_v14 = vunpack.c.l.b16 %v5948_v19  ;;  %v5941_v1 = vpack.c.bf16 %v5018_v34, %v5018_v34  ;;  %v5942_v31 = vpack.c.bf16 %v5019_v59, %v5019_v59 }
 0x423   : > { %v5347_v23 = vunpack.c.l.b16 %v5950_v43  ;;  %v8179_v4 = vpack.c.bf16 %v5020_v2, %v5020_v2  ;;  %v4349_v28 = vrot.slane %v4335_v60, %v8005_v56  ;;  %v4350_v53 = vcombine.high %v4342_v11, %v4342_v11 }
 0x424   : > { %v5413_v7 = vsel %vm5385_vm9, %v5346_v40, %v5345_v14  ;;  %v5337_v6 = vunpack.c.l.b16 %v5940_v32  ;;  %v5338_v26 = vunpack.c.l.b16 %v5941_v1  ;;  %v5339_v37 = vunpack.c.l.b16 %v5942_v31 }
 0x425   : > { %v4351_v18 = vcombine.high %v4349_v28, %v4349_v28  ;;  %v4749_v20 = vsel %vm4552_vm8, %v4342_v11, -inf  ;;  %v4756_v5 = vsel %vm4552_vm8, %v4350_v53, -inf  ;;  %v4763_v24 = vsel %vm4552_vm8, %v4349_v28, -inf }
 0x426   : > { %v5406_v13 = vsel %vm5385_vm9, %v5338_v26, %v5337_v6  ;;  %v4750_v44 = vrot.slane %v4749_v20, 4  ;;  %v4757_v52 = vrot.slane %v4756_v5, 4  ;;  %v4764_v22 = vrot.slane %v4763_v24, 4  ;;  %v6195_v6 = vpop.f32.mrf.mxu0 }
 0x427   : > { %v5348_v61 = vunpack.c.l.b16 %v5951_v47  ;;  %v5414_v3 = vsel %vm5387_vm10, %v5347_v23, %v5413_v7  ;;  %v4770_v36 = vsel %vm4552_vm8, %v4351_v18, -inf  ;;  %v4169_v27 = vmax.f32 %v8129_v0, %v8159_v15  ;;  %v4021_v7 = vpop.f32.mrf.mxu1 }
 0x428   : > { %v4751_v55 = vmax.f32 %v4749_v20, %v4750_v44  ;;  %v4758_v57 = vmax.f32 %v4756_v5, %v4757_v52  ;;  %v4765_v41 = vmax.f32 %v4763_v24, %v4764_v22  ;;  %v4771_v48 = vrot.slane %v4770_v36, 4 }
 0x429   : > { %v5340_v49 = vunpack.c.l.b16 %v8179_v4  ;;  %v8193_v17 = vsel %vm5387_vm10, %v5339_v37, %v5406_v13  ;;  %v4301_v46 = vcombine.high %v4169_v27, %v4169_v27  ;;  %v4308_v50 = vrot.slane %v4169_v27, %v8005_v56  ;;  %v6239_v52 = vpop.f32.mrf.mxu1 }
 0x42a   : > { %v4752_v19 = vrot.slane %v4751_v55, 2  ;;  %v4759_v8 = vrot.slane %v4758_v57, 2  ;;  %v4766_v9 = vrot.slane %v4765_v41, 2  ;;  %v4772_v21 = vmax.f32 %v4770_v36, %v4771_v48  ;;  %v3287_v48 = vpop.f32.mrf.mxu0 }
 0x42b   : > { %v5415_v35 = vsel %vm5389_vm11, %v5348_v61, %v5414_v3  ;;  %v4315_v0 = vrot.slane %v4301_v46, %v8005_v56  ;;  %v4316_v15 = vcombine.high %v4308_v50, %v4308_v50  ;;  %v4693_v62 = vsel %vm4552_vm8, %v4308_v50, -inf }
 0x42c   : > { %v4753_v51 = vmax.f32 %v4751_v55, %v4752_v19  ;;  %v4760_v43 = vmax.f32 %v4758_v57, %v4759_v8  ;;  %v4767_v60 = vmax.f32 %v4765_v41, %v4766_v9  ;;  %v4773_v34 = vrot.slane %v4772_v21, 2 }
 0x42d   : > { %v4317_v59 = vcombine.high %v4315_v0, %v4315_v0  ;;  %v4694_v2 = vrot.slane %v4693_v62, 4  ;;  %v4700_v32 = vsel %vm4552_vm8, %v4316_v15, -inf  ;;  %v4707_v40 = vsel %vm4552_vm8, %v4315_v0, -inf }
 0x42e   : > { %v4754_v11 = vrot.slane %v4753_v51, 1  ;;  %v4761_v47 = vrot.slane %v4760_v43, 1  ;;  %v4768_v14 = vrot.slane %v4767_v60, 1  ;;  %v4774_v1 = vmax.f32 %v4772_v21, %v4773_v34 }
 0x42f   : > { %v4695_v31 = vmax.f32 %v4693_v62, %v4694_v2  ;;  %v4701_v23 = vrot.slane %v4700_v32, 4  ;;  %v4708_v28 = vrot.slane %v4707_v40, 4  ;;  %v4714_v53 = vsel %vm4552_vm8, %v4317_v59, -inf  ;;  %v4034_v62 = vpop.f32.mrf.mxu1 }
 0x430   : > { %v4755_v26 = vmax.f32 %v4753_v51, %v4754_v11  ;;  %v4762_v37 = vmax.f32 %v4760_v43, %v4761_v47  ;;  %v4769_v18 = vmax.f32 %v4767_v60, %v4768_v14  ;;  %v4775_v20 = vrot.slane %v4774_v1, 1  ;;  %v6196_v11 = vpop.f32.mrf.mxu0 }
 0x431   : > { %v4696_v5 = vrot.slane %v4695_v31, 2  ;;  %v4702_v24 = vmax.f32 %v4700_v32, %v4701_v23  ;;  %v4709_v13 = vmax.f32 %v4707_v40, %v4708_v28  ;;  %v4715_v44 = vrot.slane %v4714_v53, 4 }
 0x432   : > { %v4776_v22 = vmax.f32 %v4774_v1, %v4775_v20  ;;  %v5029_v61 = vmax.f32 %v4755_v26, 0.0  ;;  %v5030_v3 = vmax.f32 %v4762_v37, 0.0  ;;  %v5031_v36 = vmax.f32 %v4769_v18, 0.0  ;;  %v6240_v37 = vpop.f32.mrf.mxu1 }
 0x433   : > { %v4697_v27 = vmax.f32 %v4695_v31, %v4696_v5  ;;  %v4703_v55 = vrot.slane %v4702_v24, 2  ;;  %v4710_v57 = vrot.slane %v4709_v13, 2  ;;  %v4716_v41 = vmax.f32 %v4714_v53, %v4715_v44  ;;  %v8215_v44 = vld [vmem:[#allocation7] ss:$0 sm:$0xff] }
 0x434   : > { %v5032_v46 = vmax.f32 %v4776_v22, 0.0  ;;  %v5952_v50 = vpack.c.bf16 %v5029_v61, %v5029_v61  ;;  %v5953_v19 = vpack.c.bf16 %v5030_v3, %v5030_v3  ;;  %v5954_v8 = vpack.c.bf16 %v5031_v36, %v5031_v36 }
 0x435   : > { %v4698_v9 = vrot.slane %v4697_v27, 1  ;;  %v4704_v21 = vmax.f32 %v4702_v24, %v4703_v55  ;;  %v4711_v0 = vmax.f32 %v4709_v13, %v4710_v57  ;;  %v4717_v15 = vrot.slane %v4716_v41, 2 }
 0x436   : > { %v5955_v51 = vpack.c.bf16 %v5032_v46, %v5032_v46  ;;  %v5349_v43 = vunpack.c.l.b16 %v5952_v50  ;;  %v5350_v60 = vunpack.c.l.b16 %v5953_v19  ;;  %v5351_v34 = vunpack.c.l.b16 %v5954_v8 }
 0x437   : > { %v4699_v59 = vmax.f32 %v4697_v27, %v4698_v9  ;;  %v4705_v2 = vrot.slane %v4704_v21, 1  ;;  %v4712_v32 = vrot.slane %v4711_v0, 1  ;;  %v4718_v40 = vmax.f32 %v4716_v41, %v4717_v15 }
 0x438   : > { %v5352_v47 = vunpack.c.l.b16 %v5955_v51  ;;  %v5416_v14 = vsel %vm5391_vm12, %v5349_v43, %v5415_v35  ;;  %v5408_v1 = vsel %vm5389_vm11, %v5340_v49, %v8193_v17  ;;  %v4098_v31 = vadd.f32 %v4021_v7, %v8142_v38  ;;  %v3290_v7 = vpop.f32.mrf.mxu0 }
 0x439   : > { %v5417_v23 = vsel %vm5393_vm13, %v5350_v60, %v5416_v14  ;;  %v4706_v28 = vmax.f32 %v4704_v21, %v4705_v2  ;;  %v4713_v53 = vmax.f32 %v4711_v0, %v4712_v32  ;;  %v4719_v26 = vrot.slane %v4718_v40, 1 }
 0x43a   : > { %v5418_v18 = vsel %vm5395_vm14, %v5351_v34, %v5417_v23  ;;  %v5021_v20 = vmax.f32 %v4699_v59, 0.0  ;;  %v4182_v5 = vsel %vm2312_vm6, %v8173_v33, -inf  ;;  %v4139_v35 = vadd.f32 %v7996_v63, %v8152_v25  ;;  %v4037_v25 = vpop.f32.mrf.mxu1  ;;  %v6199_v9 = vpop.f32.mrf.mxu0 }
 0x43b   : > { %v5419_v4 = vsel %vm5397_vm15, %v5352_v47, %v5418_v18  ;;  %v4720_v49 = vmax.f32 %v4718_v40, %v4719_v26  ;;  %v5022_v38 = vmax.f32 %v4706_v28, 0.0  ;;  %v5023_v17 = vmax.f32 %v4713_v53, 0.0 }
 0x43c   : > { %v5451_v24 = vpack.c.b16 %v5419_v4, %v5419_v4  ;;  %v5944_v13 = vpack.c.bf16 %v5021_v20, %v5021_v20  ;;  %v4137_v22 = vadd.f32 %v8215_v44, %v4098_v31  ;;  %v3296_v61 = vadd.f32 %v6195_v6, %v7972_v45  ;;  %v3303_v2 = vpop.f32.mrf.mxu0 }
 0x43d   : > { %v5024_v3 = vmax.f32 %v4720_v49, 0.0  ;;  %v5945_v33 = vpack.c.bf16 %v5022_v38, %v5022_v38  ;;  %v5946_v36 = vpack.c.bf16 %v5023_v17, %v5023_v17  ;;  %v3288_v63 = vadd.f32 %v3287_v48, %v7974_v10 }
 0x43e   : > { %5468 = vst.msk [vmem:[%s6653_s26 + $0xc] sm:$0xf] %vm5464_vm0, %v5451_v24  ;;  %v5341_v27 = vunpack.c.l.b16 %v5944_v13  ;;  %v3299_v55 = vadd.f32 %v6196_v11, %v7976_v58  ;;  %v3291_v57 = vadd.f32 %v3290_v7, %v7978_v42  ;;  %v4103_v41 = vadd.f32 %v6239_v52, %v3296_v61 }
 0x43f   : > { %v5947_v46 = vpack.c.bf16 %v5024_v3, %v5024_v3  ;;  %v5342_v50 = vunpack.c.l.b16 %v5945_v33  ;;  %v5343_v19 = vunpack.c.l.b16 %v5946_v36  ;;  %v4101_v8 = vadd.f32 %v4034_v62, %v3288_v63 }
 0x440   : > { %v5409_v45 = vsel %vm5391_vm12, %v5341_v27, %v5408_v1  ;;  %v4142_v6 = vadd.f32 %v8215_v44, %v4103_v41  ;;  %v4104_v21 = vadd.f32 %v6240_v37, %v3299_v55  ;;  %v4102_v10 = vadd.f32 %v4037_v25, %v3291_v57 }
 0x441   : > { %v5344_v48 = vunpack.c.l.b16 %v5947_v46  ;;  %v5410_v0 = vsel %vm5393_vm13, %v5342_v50, %v5409_v45  ;;  %v4176_v58 = vsel %vm2312_vm6, %v8177_v29, -inf  ;;  %v4140_v42 = vadd.f32 %v8215_v44, %v4101_v8 }
 0x442   : > { %v5411_v52 = vsel %vm5395_vm14, %v5343_v19, %v5410_v0  ;;  %v4183_v15 = vsel %vm2312_vm6, %v4142_v6, -inf  ;;  %v4143_v62 = vadd.f32 %v8215_v44, %v4104_v21  ;;  %v4141_v51 = vadd.f32 %v8215_v44, %v4102_v10 }
 0x443   : > { %v5412_v43 = vsel %vm5397_vm15, %v5344_v48, %v5411_v52  ;;  %v4185_v60 = vsel %vm2312_vm6, %v4139_v35, -inf  ;;  %v4184_v34 = vmax.f32 %v4182_v5, %v4183_v15  ;;  %v4177_v59 = vsel %vm2312_vm6, %v4140_v42, -inf }
 0x444   : > { %v5450_v29 = vpack.c.b16 %v5412_v43, %v5412_v43  ;;  %v8238_v32 = vsel %vm2312_vm6, %v4137_v22, -inf  ;;  %v4178_v40 = vmax.f32 %v4176_v58, %v4177_v59  ;;  %v4186_v11 = vsel %vm2312_vm6, %v4143_v62, -inf }
 0x445   : > { %v4386_v47 = vcombine.high %v4184_v34, %v4184_v34  ;;  %v4393_v14 = vrot.slane %v4184_v34, %v8005_v56  ;;  %v8242_v1 = vmax.f32 %v4185_v60, %v4186_v11  ;;  %v8245_v31 = vadd.f32 %v6199_v9, %v7980_v30 }
 0x446   : > { %5467 = vst.msk [vmem:[%s6653_s26 + $0x8] sm:$0xf] %vm5464_vm0, %v5450_v29  ;;  %v4352_v23 = vcombine.high %v4178_v40, %v4178_v40  ;;  %v4359_v28 = vrot.slane %v4178_v40, %v8005_v56  ;;  %v8251_v53 = vsel %vm2312_vm6, %v4141_v51, -inf  ;;  %v8254_v26 = vadd.f32 %v3303_v2, %v7982_v12 }
 0x447   : > { %v4400_v37 = vrot.slane %v4386_v47, %v8005_v56  ;;  %v4401_v18 = vcombine.high %v4393_v14, %v4393_v14  ;;  %v4833_v20 = vsel %vm4552_vm8, %v4393_v14, -inf  ;;  %v4403_v30 = vcombine.high %v8242_v1, %v8242_v1 }
 0x448   : > { %v4834_v5 = vrot.slane %v4833_v20, 4  ;;  %v4366_v35 = vrot.slane %v4352_v23, %v8005_v56  ;;  %v4367_v4 = vcombine.high %v4359_v28, %v4359_v28  ;;  %v4777_v49 = vsel %vm4552_vm8, %v4359_v28, -inf }
 0x449   : > { %v4402_v38 = vcombine.high %v4400_v37, %v4400_v37  ;;  %v4840_v17 = vsel %vm4552_vm8, %v4401_v18, -inf  ;;  %v4847_v12 = vsel %vm4552_vm8, %v4400_v37, -inf  ;;  %v4778_v7 = vrot.slane %v4777_v49, 4 }
 0x44a   : > { %v4835_v24 = vmax.f32 %v4833_v20, %v4834_v5  ;;  %v4841_v13 = vrot.slane %v4840_v17, 4  ;;  %v4848_v22 = vrot.slane %v4847_v12, 4  ;;  %v4368_v61 = vcombine.high %v4366_v35, %v4366_v35 }
 0x44b   : > { %v4854_v3 = vsel %vm4552_vm8, %v4402_v38, -inf  ;;  %v4779_v33 = vmax.f32 %v4777_v49, %v4778_v7  ;;  %v4784_v36 = vsel %vm4552_vm8, %v4367_v4, -inf  ;;  %v4791_v63 = vsel %vm4552_vm8, %v4366_v35, -inf  ;;  %v6200_v7 = vpop.f32.mrf.mxu0 }
 0x44c   : > { %v4836_v25 = vrot.slane %v4835_v24, 2  ;;  %v4842_v27 = vmax.f32 %v4840_v17, %v4841_v13  ;;  %v4849_v55 = vmax.f32 %v4847_v12, %v4848_v22  ;;  %v4855_v57 = vrot.slane %v4854_v3, 4 }
 0x44d   : > { %v4780_v41 = vrot.slane %v4779_v33, 2  ;;  %v4785_v46 = vrot.slane %v4784_v36, 4  ;;  %v4792_v50 = vrot.slane %v4791_v63, 4  ;;  %v4798_v19 = vsel %vm4552_vm8, %v4368_v61, -inf }
 0x44e   : > { %v4837_v8 = vmax.f32 %v4835_v24, %v4836_v25  ;;  %v4843_v9 = vrot.slane %v4842_v27, 2  ;;  %v4850_v45 = vrot.slane %v4849_v55, 2  ;;  %v4856_v6 = vmax.f32 %v4854_v3, %v4855_v57 }
 0x44f   : > { %v4781_v21 = vmax.f32 %v4779_v33, %v4780_v41  ;;  %v4786_v10 = vmax.f32 %v4784_v36, %v4785_v46  ;;  %v4793_v48 = vmax.f32 %v4791_v63, %v4792_v50  ;;  %v4799_v0 = vrot.slane %v4798_v19, 4 }
 0x450   : > { %v4838_v58 = vrot.slane %v4837_v8, 1  ;;  %v4844_v42 = vmax.f32 %v4842_v27, %v4843_v9  ;;  %v4851_v52 = vmax.f32 %v4849_v55, %v4850_v45  ;;  %v4857_v15 = vrot.slane %v4856_v6, 2 }
 0x451   : > { %v4782_v62 = vrot.slane %v4781_v21, 1  ;;  %v4787_v51 = vrot.slane %v4786_v10, 2  ;;  %v4794_v43 = vrot.slane %v4793_v48, 2  ;;  %v4800_v60 = vmax.f32 %v4798_v19, %v4799_v0 }
 0x452   : > { %v4839_v34 = vmax.f32 %v4837_v8, %v4838_v58  ;;  %v4845_v59 = vrot.slane %v4844_v42, 1  ;;  %v4852_v2 = vrot.slane %v4851_v52, 1  ;;  %v4858_v29 = vmax.f32 %v4856_v6, %v4857_v15 }
 0x453   : > { %v4783_v40 = vmax.f32 %v4781_v21, %v4782_v62  ;;  %v4788_v11 = vmax.f32 %v4786_v10, %v4787_v51  ;;  %v4795_v47 = vmax.f32 %v4793_v48, %v4794_v43  ;;  %v4801_v14 = vrot.slane %v4800_v60, 2  ;;  %v3306_v10 = vpop.f32.mrf.mxu0 }
 0x454   : > { %v4846_v23 = vmax.f32 %v4844_v42, %v4845_v59  ;;  %v4853_v28 = vmax.f32 %v4851_v52, %v4852_v2  ;;  %v4859_v37 = vrot.slane %v4858_v29, 1  ;;  %v5041_v18 = vmax.f32 %v4839_v34, 0.0 }
 0x455   : > { %v4789_v20 = vrot.slane %v4788_v11, 1  ;;  %v4796_v5 = vrot.slane %v4795_v47, 1  ;;  %v4802_v35 = vmax.f32 %v4800_v60, %v4801_v14  ;;  %v5033_v4 = vmax.f32 %v4783_v40, 0.0 }
 0x456   : > { %v4860_v49 = vmax.f32 %v4858_v29, %v4859_v37  ;;  %v5042_v38 = vmax.f32 %v4846_v23, 0.0  ;;  %v5043_v17 = vmax.f32 %v4853_v28, 0.0  ;;  %v5964_v12 = vpack.c.bf16 %v5041_v18, %v5041_v18 }
 0x457   : > { %v4790_v24 = vmax.f32 %v4788_v11, %v4789_v20  ;;  %v4797_v13 = vmax.f32 %v4795_v47, %v4796_v5  ;;  %v4803_v22 = vrot.slane %v4802_v35, 1  ;;  %v5956_v61 = vpack.c.bf16 %v5033_v4, %v5033_v4 }
 0x458   : > { %v5044_v3 = vmax.f32 %v4860_v49, 0.0  ;;  %v5965_v33 = vpack.c.bf16 %v5042_v38, %v5042_v38  ;;  %v5966_v36 = vpack.c.bf16 %v5043_v17, %v5043_v17  ;;  %v4181_v63 = vmax.f32 %v8238_v32, %v8251_v53 }
 0x459   : > { %v4804_v25 = vmax.f32 %v4802_v35, %v4803_v22  ;;  %v5034_v27 = vmax.f32 %v4790_v24, 0.0  ;;  %v5035_v55 = vmax.f32 %v4797_v13, 0.0  ;;  %v8271_v57 = vadd.f32 %v6200_v7, %v7984_v54 }
 0x45a   : > { %v5361_v41 = vunpack.c.l.b16 %v5964_v12  ;;  %v5362_v46 = vunpack.c.l.b16 %v5965_v33  ;;  %v5353_v50 = vunpack.c.l.b16 %v5956_v61  ;;  %v4410_v19 = vrot.slane %v8242_v1, %v8005_v56  ;;  %v8285_v1 = vpop.f32.mrf.mxu1 }
 0x45b   : > { %v5036_v8 = vmax.f32 %v4804_v25, 0.0  ;;  %v5957_v9 = vpack.c.bf16 %v5034_v27, %v5034_v27  ;;  %v5958_v45 = vpack.c.bf16 %v5035_v55, %v5035_v55  ;;  %v4417_v32 = vrot.slane %v4403_v30, %v8005_v56 }
 0x45c   : > { %v5967_v53 = vpack.c.bf16 %v5044_v3, %v5044_v3  ;;  %v5363_v6 = vunpack.c.l.b16 %v5966_v36  ;;  %v4418_v21 = vcombine.high %v4410_v19, %v4410_v19  ;;  %v4861_v54 = vsel %vm4552_vm8, %v4410_v19, -inf }
 0x45d   : > { %v5427_v48 = vsel %vm5385_vm9, %v5362_v46, %v5361_v41  ;;  %v8281_v0 = vpack.c.bf16 %v5036_v8, %v5036_v8  ;;  %v5354_v58 = vunpack.c.l.b16 %v5957_v9  ;;  %v5355_v42 = vunpack.c.l.b16 %v5958_v45 }
 0x45e   : > { %v4419_v52 = vcombine.high %v4417_v32, %v4417_v32  ;;  %v4862_v15 = vrot.slane %v4861_v54, 4  ;;  %v4868_v62 = vsel %vm4552_vm8, %v4418_v21, -inf  ;;  %v4875_v51 = vsel %vm4552_vm8, %v4417_v32, -inf }
 0x45f   : > { %v5420_v30 = vsel %vm5385_vm9, %v5354_v58, %v5353_v50  ;;  %v4869_v43 = vrot.slane %v4868_v62, 4  ;;  %v4876_v60 = vrot.slane %v4875_v51, 4  ;;  %v8289_v34 = vadd.f32 %v3306_v10, %v7986_v39  ;;  %v8298_v39 = vpop.f32.mrf.mxu1 }
 0x460   : > { %v5364_v59 = vunpack.c.l.b16 %v5967_v53  ;;  %v5428_v2 = vsel %vm5387_vm10, %v5363_v6, %v5427_v48  ;;  %v4863_v29 = vmax.f32 %v4861_v54, %v4862_v15  ;;  %v4882_v40 = vsel %vm4552_vm8, %v4419_v52, -inf }
 0x461   : > { %v4870_v11 = vmax.f32 %v4868_v62, %v4869_v43  ;;  %v4877_v47 = vmax.f32 %v4875_v51, %v4876_v60  ;;  %v4883_v14 = vrot.slane %v4882_v40, 4  ;;  %v4369_v23 = vcombine.high %v4181_v63, %v4181_v63  ;;  %v6244_v25 = vpop.f32.mrf.mxu1 }
 0x462   : > { %v5356_v28 = vunpack.c.l.b16 %v8281_v0  ;;  %v8295_v37 = vsel %vm5387_vm10, %v5355_v42, %v5420_v30  ;;  %v4864_v18 = vrot.slane %v4863_v29, 2  ;;  %v4376_v20 = vrot.slane %v4181_v63, %v8005_v56  ;;  %v6203_v42 = vpop.f32.mrf.mxu0 }
 0x463   : > { %v4871_v5 = vrot.slane %v4870_v11, 2  ;;  %v4878_v35 = vrot.slane %v4877_v47, 2  ;;  %v4884_v4 = vmax.f32 %v4882_v40, %v4883_v14  ;;  %v4383_v49 = vrot.slane %v4369_v23, %v8005_v56  ;;  %v4053_v58 = vpop.f32.mrf.mxu1 }
 0x464   : > { %v4865_v38 = vmax.f32 %v4863_v29, %v4864_v18  ;;  %v5429_v17 = vsel %vm5389_vm11, %v5364_v59, %v5428_v2  ;;  %v4384_v12 = vcombine.high %v4376_v20, %v4376_v20  ;;  %v4805_v7 = vsel %vm4552_vm8, %v4376_v20, -inf }
 0x465   : > { %v4872_v24 = vmax.f32 %v4870_v11, %v4871_v5  ;;  %v4879_v13 = vmax.f32 %v4877_v47, %v4878_v35  ;;  %v4885_v22 = vrot.slane %v4884_v4, 2  ;;  %v4385_v61 = vcombine.high %v4383_v49, %v4383_v49  ;;  %v6247_v2 = vpop.f32.mrf.mxu1  ;;  %v3319_v5 = vpop.f32.mrf.mxu0 }
 0x466   : > { %v4866_v3 = vrot.slane %v4865_v38, 1  ;;  %v4806_v33 = vrot.slane %v4805_v7, 4  ;;  %v4812_v36 = vsel %vm4552_vm8, %v4384_v12, -inf  ;;  %v4819_v63 = vsel %vm4552_vm8, %v4383_v49, -inf }
 0x467   : > { %v4873_v27 = vrot.slane %v4872_v24, 1  ;;  %v4880_v55 = vrot.slane %v4879_v13, 1  ;;  %v4886_v41 = vmax.f32 %v4884_v4, %v4885_v22  ;;  %v4813_v46 = vrot.slane %v4812_v36, 4  ;;  %v4066_v22 = vpop.f32.mrf.mxu1 }
 0x468   : > { %v4867_v50 = vmax.f32 %v4865_v38, %v4866_v3  ;;  %v4807_v19 = vmax.f32 %v4805_v7, %v4806_v33  ;;  %v4820_v8 = vrot.slane %v4819_v63, 4  ;;  %v4826_v9 = vsel %vm4552_vm8, %v4385_v61, -inf }
 0x469   : > { %v4874_v45 = vmax.f32 %v4872_v24, %v4873_v27  ;;  %v4881_v32 = vmax.f32 %v4879_v13, %v4880_v55  ;;  %v4887_v53 = vrot.slane %v4886_v41, 1  ;;  %v4814_v6 = vmax.f32 %v4812_v36, %v4813_v46  ;;  %v6204_v46 = vpop.f32.mrf.mxu0 }
 0x46a   : > { %v5045_v21 = vmax.f32 %v4867_v50, 0.0  ;;  %v4808_v54 = vrot.slane %v4807_v19, 2  ;;  %v4821_v10 = vmax.f32 %v4819_v63, %v4820_v8  ;;  %v4827_v48 = vrot.slane %v4826_v9, 4 }
 0x46b   : > { %v4888_v52 = vmax.f32 %v4886_v41, %v4887_v53  ;;  %v5046_v15 = vmax.f32 %v4874_v45, 0.0  ;;  %v5047_v62 = vmax.f32 %v4881_v32, 0.0  ;;  %v4815_v51 = vrot.slane %v4814_v6, 2 }
 0x46c   : > { %v5968_v30 = vpack.c.bf16 %v5045_v21, %v5045_v21  ;;  %v4809_v43 = vmax.f32 %v4807_v19, %v4808_v54  ;;  %v4822_v60 = vrot.slane %v4821_v10, 2  ;;  %v4828_v59 = vmax.f32 %v4826_v9, %v4827_v48 }
 0x46d   : > { %v5048_v29 = vmax.f32 %v4888_v52, 0.0  ;;  %v5969_v40 = vpack.c.bf16 %v5046_v15, %v5046_v15  ;;  %v5970_v11 = vpack.c.bf16 %v5047_v62, %v5047_v62  ;;  %v4816_v47 = vmax.f32 %v4814_v6, %v4815_v51 }
 0x46e   : > { %v5365_v14 = vunpack.c.l.b16 %v5968_v30  ;;  %v4810_v23 = vrot.slane %v4809_v43, 1  ;;  %v4823_v18 = vmax.f32 %v4821_v10, %v4822_v60  ;;  %v4829_v20 = vrot.slane %v4828_v59, 2 }
 0x46f   : > { %v5971_v35 = vpack.c.bf16 %v5048_v29, %v5048_v29  ;;  %v5366_v4 = vunpack.c.l.b16 %v5969_v40  ;;  %v5367_v49 = vunpack.c.l.b16 %v5970_v11  ;;  %v4817_v38 = vrot.slane %v4816_v47, 1 }
 0x470   : > { %v5430_v12 = vsel %vm5391_vm12, %v5365_v14, %v5429_v17  ;;  %v4811_v7 = vmax.f32 %v4809_v43, %v4810_v23  ;;  %v4824_v24 = vrot.slane %v4823_v18, 1  ;;  %v4830_v13 = vmax.f32 %v4828_v59, %v4829_v20  ;;  %v8454_v43 = vld [vmem:[#allocation11_spill] sm:$0xff]  ;;  %v8455_v59 = vld [vmem:[#allocation12_spill] sm:$0xff] }
 0x471   : > { %v5368_v61 = vunpack.c.l.b16 %v5971_v35  ;;  %v5431_v3 = vsel %vm5393_vm13, %v5366_v4, %v5430_v12  ;;  %v4818_v33 = vmax.f32 %v4816_v47, %v4817_v38  ;;  %v4107_v36 = vadd.f32 %v8285_v1, %v8245_v31  ;;  %v6248_v31 = vpop.f32.mrf.mxu1 }
 0x472   : > { %v5432_v63 = vsel %vm5395_vm14, %v5367_v49, %v5431_v3  ;;  %v4825_v27 = vmax.f32 %v4823_v18, %v4824_v24  ;;  %v4831_v55 = vrot.slane %v4830_v13, 1  ;;  %v5037_v41 = vmax.f32 %v4811_v7, 0.0 }
 0x473   : > { %v5433_v17 = vsel %vm5397_vm15, %v5368_v61, %v5432_v63  ;;  %v5038_v50 = vmax.f32 %v4818_v33, 0.0  ;;  %v4105_v19 = vadd.f32 %v8298_v39, %v8254_v26  ;;  %v4108_v8 = vadd.f32 %v6244_v25, %v8271_v57  ;;  %v3322_v39 = vpop.f32.mrf.mxu0 }
 0x474   : > { %v5453_v9 = vpack.c.b16 %v5433_v17, %v5433_v17  ;;  %v4832_v45 = vmax.f32 %v4830_v13, %v4831_v55  ;;  %v5039_v32 = vmax.f32 %v4825_v27, 0.0  ;;  %v5960_v53 = vpack.c.bf16 %v5037_v41, %v5037_v41 }
 0x475   : > { %v5961_v1 = vpack.c.bf16 %v5038_v50, %v5038_v50  ;;  %v5422_v6 = vsel %vm5389_vm11, %v5356_v28, %v8295_v37  ;;  %v4106_v21 = vadd.f32 %v4053_v58, %v8289_v34  ;;  %v4146_v57 = vadd.f32 %v8215_v44, %v4107_v36  ;;  %v8453_v34 = vld [vmem:[#allocation10_spill] sm:$0xff]  ;;  %v4069_v58 = vpop.f32.mrf.mxu1 }
 0x476   : > { %5470 = vst.msk [vmem:[%s6653_s26 + $0x14] sm:$0xf] %vm5464_vm0, %v5453_v9  ;;  %v5040_v54 = vmax.f32 %v4832_v45, 0.0  ;;  %v5962_v10 = vpack.c.bf16 %v5039_v32, %v5039_v32  ;;  %v5357_v26 = vunpack.c.l.b16 %v5960_v53  ;;  %v4144_v48 = vadd.f32 %v8215_v44, %v4105_v19 }
 0x477   : > { %v5358_v25 = vunpack.c.l.b16 %v5961_v1  ;;  %v4147_v52 = vadd.f32 %v8215_v44, %v4108_v8  ;;  %v3328_v15 = vadd.f32 %v6203_v42, %v7988_v16  ;;  %v3320_v37 = vadd.f32 %v3319_v5, %v8453_v34 }
 0x478   : > { %v5963_v0 = vpack.c.bf16 %v5040_v54, %v5040_v54  ;;  %v5359_v62 = vunpack.c.l.b16 %v5962_v10  ;;  %v5423_v28 = vsel %vm5391_vm12, %v5357_v26, %v5422_v6  ;;  %v4145_v30 = vadd.f32 %v8215_v44, %v4106_v21 }
 0x479   : > { %v5424_v51 = vsel %vm5393_vm13, %v5358_v25, %v5423_v28  ;;  %v3331_v60 = vadd.f32 %v6204_v46, %v8454_v43  ;;  %v3323_v29 = vadd.f32 %v3322_v39, %v8455_v59  ;;  %v4111_v47 = vadd.f32 %v6247_v2, %v3328_v15 }
 0x47a   : > { %v5360_v40 = vunpack.c.l.b16 %v5963_v0  ;;  %v5425_v11 = vsel %vm5395_vm14, %v5359_v62, %v5424_v51  ;;  %v4109_v16 = vadd.f32 %v4066_v22, %v3320_v37  ;;  %v4194_v18 = vsel %vm2312_vm6, %v4146_v57, -inf }
 0x47b   : > { %v4112_v42 = vadd.f32 %v6248_v31, %v3331_v60  ;;  %v4110_v14 = vadd.f32 %v4069_v58, %v3323_v29  ;;  %v4150_v20 = vadd.f32 %v8215_v44, %v4111_v47  ;;  %v4188_v4 = vsel %vm2312_vm6, %v4144_v48, -inf }
 0x47c   : > { %v5426_v23 = vsel %vm5397_vm15, %v5360_v40, %v5425_v11  ;;  %v4148_v5 = vadd.f32 %v8215_v44, %v4109_v16  ;;  %v4197_v2 = vsel %vm2312_vm6, %v4147_v52, -inf  ;;  %v4191_v12 = vsel %vm2312_vm6, %v4145_v30, -inf }
 0x47d   : > { %v5452_v35 = vpack.c.b16 %v5426_v23, %v5426_v23  ;;  %v4151_v49 = vadd.f32 %v8215_v44, %v4112_v42  ;;  %v4149_v38 = vadd.f32 %v8215_v44, %v4110_v14  ;;  %v4195_v7 = vsel %vm2312_vm6, %v4150_v20, -inf }
 0x47e   : > { %v4189_v24 = vsel %vm2312_vm6, %v4148_v5, -inf  ;;  %v4196_v13 = vmax.f32 %v4194_v18, %v4195_v7 }
 0x47f   : > { %5469 = vst.msk [vmem:[%s6653_s26 + $0x10] sm:$0xf] %vm5464_vm0, %v5452_v35  ;;  %v4190_v22 = vmax.f32 %v4188_v4, %v4189_v24  ;;  %v4198_v61 = vsel %vm2312_vm6, %v4151_v49, -inf  ;;  %v4192_v3 = vsel %vm2312_vm6, %v4149_v38, -inf }
 0x480   : > { %v4199_v33 = vmax.f32 %v4197_v2, %v4198_v61  ;;  %v8348_v36 = vmax.f32 %v4191_v12, %v4192_v3  ;;  %v4454_v44 = vcombine.high %v4196_v13, %v4196_v13  ;;  %v4461_v63 = vrot.slane %v4196_v13, %v8005_v56 }
 0x481   : > { %v4420_v27 = vcombine.high %v4190_v22, %v4190_v22  ;;  %v4427_v55 = vrot.slane %v4190_v22, %v8005_v56 }
 0x482   : > { %v4471_v41 = vcombine.high %v4199_v33, %v4199_v33  ;;  %v8353_v46 = vrot.slane %v4199_v33, %v8005_v56  ;;  %v4437_v17 = vcombine.high %v8348_v36, %v8348_v36  ;;  %v8359_v50 = vrot.slane %v8348_v36, %v8005_v56 }
 0x483   : > { %v4468_v19 = vrot.slane %v4454_v44, %v8005_v56  ;;  %v4469_v8 = vcombine.high %v4461_v63, %v4461_v63  ;;  %v4945_v9 = vsel %vm4552_vm8, %v4461_v63, -inf  ;;  %v4434_v45 = vrot.slane %v4420_v27, %v8005_v56 }
 0x484   : > { %v4946_v32 = vrot.slane %v4945_v9, 4  ;;  %v4435_v53 = vcombine.high %v4427_v55, %v4427_v55  ;;  %v4889_v31 = vsel %vm4552_vm8, %v4427_v55, -inf  ;;  %v8366_v1 = vrot.slane %v4471_v41, %v8005_v56 }
 0x485   : > { %v4470_v6 = vcombine.high %v4468_v19, %v4468_v19  ;;  %v4952_v21 = vsel %vm4552_vm8, %v4469_v8, -inf  ;;  %v4959_v54 = vsel %vm4552_vm8, %v4468_v19, -inf  ;;  %v4436_v10 = vcombine.high %v4434_v45, %v4434_v45 }
 0x486   : > { %v4947_v26 = vmax.f32 %v4945_v9, %v4946_v32  ;;  %v4953_v57 = vrot.slane %v4952_v21, 4  ;;  %v4960_v39 = vrot.slane %v4959_v54, 4  ;;  %v4890_v25 = vrot.slane %v4889_v31, 4 }
 0x487   : > { %v4966_v48 = vsel %vm4552_vm8, %v4470_v6, -inf  ;;  %v4896_v52 = vsel %vm4552_vm8, %v4435_v53, -inf  ;;  %v4903_v15 = vsel %vm4552_vm8, %v4434_v45, -inf  ;;  %v4910_v0 = vsel %vm4552_vm8, %v4436_v10, -inf }
 0x488   : > { %v4948_v62 = vrot.slane %v4947_v26, 2  ;;  %v4954_v28 = vmax.f32 %v4952_v21, %v4953_v57  ;;  %v4961_v34 = vmax.f32 %v4959_v54, %v4960_v39  ;;  %v4967_v37 = vrot.slane %v4966_v48, 4 }
 0x489   : > { %v4891_v58 = vmax.f32 %v4889_v31, %v4890_v25  ;;  %v4897_v51 = vrot.slane %v4896_v52, 4  ;;  %v4904_v30 = vrot.slane %v4903_v15, 4  ;;  %v4911_v43 = vrot.slane %v4910_v0, 4 }
 0x48a   : > { %v4949_v60 = vmax.f32 %v4947_v26, %v4948_v62  ;;  %v4955_v59 = vrot.slane %v4954_v28, 2  ;;  %v4962_v29 = vrot.slane %v4961_v34, 2  ;;  %v4968_v40 = vmax.f32 %v4966_v48, %v4967_v37 }
 0x48b   : > { %v4892_v11 = vrot.slane %v4891_v58, 2  ;;  %v4898_v47 = vmax.f32 %v4896_v52, %v4897_v51  ;;  %v4905_v16 = vmax.f32 %v4903_v15, %v4904_v30  ;;  %v4912_v42 = vmax.f32 %v4910_v0, %v4911_v43 }
 0x48c   : > { %v4950_v14 = vrot.slane %v4949_v60, 1  ;;  %v4956_v23 = vmax.f32 %v4954_v28, %v4955_v59  ;;  %v4963_v18 = vmax.f32 %v4961_v34, %v4962_v29  ;;  %v4969_v20 = vrot.slane %v4968_v40, 2 }
 0x48d   : > { %v4893_v5 = vmax.f32 %v4891_v58, %v4892_v11  ;;  %v4899_v35 = vrot.slane %v4898_v47, 2  ;;  %v4906_v4 = vrot.slane %v4905_v16, 2  ;;  %v4913_v49 = vrot.slane %v4912_v42, 2 }
 0x48e   : > { %v4951_v38 = vmax.f32 %v4949_v60, %v4950_v14  ;;  %v4957_v2 = vrot.slane %v4956_v23, 1  ;;  %v4964_v12 = vrot.slane %v4963_v18, 1  ;;  %v4970_v7 = vmax.f32 %v4968_v40, %v4969_v20 }
 0x48f   : > { %v4894_v24 = vrot.slane %v4893_v5, 1  ;;  %v4900_v13 = vmax.f32 %v4898_v47, %v4899_v35  ;;  %v4907_v22 = vmax.f32 %v4905_v16, %v4906_v4  ;;  %v4914_v61 = vmax.f32 %v4912_v42, %v4913_v49 }
 0x490   : > { %v4958_v3 = vmax.f32 %v4956_v23, %v4957_v2  ;;  %v4965_v33 = vmax.f32 %v4963_v18, %v4964_v12  ;;  %v4971_v44 = vrot.slane %v4970_v7, 1  ;;  %v5057_v63 = vmax.f32 %v4951_v38, 0.0 }
 0x491   : > { %v4895_v27 = vmax.f32 %v4893_v5, %v4894_v24  ;;  %v4901_v55 = vrot.slane %v4900_v13, 1  ;;  %v4908_v41 = vrot.slane %v4907_v22, 1  ;;  %v4915_v19 = vrot.slane %v4914_v61, 1 }
 0x492   : > { %v4972_v8 = vmax.f32 %v4970_v7, %v4971_v44  ;;  %v5058_v9 = vmax.f32 %v4958_v3, 0.0  ;;  %v5059_v45 = vmax.f32 %v4965_v33, 0.0  ;;  %v5980_v32 = vpack.c.bf16 %v5057_v63, %v5057_v63 }
 0x493   : > { %v4902_v53 = vmax.f32 %v4900_v13, %v4901_v55  ;;  %v4909_v31 = vmax.f32 %v4907_v22, %v4908_v41  ;;  %v4916_v6 = vmax.f32 %v4914_v61, %v4915_v19  ;;  %v5049_v21 = vmax.f32 %v4895_v27, 0.0 }
 0x494   : > { %v5060_v54 = vmax.f32 %v4972_v8, 0.0  ;;  %v5981_v10 = vpack.c.bf16 %v5058_v9, %v5058_v9  ;;  %v5982_v26 = vpack.c.bf16 %v5059_v45, %v5059_v45  ;;  %v5377_v57 = vunpack.c.l.b16 %v5980_v32 }
 0x495   : > { %v5050_v39 = vmax.f32 %v4902_v53, 0.0  ;;  %v5051_v25 = vmax.f32 %v4909_v31, 0.0  ;;  %v5052_v48 = vmax.f32 %v4916_v6, 0.0  ;;  %v5972_v52 = vpack.c.bf16 %v5049_v21, %v5049_v21 }
 0x496   : > { %v5983_v15 = vpack.c.bf16 %v5060_v54, %v5060_v54  ;;  %v5378_v0 = vunpack.c.l.b16 %v5981_v10  ;;  %v5379_v62 = vunpack.c.l.b16 %v5982_v26  ;;  %v4486_v28 = vcombine.high %v8353_v46, %v8353_v46 }
 0x497   : > { %v5973_v34 = vpack.c.bf16 %v5050_v39, %v5050_v39  ;;  %v5974_v37 = vpack.c.bf16 %v5051_v25, %v5051_v25  ;;  %v8376_v58 = vpack.c.bf16 %v5052_v48, %v5052_v48  ;;  %v5369_v51 = vunpack.c.l.b16 %v5972_v52 }
 0x498   : > { %v5380_v30 = vunpack.c.l.b16 %v5983_v15  ;;  %v5441_v43 = vsel %vm5385_vm9, %v5378_v0, %v5377_v57  ;;  %v4487_v60 = vcombine.high %v8366_v1, %v8366_v1  ;;  %v4973_v59 = vsel %vm4552_vm8, %v8353_v46, -inf }
 0x499   : > { %v5442_v29 = vsel %vm5387_vm10, %v5379_v62, %v5441_v43  ;;  %v5370_v40 = vunpack.c.l.b16 %v5973_v34  ;;  %v5371_v11 = vunpack.c.l.b16 %v5974_v37  ;;  %v5372_v47 = vunpack.c.l.b16 %v8376_v58 }
 0x49a   : > { %v4974_v16 = vrot.slane %v4973_v59, 4  ;;  %v4980_v42 = vsel %vm4552_vm8, %v4486_v28, -inf  ;;  %v4987_v14 = vsel %vm4552_vm8, %v8366_v1, -inf  ;;  %v4994_v23 = vsel %vm4552_vm8, %v4487_v60, -inf }
 0x49b   : > { %v5434_v18 = vsel %vm5385_vm9, %v5370_v40, %v5369_v51  ;;  %v4981_v20 = vrot.slane %v4980_v42, 4  ;;  %v4988_v5 = vrot.slane %v4987_v14, 4  ;;  %v4995_v35 = vrot.slane %v4994_v23, 4 }
 0x49c   : > { %v8391_v46 = vsel %vm5387_vm10, %v5371_v11, %v5434_v18  ;;  %v4975_v4 = vmax.f32 %v4973_v59, %v4974_v16  ;;  %v8394_v49 = vsel %vm5389_vm11, %v5380_v30, %v5442_v29  ;;  %v4451_v38 = vrot.slane %v4437_v17, %v8005_v56 }
 0x49d   : > { %v4982_v1 = vmax.f32 %v4980_v42, %v4981_v20  ;;  %v4989_v2 = vmax.f32 %v4987_v14, %v4988_v5  ;;  %v4996_v12 = vmax.f32 %v4994_v23, %v4995_v35  ;;  %v4452_v7 = vcombine.high %v8359_v50, %v8359_v50 }
 0x49e   : > { %v4976_v24 = vrot.slane %v4975_v4, 2  ;;  %v4453_v13 = vcombine.high %v4451_v38, %v4451_v38  ;;  %v4917_v22 = vsel %vm4552_vm8, %v8359_v50, -inf  ;;  %v4931_v61 = vsel %vm4552_vm8, %v4451_v38, -inf }
 0x49f   : > { %v4983_v3 = vrot.slane %v4982_v1, 2  ;;  %v4990_v33 = vrot.slane %v4989_v2, 2  ;;  %v4997_v44 = vrot.slane %v4996_v12, 2  ;;  %v4918_v63 = vrot.slane %v4917_v22, 4 }
 0x4a0   : > { %v4977_v27 = vmax.f32 %v4975_v4, %v4976_v24  ;;  %v4924_v56 = vsel %vm4552_vm8, %v4452_v7, -inf  ;;  %v4932_v36 = vrot.slane %v4931_v61, 4  ;;  %v4938_v17 = vsel %vm4552_vm8, %v4453_v13, -inf }
 0x4a1   : > { %v4984_v55 = vmax.f32 %v4982_v1, %v4983_v3  ;;  %v4991_v41 = vmax.f32 %v4989_v2, %v4990_v33  ;;  %v4998_v19 = vmax.f32 %v4996_v12, %v4997_v44  ;;  %v4919_v8 = vmax.f32 %v4917_v22, %v4918_v63 }
 0x4a2   : > { %v4978_v9 = vrot.slane %v4977_v27, 1  ;;  %v4925_v45 = vrot.slane %v4924_v56, 4  ;;  %v4933_v32 = vmax.f32 %v4931_v61, %v4932_v36  ;;  %v4939_v50 = vrot.slane %v4938_v17, 4 }
 0x4a3   : > { %v4985_v53 = vrot.slane %v4984_v55, 1  ;;  %v4992_v31 = vrot.slane %v4991_v41, 1  ;;  %v4999_v6 = vrot.slane %v4998_v19, 1  ;;  %v4920_v21 = vrot.slane %v4919_v8, 2 }
 0x4a4   : > { %v4979_v54 = vmax.f32 %v4977_v27, %v4978_v9  ;;  %v4926_v10 = vmax.f32 %v4924_v56, %v4925_v45  ;;  %v4934_v26 = vrot.slane %v4933_v32, 2  ;;  %v4940_v57 = vmax.f32 %v4938_v17, %v4939_v50 }
 0x4a5   : > { %v4986_v39 = vmax.f32 %v4984_v55, %v4985_v53  ;;  %v4993_v25 = vmax.f32 %v4991_v41, %v4992_v31  ;;  %v5000_v48 = vmax.f32 %v4998_v19, %v4999_v6  ;;  %v4921_v52 = vmax.f32 %v4919_v8, %v4920_v21 }
 0x4a6   : > { %v5061_v15 = vmax.f32 %v4979_v54, 0.0  ;;  %v4927_v0 = vrot.slane %v4926_v10, 2  ;;  %v4935_v62 = vmax.f32 %v4933_v32, %v4934_v26  ;;  %v4941_v28 = vrot.slane %v4940_v57, 2 }
 0x4a7   : > { %v5062_v34 = vmax.f32 %v4986_v39, 0.0  ;;  %v5063_v37 = vmax.f32 %v4993_v25, 0.0  ;;  %v5064_v51 = vmax.f32 %v5000_v48, 0.0  ;;  %v4922_v30 = vrot.slane %v4921_v52, 1 }
 0x4a8   : > { %v5984_v43 = vpack.c.bf16 %v5061_v15, %v5061_v15  ;;  %v4928_v60 = vmax.f32 %v4926_v10, %v4927_v0  ;;  %v4936_v59 = vrot.slane %v4935_v62, 1  ;;  %v4942_v29 = vmax.f32 %v4940_v57, %v4941_v28 }
 0x4a9   : > { %v5985_v40 = vpack.c.bf16 %v5062_v34, %v5062_v34  ;;  %v5986_v11 = vpack.c.bf16 %v5063_v37, %v5063_v37  ;;  %v5987_v16 = vpack.c.bf16 %v5064_v51, %v5064_v51  ;;  %v4923_v42 = vmax.f32 %v4921_v52, %v4922_v30 }
 0x4aa   : > { %v5381_v14 = vunpack.c.l.b16 %v5984_v43  ;;  %v4929_v23 = vrot.slane %v4928_v60, 1  ;;  %v4937_v18 = vmax.f32 %v4935_v62, %v4936_v59  ;;  %v4943_v20 = vrot.slane %v4942_v29, 1 }
 0x4ab   : > { %v5382_v5 = vunpack.c.l.b16 %v5985_v40  ;;  %v5383_v35 = vunpack.c.l.b16 %v5986_v11  ;;  %v5384_v4 = vunpack.c.l.b16 %v5987_v16  ;;  %v5053_v38 = vmax.f32 %v4923_v42, 0.0 }
 0x4ac   : > { %v5444_v1 = vsel %vm5391_vm12, %v5381_v14, %v8394_v49  ;;  %v4930_v2 = vmax.f32 %v4928_v60, %v4929_v23  ;;  %v4944_v12 = vmax.f32 %v4942_v29, %v4943_v20  ;;  %v5055_v7 = vmax.f32 %v4937_v18, 0.0 }
 0x4ad   : > { %v5445_v24 = vsel %vm5393_vm13, %v5382_v5, %v5444_v1  ;;  %v5976_v13 = vpack.c.bf16 %v5053_v38, %v5053_v38  ;;  %v5436_v22 = vsel %vm5389_vm11, %v5372_v47, %v8391_v46 }
 0x4ae   : > { %v5446_v61 = vsel %vm5395_vm14, %v5383_v35, %v5445_v24  ;;  %v5054_v3 = vmax.f32 %v4930_v2, 0.0  ;;  %v5056_v33 = vmax.f32 %v4944_v12, 0.0  ;;  %v5978_v44 = vpack.c.bf16 %v5055_v7, %v5055_v7 }
 0x4af   : > { %v5447_v49 = vsel %vm5397_vm15, %v5384_v4, %v5446_v61  ;;  %v5373_v63 = vunpack.c.l.b16 %v5976_v13 }
 0x4b0   : > { %v5455_v27 = vpack.c.b16 %v5447_v49, %v5447_v49  ;;  %v5977_v56 = vpack.c.bf16 %v5054_v3, %v5054_v3  ;;  %v5979_v36 = vpack.c.bf16 %v5056_v33, %v5056_v33  ;;  %v5375_v17 = vunpack.c.l.b16 %v5978_v44 }
 0x4b1   : > { %v5437_v55 = vsel %vm5391_vm12, %v5373_v63, %v5436_v22 }
 0x4b2   : > { %5472 = vst.msk [vmem:[%s6653_s26 + $0x1c] sm:$0xf] %vm5464_vm0, %v5455_v27  ;;  %v5374_v58 = vunpack.c.l.b16 %v5977_v56  ;;  %v5376_v41 = vunpack.c.l.b16 %v5979_v36 }
 0x4b4   : > { %v5438_v47 = vsel %vm5393_vm13, %v5374_v58, %v5437_v55 }
 0x4b5   : > { %v5439_v46 = vsel %vm5395_vm14, %v5375_v17, %v5438_v47 }
 0x4b6   : > { %v5440_v19 = vsel %vm5397_vm15, %v5376_v41, %v5439_v46 }
 0x4b7   : > { %v5454_v8 = vpack.c.b16 %v5440_v19, %v5440_v19 }
 0x4b9   : > { %5471 = vst.msk [vmem:[%s6653_s26 + $0x18] sm:$0xf] %vm5464_vm0, %v5454_v8 }
 0x4ba PF: > { %s17_s18 = sadd.s32 1, %s6518_s18  }
 0x4bb   : > { %p14_p10 = scmp.ge.s32.totalorder %s17_s18, 6  }
 0x4bd   :  { %16 = sbr.rel (!%p14_p10) target bundleno = 2 (0x2), region = 94 }
 0x4c2   :  { %5497 = vsyncpa [#allocation4], 1 }
 0x4c3   :  { %5499 = vsyncpa [#allocation4 + $0x1], 1 }
 0x4c4   :  { %5500 = vsyncpa [#allocation6], 1 }

</bundles_post_ra>
